<compile_context>
chip_gen: v6e
topology: v6e:2x2x1
jax: 0.10.0
libtpu: 0.0.40
codegen_flags: <defaults>
</compile_context>

<pallas_src>
import functools

import jax
import jax.numpy as jnp
from jax.experimental import pallas as pl
from jax.experimental.pallas import tpu as pltpu

LANE = 128          # TPU lane width; last channel count must equal this
_EPS = 1e-5


# ----------------------------------------------------------------------------
# In-kernel helpers (traced inside the Pallas kernel)
# ----------------------------------------------------------------------------
def _row_select(x, h_out, stride, offset):
    """rows[y, :] = x[stride*y + offset, :] (zero when out of range).

    Implemented as a tiny 0/1 selection matmul on the MXU: exact, cheap, and
    avoids strided / shifted sublane slices (no VMEM relayouts).
    """
    h_in = x.shape[0]
    yy = jax.lax.broadcasted_iota(jnp.int32, (h_out, h_in), 0)
    rr = jax.lax.broadcasted_iota(jnp.int32, (h_out, h_in), 1)
    sel = jnp.where(rr == stride * yy + offset, 1.0, 0.0).astype(jnp.bfloat16)
    rows = jnp.dot(sel, x, preferred_element_type=jnp.float32)
    return rows.astype(jnp.bfloat16)        # exact (0/1-selection of bf16 rows)


def _conv_rowmm(x, t_ref, b_ref, *, kh, stride, pad, h_out):
    """Conv(+folded BN) as kh row-matmuls against block-Toeplitz slabs.

    x:     (H_in, W_in*Cin)  bf16 activation in (H, W*C) layout
    t_ref: (kh, W_in*Cin, W_out*Cout) bf16 slabs (W offset/stride/pad baked in)
    b_ref: (1, W_out*Cout)   f32 bias row (BN folded)
    returns (h_out, W_out*Cout) f32 pre-activation.
    """
    h_in = x.shape[0]
    n_out = t_ref.shape[-1]
    acc = jnp.zeros((h_out, n_out), jnp.float32)
    for dy in range(kh):
        off = dy - pad
        if stride == 1 and off == 0 and h_out == h_in:
            rows = x                                     # identity tap: no select
        else:
            rows = _row_select(x, h_out, stride, off)
        acc = acc + jnp.dot(rows, t_ref[dy], preferred_element_type=jnp.float32)
    return acc + b_ref[...]


# ----------------------------------------------------------------------------
# The fused network kernel
# ----------------------------------------------------------------------------
def _fused_rsn_kernel(x_ref,
                      t0, b0, t1, b1,
                      t2c1, b2c1, t2c2, b2c2, t2d, b2d,
                      t3c1, b3c1, t3c2, b3c2, t3d, b3d,
                      t4c1, b4c1, t4c2, b4c2, t4d, b4d,
                      wc1, bc1, wc2, bc2, wc3, bc3,
                      sm_ref, lsm_ref, *, n_classes):
    x = x_ref[0]                                         # (H, W*Cp0) bf16
    h_cur = x.shape[0]

    # layer0: 7x7 s1 p3 conv + BN + ReLU
    x = jnp.maximum(_conv_rowmm(x, t0, b0, kh=7, stride=1, pad=3, h_out=h_cur),
                    0.0).astype(jnp.bfloat16)
    # layer1: 3x3 s1 p1 conv + BN + ReLU  (Dropout p=0 -> identity)
    x = jnp.maximum(_conv_rowmm(x, t1, b1, kh=3, stride=1, pad=1, h_out=h_cur),
                    0.0).astype(jnp.bfloat16)

    # layer2..4: BasicBlock(stride=2) with fused 1x1-s2 downsample + residual
    blocks = ((t2c1, b2c1, t2c2, b2c2, t2d, b2d),
              (t3c1, b3c1, t3c2, b3c2, t3d, b3d),
              (t4c1, b4c1, t4c2, b4c2, t4d, b4d))
    for (tc1, bb1, tc2, bb2, td, bd) in blocks:
        h_out = (h_cur - 1) // 2 + 1                     # (H + 2 - 3)//2 + 1
        h1 = jnp.maximum(
            _conv_rowmm(x, tc1, bb1, kh=3, stride=2, pad=1, h_out=h_out),
            0.0).astype(jnp.bfloat16)
        y = _conv_rowmm(h1, tc2, bb2, kh=3, stride=1, pad=1, h_out=h_out)
        y = y + _conv_rowmm(x, td, bd, kh=1, stride=2, pad=0, h_out=h_out)
        x = jnp.maximum(y, 0.0).astype(jnp.bfloat16)
        h_cur = h_out

    # classifier: 3 x (1x1 conv + bias) with ReLU between, then channel
    # softmax / log_softmax.  Layer-4 output layout is (H4, W4*128): process
    # one 128-lane column group (= one w position) at a time.
    h4 = h_cur
    w4 = x.shape[1] // LANE
    lane = jax.lax.broadcasted_iota(jnp.int32, (h4, LANE), 1)
    for w in range(w4):
        y0 = x[:, w * LANE:(w + 1) * LANE]               # (H4, 128) bf16, free slice
        h = jnp.dot(y0, wc1[...], preferred_element_type=jnp.float32) + bc1[...]
        h = jnp.maximum(h, 0.0).astype(jnp.bfloat16)
        h = jnp.dot(h, wc2[...], preferred_element_type=jnp.float32) + bc2[...]
        h = jnp.maximum(h, 0.0).astype(jnp.bfloat16)
        z = jnp.dot(h, wc3[...], preferred_element_type=jnp.float32) + bc3[...]
        z = jnp.where(lane < n_classes, z, -1e30)        # mask padded class lanes (f32)
        m = jnp.max(z, axis=-1, keepdims=True)
        e = jnp.exp(z - m)
        s = jnp.sum(e, axis=-1, keepdims=True)
        inv = pl.reciprocal(s, approx=True)              # EUP slot, ~free
        sm_ref[0, w] = e * inv
        lsm_ref[0, w] = (z - m) - jnp.log(s)


# ----------------------------------------------------------------------------
# Host-side parameter construction (deterministic; BN folded; Toeplitz slabs)
# ----------------------------------------------------------------------------
def _kaiming(key, kh, kw, cin, cout):
    fan_in = kh * kw * cin
    std = (2.0 / fan_in) ** 0.5
    return std * jax.random.normal(key, (kh, kw, cin, cout), dtype=jnp.float32)


def _conv_bn_params(key, kh, kw, cin, cout):
    """Kaiming conv weight with synthetic eval-mode BN folded in."""
    kw_, kb = jax.random.split(key)
    w = _kaiming(kw_, kh, kw, cin, cout)
    k1, k2, k3, k4 = jax.random.split(kb, 4)
    gamma = 1.0 + 0.05 * jax.random.normal(k1, (cout,), jnp.float32)
    beta = 0.05 * jax.random.normal(k2, (cout,), jnp.float32)
    mean = 0.05 * jax.random.normal(k3, (cout,), jnp.float32)
    var = 1.0 + jnp.abs(0.05 * jax.random.normal(k4, (cout,), jnp.float32))
    scale = gamma / jnp.sqrt(var + _EPS)
    bias = beta - mean * scale
    return w * scale[None, None, None, :], bias


def _toeplitz(w, cp, w_in_sz, w_out_sz, stride, pad):
    """Block-Toeplitz slabs: T[dy, wi*cp + ci, wo*cout + co] =
    w[dy, wi - (stride*wo - pad), ci, co]  (0 outside kernel support)."""
    kh, kw, cin, cout = w.shape
    wp = jnp.pad(w, ((0, 0), (0, 0), (0, cp - cin), (0, 0)))
    i = jnp.arange(w_in_sz * cp)
    j = jnp.arange(w_out_sz * cout)
    wi, ci = i // cp, i % cp
    wo, co = j // cout, j % cout
    dx = wi[:, None] - (stride * wo[None, :] - pad)
    valid = (dx >= 0) & (dx < kw)
    dxc = jnp.clip(dx, 0, kw - 1)
    ci_b = jnp.broadcast_to(ci[:, None], dx.shape)
    co_b = jnp.broadcast_to(co[None, :], dx.shape)
    t = jnp.where(valid[None, :, :], wp[:, dxc, ci_b, co_b], 0.0)
    return t.astype(jnp.bfloat16)


def _pack(w_folded, bias, w_in_sz, w_out_sz, stride, pad, cp=None):
    cin, cout = w_folded.shape[2], w_folded.shape[3]
    cp = cin if cp is None else cp
    t = _toeplitz(w_folded, cp, w_in_sz, w_out_sz, stride, pad)
    b = jnp.tile(bias, w_out_sz)[None, :].astype(jnp.float32)
    return t, b


def _cls_params(key, cin, cout):
    """Classifier 1x1 conv: kaiming weights, zero bias (weights_init), no BN."""
    assert cin == LANE
    w = _kaiming(key, 1, 1, cin, cout)                   # (1,1,cin,cout) f32
    bias = jnp.zeros((cout,), jnp.float32)
    wk = jnp.pad(w[0, 0], ((0, 0), (0, LANE - cout))).astype(jnp.bfloat16)
    bk = jnp.zeros((1, LANE), jnp.float32)
    return (wk, bk), (w, bias)


def build_params(key, channels=(16, 32, 64, 128), n_in=3, n_classes=2,
                 H=16, W=16):
    assert channels[-1] == LANE, "last channel count must equal the lane width"
    cp0 = 8
    assert n_in <= cp0 and (W * cp0) % LANE == 0

    keys = jax.random.split(key, 9)
    weights = []                       # flat, in kernel-argument order
    ref = {}

    wf, b = _conv_bn_params(keys[0], 7, 7, n_in, channels[0])
    ref["layer0"] = (wf, b)
    weights += list(_pack(wf, b, W, W, 1, 3, cp=cp0))

    wf, b = _conv_bn_params(keys[1], 3, 3, channels[0], channels[1])
    ref["layer1"] = (wf, b)
    weights += list(_pack(wf, b, W, W, 1, 1))

    inplanes, wc, hc = channels[1], W, H
    for i, planes in enumerate(channels[1:]):
        wo, ho = (wc - 1) // 2 + 1, (hc - 1) // 2 + 1
        kb = jax.random.split(keys[2 + i], 3)
        c1 = _conv_bn_params(kb[0], 3, 3, inplanes, planes)
        c2 = _conv_bn_params(kb[1], 3, 3, planes, planes)
        dn = _conv_bn_params(kb[2], 1, 1, inplanes, planes)
        ref[f"layer{2 + i}"] = (c1, c2, dn)
        weights += list(_pack(*c1, wc, wo, 2, 1))
        weights += list(_pack(*c2, wo, wo, 1, 1))
        weights += list(_pack(*dn, wc, wo, 2, 0))
        inplanes, wc, hc = planes, wo, ho

    out_dim = channels[-1]
    for j, (ci, co) in enumerate(((inplanes, out_dim), (out_dim, out_dim),
                                  (out_dim, n_classes))):
        (wk, bk), r = _cls_params(keys[6 + j], ci, co)
        ref[f"cls{j + 1}"] = r
        weights += [wk, bk]

    return {"weights": weights, "ref": ref, "n_classes": n_classes,
            "cp0": cp0, "H4": hc, "W4": wc}


# ----------------------------------------------------------------------------
# Forward pass: one fused pallas_call
# ----------------------------------------------------------------------------
def simple_rsn_forward(x_nchw, params):
    weights = params["weights"]
    n_classes = params["n_classes"]
    cp0 = params["cp0"]
    h4, w4 = params["H4"], params["W4"]
    N, cin, H, W = x_nchw.shape

    # NCHW -> lane-dense (H, W*Cp0) layout, bf16 (tiny, one-time boundary op)
    x = jnp.transpose(x_nchw, (0, 2, 3, 1)).astype(jnp.float32)
    x = jnp.pad(x, ((0, 0), (0, 0), (0, 0), (0, cp0 - cin)))
    x = x.reshape(N, H, W * cp0).astype(jnp.bfloat16)

    def _const_spec(a):
        zeros = (0,) * a.ndim
        return pl.BlockSpec(a.shape, lambda n: zeros)    # VMEM-resident weights

    in_specs = [pl.BlockSpec((1, H, W * cp0), lambda n: (n, 0, 0))]
    in_specs += [_const_spec(a) for a in weights]
    out_sds = jax.ShapeDtypeStruct((N, w4, h4, LANE), jnp.float32)
    out_spec = pl.BlockSpec((1, w4, h4, LANE), lambda n: (n, 0, 0, 0))

    kernel = functools.partial(_fused_rsn_kernel, n_classes=n_classes)
    sm, lsm = pl.pallas_call(
        kernel,
        out_shape=(out_sds, out_sds),
        grid=(N,),
        in_specs=in_specs,
        out_specs=(out_spec, out_spec),
        compiler_params=pltpu.CompilerParams(
            dimension_semantics=("parallel",),           # v7x: 2 TCs split batch
            vmem_limit_bytes=48 * 1024 * 1024),
    )(x, *weights)

    # (N, W4, H4, LANE) -> NCHW (N, n_classes, H4, W4)
    sm = jnp.transpose(sm[..., :n_classes], (0, 3, 2, 1))
    lsm = jnp.transpose(lsm[..., :n_classes], (0, 3, 2, 1))
    return {"log_softmax": lsm, "softmax": sm}


# ----------------------------------------------------------------------------
# Pure-JAX f32 reference (same folded params) for correctness checking
# ----------------------------------------------------------------------------
def reference_forward(x_nchw, ref):
    def conv(x, w, b, stride, pad):
        wt = jnp.transpose(w, (3, 2, 0, 1))              # HWIO -> OIHW
        y = jax.lax.conv_general_dilated(
            x, wt, (stride, stride), ((pad, pad), (pad, pad)),
            dimension_numbers=("NCHW", "OIHW", "NCHW"))
        return y + b[None, :, None, None]

    x = jnp.maximum(conv(x_nchw, *ref["layer0"], 1, 3), 0.0)
    x = jnp.maximum(conv(x, *ref["layer1"], 1, 1), 0.0)
    for name in ("layer2", "layer3", "layer4"):
        c1, c2, dn = ref[name]
        h = jnp.maximum(conv(x, *c1, 2, 1), 0.0)
        y = conv(h, *c2, 1, 1) + conv(x, *dn, 2, 0)
        x = jnp.maximum(y, 0.0)
    y = jnp.maximum(conv(x, *ref["cls1"], 1, 0), 0.0)
    y = jnp.maximum(conv(y, *ref["cls2"], 1, 0), 0.0)
    y = conv(y, *ref["cls3"], 1, 0)
    return jax.nn.softmax(y, axis=1), jax.nn.log_softmax(y, axis=1)


if __name__ == "__main__":
    key = jax.random.PRNGKey(0)
    k_param, k_x = jax.random.split(key)

    params = build_params(k_param, channels=(16, 32, 64, 128),
                          n_in=3, n_classes=2, H=16, W=16)
    x = jax.random.normal(k_x, (2, 3, 16, 16), dtype=jnp.float32)     # NCHW

    fwd = jax.jit(lambda xx: simple_rsn_forward(xx, params))
    out = fwd(x)
    jax.block_until_ready(out)

    assert out["softmax"].shape == (2, 2, 2, 2)
    assert out["log_softmax"].shape == (2, 2, 2, 2)
    # softmax over the class dim sums to 1 (approx reciprocal -> loose tol)
    s = jnp.sum(out["softmax"], axis=1)
    assert bool(jnp.allclose(s, 1.0, atol=2e-2)), "softmax does not sum to 1"

    # compare against the pure-JAX f32 reference (kernel is bf16 -> loose tol)
    sm_ref, lsm_ref = reference_forward(x, params["ref"])
    assert bool(jnp.allclose(out["softmax"], sm_ref, atol=0.15)), "softmax mismatch"
    assert bool(jnp.allclose(out["log_softmax"], lsm_ref, atol=0.5)), "log_softmax mismatch"

    print("KERNEL_OK")
</pallas_src>

<mosaic_0001>
module attributes {stable_mosaic.version = 11 : i64} {
  func.func @_fused_rsn_kernel(%arg0: i32, %arg1: memref<1x16x128xbf16, #tpu.memory_space<vmem>>, %arg2: memref<7x128x256xbf16, #tpu.memory_space<vmem>>, %arg3: memref<1x256xf32, #tpu.memory_space<vmem>>, %arg4: memref<3x256x512xbf16, #tpu.memory_space<vmem>>, %arg5: memref<1x512xf32, #tpu.memory_space<vmem>>, %arg6: memref<3x512x256xbf16, #tpu.memory_space<vmem>>, %arg7: memref<1x256xf32, #tpu.memory_space<vmem>>, %arg8: memref<3x256x256xbf16, #tpu.memory_space<vmem>>, %arg9: memref<1x256xf32, #tpu.memory_space<vmem>>, %arg10: memref<1x512x256xbf16, #tpu.memory_space<vmem>>, %arg11: memref<1x256xf32, #tpu.memory_space<vmem>>, %arg12: memref<3x256x256xbf16, #tpu.memory_space<vmem>>, %arg13: memref<1x256xf32, #tpu.memory_space<vmem>>, %arg14: memref<3x256x256xbf16, #tpu.memory_space<vmem>>, %arg15: memref<1x256xf32, #tpu.memory_space<vmem>>, %arg16: memref<1x256x256xbf16, #tpu.memory_space<vmem>>, %arg17: memref<1x256xf32, #tpu.memory_space<vmem>>, %arg18: memref<3x256x256xbf16, #tpu.memory_space<vmem>>, %arg19: memref<1x256xf32, #tpu.memory_space<vmem>>, %arg20: memref<3x256x256xbf16, #tpu.memory_space<vmem>>, %arg21: memref<1x256xf32, #tpu.memory_space<vmem>>, %arg22: memref<1x256x256xbf16, #tpu.memory_space<vmem>>, %arg23: memref<1x256xf32, #tpu.memory_space<vmem>>, %arg24: memref<128x128xbf16, #tpu.memory_space<vmem>>, %arg25: memref<1x128xf32, #tpu.memory_space<vmem>>, %arg26: memref<128x128xbf16, #tpu.memory_space<vmem>>, %arg27: memref<1x128xf32, #tpu.memory_space<vmem>>, %arg28: memref<128x128xbf16, #tpu.memory_space<vmem>>, %arg29: memref<1x128xf32, #tpu.memory_space<vmem>>, %arg30: memref<1x2x2x128xf32, #tpu.memory_space<vmem>>, %arg31: memref<1x2x2x128xf32, #tpu.memory_space<vmem>>) attributes {dimension_semantics = [#tpu.dimension_semantics<parallel>], iteration_bounds = array<i64: 2>, scalar_prefetch = 0 : i64, scratch_operands = 0 : i64, tpu.core_type = #tpu.core_type<tc>, window_params = [{transform_indices = @transform_0, window_bounds = array<i64: 1, 16, 128>}, {pipeline_mode = #tpu.pipeline_mode<synchronous>, transform_indices = @transform_1, window_bounds = array<i64: 7, 128, 256>}, {pipeline_mode = #tpu.pipeline_mode<synchronous>, transform_indices = @transform_2, window_bounds = array<i64: 1, 256>}, {pipeline_mode = #tpu.pipeline_mode<synchronous>, transform_indices = @transform_3, window_bounds = array<i64: 3, 256, 512>}, {pipeline_mode = #tpu.pipeline_mode<synchronous>, transform_indices = @transform_4, window_bounds = array<i64: 1, 512>}, {pipeline_mode = #tpu.pipeline_mode<synchronous>, transform_indices = @transform_5, window_bounds = array<i64: 3, 512, 256>}, {pipeline_mode = #tpu.pipeline_mode<synchronous>, transform_indices = @transform_6, window_bounds = array<i64: 1, 256>}, {pipeline_mode = #tpu.pipeline_mode<synchronous>, transform_indices = @transform_7, window_bounds = array<i64: 3, 256, 256>}, {pipeline_mode = #tpu.pipeline_mode<synchronous>, transform_indices = @transform_8, window_bounds = array<i64: 1, 256>}, {pipeline_mode = #tpu.pipeline_mode<synchronous>, transform_indices = @transform_9, window_bounds = array<i64: 1, 512, 256>}, {pipeline_mode = #tpu.pipeline_mode<synchronous>, transform_indices = @transform_10, window_bounds = array<i64: 1, 256>}, {pipeline_mode = #tpu.pipeline_mode<synchronous>, transform_indices = @transform_11, window_bounds = array<i64: 3, 256, 256>}, {pipeline_mode = #tpu.pipeline_mode<synchronous>, transform_indices = @transform_12, window_bounds = array<i64: 1, 256>}, {pipeline_mode = #tpu.pipeline_mode<synchronous>, transform_indices = @transform_13, window_bounds = array<i64: 3, 256, 256>}, {pipeline_mode = #tpu.pipeline_mode<synchronous>, transform_indices = @transform_14, window_bounds = array<i64: 1, 256>}, {pipeline_mode = #tpu.pipeline_mode<synchronous>, transform_indices = @transform_15, window_bounds = array<i64: 1, 256, 256>}, {pipeline_mode = #tpu.pipeline_mode<synchronous>, transform_indices = @transform_16, window_bounds = array<i64: 1, 256>}, {pipeline_mode = #tpu.pipeline_mode<synchronous>, transform_indices = @transform_17, window_bounds = array<i64: 3, 256, 256>}, {pipeline_mode = #tpu.pipeline_mode<synchronous>, transform_indices = @transform_18, window_bounds = array<i64: 1, 256>}, {pipeline_mode = #tpu.pipeline_mode<synchronous>, transform_indices = @transform_19, window_bounds = array<i64: 3, 256, 256>}, {pipeline_mode = #tpu.pipeline_mode<synchronous>, transform_indices = @transform_20, window_bounds = array<i64: 1, 256>}, {pipeline_mode = #tpu.pipeline_mode<synchronous>, transform_indices = @transform_21, window_bounds = array<i64: 1, 256, 256>}, {pipeline_mode = #tpu.pipeline_mode<synchronous>, transform_indices = @transform_22, window_bounds = array<i64: 1, 256>}, {pipeline_mode = #tpu.pipeline_mode<synchronous>, transform_indices = @transform_23, window_bounds = array<i64: 128, 128>}, {pipeline_mode = #tpu.pipeline_mode<synchronous>, transform_indices = @transform_24, window_bounds = array<i64: 1, 128>}, {pipeline_mode = #tpu.pipeline_mode<synchronous>, transform_indices = @transform_25, window_bounds = array<i64: 128, 128>}, {pipeline_mode = #tpu.pipeline_mode<synchronous>, transform_indices = @transform_26, window_bounds = array<i64: 1, 128>}, {pipeline_mode = #tpu.pipeline_mode<synchronous>, transform_indices = @transform_27, window_bounds = array<i64: 128, 128>}, {pipeline_mode = #tpu.pipeline_mode<synchronous>, transform_indices = @transform_28, window_bounds = array<i64: 1, 128>}, {transform_indices = @transform_29, window_bounds = array<i64: 1, 2, 2, 128>}, {transform_indices = @transform_30, window_bounds = array<i64: 1, 2, 2, 128>}]} {
    %c0 = arith.constant 0 : index
    %c0_0 = arith.constant 0 : index
    %c0_1 = arith.constant 0 : index
    %0 = vector.load %arg1[%c0, %c0_0, %c0_1] : memref<1x16x128xbf16, #tpu.memory_space<vmem>>, vector<1x16x128xbf16>
    %1 = vector.shape_cast %0 : vector<1x16x128xbf16> to vector<16x128xbf16>
    %cst = arith.constant 0.000000e+00 : f32
    %2 = vector.broadcast %cst : f32 to vector<16x256xf32>
    %3 = tpu.iota {dimensions = array<i32: 0>} : vector<16x16xi32>
    %4 = tpu.iota {dimensions = array<i32: 1>} : vector<16x16xi32>
    %c1_i32 = arith.constant 1 : i32
    %5 = vector.broadcast %c1_i32 : i32 to vector<16x16xi32>
    %6 = arith.muli %5, %3 : vector<16x16xi32>
    %c-3_i32 = arith.constant -3 : i32
    %7 = vector.broadcast %c-3_i32 : i32 to vector<16x16xi32>
    %8 = arith.addi %6, %7 : vector<16x16xi32>
    %9 = arith.cmpi eq, %4, %8 : vector<16x16xi32>
    %cst_2 = arith.constant 1.000000e+00 : f32
    %cst_3 = arith.constant 0.000000e+00 : f32
    %10 = vector.broadcast %cst_2 : f32 to vector<16x16xf32>
    %11 = vector.broadcast %cst_3 : f32 to vector<16x16xf32>
    %12 = arith.select %9, %10, %11 : vector<16x16xi1>, vector<16x16xf32>
    %13 = arith.truncf %12 : vector<16x16xf32> to vector<16x16xbf16>
    %cst_4 = arith.constant dense<0.000000e+00> : vector<16x128xf32>
    %14 = tpu.matmul %13, %1, %cst_4 {dimension_numbers = #tpu.dot_dimension_numbers<[1], [0], [0], [1], [0, 0, 1, 1], [], []>} : vector<16x16xbf16>, vector<16x128xbf16>, vector<16x128xf32> -> vector<16x128xf32>
    %15 = arith.truncf %14 : vector<16x128xf32> to vector<16x128xbf16>
    %c0_5 = arith.constant 0 : index
    %c0_6 = arith.constant 0 : index
    %c0_7 = arith.constant 0 : index
    %16 = vector.load %arg2[%c0_5, %c0_6, %c0_7] : memref<7x128x256xbf16, #tpu.memory_space<vmem>>, vector<1x128x256xbf16>
    %17 = vector.shape_cast %16 : vector<1x128x256xbf16> to vector<128x256xbf16>
    %cst_8 = arith.constant dense<0.000000e+00> : vector<16x256xf32>
    %18 = tpu.matmul %15, %17, %cst_8 {dimension_numbers = #tpu.dot_dimension_numbers<[1], [0], [0], [1], [0, 0, 1, 1], [], []>} : vector<16x128xbf16>, vector<128x256xbf16>, vector<16x256xf32> -> vector<16x256xf32>
    %19 = arith.addf %2, %18 : vector<16x256xf32>
    %20 = tpu.iota {dimensions = array<i32: 0>} : vector<16x16xi32>
    %21 = tpu.iota {dimensions = array<i32: 1>} : vector<16x16xi32>
    %c1_i32_9 = arith.constant 1 : i32
    %22 = vector.broadcast %c1_i32_9 : i32 to vector<16x16xi32>
    %23 = arith.muli %22, %20 : vector<16x16xi32>
    %c-2_i32 = arith.constant -2 : i32
    %24 = vector.broadcast %c-2_i32 : i32 to vector<16x16xi32>
    %25 = arith.addi %23, %24 : vector<16x16xi32>
    %26 = arith.cmpi eq, %21, %25 : vector<16x16xi32>
    %cst_10 = arith.constant 1.000000e+00 : f32
    %cst_11 = arith.constant 0.000000e+00 : f32
    %27 = vector.broadcast %cst_10 : f32 to vector<16x16xf32>
    %28 = vector.broadcast %cst_11 : f32 to vector<16x16xf32>
    %29 = arith.select %26, %27, %28 : vector<16x16xi1>, vector<16x16xf32>
    %30 = arith.truncf %29 : vector<16x16xf32> to vector<16x16xbf16>
    %cst_12 = arith.constant dense<0.000000e+00> : vector<16x128xf32>
    %31 = tpu.matmul %30, %1, %cst_12 {dimension_numbers = #tpu.dot_dimension_numbers<[1], [0], [0], [1], [0, 0, 1, 1], [], []>} : vector<16x16xbf16>, vector<16x128xbf16>, vector<16x128xf32> -> vector<16x128xf32>
    %32 = arith.truncf %31 : vector<16x128xf32> to vector<16x128xbf16>
    %c1 = arith.constant 1 : index
    %c0_13 = arith.constant 0 : index
    %c0_14 = arith.constant 0 : index
    %33 = vector.load %arg2[%c1, %c0_13, %c0_14] : memref<7x128x256xbf16, #tpu.memory_space<vmem>>, vector<1x128x256xbf16>
    %34 = vector.shape_cast %33 : vector<1x128x256xbf16> to vector<128x256xbf16>
    %cst_15 = arith.constant dense<0.000000e+00> : vector<16x256xf32>
    %35 = tpu.matmul %32, %34, %cst_15 {dimension_numbers = #tpu.dot_dimension_numbers<[1], [0], [0], [1], [0, 0, 1, 1], [], []>} : vector<16x128xbf16>, vector<128x256xbf16>, vector<16x256xf32> -> vector<16x256xf32>
    %36 = arith.addf %19, %35 : vector<16x256xf32>
    %37 = tpu.iota {dimensions = array<i32: 0>} : vector<16x16xi32>
    %38 = tpu.iota {dimensions = array<i32: 1>} : vector<16x16xi32>
    %c1_i32_16 = arith.constant 1 : i32
    %39 = vector.broadcast %c1_i32_16 : i32 to vector<16x16xi32>
    %40 = arith.muli %39, %37 : vector<16x16xi32>
    %c-1_i32 = arith.constant -1 : i32
    %41 = vector.broadcast %c-1_i32 : i32 to vector<16x16xi32>
    %42 = arith.addi %40, %41 : vector<16x16xi32>
    %43 = arith.cmpi eq, %38, %42 : vector<16x16xi32>
    %cst_17 = arith.constant 1.000000e+00 : f32
    %cst_18 = arith.constant 0.000000e+00 : f32
    %44 = vector.broadcast %cst_17 : f32 to vector<16x16xf32>
    %45 = vector.broadcast %cst_18 : f32 to vector<16x16xf32>
    %46 = arith.select %43, %44, %45 : vector<16x16xi1>, vector<16x16xf32>
    %47 = arith.truncf %46 : vector<16x16xf32> to vector<16x16xbf16>
    %cst_19 = arith.constant dense<0.000000e+00> : vector<16x128xf32>
    %48 = tpu.matmul %47, %1, %cst_19 {dimension_numbers = #tpu.dot_dimension_numbers<[1], [0], [0], [1], [0, 0, 1, 1], [], []>} : vector<16x16xbf16>, vector<16x128xbf16>, vector<16x128xf32> -> vector<16x128xf32>
    %49 = arith.truncf %48 : vector<16x128xf32> to vector<16x128xbf16>
    %c2 = arith.constant 2 : index
    %c0_20 = arith.constant 0 : index
    %c0_21 = arith.constant 0 : index
    %50 = vector.load %arg2[%c2, %c0_20, %c0_21] : memref<7x128x256xbf16, #tpu.memory_space<vmem>>, vector<1x128x256xbf16>
    %51 = vector.shape_cast %50 : vector<1x128x256xbf16> to vector<128x256xbf16>
    %cst_22 = arith.constant dense<0.000000e+00> : vector<16x256xf32>
    %52 = tpu.matmul %49, %51, %cst_22 {dimension_numbers = #tpu.dot_dimension_numbers<[1], [0], [0], [1], [0, 0, 1, 1], [], []>} : vector<16x128xbf16>, vector<128x256xbf16>, vector<16x256xf32> -> vector<16x256xf32>
    %53 = arith.addf %36, %52 : vector<16x256xf32>
    %c3 = arith.constant 3 : index
    %c0_23 = arith.constant 0 : index
    %c0_24 = arith.constant 0 : index
    %54 = vector.load %arg2[%c3, %c0_23, %c0_24] : memref<7x128x256xbf16, #tpu.memory_space<vmem>>, vector<1x128x256xbf16>
    %55 = vector.shape_cast %54 : vector<1x128x256xbf16> to vector<128x256xbf16>
    %cst_25 = arith.constant dense<0.000000e+00> : vector<16x256xf32>
    %56 = tpu.matmul %1, %55, %cst_25 {dimension_numbers = #tpu.dot_dimension_numbers<[1], [0], [0], [1], [0, 0, 1, 1], [], []>} : vector<16x128xbf16>, vector<128x256xbf16>, vector<16x256xf32> -> vector<16x256xf32>
    %57 = arith.addf %53, %56 : vector<16x256xf32>
    %58 = tpu.iota {dimensions = array<i32: 0>} : vector<16x16xi32>
    %59 = tpu.iota {dimensions = array<i32: 1>} : vector<16x16xi32>
    %c1_i32_26 = arith.constant 1 : i32
    %60 = vector.broadcast %c1_i32_26 : i32 to vector<16x16xi32>
    %61 = arith.muli %60, %58 : vector<16x16xi32>
    %c1_i32_27 = arith.constant 1 : i32
    %62 = vector.broadcast %c1_i32_27 : i32 to vector<16x16xi32>
    %63 = arith.addi %61, %62 : vector<16x16xi32>
    %64 = arith.cmpi eq, %59, %63 : vector<16x16xi32>
    %cst_28 = arith.constant 1.000000e+00 : f32
    %cst_29 = arith.constant 0.000000e+00 : f32
    %65 = vector.broadcast %cst_28 : f32 to vector<16x16xf32>
    %66 = vector.broadcast %cst_29 : f32 to vector<16x16xf32>
    %67 = arith.select %64, %65, %66 : vector<16x16xi1>, vector<16x16xf32>
    %68 = arith.truncf %67 : vector<16x16xf32> to vector<16x16xbf16>
    %cst_30 = arith.constant dense<0.000000e+00> : vector<16x128xf32>
    %69 = tpu.matmul %68, %1, %cst_30 {dimension_numbers = #tpu.dot_dimension_numbers<[1], [0], [0], [1], [0, 0, 1, 1], [], []>} : vector<16x16xbf16>, vector<16x128xbf16>, vector<16x128xf32> -> vector<16x128xf32>
    %70 = arith.truncf %69 : vector<16x128xf32> to vector<16x128xbf16>
    %c4 = arith.constant 4 : index
    %c0_31 = arith.constant 0 : index
    %c0_32 = arith.constant 0 : index
    %71 = vector.load %arg2[%c4, %c0_31, %c0_32] : memref<7x128x256xbf16, #tpu.memory_space<vmem>>, vector<1x128x256xbf16>
    %72 = vector.shape_cast %71 : vector<1x128x256xbf16> to vector<128x256xbf16>
    %cst_33 = arith.constant dense<0.000000e+00> : vector<16x256xf32>
    %73 = tpu.matmul %70, %72, %cst_33 {dimension_numbers = #tpu.dot_dimension_numbers<[1], [0], [0], [1], [0, 0, 1, 1], [], []>} : vector<16x128xbf16>, vector<128x256xbf16>, vector<16x256xf32> -> vector<16x256xf32>
    %74 = arith.addf %57, %73 : vector<16x256xf32>
    %75 = tpu.iota {dimensions = array<i32: 0>} : vector<16x16xi32>
    %76 = tpu.iota {dimensions = array<i32: 1>} : vector<16x16xi32>
    %c1_i32_34 = arith.constant 1 : i32
    %77 = vector.broadcast %c1_i32_34 : i32 to vector<16x16xi32>
    %78 = arith.muli %77, %75 : vector<16x16xi32>
    %c2_i32 = arith.constant 2 : i32
    %79 = vector.broadcast %c2_i32 : i32 to vector<16x16xi32>
    %80 = arith.addi %78, %79 : vector<16x16xi32>
    %81 = arith.cmpi eq, %76, %80 : vector<16x16xi32>
    %cst_35 = arith.constant 1.000000e+00 : f32
    %cst_36 = arith.constant 0.000000e+00 : f32
    %82 = vector.broadcast %cst_35 : f32 to vector<16x16xf32>
    %83 = vector.broadcast %cst_36 : f32 to vector<16x16xf32>
    %84 = arith.select %81, %82, %83 : vector<16x16xi1>, vector<16x16xf32>
    %85 = arith.truncf %84 : vector<16x16xf32> to vector<16x16xbf16>
    %cst_37 = arith.constant dense<0.000000e+00> : vector<16x128xf32>
    %86 = tpu.matmul %85, %1, %cst_37 {dimension_numbers = #tpu.dot_dimension_numbers<[1], [0], [0], [1], [0, 0, 1, 1], [], []>} : vector<16x16xbf16>, vector<16x128xbf16>, vector<16x128xf32> -> vector<16x128xf32>
    %87 = arith.truncf %86 : vector<16x128xf32> to vector<16x128xbf16>
    %c5 = arith.constant 5 : index
    %c0_38 = arith.constant 0 : index
    %c0_39 = arith.constant 0 : index
    %88 = vector.load %arg2[%c5, %c0_38, %c0_39] : memref<7x128x256xbf16, #tpu.memory_space<vmem>>, vector<1x128x256xbf16>
    %89 = vector.shape_cast %88 : vector<1x128x256xbf16> to vector<128x256xbf16>
    %cst_40 = arith.constant dense<0.000000e+00> : vector<16x256xf32>
    %90 = tpu.matmul %87, %89, %cst_40 {dimension_numbers = #tpu.dot_dimension_numbers<[1], [0], [0], [1], [0, 0, 1, 1], [], []>} : vector<16x128xbf16>, vector<128x256xbf16>, vector<16x256xf32> -> vector<16x256xf32>
    %91 = arith.addf %74, %90 : vector<16x256xf32>
    %92 = tpu.iota {dimensions = array<i32: 0>} : vector<16x16xi32>
    %93 = tpu.iota {dimensions = array<i32: 1>} : vector<16x16xi32>
    %c1_i32_41 = arith.constant 1 : i32
    %94 = vector.broadcast %c1_i32_41 : i32 to vector<16x16xi32>
    %95 = arith.muli %94, %92 : vector<16x16xi32>
    %c3_i32 = arith.constant 3 : i32
    %96 = vector.broadcast %c3_i32 : i32 to vector<16x16xi32>
    %97 = arith.addi %95, %96 : vector<16x16xi32>
    %98 = arith.cmpi eq, %93, %97 : vector<16x16xi32>
    %cst_42 = arith.constant 1.000000e+00 : f32
    %cst_43 = arith.constant 0.000000e+00 : f32
    %99 = vector.broadcast %cst_42 : f32 to vector<16x16xf32>
    %100 = vector.broadcast %cst_43 : f32 to vector<16x16xf32>
    %101 = arith.select %98, %99, %100 : vector<16x16xi1>, vector<16x16xf32>
    %102 = arith.truncf %101 : vector<16x16xf32> to vector<16x16xbf16>
    %cst_44 = arith.constant dense<0.000000e+00> : vector<16x128xf32>
    %103 = tpu.matmul %102, %1, %cst_44 {dimension_numbers = #tpu.dot_dimension_numbers<[1], [0], [0], [1], [0, 0, 1, 1], [], []>} : vector<16x16xbf16>, vector<16x128xbf16>, vector<16x128xf32> -> vector<16x128xf32>
    %104 = arith.truncf %103 : vector<16x128xf32> to vector<16x128xbf16>
    %c6 = arith.constant 6 : index
    %c0_45 = arith.constant 0 : index
    %c0_46 = arith.constant 0 : index
    %105 = vector.load %arg2[%c6, %c0_45, %c0_46] : memref<7x128x256xbf16, #tpu.memory_space<vmem>>, vector<1x128x256xbf16>
    %106 = vector.shape_cast %105 : vector<1x128x256xbf16> to vector<128x256xbf16>
    %cst_47 = arith.constant dense<0.000000e+00> : vector<16x256xf32>
    %107 = tpu.matmul %104, %106, %cst_47 {dimension_numbers = #tpu.dot_dimension_numbers<[1], [0], [0], [1], [0, 0, 1, 1], [], []>} : vector<16x128xbf16>, vector<128x256xbf16>, vector<16x256xf32> -> vector<16x256xf32>
    %108 = arith.addf %91, %107 : vector<16x256xf32>
    %c0_48 = arith.constant 0 : index
    %c0_49 = arith.constant 0 : index
    %109 = vector.load %arg3[%c0_48, %c0_49] : memref<1x256xf32, #tpu.memory_space<vmem>>, vector<1x256xf32>
    %110 = vector.broadcast %109 : vector<1x256xf32> to vector<16x256xf32>
    %111 = arith.addf %108, %110 : vector<16x256xf32>
    %cst_50 = arith.constant 0.000000e+00 : f32
    %112 = vector.broadcast %cst_50 : f32 to vector<16x256xf32>
    %113 = arith.maximumf %111, %112 : vector<16x256xf32>
    %114 = arith.truncf %113 : vector<16x256xf32> to vector<16x256xbf16>
    %cst_51 = arith.constant 0.000000e+00 : f32
    %115 = vector.broadcast %cst_51 : f32 to vector<16x512xf32>
    %116 = tpu.iota {dimensions = array<i32: 0>} : vector<16x16xi32>
    %117 = tpu.iota {dimensions = array<i32: 1>} : vector<16x16xi32>
    %c1_i32_52 = arith.constant 1 : i32
    %118 = vector.broadcast %c1_i32_52 : i32 to vector<16x16xi32>
    %119 = arith.muli %118, %116 : vector<16x16xi32>
    %c-1_i32_53 = arith.constant -1 : i32
    %120 = vector.broadcast %c-1_i32_53 : i32 to vector<16x16xi32>
    %121 = arith.addi %119, %120 : vector<16x16xi32>
    %122 = arith.cmpi eq, %117, %121 : vector<16x16xi32>
    %cst_54 = arith.constant 1.000000e+00 : f32
    %cst_55 = arith.constant 0.000000e+00 : f32
    %123 = vector.broadcast %cst_54 : f32 to vector<16x16xf32>
    %124 = vector.broadcast %cst_55 : f32 to vector<16x16xf32>
    %125 = arith.select %122, %123, %124 : vector<16x16xi1>, vector<16x16xf32>
    %126 = arith.truncf %125 : vector<16x16xf32> to vector<16x16xbf16>
    %cst_56 = arith.constant dense<0.000000e+00> : vector<16x256xf32>
    %127 = tpu.matmul %126, %114, %cst_56 {dimension_numbers = #tpu.dot_dimension_numbers<[1], [0], [0], [1], [0, 0, 1, 1], [], []>} : vector<16x16xbf16>, vector<16x256xbf16>, vector<16x256xf32> -> vector<16x256xf32>
    %128 = arith.truncf %127 : vector<16x256xf32> to vector<16x256xbf16>
    %c0_57 = arith.constant 0 : index
    %c0_58 = arith.constant 0 : index
    %c0_59 = arith.constant 0 : index
    %129 = vector.load %arg4[%c0_57, %c0_58, %c0_59] : memref<3x256x512xbf16, #tpu.memory_space<vmem>>, vector<1x256x512xbf16>
    %130 = vector.shape_cast %129 : vector<1x256x512xbf16> to vector<256x512xbf16>
    %cst_60 = arith.constant dense<0.000000e+00> : vector<16x512xf32>
    %131 = tpu.matmul %128, %130, %cst_60 {dimension_numbers = #tpu.dot_dimension_numbers<[1], [0], [0], [1], [0, 0, 1, 1], [], []>} : vector<16x256xbf16>, vector<256x512xbf16>, vector<16x512xf32> -> vector<16x512xf32>
    %132 = arith.addf %115, %131 : vector<16x512xf32>
    %c1_61 = arith.constant 1 : index
    %c0_62 = arith.constant 0 : index
    %c0_63 = arith.constant 0 : index
    %133 = vector.load %arg4[%c1_61, %c0_62, %c0_63] : memref<3x256x512xbf16, #tpu.memory_space<vmem>>, vector<1x256x512xbf16>
    %134 = vector.shape_cast %133 : vector<1x256x512xbf16> to vector<256x512xbf16>
    %cst_64 = arith.constant dense<0.000000e+00> : vector<16x512xf32>
    %135 = tpu.matmul %114, %134, %cst_64 {dimension_numbers = #tpu.dot_dimension_numbers<[1], [0], [0], [1], [0, 0, 1, 1], [], []>} : vector<16x256xbf16>, vector<256x512xbf16>, vector<16x512xf32> -> vector<16x512xf32>
    %136 = arith.addf %132, %135 : vector<16x512xf32>
    %137 = tpu.iota {dimensions = array<i32: 0>} : vector<16x16xi32>
    %138 = tpu.iota {dimensions = array<i32: 1>} : vector<16x16xi32>
    %c1_i32_65 = arith.constant 1 : i32
    %139 = vector.broadcast %c1_i32_65 : i32 to vector<16x16xi32>
    %140 = arith.muli %139, %137 : vector<16x16xi32>
    %c1_i32_66 = arith.constant 1 : i32
    %141 = vector.broadcast %c1_i32_66 : i32 to vector<16x16xi32>
    %142 = arith.addi %140, %141 : vector<16x16xi32>
    %143 = arith.cmpi eq, %138, %142 : vector<16x16xi32>
    %cst_67 = arith.constant 1.000000e+00 : f32
    %cst_68 = arith.constant 0.000000e+00 : f32
    %144 = vector.broadcast %cst_67 : f32 to vector<16x16xf32>
    %145 = vector.broadcast %cst_68 : f32 to vector<16x16xf32>
    %146 = arith.select %143, %144, %145 : vector<16x16xi1>, vector<16x16xf32>
    %147 = arith.truncf %146 : vector<16x16xf32> to vector<16x16xbf16>
    %cst_69 = arith.constant dense<0.000000e+00> : vector<16x256xf32>
    %148 = tpu.matmul %147, %114, %cst_69 {dimension_numbers = #tpu.dot_dimension_numbers<[1], [0], [0], [1], [0, 0, 1, 1], [], []>} : vector<16x16xbf16>, vector<16x256xbf16>, vector<16x256xf32> -> vector<16x256xf32>
    %149 = arith.truncf %148 : vector<16x256xf32> to vector<16x256xbf16>
    %c2_70 = arith.constant 2 : index
    %c0_71 = arith.constant 0 : index
    %c0_72 = arith.constant 0 : index
    %150 = vector.load %arg4[%c2_70, %c0_71, %c0_72] : memref<3x256x512xbf16, #tpu.memory_space<vmem>>, vector<1x256x512xbf16>
    %151 = vector.shape_cast %150 : vector<1x256x512xbf16> to vector<256x512xbf16>
    %cst_73 = arith.constant dense<0.000000e+00> : vector<16x512xf32>
    %152 = tpu.matmul %149, %151, %cst_73 {dimension_numbers = #tpu.dot_dimension_numbers<[1], [0], [0], [1], [0, 0, 1, 1], [], []>} : vector<16x256xbf16>, vector<256x512xbf16>, vector<16x512xf32> -> vector<16x512xf32>
    %153 = arith.addf %136, %152 : vector<16x512xf32>
    %c0_74 = arith.constant 0 : index
    %c0_75 = arith.constant 0 : index
    %154 = vector.load %arg5[%c0_74, %c0_75] : memref<1x512xf32, #tpu.memory_space<vmem>>, vector<1x512xf32>
    %155 = vector.broadcast %154 : vector<1x512xf32> to vector<16x512xf32>
    %156 = arith.addf %153, %155 : vector<16x512xf32>
    %cst_76 = arith.constant 0.000000e+00 : f32
    %157 = vector.broadcast %cst_76 : f32 to vector<16x512xf32>
    %158 = arith.maximumf %156, %157 : vector<16x512xf32>
    %159 = arith.truncf %158 : vector<16x512xf32> to vector<16x512xbf16>
    %cst_77 = arith.constant 0.000000e+00 : f32
    %160 = vector.broadcast %cst_77 : f32 to vector<8x256xf32>
    %161 = tpu.iota {dimensions = array<i32: 0>} : vector<8x16xi32>
    %162 = tpu.iota {dimensions = array<i32: 1>} : vector<8x16xi32>
    %c2_i32_78 = arith.constant 2 : i32
    %163 = vector.broadcast %c2_i32_78 : i32 to vector<8x16xi32>
    %164 = arith.muli %163, %161 : vector<8x16xi32>
    %c-1_i32_79 = arith.constant -1 : i32
    %165 = vector.broadcast %c-1_i32_79 : i32 to vector<8x16xi32>
    %166 = arith.addi %164, %165 : vector<8x16xi32>
    %167 = arith.cmpi eq, %162, %166 : vector<8x16xi32>
    %cst_80 = arith.constant 1.000000e+00 : f32
    %cst_81 = arith.constant 0.000000e+00 : f32
    %168 = vector.broadcast %cst_80 : f32 to vector<8x16xf32>
    %169 = vector.broadcast %cst_81 : f32 to vector<8x16xf32>
    %170 = arith.select %167, %168, %169 : vector<8x16xi1>, vector<8x16xf32>
    %171 = arith.truncf %170 : vector<8x16xf32> to vector<8x16xbf16>
    %cst_82 = arith.constant dense<0.000000e+00> : vector<8x512xf32>
    %172 = tpu.matmul %171, %159, %cst_82 {dimension_numbers = #tpu.dot_dimension_numbers<[1], [0], [0], [1], [0, 0, 1, 1], [], []>} : vector<8x16xbf16>, vector<16x512xbf16>, vector<8x512xf32> -> vector<8x512xf32>
    %173 = arith.truncf %172 : vector<8x512xf32> to vector<8x512xbf16>
    %c0_83 = arith.constant 0 : index
    %c0_84 = arith.constant 0 : index
    %c0_85 = arith.constant 0 : index
    %174 = vector.load %arg6[%c0_83, %c0_84, %c0_85] : memref<3x512x256xbf16, #tpu.memory_space<vmem>>, vector<1x512x256xbf16>
    %175 = vector.shape_cast %174 : vector<1x512x256xbf16> to vector<512x256xbf16>
    %cst_86 = arith.constant dense<0.000000e+00> : vector<8x256xf32>
    %176 = tpu.matmul %173, %175, %cst_86 {dimension_numbers = #tpu.dot_dimension_numbers<[1], [0], [0], [1], [0, 0, 1, 1], [], []>} : vector<8x512xbf16>, vector<512x256xbf16>, vector<8x256xf32> -> vector<8x256xf32>
    %177 = arith.addf %160, %176 : vector<8x256xf32>
    %178 = tpu.iota {dimensions = array<i32: 0>} : vector<8x16xi32>
    %179 = tpu.iota {dimensions = array<i32: 1>} : vector<8x16xi32>
    %c2_i32_87 = arith.constant 2 : i32
    %180 = vector.broadcast %c2_i32_87 : i32 to vector<8x16xi32>
    %181 = arith.muli %180, %178 : vector<8x16xi32>
    %c0_i32 = arith.constant 0 : i32
    %182 = vector.broadcast %c0_i32 : i32 to vector<8x16xi32>
    %183 = arith.addi %181, %182 : vector<8x16xi32>
    %184 = arith.cmpi eq, %179, %183 : vector<8x16xi32>
    %cst_88 = arith.constant 1.000000e+00 : f32
    %cst_89 = arith.constant 0.000000e+00 : f32
    %185 = vector.broadcast %cst_88 : f32 to vector<8x16xf32>
    %186 = vector.broadcast %cst_89 : f32 to vector<8x16xf32>
    %187 = arith.select %184, %185, %186 : vector<8x16xi1>, vector<8x16xf32>
    %188 = arith.truncf %187 : vector<8x16xf32> to vector<8x16xbf16>
    %cst_90 = arith.constant dense<0.000000e+00> : vector<8x512xf32>
    %189 = tpu.matmul %188, %159, %cst_90 {dimension_numbers = #tpu.dot_dimension_numbers<[1], [0], [0], [1], [0, 0, 1, 1], [], []>} : vector<8x16xbf16>, vector<16x512xbf16>, vector<8x512xf32> -> vector<8x512xf32>
    %190 = arith.truncf %189 : vector<8x512xf32> to vector<8x512xbf16>
    %c1_91 = arith.constant 1 : index
    %c0_92 = arith.constant 0 : index
    %c0_93 = arith.constant 0 : index
    %191 = vector.load %arg6[%c1_91, %c0_92, %c0_93] : memref<3x512x256xbf16, #tpu.memory_space<vmem>>, vector<1x512x256xbf16>
    %192 = vector.shape_cast %191 : vector<1x512x256xbf16> to vector<512x256xbf16>
    %cst_94 = arith.constant dense<0.000000e+00> : vector<8x256xf32>
    %193 = tpu.matmul %190, %192, %cst_94 {dimension_numbers = #tpu.dot_dimension_numbers<[1], [0], [0], [1], [0, 0, 1, 1], [], []>} : vector<8x512xbf16>, vector<512x256xbf16>, vector<8x256xf32> -> vector<8x256xf32>
    %194 = arith.addf %177, %193 : vector<8x256xf32>
    %195 = tpu.iota {dimensions = array<i32: 0>} : vector<8x16xi32>
    %196 = tpu.iota {dimensions = array<i32: 1>} : vector<8x16xi32>
    %c2_i32_95 = arith.constant 2 : i32
    %197 = vector.broadcast %c2_i32_95 : i32 to vector<8x16xi32>
    %198 = arith.muli %197, %195 : vector<8x16xi32>
    %c1_i32_96 = arith.constant 1 : i32
    %199 = vector.broadcast %c1_i32_96 : i32 to vector<8x16xi32>
    %200 = arith.addi %198, %199 : vector<8x16xi32>
    %201 = arith.cmpi eq, %196, %200 : vector<8x16xi32>
    %cst_97 = arith.constant 1.000000e+00 : f32
    %cst_98 = arith.constant 0.000000e+00 : f32
    %202 = vector.broadcast %cst_97 : f32 to vector<8x16xf32>
    %203 = vector.broadcast %cst_98 : f32 to vector<8x16xf32>
    %204 = arith.select %201, %202, %203 : vector<8x16xi1>, vector<8x16xf32>
    %205 = arith.truncf %204 : vector<8x16xf32> to vector<8x16xbf16>
    %cst_99 = arith.constant dense<0.000000e+00> : vector<8x512xf32>
    %206 = tpu.matmul %205, %159, %cst_99 {dimension_numbers = #tpu.dot_dimension_numbers<[1], [0], [0], [1], [0, 0, 1, 1], [], []>} : vector<8x16xbf16>, vector<16x512xbf16>, vector<8x512xf32> -> vector<8x512xf32>
    %207 = arith.truncf %206 : vector<8x512xf32> to vector<8x512xbf16>
    %c2_100 = arith.constant 2 : index
    %c0_101 = arith.constant 0 : index
    %c0_102 = arith.constant 0 : index
    %208 = vector.load %arg6[%c2_100, %c0_101, %c0_102] : memref<3x512x256xbf16, #tpu.memory_space<vmem>>, vector<1x512x256xbf16>
    %209 = vector.shape_cast %208 : vector<1x512x256xbf16> to vector<512x256xbf16>
    %cst_103 = arith.constant dense<0.000000e+00> : vector<8x256xf32>
    %210 = tpu.matmul %207, %209, %cst_103 {dimension_numbers = #tpu.dot_dimension_numbers<[1], [0], [0], [1], [0, 0, 1, 1], [], []>} : vector<8x512xbf16>, vector<512x256xbf16>, vector<8x256xf32> -> vector<8x256xf32>
    %211 = arith.addf %194, %210 : vector<8x256xf32>
    %c0_104 = arith.constant 0 : index
    %c0_105 = arith.constant 0 : index
    %212 = vector.load %arg7[%c0_104, %c0_105] : memref<1x256xf32, #tpu.memory_space<vmem>>, vector<1x256xf32>
    %213 = vector.broadcast %212 : vector<1x256xf32> to vector<8x256xf32>
    %214 = arith.addf %211, %213 : vector<8x256xf32>
    %cst_106 = arith.constant 0.000000e+00 : f32
    %215 = vector.broadcast %cst_106 : f32 to vector<8x256xf32>
    %216 = arith.maximumf %214, %215 : vector<8x256xf32>
    %217 = arith.truncf %216 : vector<8x256xf32> to vector<8x256xbf16>
    %cst_107 = arith.constant 0.000000e+00 : f32
    %218 = vector.broadcast %cst_107 : f32 to vector<8x256xf32>
    %219 = tpu.iota {dimensions = array<i32: 0>} : vector<8x8xi32>
    %220 = tpu.iota {dimensions = array<i32: 1>} : vector<8x8xi32>
    %c1_i32_108 = arith.constant 1 : i32
    %221 = vector.broadcast %c1_i32_108 : i32 to vector<8x8xi32>
    %222 = arith.muli %221, %219 : vector<8x8xi32>
    %c-1_i32_109 = arith.constant -1 : i32
    %223 = vector.broadcast %c-1_i32_109 : i32 to vector<8x8xi32>
    %224 = arith.addi %222, %223 : vector<8x8xi32>
    %225 = arith.cmpi eq, %220, %224 : vector<8x8xi32>
    %cst_110 = arith.constant 1.000000e+00 : f32
    %cst_111 = arith.constant 0.000000e+00 : f32
    %226 = vector.broadcast %cst_110 : f32 to vector<8x8xf32>
    %227 = vector.broadcast %cst_111 : f32 to vector<8x8xf32>
    %228 = arith.select %225, %226, %227 : vector<8x8xi1>, vector<8x8xf32>
    %229 = arith.truncf %228 : vector<8x8xf32> to vector<8x8xbf16>
    %cst_112 = arith.constant dense<0.000000e+00> : vector<8x256xf32>
    %230 = tpu.matmul %229, %217, %cst_112 {dimension_numbers = #tpu.dot_dimension_numbers<[1], [0], [0], [1], [0, 0, 1, 1], [], []>} : vector<8x8xbf16>, vector<8x256xbf16>, vector<8x256xf32> -> vector<8x256xf32>
    %231 = arith.truncf %230 : vector<8x256xf32> to vector<8x256xbf16>
    %c0_113 = arith.constant 0 : index
    %c0_114 = arith.constant 0 : index
    %c0_115 = arith.constant 0 : index
    %232 = vector.load %arg8[%c0_113, %c0_114, %c0_115] : memref<3x256x256xbf16, #tpu.memory_space<vmem>>, vector<1x256x256xbf16>
    %233 = vector.shape_cast %232 : vector<1x256x256xbf16> to vector<256x256xbf16>
    %cst_116 = arith.constant dense<0.000000e+00> : vector<8x256xf32>
    %234 = tpu.matmul %231, %233, %cst_116 {dimension_numbers = #tpu.dot_dimension_numbers<[1], [0], [0], [1], [0, 0, 1, 1], [], []>} : vector<8x256xbf16>, vector<256x256xbf16>, vector<8x256xf32> -> vector<8x256xf32>
    %235 = arith.addf %218, %234 : vector<8x256xf32>
    %c1_117 = arith.constant 1 : index
    %c0_118 = arith.constant 0 : index
    %c0_119 = arith.constant 0 : index
    %236 = vector.load %arg8[%c1_117, %c0_118, %c0_119] : memref<3x256x256xbf16, #tpu.memory_space<vmem>>, vector<1x256x256xbf16>
    %237 = vector.shape_cast %236 : vector<1x256x256xbf16> to vector<256x256xbf16>
    %cst_120 = arith.constant dense<0.000000e+00> : vector<8x256xf32>
    %238 = tpu.matmul %217, %237, %cst_120 {dimension_numbers = #tpu.dot_dimension_numbers<[1], [0], [0], [1], [0, 0, 1, 1], [], []>} : vector<8x256xbf16>, vector<256x256xbf16>, vector<8x256xf32> -> vector<8x256xf32>
    %239 = arith.addf %235, %238 : vector<8x256xf32>
    %240 = tpu.iota {dimensions = array<i32: 0>} : vector<8x8xi32>
    %241 = tpu.iota {dimensions = array<i32: 1>} : vector<8x8xi32>
    %c1_i32_121 = arith.constant 1 : i32
    %242 = vector.broadcast %c1_i32_121 : i32 to vector<8x8xi32>
    %243 = arith.muli %242, %240 : vector<8x8xi32>
    %c1_i32_122 = arith.constant 1 : i32
    %244 = vector.broadcast %c1_i32_122 : i32 to vector<8x8xi32>
    %245 = arith.addi %243, %244 : vector<8x8xi32>
    %246 = arith.cmpi eq, %241, %245 : vector<8x8xi32>
    %cst_123 = arith.constant 1.000000e+00 : f32
    %cst_124 = arith.constant 0.000000e+00 : f32
    %247 = vector.broadcast %cst_123 : f32 to vector<8x8xf32>
    %248 = vector.broadcast %cst_124 : f32 to vector<8x8xf32>
    %249 = arith.select %246, %247, %248 : vector<8x8xi1>, vector<8x8xf32>
    %250 = arith.truncf %249 : vector<8x8xf32> to vector<8x8xbf16>
    %cst_125 = arith.constant dense<0.000000e+00> : vector<8x256xf32>
    %251 = tpu.matmul %250, %217, %cst_125 {dimension_numbers = #tpu.dot_dimension_numbers<[1], [0], [0], [1], [0, 0, 1, 1], [], []>} : vector<8x8xbf16>, vector<8x256xbf16>, vector<8x256xf32> -> vector<8x256xf32>
    %252 = arith.truncf %251 : vector<8x256xf32> to vector<8x256xbf16>
    %c2_126 = arith.constant 2 : index
    %c0_127 = arith.constant 0 : index
    %c0_128 = arith.constant 0 : index
    %253 = vector.load %arg8[%c2_126, %c0_127, %c0_128] : memref<3x256x256xbf16, #tpu.memory_space<vmem>>, vector<1x256x256xbf16>
    %254 = vector.shape_cast %253 : vector<1x256x256xbf16> to vector<256x256xbf16>
    %cst_129 = arith.constant dense<0.000000e+00> : vector<8x256xf32>
    %255 = tpu.matmul %252, %254, %cst_129 {dimension_numbers = #tpu.dot_dimension_numbers<[1], [0], [0], [1], [0, 0, 1, 1], [], []>} : vector<8x256xbf16>, vector<256x256xbf16>, vector<8x256xf32> -> vector<8x256xf32>
    %256 = arith.addf %239, %255 : vector<8x256xf32>
    %c0_130 = arith.constant 0 : index
    %c0_131 = arith.constant 0 : index
    %257 = vector.load %arg9[%c0_130, %c0_131] : memref<1x256xf32, #tpu.memory_space<vmem>>, vector<1x256xf32>
    %258 = vector.broadcast %257 : vector<1x256xf32> to vector<8x256xf32>
    %259 = arith.addf %256, %258 : vector<8x256xf32>
    %cst_132 = arith.constant 0.000000e+00 : f32
    %260 = vector.broadcast %cst_132 : f32 to vector<8x256xf32>
    %261 = tpu.iota {dimensions = array<i32: 0>} : vector<8x16xi32>
    %262 = tpu.iota {dimensions = array<i32: 1>} : vector<8x16xi32>
    %c2_i32_133 = arith.constant 2 : i32
    %263 = vector.broadcast %c2_i32_133 : i32 to vector<8x16xi32>
    %264 = arith.muli %263, %261 : vector<8x16xi32>
    %c0_i32_134 = arith.constant 0 : i32
    %265 = vector.broadcast %c0_i32_134 : i32 to vector<8x16xi32>
    %266 = arith.addi %264, %265 : vector<8x16xi32>
    %267 = arith.cmpi eq, %262, %266 : vector<8x16xi32>
    %cst_135 = arith.constant 1.000000e+00 : f32
    %cst_136 = arith.constant 0.000000e+00 : f32
    %268 = vector.broadcast %cst_135 : f32 to vector<8x16xf32>
    %269 = vector.broadcast %cst_136 : f32 to vector<8x16xf32>
    %270 = arith.select %267, %268, %269 : vector<8x16xi1>, vector<8x16xf32>
    %271 = arith.truncf %270 : vector<8x16xf32> to vector<8x16xbf16>
    %cst_137 = arith.constant dense<0.000000e+00> : vector<8x512xf32>
    %272 = tpu.matmul %271, %159, %cst_137 {dimension_numbers = #tpu.dot_dimension_numbers<[1], [0], [0], [1], [0, 0, 1, 1], [], []>} : vector<8x16xbf16>, vector<16x512xbf16>, vector<8x512xf32> -> vector<8x512xf32>
    %273 = arith.truncf %272 : vector<8x512xf32> to vector<8x512xbf16>
    %c0_138 = arith.constant 0 : index
    %c0_139 = arith.constant 0 : index
    %c0_140 = arith.constant 0 : index
    %274 = vector.load %arg10[%c0_138, %c0_139, %c0_140] : memref<1x512x256xbf16, #tpu.memory_space<vmem>>, vector<1x512x256xbf16>
    %275 = vector.shape_cast %274 : vector<1x512x256xbf16> to vector<512x256xbf16>
    %cst_141 = arith.constant dense<0.000000e+00> : vector<8x256xf32>
    %276 = tpu.matmul %273, %275, %cst_141 {dimension_numbers = #tpu.dot_dimension_numbers<[1], [0], [0], [1], [0, 0, 1, 1], [], []>} : vector<8x512xbf16>, vector<512x256xbf16>, vector<8x256xf32> -> vector<8x256xf32>
    %277 = arith.addf %260, %276 : vector<8x256xf32>
    %c0_142 = arith.constant 0 : index
    %c0_143 = arith.constant 0 : index
    %278 = vector.load %arg11[%c0_142, %c0_143] : memref<1x256xf32, #tpu.memory_space<vmem>>, vector<1x256xf32>
    %279 = vector.broadcast %278 : vector<1x256xf32> to vector<8x256xf32>
    %280 = arith.addf %277, %279 : vector<8x256xf32>
    %281 = arith.addf %259, %280 : vector<8x256xf32>
    %cst_144 = arith.constant 0.000000e+00 : f32
    %282 = vector.broadcast %cst_144 : f32 to vector<8x256xf32>
    %283 = arith.maximumf %281, %282 : vector<8x256xf32>
    %284 = arith.truncf %283 : vector<8x256xf32> to vector<8x256xbf16>
    %cst_145 = arith.constant 0.000000e+00 : f32
    %285 = vector.broadcast %cst_145 : f32 to vector<4x256xf32>
    %286 = tpu.iota {dimensions = array<i32: 0>} : vector<4x8xi32>
    %287 = tpu.iota {dimensions = array<i32: 1>} : vector<4x8xi32>
    %c2_i32_146 = arith.constant 2 : i32
    %288 = vector.broadcast %c2_i32_146 : i32 to vector<4x8xi32>
    %289 = arith.muli %288, %286 : vector<4x8xi32>
    %c-1_i32_147 = arith.constant -1 : i32
    %290 = vector.broadcast %c-1_i32_147 : i32 to vector<4x8xi32>
    %291 = arith.addi %289, %290 : vector<4x8xi32>
    %292 = arith.cmpi eq, %287, %291 : vector<4x8xi32>
    %cst_148 = arith.constant 1.000000e+00 : f32
    %cst_149 = arith.constant 0.000000e+00 : f32
    %293 = vector.broadcast %cst_148 : f32 to vector<4x8xf32>
    %294 = vector.broadcast %cst_149 : f32 to vector<4x8xf32>
    %295 = arith.select %292, %293, %294 : vector<4x8xi1>, vector<4x8xf32>
    %296 = arith.truncf %295 : vector<4x8xf32> to vector<4x8xbf16>
    %cst_150 = arith.constant dense<0.000000e+00> : vector<4x256xf32>
    %297 = tpu.matmul %296, %284, %cst_150 {dimension_numbers = #tpu.dot_dimension_numbers<[1], [0], [0], [1], [0, 0, 1, 1], [], []>} : vector<4x8xbf16>, vector<8x256xbf16>, vector<4x256xf32> -> vector<4x256xf32>
    %298 = arith.truncf %297 : vector<4x256xf32> to vector<4x256xbf16>
    %c0_151 = arith.constant 0 : index
    %c0_152 = arith.constant 0 : index
    %c0_153 = arith.constant 0 : index
    %299 = vector.load %arg12[%c0_151, %c0_152, %c0_153] : memref<3x256x256xbf16, #tpu.memory_space<vmem>>, vector<1x256x256xbf16>
    %300 = vector.shape_cast %299 : vector<1x256x256xbf16> to vector<256x256xbf16>
    %cst_154 = arith.constant dense<0.000000e+00> : vector<4x256xf32>
    %301 = tpu.matmul %298, %300, %cst_154 {dimension_numbers = #tpu.dot_dimension_numbers<[1], [0], [0], [1], [0, 0, 1, 1], [], []>} : vector<4x256xbf16>, vector<256x256xbf16>, vector<4x256xf32> -> vector<4x256xf32>
    %302 = arith.addf %285, %301 : vector<4x256xf32>
    %303 = tpu.iota {dimensions = array<i32: 0>} : vector<4x8xi32>
    %304 = tpu.iota {dimensions = array<i32: 1>} : vector<4x8xi32>
    %c2_i32_155 = arith.constant 2 : i32
    %305 = vector.broadcast %c2_i32_155 : i32 to vector<4x8xi32>
    %306 = arith.muli %305, %303 : vector<4x8xi32>
    %c0_i32_156 = arith.constant 0 : i32
    %307 = vector.broadcast %c0_i32_156 : i32 to vector<4x8xi32>
    %308 = arith.addi %306, %307 : vector<4x8xi32>
    %309 = arith.cmpi eq, %304, %308 : vector<4x8xi32>
    %cst_157 = arith.constant 1.000000e+00 : f32
    %cst_158 = arith.constant 0.000000e+00 : f32
    %310 = vector.broadcast %cst_157 : f32 to vector<4x8xf32>
    %311 = vector.broadcast %cst_158 : f32 to vector<4x8xf32>
    %312 = arith.select %309, %310, %311 : vector<4x8xi1>, vector<4x8xf32>
    %313 = arith.truncf %312 : vector<4x8xf32> to vector<4x8xbf16>
    %cst_159 = arith.constant dense<0.000000e+00> : vector<4x256xf32>
    %314 = tpu.matmul %313, %284, %cst_159 {dimension_numbers = #tpu.dot_dimension_numbers<[1], [0], [0], [1], [0, 0, 1, 1], [], []>} : vector<4x8xbf16>, vector<8x256xbf16>, vector<4x256xf32> -> vector<4x256xf32>
    %315 = arith.truncf %314 : vector<4x256xf32> to vector<4x256xbf16>
    %c1_160 = arith.constant 1 : index
    %c0_161 = arith.constant 0 : index
    %c0_162 = arith.constant 0 : index
    %316 = vector.load %arg12[%c1_160, %c0_161, %c0_162] : memref<3x256x256xbf16, #tpu.memory_space<vmem>>, vector<1x256x256xbf16>
    %317 = vector.shape_cast %316 : vector<1x256x256xbf16> to vector<256x256xbf16>
    %cst_163 = arith.constant dense<0.000000e+00> : vector<4x256xf32>
    %318 = tpu.matmul %315, %317, %cst_163 {dimension_numbers = #tpu.dot_dimension_numbers<[1], [0], [0], [1], [0, 0, 1, 1], [], []>} : vector<4x256xbf16>, vector<256x256xbf16>, vector<4x256xf32> -> vector<4x256xf32>
    %319 = arith.addf %302, %318 : vector<4x256xf32>
    %320 = tpu.iota {dimensions = array<i32: 0>} : vector<4x8xi32>
    %321 = tpu.iota {dimensions = array<i32: 1>} : vector<4x8xi32>
    %c2_i32_164 = arith.constant 2 : i32
    %322 = vector.broadcast %c2_i32_164 : i32 to vector<4x8xi32>
    %323 = arith.muli %322, %320 : vector<4x8xi32>
    %c1_i32_165 = arith.constant 1 : i32
    %324 = vector.broadcast %c1_i32_165 : i32 to vector<4x8xi32>
    %325 = arith.addi %323, %324 : vector<4x8xi32>
    %326 = arith.cmpi eq, %321, %325 : vector<4x8xi32>
    %cst_166 = arith.constant 1.000000e+00 : f32
    %cst_167 = arith.constant 0.000000e+00 : f32
    %327 = vector.broadcast %cst_166 : f32 to vector<4x8xf32>
    %328 = vector.broadcast %cst_167 : f32 to vector<4x8xf32>
    %329 = arith.select %326, %327, %328 : vector<4x8xi1>, vector<4x8xf32>
    %330 = arith.truncf %329 : vector<4x8xf32> to vector<4x8xbf16>
    %cst_168 = arith.constant dense<0.000000e+00> : vector<4x256xf32>
    %331 = tpu.matmul %330, %284, %cst_168 {dimension_numbers = #tpu.dot_dimension_numbers<[1], [0], [0], [1], [0, 0, 1, 1], [], []>} : vector<4x8xbf16>, vector<8x256xbf16>, vector<4x256xf32> -> vector<4x256xf32>
    %332 = arith.truncf %331 : vector<4x256xf32> to vector<4x256xbf16>
    %c2_169 = arith.constant 2 : index
    %c0_170 = arith.constant 0 : index
    %c0_171 = arith.constant 0 : index
    %333 = vector.load %arg12[%c2_169, %c0_170, %c0_171] : memref<3x256x256xbf16, #tpu.memory_space<vmem>>, vector<1x256x256xbf16>
    %334 = vector.shape_cast %333 : vector<1x256x256xbf16> to vector<256x256xbf16>
    %cst_172 = arith.constant dense<0.000000e+00> : vector<4x256xf32>
    %335 = tpu.matmul %332, %334, %cst_172 {dimension_numbers = #tpu.dot_dimension_numbers<[1], [0], [0], [1], [0, 0, 1, 1], [], []>} : vector<4x256xbf16>, vector<256x256xbf16>, vector<4x256xf32> -> vector<4x256xf32>
    %336 = arith.addf %319, %335 : vector<4x256xf32>
    %c0_173 = arith.constant 0 : index
    %c0_174 = arith.constant 0 : index
    %337 = vector.load %arg13[%c0_173, %c0_174] : memref<1x256xf32, #tpu.memory_space<vmem>>, vector<1x256xf32>
    %338 = vector.broadcast %337 : vector<1x256xf32> to vector<4x256xf32>
    %339 = arith.addf %336, %338 : vector<4x256xf32>
    %cst_175 = arith.constant 0.000000e+00 : f32
    %340 = vector.broadcast %cst_175 : f32 to vector<4x256xf32>
    %341 = arith.maximumf %339, %340 : vector<4x256xf32>
    %342 = arith.truncf %341 : vector<4x256xf32> to vector<4x256xbf16>
    %cst_176 = arith.constant 0.000000e+00 : f32
    %343 = vector.broadcast %cst_176 : f32 to vector<4x256xf32>
    %344 = tpu.iota {dimensions = array<i32: 0>} : vector<4x4xi32>
    %345 = tpu.iota {dimensions = array<i32: 1>} : vector<4x4xi32>
    %c1_i32_177 = arith.constant 1 : i32
    %346 = vector.broadcast %c1_i32_177 : i32 to vector<4x4xi32>
    %347 = arith.muli %346, %344 : vector<4x4xi32>
    %c-1_i32_178 = arith.constant -1 : i32
    %348 = vector.broadcast %c-1_i32_178 : i32 to vector<4x4xi32>
    %349 = arith.addi %347, %348 : vector<4x4xi32>
    %350 = arith.cmpi eq, %345, %349 : vector<4x4xi32>
    %cst_179 = arith.constant 1.000000e+00 : f32
    %cst_180 = arith.constant 0.000000e+00 : f32
    %351 = vector.broadcast %cst_179 : f32 to vector<4x4xf32>
    %352 = vector.broadcast %cst_180 : f32 to vector<4x4xf32>
    %353 = arith.select %350, %351, %352 : vector<4x4xi1>, vector<4x4xf32>
    %354 = arith.truncf %353 : vector<4x4xf32> to vector<4x4xbf16>
    %cst_181 = arith.constant dense<0.000000e+00> : vector<4x256xf32>
    %355 = tpu.matmul %354, %342, %cst_181 {dimension_numbers = #tpu.dot_dimension_numbers<[1], [0], [0], [1], [0, 0, 1, 1], [], []>} : vector<4x4xbf16>, vector<4x256xbf16>, vector<4x256xf32> -> vector<4x256xf32>
    %356 = arith.truncf %355 : vector<4x256xf32> to vector<4x256xbf16>
    %c0_182 = arith.constant 0 : index
    %c0_183 = arith.constant 0 : index
    %c0_184 = arith.constant 0 : index
    %357 = vector.load %arg14[%c0_182, %c0_183, %c0_184] : memref<3x256x256xbf16, #tpu.memory_space<vmem>>, vector<1x256x256xbf16>
    %358 = vector.shape_cast %357 : vector<1x256x256xbf16> to vector<256x256xbf16>
    %cst_185 = arith.constant dense<0.000000e+00> : vector<4x256xf32>
    %359 = tpu.matmul %356, %358, %cst_185 {dimension_numbers = #tpu.dot_dimension_numbers<[1], [0], [0], [1], [0, 0, 1, 1], [], []>} : vector<4x256xbf16>, vector<256x256xbf16>, vector<4x256xf32> -> vector<4x256xf32>
    %360 = arith.addf %343, %359 : vector<4x256xf32>
    %c1_186 = arith.constant 1 : index
    %c0_187 = arith.constant 0 : index
    %c0_188 = arith.constant 0 : index
    %361 = vector.load %arg14[%c1_186, %c0_187, %c0_188] : memref<3x256x256xbf16, #tpu.memory_space<vmem>>, vector<1x256x256xbf16>
    %362 = vector.shape_cast %361 : vector<1x256x256xbf16> to vector<256x256xbf16>
    %cst_189 = arith.constant dense<0.000000e+00> : vector<4x256xf32>
    %363 = tpu.matmul %342, %362, %cst_189 {dimension_numbers = #tpu.dot_dimension_numbers<[1], [0], [0], [1], [0, 0, 1, 1], [], []>} : vector<4x256xbf16>, vector<256x256xbf16>, vector<4x256xf32> -> vector<4x256xf32>
    %364 = arith.addf %360, %363 : vector<4x256xf32>
    %365 = tpu.iota {dimensions = array<i32: 0>} : vector<4x4xi32>
    %366 = tpu.iota {dimensions = array<i32: 1>} : vector<4x4xi32>
    %c1_i32_190 = arith.constant 1 : i32
    %367 = vector.broadcast %c1_i32_190 : i32 to vector<4x4xi32>
    %368 = arith.muli %367, %365 : vector<4x4xi32>
    %c1_i32_191 = arith.constant 1 : i32
    %369 = vector.broadcast %c1_i32_191 : i32 to vector<4x4xi32>
    %370 = arith.addi %368, %369 : vector<4x4xi32>
    %371 = arith.cmpi eq, %366, %370 : vector<4x4xi32>
    %cst_192 = arith.constant 1.000000e+00 : f32
    %cst_193 = arith.constant 0.000000e+00 : f32
    %372 = vector.broadcast %cst_192 : f32 to vector<4x4xf32>
    %373 = vector.broadcast %cst_193 : f32 to vector<4x4xf32>
    %374 = arith.select %371, %372, %373 : vector<4x4xi1>, vector<4x4xf32>
    %375 = arith.truncf %374 : vector<4x4xf32> to vector<4x4xbf16>
    %cst_194 = arith.constant dense<0.000000e+00> : vector<4x256xf32>
    %376 = tpu.matmul %375, %342, %cst_194 {dimension_numbers = #tpu.dot_dimension_numbers<[1], [0], [0], [1], [0, 0, 1, 1], [], []>} : vector<4x4xbf16>, vector<4x256xbf16>, vector<4x256xf32> -> vector<4x256xf32>
    %377 = arith.truncf %376 : vector<4x256xf32> to vector<4x256xbf16>
    %c2_195 = arith.constant 2 : index
    %c0_196 = arith.constant 0 : index
    %c0_197 = arith.constant 0 : index
    %378 = vector.load %arg14[%c2_195, %c0_196, %c0_197] : memref<3x256x256xbf16, #tpu.memory_space<vmem>>, vector<1x256x256xbf16>
    %379 = vector.shape_cast %378 : vector<1x256x256xbf16> to vector<256x256xbf16>
    %cst_198 = arith.constant dense<0.000000e+00> : vector<4x256xf32>
    %380 = tpu.matmul %377, %379, %cst_198 {dimension_numbers = #tpu.dot_dimension_numbers<[1], [0], [0], [1], [0, 0, 1, 1], [], []>} : vector<4x256xbf16>, vector<256x256xbf16>, vector<4x256xf32> -> vector<4x256xf32>
    %381 = arith.addf %364, %380 : vector<4x256xf32>
    %c0_199 = arith.constant 0 : index
    %c0_200 = arith.constant 0 : index
    %382 = vector.load %arg15[%c0_199, %c0_200] : memref<1x256xf32, #tpu.memory_space<vmem>>, vector<1x256xf32>
    %383 = vector.broadcast %382 : vector<1x256xf32> to vector<4x256xf32>
    %384 = arith.addf %381, %383 : vector<4x256xf32>
    %cst_201 = arith.constant 0.000000e+00 : f32
    %385 = vector.broadcast %cst_201 : f32 to vector<4x256xf32>
    %386 = tpu.iota {dimensions = array<i32: 0>} : vector<4x8xi32>
    %387 = tpu.iota {dimensions = array<i32: 1>} : vector<4x8xi32>
    %c2_i32_202 = arith.constant 2 : i32
    %388 = vector.broadcast %c2_i32_202 : i32 to vector<4x8xi32>
    %389 = arith.muli %388, %386 : vector<4x8xi32>
    %c0_i32_203 = arith.constant 0 : i32
    %390 = vector.broadcast %c0_i32_203 : i32 to vector<4x8xi32>
    %391 = arith.addi %389, %390 : vector<4x8xi32>
    %392 = arith.cmpi eq, %387, %391 : vector<4x8xi32>
    %cst_204 = arith.constant 1.000000e+00 : f32
    %cst_205 = arith.constant 0.000000e+00 : f32
    %393 = vector.broadcast %cst_204 : f32 to vector<4x8xf32>
    %394 = vector.broadcast %cst_205 : f32 to vector<4x8xf32>
    %395 = arith.select %392, %393, %394 : vector<4x8xi1>, vector<4x8xf32>
    %396 = arith.truncf %395 : vector<4x8xf32> to vector<4x8xbf16>
    %cst_206 = arith.constant dense<0.000000e+00> : vector<4x256xf32>
    %397 = tpu.matmul %396, %284, %cst_206 {dimension_numbers = #tpu.dot_dimension_numbers<[1], [0], [0], [1], [0, 0, 1, 1], [], []>} : vector<4x8xbf16>, vector<8x256xbf16>, vector<4x256xf32> -> vector<4x256xf32>
    %398 = arith.truncf %397 : vector<4x256xf32> to vector<4x256xbf16>
    %c0_207 = arith.constant 0 : index
    %c0_208 = arith.constant 0 : index
    %c0_209 = arith.constant 0 : index
    %399 = vector.load %arg16[%c0_207, %c0_208, %c0_209] : memref<1x256x256xbf16, #tpu.memory_space<vmem>>, vector<1x256x256xbf16>
    %400 = vector.shape_cast %399 : vector<1x256x256xbf16> to vector<256x256xbf16>
    %cst_210 = arith.constant dense<0.000000e+00> : vector<4x256xf32>
    %401 = tpu.matmul %398, %400, %cst_210 {dimension_numbers = #tpu.dot_dimension_numbers<[1], [0], [0], [1], [0, 0, 1, 1], [], []>} : vector<4x256xbf16>, vector<256x256xbf16>, vector<4x256xf32> -> vector<4x256xf32>
    %402 = arith.addf %385, %401 : vector<4x256xf32>
    %c0_211 = arith.constant 0 : index
    %c0_212 = arith.constant 0 : index
    %403 = vector.load %arg17[%c0_211, %c0_212] : memref<1x256xf32, #tpu.memory_space<vmem>>, vector<1x256xf32>
    %404 = vector.broadcast %403 : vector<1x256xf32> to vector<4x256xf32>
    %405 = arith.addf %402, %404 : vector<4x256xf32>
    %406 = arith.addf %384, %405 : vector<4x256xf32>
    %cst_213 = arith.constant 0.000000e+00 : f32
    %407 = vector.broadcast %cst_213 : f32 to vector<4x256xf32>
    %408 = arith.maximumf %406, %407 : vector<4x256xf32>
    %409 = arith.truncf %408 : vector<4x256xf32> to vector<4x256xbf16>
    %cst_214 = arith.constant 0.000000e+00 : f32
    %410 = vector.broadcast %cst_214 : f32 to vector<2x256xf32>
    %411 = tpu.iota {dimensions = array<i32: 0>} : vector<2x4xi32>
    %412 = tpu.iota {dimensions = array<i32: 1>} : vector<2x4xi32>
    %c2_i32_215 = arith.constant 2 : i32
    %413 = vector.broadcast %c2_i32_215 : i32 to vector<2x4xi32>
    %414 = arith.muli %413, %411 : vector<2x4xi32>
    %c-1_i32_216 = arith.constant -1 : i32
    %415 = vector.broadcast %c-1_i32_216 : i32 to vector<2x4xi32>
    %416 = arith.addi %414, %415 : vector<2x4xi32>
    %417 = arith.cmpi eq, %412, %416 : vector<2x4xi32>
    %cst_217 = arith.constant 1.000000e+00 : f32
    %cst_218 = arith.constant 0.000000e+00 : f32
    %418 = vector.broadcast %cst_217 : f32 to vector<2x4xf32>
    %419 = vector.broadcast %cst_218 : f32 to vector<2x4xf32>
    %420 = arith.select %417, %418, %419 : vector<2x4xi1>, vector<2x4xf32>
    %421 = arith.truncf %420 : vector<2x4xf32> to vector<2x4xbf16>
    %cst_219 = arith.constant dense<0.000000e+00> : vector<2x256xf32>
    %422 = tpu.matmul %421, %409, %cst_219 {dimension_numbers = #tpu.dot_dimension_numbers<[1], [0], [0], [1], [0, 0, 1, 1], [], []>} : vector<2x4xbf16>, vector<4x256xbf16>, vector<2x256xf32> -> vector<2x256xf32>
    %423 = arith.truncf %422 : vector<2x256xf32> to vector<2x256xbf16>
    %c0_220 = arith.constant 0 : index
    %c0_221 = arith.constant 0 : index
    %c0_222 = arith.constant 0 : index
    %424 = vector.load %arg18[%c0_220, %c0_221, %c0_222] : memref<3x256x256xbf16, #tpu.memory_space<vmem>>, vector<1x256x256xbf16>
    %425 = vector.shape_cast %424 : vector<1x256x256xbf16> to vector<256x256xbf16>
    %cst_223 = arith.constant dense<0.000000e+00> : vector<2x256xf32>
    %426 = tpu.matmul %423, %425, %cst_223 {dimension_numbers = #tpu.dot_dimension_numbers<[1], [0], [0], [1], [0, 0, 1, 1], [], []>} : vector<2x256xbf16>, vector<256x256xbf16>, vector<2x256xf32> -> vector<2x256xf32>
    %427 = arith.addf %410, %426 : vector<2x256xf32>
    %428 = tpu.iota {dimensions = array<i32: 0>} : vector<2x4xi32>
    %429 = tpu.iota {dimensions = array<i32: 1>} : vector<2x4xi32>
    %c2_i32_224 = arith.constant 2 : i32
    %430 = vector.broadcast %c2_i32_224 : i32 to vector<2x4xi32>
    %431 = arith.muli %430, %428 : vector<2x4xi32>
    %c0_i32_225 = arith.constant 0 : i32
    %432 = vector.broadcast %c0_i32_225 : i32 to vector<2x4xi32>
    %433 = arith.addi %431, %432 : vector<2x4xi32>
    %434 = arith.cmpi eq, %429, %433 : vector<2x4xi32>
    %cst_226 = arith.constant 1.000000e+00 : f32
    %cst_227 = arith.constant 0.000000e+00 : f32
    %435 = vector.broadcast %cst_226 : f32 to vector<2x4xf32>
    %436 = vector.broadcast %cst_227 : f32 to vector<2x4xf32>
    %437 = arith.select %434, %435, %436 : vector<2x4xi1>, vector<2x4xf32>
    %438 = arith.truncf %437 : vector<2x4xf32> to vector<2x4xbf16>
    %cst_228 = arith.constant dense<0.000000e+00> : vector<2x256xf32>
    %439 = tpu.matmul %438, %409, %cst_228 {dimension_numbers = #tpu.dot_dimension_numbers<[1], [0], [0], [1], [0, 0, 1, 1], [], []>} : vector<2x4xbf16>, vector<4x256xbf16>, vector<2x256xf32> -> vector<2x256xf32>
    %440 = arith.truncf %439 : vector<2x256xf32> to vector<2x256xbf16>
    %c1_229 = arith.constant 1 : index
    %c0_230 = arith.constant 0 : index
    %c0_231 = arith.constant 0 : index
    %441 = vector.load %arg18[%c1_229, %c0_230, %c0_231] : memref<3x256x256xbf16, #tpu.memory_space<vmem>>, vector<1x256x256xbf16>
    %442 = vector.shape_cast %441 : vector<1x256x256xbf16> to vector<256x256xbf16>
    %cst_232 = arith.constant dense<0.000000e+00> : vector<2x256xf32>
    %443 = tpu.matmul %440, %442, %cst_232 {dimension_numbers = #tpu.dot_dimension_numbers<[1], [0], [0], [1], [0, 0, 1, 1], [], []>} : vector<2x256xbf16>, vector<256x256xbf16>, vector<2x256xf32> -> vector<2x256xf32>
    %444 = arith.addf %427, %443 : vector<2x256xf32>
    %445 = tpu.iota {dimensions = array<i32: 0>} : vector<2x4xi32>
    %446 = tpu.iota {dimensions = array<i32: 1>} : vector<2x4xi32>
    %c2_i32_233 = arith.constant 2 : i32
    %447 = vector.broadcast %c2_i32_233 : i32 to vector<2x4xi32>
    %448 = arith.muli %447, %445 : vector<2x4xi32>
    %c1_i32_234 = arith.constant 1 : i32
    %449 = vector.broadcast %c1_i32_234 : i32 to vector<2x4xi32>
    %450 = arith.addi %448, %449 : vector<2x4xi32>
    %451 = arith.cmpi eq, %446, %450 : vector<2x4xi32>
    %cst_235 = arith.constant 1.000000e+00 : f32
    %cst_236 = arith.constant 0.000000e+00 : f32
    %452 = vector.broadcast %cst_235 : f32 to vector<2x4xf32>
    %453 = vector.broadcast %cst_236 : f32 to vector<2x4xf32>
    %454 = arith.select %451, %452, %453 : vector<2x4xi1>, vector<2x4xf32>
    %455 = arith.truncf %454 : vector<2x4xf32> to vector<2x4xbf16>
    %cst_237 = arith.constant dense<0.000000e+00> : vector<2x256xf32>
    %456 = tpu.matmul %455, %409, %cst_237 {dimension_numbers = #tpu.dot_dimension_numbers<[1], [0], [0], [1], [0, 0, 1, 1], [], []>} : vector<2x4xbf16>, vector<4x256xbf16>, vector<2x256xf32> -> vector<2x256xf32>
    %457 = arith.truncf %456 : vector<2x256xf32> to vector<2x256xbf16>
    %c2_238 = arith.constant 2 : index
    %c0_239 = arith.constant 0 : index
    %c0_240 = arith.constant 0 : index
    %458 = vector.load %arg18[%c2_238, %c0_239, %c0_240] : memref<3x256x256xbf16, #tpu.memory_space<vmem>>, vector<1x256x256xbf16>
    %459 = vector.shape_cast %458 : vector<1x256x256xbf16> to vector<256x256xbf16>
    %cst_241 = arith.constant dense<0.000000e+00> : vector<2x256xf32>
    %460 = tpu.matmul %457, %459, %cst_241 {dimension_numbers = #tpu.dot_dimension_numbers<[1], [0], [0], [1], [0, 0, 1, 1], [], []>} : vector<2x256xbf16>, vector<256x256xbf16>, vector<2x256xf32> -> vector<2x256xf32>
    %461 = arith.addf %444, %460 : vector<2x256xf32>
    %c0_242 = arith.constant 0 : index
    %c0_243 = arith.constant 0 : index
    %462 = vector.load %arg19[%c0_242, %c0_243] : memref<1x256xf32, #tpu.memory_space<vmem>>, vector<1x256xf32>
    %463 = vector.broadcast %462 : vector<1x256xf32> to vector<2x256xf32>
    %464 = arith.addf %461, %463 : vector<2x256xf32>
    %cst_244 = arith.constant 0.000000e+00 : f32
    %465 = vector.broadcast %cst_244 : f32 to vector<2x256xf32>
    %466 = arith.maximumf %464, %465 : vector<2x256xf32>
    %467 = arith.truncf %466 : vector<2x256xf32> to vector<2x256xbf16>
    %cst_245 = arith.constant 0.000000e+00 : f32
    %468 = vector.broadcast %cst_245 : f32 to vector<2x256xf32>
    %469 = tpu.iota {dimensions = array<i32: 0>} : vector<2x2xi32>
    %470 = tpu.iota {dimensions = array<i32: 1>} : vector<2x2xi32>
    %c1_i32_246 = arith.constant 1 : i32
    %471 = vector.broadcast %c1_i32_246 : i32 to vector<2x2xi32>
    %472 = arith.muli %471, %469 : vector<2x2xi32>
    %c-1_i32_247 = arith.constant -1 : i32
    %473 = vector.broadcast %c-1_i32_247 : i32 to vector<2x2xi32>
    %474 = arith.addi %472, %473 : vector<2x2xi32>
    %475 = arith.cmpi eq, %470, %474 : vector<2x2xi32>
    %cst_248 = arith.constant 1.000000e+00 : f32
    %cst_249 = arith.constant 0.000000e+00 : f32
    %476 = vector.broadcast %cst_248 : f32 to vector<2x2xf32>
    %477 = vector.broadcast %cst_249 : f32 to vector<2x2xf32>
    %478 = arith.select %475, %476, %477 : vector<2x2xi1>, vector<2x2xf32>
    %479 = arith.truncf %478 : vector<2x2xf32> to vector<2x2xbf16>
    %cst_250 = arith.constant dense<0.000000e+00> : vector<2x256xf32>
    %480 = tpu.matmul %479, %467, %cst_250 {dimension_numbers = #tpu.dot_dimension_numbers<[1], [0], [0], [1], [0, 0, 1, 1], [], []>} : vector<2x2xbf16>, vector<2x256xbf16>, vector<2x256xf32> -> vector<2x256xf32>
    %481 = arith.truncf %480 : vector<2x256xf32> to vector<2x256xbf16>
    %c0_251 = arith.constant 0 : index
    %c0_252 = arith.constant 0 : index
    %c0_253 = arith.constant 0 : index
    %482 = vector.load %arg20[%c0_251, %c0_252, %c0_253] : memref<3x256x256xbf16, #tpu.memory_space<vmem>>, vector<1x256x256xbf16>
    %483 = vector.shape_cast %482 : vector<1x256x256xbf16> to vector<256x256xbf16>
    %cst_254 = arith.constant dense<0.000000e+00> : vector<2x256xf32>
    %484 = tpu.matmul %481, %483, %cst_254 {dimension_numbers = #tpu.dot_dimension_numbers<[1], [0], [0], [1], [0, 0, 1, 1], [], []>} : vector<2x256xbf16>, vector<256x256xbf16>, vector<2x256xf32> -> vector<2x256xf32>
    %485 = arith.addf %468, %484 : vector<2x256xf32>
    %c1_255 = arith.constant 1 : index
    %c0_256 = arith.constant 0 : index
    %c0_257 = arith.constant 0 : index
    %486 = vector.load %arg20[%c1_255, %c0_256, %c0_257] : memref<3x256x256xbf16, #tpu.memory_space<vmem>>, vector<1x256x256xbf16>
    %487 = vector.shape_cast %486 : vector<1x256x256xbf16> to vector<256x256xbf16>
    %cst_258 = arith.constant dense<0.000000e+00> : vector<2x256xf32>
    %488 = tpu.matmul %467, %487, %cst_258 {dimension_numbers = #tpu.dot_dimension_numbers<[1], [0], [0], [1], [0, 0, 1, 1], [], []>} : vector<2x256xbf16>, vector<256x256xbf16>, vector<2x256xf32> -> vector<2x256xf32>
    %489 = arith.addf %485, %488 : vector<2x256xf32>
    %490 = tpu.iota {dimensions = array<i32: 0>} : vector<2x2xi32>
    %491 = tpu.iota {dimensions = array<i32: 1>} : vector<2x2xi32>
    %c1_i32_259 = arith.constant 1 : i32
    %492 = vector.broadcast %c1_i32_259 : i32 to vector<2x2xi32>
    %493 = arith.muli %492, %490 : vector<2x2xi32>
    %c1_i32_260 = arith.constant 1 : i32
    %494 = vector.broadcast %c1_i32_260 : i32 to vector<2x2xi32>
    %495 = arith.addi %493, %494 : vector<2x2xi32>
    %496 = arith.cmpi eq, %491, %495 : vector<2x2xi32>
    %cst_261 = arith.constant 1.000000e+00 : f32
    %cst_262 = arith.constant 0.000000e+00 : f32
    %497 = vector.broadcast %cst_261 : f32 to vector<2x2xf32>
    %498 = vector.broadcast %cst_262 : f32 to vector<2x2xf32>
    %499 = arith.select %496, %497, %498 : vector<2x2xi1>, vector<2x2xf32>
    %500 = arith.truncf %499 : vector<2x2xf32> to vector<2x2xbf16>
    %cst_263 = arith.constant dense<0.000000e+00> : vector<2x256xf32>
    %501 = tpu.matmul %500, %467, %cst_263 {dimension_numbers = #tpu.dot_dimension_numbers<[1], [0], [0], [1], [0, 0, 1, 1], [], []>} : vector<2x2xbf16>, vector<2x256xbf16>, vector<2x256xf32> -> vector<2x256xf32>
    %502 = arith.truncf %501 : vector<2x256xf32> to vector<2x256xbf16>
    %c2_264 = arith.constant 2 : index
    %c0_265 = arith.constant 0 : index
    %c0_266 = arith.constant 0 : index
    %503 = vector.load %arg20[%c2_264, %c0_265, %c0_266] : memref<3x256x256xbf16, #tpu.memory_space<vmem>>, vector<1x256x256xbf16>
    %504 = vector.shape_cast %503 : vector<1x256x256xbf16> to vector<256x256xbf16>
    %cst_267 = arith.constant dense<0.000000e+00> : vector<2x256xf32>
    %505 = tpu.matmul %502, %504, %cst_267 {dimension_numbers = #tpu.dot_dimension_numbers<[1], [0], [0], [1], [0, 0, 1, 1], [], []>} : vector<2x256xbf16>, vector<256x256xbf16>, vector<2x256xf32> -> vector<2x256xf32>
    %506 = arith.addf %489, %505 : vector<2x256xf32>
    %c0_268 = arith.constant 0 : index
    %c0_269 = arith.constant 0 : index
    %507 = vector.load %arg21[%c0_268, %c0_269] : memref<1x256xf32, #tpu.memory_space<vmem>>, vector<1x256xf32>
    %508 = vector.broadcast %507 : vector<1x256xf32> to vector<2x256xf32>
    %509 = arith.addf %506, %508 : vector<2x256xf32>
    %cst_270 = arith.constant 0.000000e+00 : f32
    %510 = vector.broadcast %cst_270 : f32 to vector<2x256xf32>
    %511 = tpu.iota {dimensions = array<i32: 0>} : vector<2x4xi32>
    %512 = tpu.iota {dimensions = array<i32: 1>} : vector<2x4xi32>
    %c2_i32_271 = arith.constant 2 : i32
    %513 = vector.broadcast %c2_i32_271 : i32 to vector<2x4xi32>
    %514 = arith.muli %513, %511 : vector<2x4xi32>
    %c0_i32_272 = arith.constant 0 : i32
    %515 = vector.broadcast %c0_i32_272 : i32 to vector<2x4xi32>
    %516 = arith.addi %514, %515 : vector<2x4xi32>
    %517 = arith.cmpi eq, %512, %516 : vector<2x4xi32>
    %cst_273 = arith.constant 1.000000e+00 : f32
    %cst_274 = arith.constant 0.000000e+00 : f32
    %518 = vector.broadcast %cst_273 : f32 to vector<2x4xf32>
    %519 = vector.broadcast %cst_274 : f32 to vector<2x4xf32>
    %520 = arith.select %517, %518, %519 : vector<2x4xi1>, vector<2x4xf32>
    %521 = arith.truncf %520 : vector<2x4xf32> to vector<2x4xbf16>
    %cst_275 = arith.constant dense<0.000000e+00> : vector<2x256xf32>
    %522 = tpu.matmul %521, %409, %cst_275 {dimension_numbers = #tpu.dot_dimension_numbers<[1], [0], [0], [1], [0, 0, 1, 1], [], []>} : vector<2x4xbf16>, vector<4x256xbf16>, vector<2x256xf32> -> vector<2x256xf32>
    %523 = arith.truncf %522 : vector<2x256xf32> to vector<2x256xbf16>
    %c0_276 = arith.constant 0 : index
    %c0_277 = arith.constant 0 : index
    %c0_278 = arith.constant 0 : index
    %524 = vector.load %arg22[%c0_276, %c0_277, %c0_278] : memref<1x256x256xbf16, #tpu.memory_space<vmem>>, vector<1x256x256xbf16>
    %525 = vector.shape_cast %524 : vector<1x256x256xbf16> to vector<256x256xbf16>
    %cst_279 = arith.constant dense<0.000000e+00> : vector<2x256xf32>
    %526 = tpu.matmul %523, %525, %cst_279 {dimension_numbers = #tpu.dot_dimension_numbers<[1], [0], [0], [1], [0, 0, 1, 1], [], []>} : vector<2x256xbf16>, vector<256x256xbf16>, vector<2x256xf32> -> vector<2x256xf32>
    %527 = arith.addf %510, %526 : vector<2x256xf32>
    %c0_280 = arith.constant 0 : index
    %c0_281 = arith.constant 0 : index
    %528 = vector.load %arg23[%c0_280, %c0_281] : memref<1x256xf32, #tpu.memory_space<vmem>>, vector<1x256xf32>
    %529 = vector.broadcast %528 : vector<1x256xf32> to vector<2x256xf32>
    %530 = arith.addf %527, %529 : vector<2x256xf32>
    %531 = arith.addf %509, %530 : vector<2x256xf32>
    %cst_282 = arith.constant 0.000000e+00 : f32
    %532 = vector.broadcast %cst_282 : f32 to vector<2x256xf32>
    %533 = arith.maximumf %531, %532 : vector<2x256xf32>
    %534 = arith.truncf %533 : vector<2x256xf32> to vector<2x256xbf16>
    %535 = tpu.iota {dimensions = array<i32: 1>} : vector<2x128xi32>
    %536 = vector.extract_strided_slice %534 {offsets = [0, 0], sizes = [2, 128], strides = [1, 1]} : vector<2x256xbf16> to vector<2x128xbf16>
    %c0_283 = arith.constant 0 : index
    %c0_284 = arith.constant 0 : index
    %537 = vector.load %arg24[%c0_283, %c0_284] : memref<128x128xbf16, #tpu.memory_space<vmem>>, vector<128x128xbf16>
    %cst_285 = arith.constant dense<0.000000e+00> : vector<2x128xf32>
    %538 = tpu.matmul %536, %537, %cst_285 {dimension_numbers = #tpu.dot_dimension_numbers<[1], [0], [0], [1], [0, 0, 1, 1], [], []>} : vector<2x128xbf16>, vector<128x128xbf16>, vector<2x128xf32> -> vector<2x128xf32>
    %c0_286 = arith.constant 0 : index
    %c0_287 = arith.constant 0 : index
    %539 = vector.load %arg25[%c0_286, %c0_287] : memref<1x128xf32, #tpu.memory_space<vmem>>, vector<1x128xf32>
    %540 = vector.broadcast %539 : vector<1x128xf32> to vector<2x128xf32>
    %541 = arith.addf %538, %540 : vector<2x128xf32>
    %cst_288 = arith.constant 0.000000e+00 : f32
    %542 = vector.broadcast %cst_288 : f32 to vector<2x128xf32>
    %543 = arith.maximumf %541, %542 : vector<2x128xf32>
    %544 = arith.truncf %543 : vector<2x128xf32> to vector<2x128xbf16>
    %c0_289 = arith.constant 0 : index
    %c0_290 = arith.constant 0 : index
    %545 = vector.load %arg26[%c0_289, %c0_290] : memref<128x128xbf16, #tpu.memory_space<vmem>>, vector<128x128xbf16>
    %cst_291 = arith.constant dense<0.000000e+00> : vector<2x128xf32>
    %546 = tpu.matmul %544, %545, %cst_291 {dimension_numbers = #tpu.dot_dimension_numbers<[1], [0], [0], [1], [0, 0, 1, 1], [], []>} : vector<2x128xbf16>, vector<128x128xbf16>, vector<2x128xf32> -> vector<2x128xf32>
    %c0_292 = arith.constant 0 : index
    %c0_293 = arith.constant 0 : index
    %547 = vector.load %arg27[%c0_292, %c0_293] : memref<1x128xf32, #tpu.memory_space<vmem>>, vector<1x128xf32>
    %548 = vector.broadcast %547 : vector<1x128xf32> to vector<2x128xf32>
    %549 = arith.addf %546, %548 : vector<2x128xf32>
    %cst_294 = arith.constant 0.000000e+00 : f32
    %550 = vector.broadcast %cst_294 : f32 to vector<2x128xf32>
    %551 = arith.maximumf %549, %550 : vector<2x128xf32>
    %552 = arith.truncf %551 : vector<2x128xf32> to vector<2x128xbf16>
    %c0_295 = arith.constant 0 : index
    %c0_296 = arith.constant 0 : index
    %553 = vector.load %arg28[%c0_295, %c0_296] : memref<128x128xbf16, #tpu.memory_space<vmem>>, vector<128x128xbf16>
    %cst_297 = arith.constant dense<0.000000e+00> : vector<2x128xf32>
    %554 = tpu.matmul %552, %553, %cst_297 {dimension_numbers = #tpu.dot_dimension_numbers<[1], [0], [0], [1], [0, 0, 1, 1], [], []>} : vector<2x128xbf16>, vector<128x128xbf16>, vector<2x128xf32> -> vector<2x128xf32>
    %c0_298 = arith.constant 0 : index
    %c0_299 = arith.constant 0 : index
    %555 = vector.load %arg29[%c0_298, %c0_299] : memref<1x128xf32, #tpu.memory_space<vmem>>, vector<1x128xf32>
    %556 = vector.broadcast %555 : vector<1x128xf32> to vector<2x128xf32>
    %557 = arith.addf %554, %556 : vector<2x128xf32>
    %c2_i32_300 = arith.constant 2 : i32
    %558 = vector.broadcast %c2_i32_300 : i32 to vector<2x128xi32>
    %559 = arith.cmpi slt, %535, %558 : vector<2x128xi32>
    %cst_301 = arith.constant -1.000000e+30 : f32
    %560 = vector.broadcast %cst_301 : f32 to vector<2x128xf32>
    %561 = arith.select %559, %557, %560 : vector<2x128xi1>, vector<2x128xf32>
    %cst_302 = arith.constant dense<0xFF800000> : vector<2xf32>
    %562 = vector.multi_reduction <maximumf>, %561, %cst_302 [1] : vector<2x128xf32> to vector<2xf32>
    %563 = vector.shape_cast %562 : vector<2xf32> to vector<2x1xf32>
    %564 = vector.broadcast %563 : vector<2x1xf32> to vector<2x128xf32>
    %565 = arith.subf %561, %564 : vector<2x128xf32>
    %566 = math.exp %565 : vector<2x128xf32>
    %cst_303 = arith.constant dense<0.000000e+00> : vector<2xf32>
    %567 = vector.multi_reduction <add>, %566, %cst_303 [1] : vector<2x128xf32> to vector<2xf32>
    %568 = vector.shape_cast %567 : vector<2xf32> to vector<2x1xf32>
    %569 = tpu.reciprocal %568 {approx = true} : vector<2x1xf32> -> vector<2x1xf32>
    %570 = vector.broadcast %569 : vector<2x1xf32> to vector<2x128xf32>
    %571 = arith.mulf %566, %570 : vector<2x128xf32>
    %c0_304 = arith.constant 0 : index
    %c0_305 = arith.constant 0 : index
    %c0_306 = arith.constant 0 : index
    %c0_307 = arith.constant 0 : index
    %572 = vector.load %arg30[%c0_304, %c0_305, %c0_306, %c0_307] : memref<1x2x2x128xf32, #tpu.memory_space<vmem>>, vector<1x1x2x128xf32>
    %573 = vector.shape_cast %572 : vector<1x1x2x128xf32> to vector<2x128xf32>
    %574 = vector.shape_cast %571 : vector<2x128xf32> to vector<1x1x2x128xf32>
    tpu.vector_store %arg30[%c0_304, %c0_305, %c0_306, %c0_307], %574 {strides = array<i32>} : memref<1x2x2x128xf32, #tpu.memory_space<vmem>>, vector<1x1x2x128xf32>,
    %575 = vector.broadcast %563 : vector<2x1xf32> to vector<2x128xf32>
    %576 = arith.subf %561, %575 : vector<2x128xf32>
    %577 = math.log %568 : vector<2x1xf32>
    %578 = vector.broadcast %577 : vector<2x1xf32> to vector<2x128xf32>
    %579 = arith.subf %576, %578 : vector<2x128xf32>
    %c0_308 = arith.constant 0 : index
    %c0_309 = arith.constant 0 : index
    %c0_310 = arith.constant 0 : index
    %c0_311 = arith.constant 0 : index
    %580 = vector.load %arg31[%c0_308, %c0_309, %c0_310, %c0_311] : memref<1x2x2x128xf32, #tpu.memory_space<vmem>>, vector<1x1x2x128xf32>
    %581 = vector.shape_cast %580 : vector<1x1x2x128xf32> to vector<2x128xf32>
    %582 = vector.shape_cast %579 : vector<2x128xf32> to vector<1x1x2x128xf32>
    tpu.vector_store %arg31[%c0_308, %c0_309, %c0_310, %c0_311], %582 {strides = array<i32>} : memref<1x2x2x128xf32, #tpu.memory_space<vmem>>, vector<1x1x2x128xf32>,
    %583 = vector.extract_strided_slice %534 {offsets = [0, 128], sizes = [2, 128], strides = [1, 1]} : vector<2x256xbf16> to vector<2x128xbf16>
    %c0_312 = arith.constant 0 : index
    %c0_313 = arith.constant 0 : index
    %584 = vector.load %arg24[%c0_312, %c0_313] : memref<128x128xbf16, #tpu.memory_space<vmem>>, vector<128x128xbf16>
    %cst_314 = arith.constant dense<0.000000e+00> : vector<2x128xf32>
    %585 = tpu.matmul %583, %584, %cst_314 {dimension_numbers = #tpu.dot_dimension_numbers<[1], [0], [0], [1], [0, 0, 1, 1], [], []>} : vector<2x128xbf16>, vector<128x128xbf16>, vector<2x128xf32> -> vector<2x128xf32>
    %c0_315 = arith.constant 0 : index
    %c0_316 = arith.constant 0 : index
    %586 = vector.load %arg25[%c0_315, %c0_316] : memref<1x128xf32, #tpu.memory_space<vmem>>, vector<1x128xf32>
    %587 = vector.broadcast %586 : vector<1x128xf32> to vector<2x128xf32>
    %588 = arith.addf %585, %587 : vector<2x128xf32>
    %cst_317 = arith.constant 0.000000e+00 : f32
    %589 = vector.broadcast %cst_317 : f32 to vector<2x128xf32>
    %590 = arith.maximumf %588, %589 : vector<2x128xf32>
    %591 = arith.truncf %590 : vector<2x128xf32> to vector<2x128xbf16>
    %c0_318 = arith.constant 0 : index
    %c0_319 = arith.constant 0 : index
    %592 = vector.load %arg26[%c0_318, %c0_319] : memref<128x128xbf16, #tpu.memory_space<vmem>>, vector<128x128xbf16>
    %cst_320 = arith.constant dense<0.000000e+00> : vector<2x128xf32>
    %593 = tpu.matmul %591, %592, %cst_320 {dimension_numbers = #tpu.dot_dimension_numbers<[1], [0], [0], [1], [0, 0, 1, 1], [], []>} : vector<2x128xbf16>, vector<128x128xbf16>, vector<2x128xf32> -> vector<2x128xf32>
    %c0_321 = arith.constant 0 : index
    %c0_322 = arith.constant 0 : index
    %594 = vector.load %arg27[%c0_321, %c0_322] : memref<1x128xf32, #tpu.memory_space<vmem>>, vector<1x128xf32>
    %595 = vector.broadcast %594 : vector<1x128xf32> to vector<2x128xf32>
    %596 = arith.addf %593, %595 : vector<2x128xf32>
    %cst_323 = arith.constant 0.000000e+00 : f32
    %597 = vector.broadcast %cst_323 : f32 to vector<2x128xf32>
    %598 = arith.maximumf %596, %597 : vector<2x128xf32>
    %599 = arith.truncf %598 : vector<2x128xf32> to vector<2x128xbf16>
    %c0_324 = arith.constant 0 : index
    %c0_325 = arith.constant 0 : index
    %600 = vector.load %arg28[%c0_324, %c0_325] : memref<128x128xbf16, #tpu.memory_space<vmem>>, vector<128x128xbf16>
    %cst_326 = arith.constant dense<0.000000e+00> : vector<2x128xf32>
    %601 = tpu.matmul %599, %600, %cst_326 {dimension_numbers = #tpu.dot_dimension_numbers<[1], [0], [0], [1], [0, 0, 1, 1], [], []>} : vector<2x128xbf16>, vector<128x128xbf16>, vector<2x128xf32> -> vector<2x128xf32>
    %c0_327 = arith.constant 0 : index
    %c0_328 = arith.constant 0 : index
    %602 = vector.load %arg29[%c0_327, %c0_328] : memref<1x128xf32, #tpu.memory_space<vmem>>, vector<1x128xf32>
    %603 = vector.broadcast %602 : vector<1x128xf32> to vector<2x128xf32>
    %604 = arith.addf %601, %603 : vector<2x128xf32>
    %c2_i32_329 = arith.constant 2 : i32
    %605 = vector.broadcast %c2_i32_329 : i32 to vector<2x128xi32>
    %606 = arith.cmpi slt, %535, %605 : vector<2x128xi32>
    %cst_330 = arith.constant -1.000000e+30 : f32
    %607 = vector.broadcast %cst_330 : f32 to vector<2x128xf32>
    %608 = arith.select %606, %604, %607 : vector<2x128xi1>, vector<2x128xf32>
    %cst_331 = arith.constant dense<0xFF800000> : vector<2xf32>
    %609 = vector.multi_reduction <maximumf>, %608, %cst_331 [1] : vector<2x128xf32> to vector<2xf32>
    %610 = vector.shape_cast %609 : vector<2xf32> to vector<2x1xf32>
    %611 = vector.broadcast %610 : vector<2x1xf32> to vector<2x128xf32>
    %612 = arith.subf %608, %611 : vector<2x128xf32>
    %613 = math.exp %612 : vector<2x128xf32>
    %cst_332 = arith.constant dense<0.000000e+00> : vector<2xf32>
    %614 = vector.multi_reduction <add>, %613, %cst_332 [1] : vector<2x128xf32> to vector<2xf32>
    %615 = vector.shape_cast %614 : vector<2xf32> to vector<2x1xf32>
    %616 = tpu.reciprocal %615 {approx = true} : vector<2x1xf32> -> vector<2x1xf32>
    %617 = vector.broadcast %616 : vector<2x1xf32> to vector<2x128xf32>
    %618 = arith.mulf %613, %617 : vector<2x128xf32>
    %c0_333 = arith.constant 0 : index
    %c1_334 = arith.constant 1 : index
    %c0_335 = arith.constant 0 : index
    %c0_336 = arith.constant 0 : index
    %619 = vector.load %arg30[%c0_333, %c1_334, %c0_335, %c0_336] : memref<1x2x2x128xf32, #tpu.memory_space<vmem>>, vector<1x1x2x128xf32>
    %620 = vector.shape_cast %619 : vector<1x1x2x128xf32> to vector<2x128xf32>
    %621 = vector.shape_cast %618 : vector<2x128xf32> to vector<1x1x2x128xf32>
    tpu.vector_store %arg30[%c0_333, %c1_334, %c0_335, %c0_336], %621 {strides = array<i32>} : memref<1x2x2x128xf32, #tpu.memory_space<vmem>>, vector<1x1x2x128xf32>,
    %622 = vector.broadcast %610 : vector<2x1xf32> to vector<2x128xf32>
    %623 = arith.subf %608, %622 : vector<2x128xf32>
    %624 = math.log %615 : vector<2x1xf32>
    %625 = vector.broadcast %624 : vector<2x1xf32> to vector<2x128xf32>
    %626 = arith.subf %623, %625 : vector<2x128xf32>
    %c0_337 = arith.constant 0 : index
    %c1_338 = arith.constant 1 : index
    %c0_339 = arith.constant 0 : index
    %c0_340 = arith.constant 0 : index
    %627 = vector.load %arg31[%c0_337, %c1_338, %c0_339, %c0_340] : memref<1x2x2x128xf32, #tpu.memory_space<vmem>>, vector<1x1x2x128xf32>
    %628 = vector.shape_cast %627 : vector<1x1x2x128xf32> to vector<2x128xf32>
    %629 = vector.shape_cast %626 : vector<2x128xf32> to vector<1x1x2x128xf32>
    tpu.vector_store %arg31[%c0_337, %c1_338, %c0_339, %c0_340], %629 {strides = array<i32>} : memref<1x2x2x128xf32, #tpu.memory_space<vmem>>, vector<1x1x2x128xf32>,
    return
  }
  func.func @transform_0(%arg0: i32) -> (i32, i32, i32) {
    %c0_i32 = arith.constant 0 : i32
    %c0_i32_0 = arith.constant 0 : i32
    %c0_i32_1 = arith.constant 0 : i32
    return %arg0, %c0_i32, %c0_i32_0 : i32, i32, i32
  }
  func.func @transform_1(%arg0: i32) -> (i32, i32, i32) {
    %c0_i32 = arith.constant 0 : i32
    %c0_i32_0 = arith.constant 0 : i32
    %c0_i32_1 = arith.constant 0 : i32
    %c0_i32_2 = arith.constant 0 : i32
    return %c0_i32, %c0_i32_0, %c0_i32_1 : i32, i32, i32
  }
  func.func @transform_2(%arg0: i32) -> (i32, i32) {
    %c0_i32 = arith.constant 0 : i32
    %c0_i32_0 = arith.constant 0 : i32
    %c0_i32_1 = arith.constant 0 : i32
    return %c0_i32, %c0_i32_0 : i32, i32
  }
  func.func @transform_3(%arg0: i32) -> (i32, i32, i32) {
    %c0_i32 = arith.constant 0 : i32
    %c0_i32_0 = arith.constant 0 : i32
    %c0_i32_1 = arith.constant 0 : i32
    %c0_i32_2 = arith.constant 0 : i32
    return %c0_i32, %c0_i32_0, %c0_i32_1 : i32, i32, i32
  }
  func.func @transform_4(%arg0: i32) -> (i32, i32) {
    %c0_i32 = arith.constant 0 : i32
    %c0_i32_0 = arith.constant 0 : i32
    %c0_i32_1 = arith.constant 0 : i32
    return %c0_i32, %c0_i32_0 : i32, i32
  }
  func.func @transform_5(%arg0: i32) -> (i32, i32, i32) {
    %c0_i32 = arith.constant 0 : i32
    %c0_i32_0 = arith.constant 0 : i32
    %c0_i32_1 = arith.constant 0 : i32
    %c0_i32_2 = arith.constant 0 : i32
    return %c0_i32, %c0_i32_0, %c0_i32_1 : i32, i32, i32
  }
  func.func @transform_6(%arg0: i32) -> (i32, i32) {
    %c0_i32 = arith.constant 0 : i32
    %c0_i32_0 = arith.constant 0 : i32
    %c0_i32_1 = arith.constant 0 : i32
    return %c0_i32, %c0_i32_0 : i32, i32
  }
  func.func @transform_7(%arg0: i32) -> (i32, i32, i32) {
    %c0_i32 = arith.constant 0 : i32
    %c0_i32_0 = arith.constant 0 : i32
    %c0_i32_1 = arith.constant 0 : i32
    %c0_i32_2 = arith.constant 0 : i32
    return %c0_i32, %c0_i32_0, %c0_i32_1 : i32, i32, i32
  }
  func.func @transform_8(%arg0: i32) -> (i32, i32) {
    %c0_i32 = arith.constant 0 : i32
    %c0_i32_0 = arith.constant 0 : i32
    %c0_i32_1 = arith.constant 0 : i32
    return %c0_i32, %c0_i32_0 : i32, i32
  }
  func.func @transform_9(%arg0: i32) -> (i32, i32, i32) {
    %c0_i32 = arith.constant 0 : i32
    %c0_i32_0 = arith.constant 0 : i32
    %c0_i32_1 = arith.constant 0 : i32
    %c0_i32_2 = arith.constant 0 : i32
    return %c0_i32, %c0_i32_0, %c0_i32_1 : i32, i32, i32
  }
  func.func @transform_10(%arg0: i32) -> (i32, i32) {
    %c0_i32 = arith.constant 0 : i32
    %c0_i32_0 = arith.constant 0 : i32
    %c0_i32_1 = arith.constant 0 : i32
    return %c0_i32, %c0_i32_0 : i32, i32
  }
  func.func @transform_11(%arg0: i32) -> (i32, i32, i32) {
    %c0_i32 = arith.constant 0 : i32
    %c0_i32_0 = arith.constant 0 : i32
    %c0_i32_1 = arith.constant 0 : i32
    %c0_i32_2 = arith.constant 0 : i32
    return %c0_i32, %c0_i32_0, %c0_i32_1 : i32, i32, i32
  }
  func.func @transform_12(%arg0: i32) -> (i32, i32) {
    %c0_i32 = arith.constant 0 : i32
    %c0_i32_0 = arith.constant 0 : i32
    %c0_i32_1 = arith.constant 0 : i32
    return %c0_i32, %c0_i32_0 : i32, i32
  }
  func.func @transform_13(%arg0: i32) -> (i32, i32, i32) {
    %c0_i32 = arith.constant 0 : i32
    %c0_i32_0 = arith.constant 0 : i32
    %c0_i32_1 = arith.constant 0 : i32
    %c0_i32_2 = arith.constant 0 : i32
    return %c0_i32, %c0_i32_0, %c0_i32_1 : i32, i32, i32
  }
  func.func @transform_14(%arg0: i32) -> (i32, i32) {
    %c0_i32 = arith.constant 0 : i32
    %c0_i32_0 = arith.constant 0 : i32
    %c0_i32_1 = arith.constant 0 : i32
    return %c0_i32, %c0_i32_0 : i32, i32
  }
  func.func @transform_15(%arg0: i32) -> (i32, i32, i32) {
    %c0_i32 = arith.constant 0 : i32
    %c0_i32_0 = arith.constant 0 : i32
    %c0_i32_1 = arith.constant 0 : i32
    %c0_i32_2 = arith.constant 0 : i32
    return %c0_i32, %c0_i32_0, %c0_i32_1 : i32, i32, i32
  }
  func.func @transform_16(%arg0: i32) -> (i32, i32) {
    %c0_i32 = arith.constant 0 : i32
    %c0_i32_0 = arith.constant 0 : i32
    %c0_i32_1 = arith.constant 0 : i32
    return %c0_i32, %c0_i32_0 : i32, i32
  }
  func.func @transform_17(%arg0: i32) -> (i32, i32, i32) {
    %c0_i32 = arith.constant 0 : i32
    %c0_i32_0 = arith.constant 0 : i32
    %c0_i32_1 = arith.constant 0 : i32
    %c0_i32_2 = arith.constant 0 : i32
    return %c0_i32, %c0_i32_0, %c0_i32_1 : i32, i32, i32
  }
  func.func @transform_18(%arg0: i32) -> (i32, i32) {
    %c0_i32 = arith.constant 0 : i32
    %c0_i32_0 = arith.constant 0 : i32
    %c0_i32_1 = arith.constant 0 : i32
    return %c0_i32, %c0_i32_0 : i32, i32
  }
  func.func @transform_19(%arg0: i32) -> (i32, i32, i32) {
    %c0_i32 = arith.constant 0 : i32
    %c0_i32_0 = arith.constant 0 : i32
    %c0_i32_1 = arith.constant 0 : i32
    %c0_i32_2 = arith.constant 0 : i32
    return %c0_i32, %c0_i32_0, %c0_i32_1 : i32, i32, i32
  }
  func.func @transform_20(%arg0: i32) -> (i32, i32) {
    %c0_i32 = arith.constant 0 : i32
    %c0_i32_0 = arith.constant 0 : i32
    %c0_i32_1 = arith.constant 0 : i32
    return %c0_i32, %c0_i32_0 : i32, i32
  }
  func.func @transform_21(%arg0: i32) -> (i32, i32, i32) {
    %c0_i32 = arith.constant 0 : i32
    %c0_i32_0 = arith.constant 0 : i32
    %c0_i32_1 = arith.constant 0 : i32
    %c0_i32_2 = arith.constant 0 : i32
    return %c0_i32, %c0_i32_0, %c0_i32_1 : i32, i32, i32
  }
  func.func @transform_22(%arg0: i32) -> (i32, i32) {
    %c0_i32 = arith.constant 0 : i32
    %c0_i32_0 = arith.constant 0 : i32
    %c0_i32_1 = arith.constant 0 : i32
    return %c0_i32, %c0_i32_0 : i32, i32
  }
  func.func @transform_23(%arg0: i32) -> (i32, i32) {
    %c0_i32 = arith.constant 0 : i32
    %c0_i32_0 = arith.constant 0 : i32
    %c0_i32_1 = arith.constant 0 : i32
    return %c0_i32, %c0_i32_0 : i32, i32
  }
  func.func @transform_24(%arg0: i32) -> (i32, i32) {
    %c0_i32 = arith.constant 0 : i32
    %c0_i32_0 = arith.constant 0 : i32
    %c0_i32_1 = arith.constant 0 : i32
    return %c0_i32, %c0_i32_0 : i32, i32
  }
  func.func @transform_25(%arg0: i32) -> (i32, i32) {
    %c0_i32 = arith.constant 0 : i32
    %c0_i32_0 = arith.constant 0 : i32
    %c0_i32_1 = arith.constant 0 : i32
    return %c0_i32, %c0_i32_0 : i32, i32
  }
  func.func @transform_26(%arg0: i32) -> (i32, i32) {
    %c0_i32 = arith.constant 0 : i32
    %c0_i32_0 = arith.constant 0 : i32
    %c0_i32_1 = arith.constant 0 : i32
    return %c0_i32, %c0_i32_0 : i32, i32
  }
  func.func @transform_27(%arg0: i32) -> (i32, i32) {
    %c0_i32 = arith.constant 0 : i32
    %c0_i32_0 = arith.constant 0 : i32
    %c0_i32_1 = arith.constant 0 : i32
    return %c0_i32, %c0_i32_0 : i32, i32
  }
  func.func @transform_28(%arg0: i32) -> (i32, i32) {
    %c0_i32 = arith.constant 0 : i32
    %c0_i32_0 = arith.constant 0 : i32
    %c0_i32_1 = arith.constant 0 : i32
    return %c0_i32, %c0_i32_0 : i32, i32
  }
  func.func @transform_29(%arg0: i32) -> (i32, i32, i32, i32) {
    %c0_i32 = arith.constant 0 : i32
    %c0_i32_0 = arith.constant 0 : i32
    %c0_i32_1 = arith.constant 0 : i32
    %c0_i32_2 = arith.constant 0 : i32
    return %arg0, %c0_i32, %c0_i32_0, %c0_i32_1 : i32, i32, i32, i32
  }
  func.func @transform_30(%arg0: i32) -> (i32, i32, i32, i32) {
    %c0_i32 = arith.constant 0 : i32
    %c0_i32_0 = arith.constant 0 : i32
    %c0_i32_1 = arith.constant 0 : i32
    %c0_i32_2 = arith.constant 0 : i32
    return %arg0, %c0_i32, %c0_i32_0, %c0_i32_1 : i32, i32, i32, i32
  }
}

</mosaic_0001>

<bundles_post_ra>
// kernel: _lambda_.1
= control target key start
LH: loop header
LB: loop body
LE: loop exit
PB: predicated region body
PF: predicated region fallthrough
CT: control target
= control target key end

     0   :  { %s15519_s6 = smov 1   ;;  %s15520_s10 = smov 2   ;;  %s16489_s0 = inlined_call_operand.smem [shape: u32[31], index: -1, kind: input, shape index: {}] }
   0x1   :  { %s15578_s5 = sld [smem:[%s16489_s0]]   ;;  %s15521_s14 = smov 3  }
   0x2   :  { %s15583_s9 = sld [smem:[%s16489_s0 + %s15519_s6]]   ;;  %s15522_s18 = smov 4  }
   0x3   :  { %s15588_s13 = sld [smem:[%s16489_s0 + %s15520_s10]]   ;;  %s15523_s22 = smov 5  }
   0x4   :  { %s15593_s17 = sld [smem:[%s16489_s0 + %s15521_s14]]   ;;  %s15524_s26 = smov 6  }
   0x5   :  { %s15598_s21 = sld [smem:[%s16489_s0 + %s15522_s18]]   ;;  %s15525_s30 = smov 7  }
   0x6   :  { %s15603_s25 = sld [smem:[%s16489_s0 + %s15523_s22]]   ;;  %s15526_s4 = smov 8  }
   0x7   :  { %s15608_s29 = sld [smem:[%s16489_s0 + %s15524_s26]]   ;;  %s15527_s10 = smov 9  }
   0x8   :  { %s15613_s3 = sld [smem:[%s16489_s0 + %s15525_s30]]   ;;  %s15528_s15 = smov 10  }
   0x9   :  { %s15618_s8 = sld [smem:[%s16489_s0 + %s15526_s4]]   ;;  %s15529_s20 = smov 11  }
   0xa   :  { %s15623_s14 = sld [smem:[%s16489_s0 + %s15527_s10]]   ;;  %s15530_s26 = smov 12  }
   0xb   :  { %s15628_s19 = sld [smem:[%s16489_s0 + %s15528_s15]]   ;;  %s15531_s1 = smov 13  }
   0xc   :  { %s15633_s24 = sld [smem:[%s16489_s0 + %s15529_s20]]   ;;  %s15532_s7 = smov 14  }
   0xd   :  { %16494 = sst [smem:[#allocation28_spill]] %s15608_s29  ;;  %s15533_s15 = smov 15  }
   0xe   :  { %16495 = sst [smem:[#allocation29_spill]] %s15613_s3  ;;  %s15534_s22 = smov 16  }
   0xf   :  { %16496 = sst [smem:[#allocation30_spill]] %s15618_s8  ;;  %s15535_s28 = smov 17  }
  0x10   :  { %16497 = sst [smem:[#allocation31_spill]] %s15623_s14 }
  0x11   :  { %16498 = sst [smem:[#allocation32_spill]] %s15628_s19 }
  0x12   :  { %s15638_s30 = sld [smem:[%s16489_s0 + %s15530_s26]]  }
  0x13   :  { %s15643_s6 = sld [smem:[%s16489_s0 + %s15531_s1]]  }
  0x14   :  { %s15648_s12 = sld [smem:[%s16489_s0 + %s15532_s7]]   ;;  %s15536_s7 = smov 18  }
  0x15   :  { %s15653_s20 = sld [smem:[%s16489_s0 + %s15533_s15]]   ;;  %s15537_s15 = smov 19  }
  0x16   :  { %s15658_s27 = sld [smem:[%s16489_s0 + %s15534_s22]]   ;;  %s15538_s22 = smov 20  }
  0x17   :  { %s15663_s4 = sld [smem:[%s16489_s0 + %s15535_s28]]   ;;  %s15539_s28 = smov 21  }
  0x18   :  { %16499 = sst [smem:[#allocation33_spill]] %s15638_s30 }
  0x19   :  { %s15673_s30 = sld [smem:[%s16489_s0 + %s15537_s15]]   ;;  %s15541_s15 = smov 23  }
  0x1a   :  { %16500 = sst [smem:[#allocation34_spill]] %s15648_s12 }
  0x1b   :  { %s15668_s12 = sld [smem:[%s16489_s0 + %s15536_s7]]   ;;  %s15540_s7 = smov 22  }
  0x1c   :  { %16501 = sst [smem:[#allocation35_spill]] %s15658_s27 }
  0x1d   :  { %s15678_s27 = sld [smem:[%s16489_s0 + %s15538_s22]]   ;;  %s15542_s22 = smov 24  }
  0x1e   :  { %s15683_s8 = sld [smem:[%s16489_s0 + %s15539_s28]]   ;;  %s15543_s28 = smov 25  }
  0x1f   :  { %s15693_s19 = sld [smem:[%s16489_s0 + %s15541_s15]]   ;;  %s15545_s15 = smov 27  }
  0x20   :  { %s15703_s14 = sld [smem:[%s16489_s0 + %s15543_s28]]   ;;  %s15547_s28 = smov 29  }
  0x21   :  { %16502 = sst [smem:[#allocation36_spill]] %s15668_s12 }
  0x22   :  { %s15688_s12 = sld [smem:[%s16489_s0 + %s15540_s7]]   ;;  %s15544_s7 = smov 26  }
  0x23   :  { %16503 = sst [smem:[#allocation37_spill]] %s15678_s27 }
  0x24   :  { %s15698_s27 = sld [smem:[%s16489_s0 + %s15542_s22]]   ;;  %s15546_s22 = smov 28  }
  0x25   :  { %16505 = sst [smem:[#allocation39_spill]] %s15693_s19 }
  0x26   :  { %s15713_s19 = sld [smem:[%s16489_s0 + %s15545_s15]]  }
  0x27   :  { %s15723_s29 = sld [smem:[%s16489_s0 + %s15547_s28]]  }
  0x28   :  { %16504 = sst [smem:[#allocation38_spill]] %s15688_s12 }
  0x29   :  { %s15708_s12 = sld [smem:[%s16489_s0 + %s15544_s7]]   ;;  %s15548_s7 = smov 30  }
  0x2a   :  { %16506 = sst [smem:[#allocation40_spill]] %s15698_s27 }
  0x2b   :  { %s15718_s27 = sld [smem:[%s16489_s0 + %s15546_s22]]  }
  0x2f   :  { %16507 = sst [smem:[#allocation41_spill]] %s15708_s12 }
  0x30   :  { %s15728_s12 = sld [smem:[%s16489_s0 + %s15548_s7]]  }
  0x31   :  { %67 = vsyncpa [#allocation3], 0 }
  0x32   :  { %68 = vsyncpa [#allocation5], 0 }
  0x33   :  { %69 = vsyncpa [#allocation8], 0 }
  0x34   :  { %70 = vsyncpa [#allocation11], 0 }
  0x35   :  { %71 = vsyncpa [#allocation14], 0 }
  0x36   :  { %72 = vsyncpa [#allocation17], 0 }
  0x37   :  { %73 = vsyncpa [#allocation20], 0  ;;  %s15730_s15 = smov 0  }
  0x38 LB: > { %s15549_s16 = smov [#allocation4]   ;;  %s15736_s18 = sadd.s32 4294967295, %s15517_s15   ;;  %s15517_s15 = sphi %s15730_s15, %s79_s15  }
  0x39   : > { %s778_s0 = sshll.u32 %s15549_s16, 4  ;;  %p11825_p0 = scmp.ge.s32.totalorder %s15517_s15, 1  ;;  %s779_s0 = int_to_ptr.vmem [resolvable:$true] %s778_s0 }
  0x3a   : > { %p750_p1 = scmp.lt.s32.totalorder %s15517_s15, 3  ;;  %p16492_p2 = scmp.eq.s32.totalorder %s15736_s18, 0 }
  0x3b   : > { %s15550_s26 = smov [#allocation7]   ;;  %s15551_s1 = smov [#allocation10]  }
  0x3c   : > { %p15741_p3 = pnand %p11825_p0, %p750_p1  ;;  %s810_s28 = sshll.u32 %s15550_s26, 4  ;;  %s15753_s28 = int_to_ptr.vmem [resolvable:$true] %s810_s28 }
  0x3d   : > { %s848_s2 = sshll.u32 %s15551_s1, 4  ;;  %s15182_s10 = scalar_lea.vmem %s779_s0, 24576  ;;  %s15755_s2 = int_to_ptr.vmem [resolvable:$true] %s848_s2 }
  0x3e   : > { %s16508_s22 = scalar_select %p15741_p3, 1, 0 }
  0x3f   : > { %p13332_p4 = pneg %p15741_p3  ;;  %p15183_p7 = scmp.ne.s32.totalorder %s779_s0, %s15182_s10 }
  0x40   : > { %p15190_p10 = scmp.lt.s32.totalorder %s779_s0, %s779_s0  ;;  %p15191_p11 = scmp.lt.s32.totalorder %s15182_s10, %s15182_s10 }
  0x41   : > { %p15749_p5 = pnand %p16492_p2, %p13332_p4 }
  0x42   : > { %p15192_p12 = por %p15191_p11, %p15190_p10 }
  0x43   : > { %p15759_p6 = pneg %p15749_p5 }
  0x45   : > { %p15185_p8 = pnand %p15183_p7, %p15759_p6 }
  0x47   : > { %p15186_p9 = pneg %p15185_p8 }
  0x49   : > { %p15193_p13 = pnand %p15192_p12, %p15186_p9 }
  0x4b   : > { %15196 = shalt.err (!%p15193_p13)
}
  0x4c   : > { %s15552_s11 = smov 256   ;;  %s15553_s16 = smov 16  }
  0x4d   : > { %13338 = dma.hbm_to_vmem [thread:$0]  (!%p15749_p5), %s15593_s17, 24576, %s779_s0, [#allocation5], %s15552_s11, %s15552_s11, %s15553_s16  }
  0x4e   : > { %s15208_s26 = scalar_lea.vmem %s15753_s28, 12288  ;;  %p15216_p7 = scmp.lt.s32.totalorder %s15753_s28, %s15753_s28 }
  0x4f   : > { %p15209_p0 = scmp.ne.s32.totalorder %s15753_s28, %s15208_s26  ;;  %p15217_p8 = scmp.lt.s32.totalorder %s15208_s26, %s15208_s26 }
  0x51   : > { %p15211_p1 = pnand %p15209_p0, %p15759_p6  ;;  %p15218_p9 = por %p15217_p8, %p15216_p7 }
  0x53   : > { %p15212_p4 = pneg %p15211_p1 }
  0x55   : > { %p15219_p10 = pnand %p15218_p9, %p15212_p4 }
  0x57   : > { %15222 = shalt.err (!%p15219_p10)
}
  0x58   : > { %s15554_s1 = smov 128   ;;  %s16511_s3 = sld [smem:[#allocation29_spill]] }
  0x59   : > { %s15555_s0 = smov 8   ;;  %s15234_s10 = scalar_lea.vmem %s15755_s2, 12288 }
  0x5a   : > { %p15235_p11 = scmp.ne.s32.totalorder %s15755_s2, %s15234_s10  ;;  %p15242_p0 = scmp.lt.s32.totalorder %s15755_s2, %s15755_s2 }
  0x5b   : > { %p15243_p1 = scmp.lt.s32.totalorder %s15234_s10, %s15234_s10 }
  0x5c   : > { %p15237_p12 = pnand %p15235_p11, %p15759_p6 }
  0x5d   : > { %p15244_p4 = por %p15243_p1, %p15242_p0 }
  0x5e   : > { %13344 = dma.hbm_to_vmem [thread:$0]  (!%p15749_p5), %s16511_s3, 12288, %s15753_s28, [#allocation8], %s15554_s1, %s15554_s1, %s15555_s0  }
  0x5f   : > { %p15238_p13 = pneg %p15237_p12 }
  0x61   : > { %p15245_p7 = pnand %p15244_p4, %p15238_p13 }
  0x63   : > { %15248 = shalt.err (!%p15245_p7)
}
  0x64   : > { %13350 = dma.hbm_to_vmem [thread:$0]  (!%p15749_p5), %s15643_s6, 12288, %s15755_s2, [#allocation11], %s15554_s1, %s15554_s1, %s15555_s0  }
  0x65   : > { %s15556_s28 = smov [#allocation13]   ;;  %s15557_s16 = smov [#allocation16]  }
  0x66   : > { %s880_s11 = sshll.u32 %s15556_s28, 4  ;;  %s912_s26 = sshll.u32 %s15557_s16, 4  ;;  %s881_s11 = int_to_ptr.vmem [resolvable:$true] %s880_s11  ;;  %s913_s26 = int_to_ptr.vmem [resolvable:$true] %s912_s26 }
  0x67   : > { %s15260_s3 = scalar_lea.vmem %s881_s11, 12288  ;;  %p15268_p11 = scmp.lt.s32.totalorder %s881_s11, %s881_s11 }
  0x68   : > { %p15261_p8 = scmp.ne.s32.totalorder %s881_s11, %s15260_s3  ;;  %p15269_p12 = scmp.lt.s32.totalorder %s15260_s3, %s15260_s3 }
  0x6a   : > { %p15263_p9 = pnand %p15261_p8, %p15759_p6  ;;  %p15270_p13 = por %p15269_p12, %p15268_p11 }
  0x6c   : > { %p15264_p10 = pneg %p15263_p9 }
  0x6e   : > { %p15271_p0 = pnand %p15270_p13, %p15264_p10 }
  0x70   : > { %15274 = shalt.err (!%p15271_p0)
}
  0x71   : > { %13356 = dma.hbm_to_vmem [thread:$0]  (!%p15749_p5), %s15663_s4, 12288, %s881_s11, [#allocation14], %s15554_s1, %s15554_s1, %s15555_s0  }
  0x72   : > { %s15286_s2 = scalar_lea.vmem %s913_s26, 4096  ;;  %p15294_p8 = scmp.lt.s32.totalorder %s913_s26, %s913_s26 }
  0x73   : > { %p15287_p1 = scmp.ne.s32.totalorder %s913_s26, %s15286_s2  ;;  %p15295_p9 = scmp.lt.s32.totalorder %s15286_s2, %s15286_s2 }
  0x75   : > { %p15289_p4 = pnand %p15287_p1, %p15759_p6  ;;  %p15296_p2 = por %p15295_p9, %p15294_p8 }
  0x77   : > { %p15290_p7 = pneg %p15289_p4 }
  0x79   : > { %p15297_p3 = pnand %p15296_p2, %p15290_p7 }
  0x7b   : > { %15300 = shalt.err (!%p15297_p3)
}
  0x7c   : > { %13362 = dma.hbm_to_vmem [thread:$0]  (!%p15749_p5), %s15683_s8, 4096, %s913_s26, [#allocation17], %s15554_s1, %s15554_s1, %s15555_s0  }
  0x7d   : > { %s15558_s3 = smov [#allocation2]   ;;  %s15559_s28 = smov [#allocation6]  }
  0x7e   : > { %s762_s10 = sshll.u32 %s15558_s3, 4  ;;  %s794_s11 = sshll.u32 %s15559_s28, 4  ;;  %s763_s10 = int_to_ptr.vmem [resolvable:$true] %s762_s10  ;;  %s795_s11 = int_to_ptr.vmem [resolvable:$true] %s794_s11 }
  0x7f   : > { %s15312_s16 = scalar_lea.vmem %s763_s10, 14336  ;;  %p15320_p3 = scmp.lt.s32.totalorder %s763_s10, %s763_s10 }
  0x80   : > { %p15313_p10 = scmp.ne.s32.totalorder %s763_s10, %s15312_s16  ;;  %p15321_p12 = scmp.lt.s32.totalorder %s15312_s16, %s15312_s16 }
  0x82   : > { %p15315_p11 = pnand %p15313_p10, %p15759_p6  ;;  %p15322_p13 = por %p15321_p12, %p15320_p3 }
  0x84   : > { %p15316_p2 = pneg %p15315_p11 }
  0x86   : > { %p15323_p0 = pnand %p15322_p13, %p15316_p2 }
  0x88   : > { %15326 = shalt.err (!%p15323_p0)
}
  0x89   : > { %13335 = dma.hbm_to_vmem [thread:$0]  (!%p15749_p5), %s15583_s9, 14336, %s763_s10, [#allocation3], %s15554_s1, %s15554_s1, %s15555_s0  }
  0x8a   : > { %s15338_s26 = scalar_lea.vmem %s795_s11, 24576  ;;  %p15346_p8 = scmp.lt.s32.totalorder %s795_s11, %s795_s11 }
  0x8b   : > { %p15339_p1 = scmp.ne.s32.totalorder %s795_s11, %s15338_s26  ;;  %p15347_p9 = scmp.lt.s32.totalorder %s15338_s26, %s15338_s26 }
  0x8d   : > { %p15341_p4 = pnand %p15339_p1, %p15759_p6  ;;  %p15348_p10 = por %p15347_p9, %p15346_p8 }
  0x8f   : > { %p15342_p7 = pneg %p15341_p4 }
  0x91   : > { %p15349_p11 = pnand %p15348_p10, %p15342_p7 }
  0x93   : > { %15352 = shalt.err (!%p15349_p11)
}
  0x94   : > { %13341 = dma.hbm_to_vmem [thread:$0]  (!%p15749_p5), %s15603_s25, 24576, %s795_s11, [#allocation5], %s15554_s1, %s15554_s1, %s15555_s0  }
  0x95   : > { %s15560_s2 = smov [#allocation9]   ;;  %s15561_s10 = smov [#allocation12]  }
  0x96   : > { %s832_s3 = sshll.u32 %s15560_s2, 4  ;;  %s864_s28 = sshll.u32 %s15561_s10, 4  ;;  %s833_s3 = int_to_ptr.vmem [resolvable:$true] %s832_s3  ;;  %s865_s28 = int_to_ptr.vmem [resolvable:$true] %s864_s28 }
  0x97   : > { %s15364_s16 = scalar_lea.vmem %s833_s3, 12288  ;;  %p15372_p13 = scmp.lt.s32.totalorder %s833_s3, %s833_s3 }
  0x98   : > { %p15365_p2 = scmp.ne.s32.totalorder %s833_s3, %s15364_s16  ;;  %p15373_p0 = scmp.lt.s32.totalorder %s15364_s16, %s15364_s16 }
  0x9a   : > { %p15367_p3 = pnand %p15365_p2, %p15759_p6  ;;  %p15374_p1 = por %p15373_p0, %p15372_p13 }
  0x9c   : > { %p15368_p12 = pneg %p15367_p3 }
  0x9e   : > { %p15375_p4 = pnand %p15374_p1, %p15368_p12 }
  0xa0   : > { %15378 = shalt.err (!%p15375_p4)
}
  0xa1   : > { %13347 = dma.hbm_to_vmem [thread:$0]  (!%p15749_p5), %s15633_s24, 12288, %s833_s3, [#allocation8], %s15554_s1, %s15554_s1, %s15555_s0  }
  0xa2   : > { %s15390_s11 = scalar_lea.vmem %s865_s28, 4096  ;;  %p15398_p10 = scmp.lt.s32.totalorder %s865_s28, %s865_s28 }
  0xa3   : > { %p15391_p7 = scmp.ne.s32.totalorder %s865_s28, %s15390_s11  ;;  %p15399_p11 = scmp.lt.s32.totalorder %s15390_s11, %s15390_s11 }
  0xa5   : > { %p15393_p8 = pnand %p15391_p7, %p15759_p6  ;;  %p15400_p2 = por %p15399_p11, %p15398_p10 }
  0xa7   : > { %p15394_p9 = pneg %p15393_p8 }
  0xa9   : > { %p15401_p3 = pnand %p15400_p2, %p15394_p9 }
  0xab   : > { %15404 = shalt.err (!%p15401_p3)
}
  0xac   : > { %13353 = dma.hbm_to_vmem [thread:$0]  (!%p15749_p5), %s15653_s20, 4096, %s865_s28, [#allocation11], %s15554_s1, %s15554_s1, %s15555_s0  }
  0xad   : > { %s15562_s26 = smov [#allocation15]   ;;  %s15563_s3 = smov [#allocation18]  }
  0xae   : > { %s896_s2 = sshll.u32 %s15562_s26, 4  ;;  %s934_s10 = sshll.u32 %s15563_s3, 4  ;;  %s897_s2 = int_to_ptr.vmem [resolvable:$true] %s896_s2  ;;  %s935_s10 = int_to_ptr.vmem [resolvable:$true] %s934_s10 }
  0xaf   : > { %s15416_s16 = scalar_lea.vmem %s897_s2, 12288  ;;  %p15424_p1 = scmp.lt.s32.totalorder %s897_s2, %s897_s2 }
  0xb0   : > { %p15417_p12 = scmp.ne.s32.totalorder %s897_s2, %s15416_s16  ;;  %p15425_p4 = scmp.lt.s32.totalorder %s15416_s16, %s15416_s16 }
  0xb2   : > { %p15419_p13 = pnand %p15417_p12, %p15759_p6  ;;  %p15426_p7 = por %p15425_p4, %p15424_p1 }
  0xb4   : > { %p15420_p0 = pneg %p15419_p13 }
  0xb6   : > { %p15427_p8 = pnand %p15426_p7, %p15420_p0 }
  0xb8   : > { %15430 = shalt.err (!%p15427_p8)
}
  0xb9   : > { %13359 = dma.hbm_to_vmem [thread:$0]  (!%p15749_p5), %s15673_s30, 12288, %s897_s2, [#allocation14], %s15554_s1, %s15554_s1, %s15555_s0  }
  0xba   : > { %s15442_s28 = scalar_lea.vmem %s935_s10, 1024  ;;  %p15450_p2 = scmp.lt.s32.totalorder %s935_s10, %s935_s10 }
  0xbb   : > { %p15443_p9 = scmp.ne.s32.totalorder %s935_s10, %s15442_s28  ;;  %p15451_p3 = scmp.lt.s32.totalorder %s15442_s28, %s15442_s28 }
  0xbd   : > { %p15445_p10 = pnand %p15443_p9, %p15759_p6  ;;  %p15452_p12 = por %p15451_p3, %p15450_p2 }
  0xbf   : > { %p15446_p11 = pneg %p15445_p10 }
  0xc1   : > { %p15453_p13 = pnand %p15452_p12, %p15446_p11 }
  0xc3   : > { %15456 = shalt.err (!%p15453_p13)
}
  0xc4   : > { %s15564_s11 = smov 64   ;;  %s15565_s26 = smov 4  }
  0xc5   : > { %13365 = dma.hbm_to_vmem [thread:$0]  (!%p15749_p5), %s15703_s14, 1024, %s935_s10, [#allocation17], %s15564_s11, %s15564_s11, %s15565_s26  }
  0xc6   : > { %s15566_s3 = smov [#allocation19]  }
  0xc7   : > { %s950_s16 = sshll.u32 %s15566_s3, 4  ;;  %s951_s16 = int_to_ptr.vmem [resolvable:$true] %s950_s16 }
  0xc8   : > { %s15468_s1 = scalar_lea.vmem %s951_s16, 1024  ;;  %p15476_p7 = scmp.lt.s32.totalorder %s951_s16, %s951_s16 }
  0xc9   : > { %p15469_p0 = scmp.ne.s32.totalorder %s951_s16, %s15468_s1  ;;  %p15477_p8 = scmp.lt.s32.totalorder %s15468_s1, %s15468_s1 }
  0xcb   : > { %p15471_p1 = pnand %p15469_p0, %p15759_p6  ;;  %p15478_p9 = por %p15477_p8, %p15476_p7 }
  0xcd   : > { %p15472_p4 = pneg %p15471_p1 }
  0xcf   : > { %p15479_p10 = pnand %p15478_p9, %p15472_p4 }
  0xd1   : > { %15482 = shalt.err (!%p15479_p10)
}
  0xd2   : > { %13368 = dma.hbm_to_vmem [thread:$0]  (!%p15749_p5), %s15713_s19, 1024, %s951_s16, [#allocation20], %s15564_s11, %s15564_s11, %s15565_s26  }
  0xd3   : > { %p16512_p11 = scmp.ne.s32.totalorder %s16508_s22, 0 }
  0xd4   : > { %p16513_p2 = scmp.eq.s32.totalorder (!%p16512_p11), %s15736_s18, 0 }
  0xd5   : > { %977 = sbr.rel (%p16512_p11) target bundleno = 6293 (0x1895), region = 136 }
  0xda   : > { %15488 = dma.done.wait (%p16513_p2), [#allocation3], 14336   ;;  %p16514_p3 = pmov %p16513_p2 }
  0xdb   : > { %p16515_p6 = pmov %p16513_p2 }
  0xdc   : > { %15490 = vsyncadd (%p16514_p3), [#allocation3], 4294952960 }
  0xdd   : > { %15492 = dma.done.wait (%p16515_p6), [#allocation5], 49152   ;;  %p16516_p12 = pmov %p16513_p2 }
  0xde   : > { %p16517_p13 = pmov %p16513_p2 }
  0xdf   : > { %15494 = vsyncadd (%p16516_p12), [#allocation5], 4294918144 }
  0xe0   : > { %15496 = dma.done.wait (%p16517_p13), [#allocation8], 24576   ;;  %p16518_p5 = pmov %p16513_p2 }
  0xe1   : > { %p16519_p0 = pmov %p16513_p2 }
  0xe2   : > { %15498 = vsyncadd (%p16518_p5), [#allocation8], 4294942720 }
  0xe3   : > { %15500 = dma.done.wait (%p16519_p0), [#allocation11], 16384   ;;  %p16520_p1 = pmov %p16519_p0 }
  0xe4   : > { %p16521_p4 = pmov %p16519_p0 }
  0xe5   : > { %15502 = vsyncadd (%p16520_p1), [#allocation11], 4294950912 }
  0xe6   : > { %15504 = dma.done.wait (%p16521_p4), [#allocation14], 24576   ;;  %p16522_p7 = pmov %p16519_p0 }
  0xe7   : > { %p16523_p8 = pmov %p16519_p0 }
  0xe8   : > { %15506 = vsyncadd (%p16522_p7), [#allocation14], 4294942720 }
  0xe9   : > { %15508 = dma.done.wait (%p16523_p8), [#allocation17], 5120   ;;  %p16524_p9 = pmov %p16519_p0 }
  0xea   : > { %p16525_p10 = pmov %p16519_p0 }
  0xeb   : > { %15510 = vsyncadd (%p16524_p9), [#allocation17], 4294962176 }
  0xec   : > { %15512 = dma.done.wait (%p16525_p10), [#allocation20], 1024   ;;  %p16526_p11 = pmov %p16519_p0 }
  0xed   : > { %p1104_p2 = scmp.lt.s32.totalorder %s15736_s18, 1  ;;  %v1122_v0 = vlaneseq  ;;  %v15567_v1 = vmov 0.0   ;;  %vm15568_vm0 = vmmov 0   ;;  %vm1140_vm4 = vcmask 130048   ;;  %v13453_v12 = vld [vmem:[#allocation2 + $0xf0] ss:$8 sps:$4 sm:$0xff]  }
  0xee   : > { %15514 = vsyncadd (%p16526_p11), [#allocation20], 4294966272  ;;  %13128 = vmatprep.subr.bf16.mxu0 %v15567_v1  ;;  %13134 = vmatprep.subr.bf16.mxu1 %v15567_v1  ;;  %v13455_v15 = vld [vmem:[#allocation2 + $0xf4] ss:$8 sps:$4 sm:$0xff]   ;;  %v13456_v18 = vld [vmem:[#allocation2 + $0x70] ss:$8 sps:$4 sm:$0xff]  }
  0xef   : > { %s16541_s18 = smov (!%p1104_p2, %s15736_s18), 1  ;;  %13130 = vmatprep.mubr.msk.bf16.mxu0 %vm15568_vm0, %v15567_v1  ;;  %13136 = vmatprep.mubr.msk.bf16.mxu1 %vm15568_vm0, %v15567_v1  ;;  %v15900_v2 = vshrl.u32 %v1122_v0, 7  ;;  %v15902_v3 = vand.u32 127, %v1122_v0  ;;  %v13458_v19 = vld [vmem:[#allocation2 + $0x74] ss:$8 sps:$4 sm:$0xff]   ;;  %v15569_v48 = vmov 0  }
  0xf0   : > { %s13059_s22 = sshll.u32 %s16541_s18, 3  ;;  %v13461_v20 = vld [vmem:[#allocation2 + $0xe4] ss:$8 sps:$4 sm:$0xff]   ;;  %v13459_v21 = vld [vmem:[#allocation2 + $0xe0] ss:$8 sps:$4 sm:$0xff]   ;;  %s16527_s7 = sld [smem:[#allocation28_spill]] }
  0xf1   : > { %v15906_v4 = vadd.s32 8, %v15900_v2  ;;  %v1127_v5 = vadd.s32 4294967293, %v15900_v2  ;;  %v1202_v6 = vadd.s32 4294967294, %v15900_v2  ;;  %s15911_s23 = scalar_lea.vmem %s15578_s5, %s13059_s22  ;;  %v13464_v22 = vld [vmem:[#allocation2 + $0x64] ss:$8 sps:$4 sm:$0xff]   ;;  %v1517_v52 = vadd.s32 4294967295, %v15900_v2 }
  0xf2   : > { %v13452_v9 = vld [vmem:[%s15911_s23] sm:$0xff]   ;;  %v13467_v24 = vld [vmem:[#allocation2 + $0xd4] ss:$8 sps:$4 sm:$0xff]   ;;  %v13465_v26 = vld [vmem:[#allocation2 + $0xd0] ss:$8 sps:$4 sm:$0xff]   ;;  %s16528_s0 = sld [smem:[#allocation31_spill]] }
  0xf3   : > { %v1128_v7 = vadd.s32 4294967293, %v15906_v4  ;;  %vm1129_vm1 = vcmp.eq.s32.totalorder %v15902_v3, %v1127_v5  ;;  %v1203_v8 = vadd.s32 4294967294, %v15906_v4  ;;  %vm1204_vm2 = vcmp.eq.s32.totalorder %v15902_v3, %v1202_v6  ;;  %13129 = vmatpush3.bf16.msra.mxu0 %v13452_v9  ;;  %13135 = vmatpush3.bf16.msra.mxu1 %v13452_v9  ;;  %v13462_v23 = vld [vmem:[#allocation2 + $0x60] ss:$8 sps:$4 sm:$0xff]   ;;  %v13470_v25 = vld [vmem:[#allocation2 + $0x54] ss:$8 sps:$4 sm:$0xff]  }
  0xf4   : > { %v1131_v10 = vsel %vm1129_vm1, 1.0, %v15567_v1  ;;  %v1206_v11 = vsel %vm1204_vm2, 1.0, %v15567_v1  ;;  %1351 = vmatprep.subr.bf16.mxu0 %v13455_v15  ;;  %1474 = vmatprep.subr.bf16.mxu1 %v13458_v19  ;;  %v13468_v27 = vld [vmem:[#allocation2 + $0x50] ss:$8 sps:$4 sm:$0xff]   ;;  %v13473_v28 = vld [vmem:[#allocation2 + $0xc4] ss:$8 sps:$4 sm:$0xff]   ;;  %vm1519_vm6 = vcmp.eq.s32.totalorder %v15902_v3, %v1517_v52 }
  0xf5   : > { %vm1130_vm3 = vcmp.eq.s32.totalorder %v15902_v3, %v1128_v7  ;;  %vm1205_vm5 = vcmp.eq.s32.totalorder %v15902_v3, %v1203_v8  ;;  %v13476_v29 = vld [vmem:[#allocation2 + $0x44] ss:$8 sps:$4 sm:$0xff]   ;;  %v13471_v30 = vld [vmem:[#allocation2 + $0xc0] ss:$8 sps:$4 sm:$0xff]   ;;  %v13479_v32 = vld [vmem:[#allocation2 + $0xb4] ss:$8 sps:$4 sm:$0xff]  }
  0xf6   : > { %v1132_v13 = vsel %vm1130_vm3, 1.0, %v15567_v1  ;;  %v1207_v14 = vsel %vm1205_vm5, 1.0, %v15567_v1  ;;  %v13474_v31 = vld [vmem:[#allocation2 + $0x40] ss:$8 sps:$4 sm:$0xff]   ;;  %v13482_v33 = vld [vmem:[#allocation2 + $0x34] ss:$8 sps:$4 sm:$0xff]  }
  0xf7   : > { %v1133_v16 = vpack.c.bf16 %v1132_v13, %v1131_v10  ;;  %v1208_v17 = vpack.c.bf16 %v1207_v14, %v1206_v11  ;;  %v13477_v34 = vld [vmem:[#allocation2 + $0xb0] ss:$8 sps:$4 sm:$0xff]   ;;  %v13485_v36 = vld [vmem:[#allocation2 + $0xa4] ss:$8 sps:$4 sm:$0xff]   ;;  %v13483_v38 = vld [vmem:[#allocation2 + $0xa0] ss:$8 sps:$4 sm:$0xff]  }
  0xf8   : > { %v13480_v35 = vld [vmem:[#allocation2 + $0x30] ss:$8 sps:$4 sm:$0xff]   ;;  %v13488_v37 = vld [vmem:[#allocation2 + $0x24] ss:$8 sps:$4 sm:$0xff]   ;;  %v13486_v39 = vld [vmem:[#allocation2 + $0x20] ss:$8 sps:$4 sm:$0xff]  }
  0xf9   : > { %13131 = vmatmul.mubr.msk.bf16.vlgmr.msra.gmra.mxu0 %vm1140_vm4, %v1133_v16  ;;  %13137 = vmatmul.mubr.msk.bf16.vlgmr.msra.gmra.mxu1 %vm1140_vm4, %v1208_v17  ;;  %v13491_v40 = vld [vmem:[#allocation2 + $0x94] ss:$8 sps:$4 sm:$0xff]   ;;  %v13489_v42 = vld [vmem:[#allocation2 + $0x90] ss:$8 sps:$4 sm:$0xff]   ;;  %v13497_v44 = vld [vmem:[#allocation2 + $0x84] ss:$8 sps:$4 sm:$0xff]  }
  0xfa   : > { %1352 = vmatpush1.bf16.msra.mxu0 %v13453_v12  ;;  %1475 = vmatpush1.bf16.msra.mxu1 %v13456_v18  ;;  %v13494_v41 = vld [vmem:[#allocation2 + $0x14] ss:$8 sps:$4 sm:$0xff]   ;;  %v13492_v43 = vld [vmem:[#allocation2 + $0x10] ss:$8 sps:$4 sm:$0xff]   ;;  %v13500_v45 = vld [vmem:[#allocation2 + $0x4] ss:$8 sps:$4 sm:$0xff]  }
  0xfb   : > { %1353 = vmatprep.subr.bf16.mxu0 %v13461_v20  ;;  %1476 = vmatprep.subr.bf16.mxu1 %v13464_v22  ;;  %v13495_v46 = vld [vmem:[#allocation2 + $0x80] ss:$8 sps:$4 sm:$0xff]   ;;  %v13527_v49 = vld [vmem:[#allocation2 + $0x174] ss:$8 sps:$4 sm:$0xff]   ;;  %v1518_v53 = vadd.s32 4294967295, %v15906_v4  ;;  %v15937_v7 = vsel %vm1519_vm6, 1.0, %v15567_v1 }
  0xfc   : > { %v13498_v47 = vld [vmem:[#allocation2] ss:$8 sps:$4 sm:$0xff]   ;;  %1383 = vmatprep.mubr.bf16.mxu0 %v15569_v48  ;;  %1506 = vmatprep.mubr.bf16.mxu1 %v15569_v48  ;;  %v13503_v56 = vld [vmem:[#allocation2 + $0x1f4] ss:$8 sps:$4 sm:$0xff]   ;;  %v13525_v57 = vld [vmem:[#allocation2 + $0x170] ss:$8 sps:$4 sm:$0xff]  }
  0xfd   : > { %v13530_v60 = vld [vmem:[#allocation2 + $0x164] ss:$8 sps:$4 sm:$0xff]   ;;  %vm1520_vm7 = vcmp.eq.s32.totalorder %v15902_v3, %v1518_v53  ;;  %v13528_v5 = vld [vmem:[#allocation2 + $0x160] ss:$8 sps:$4 sm:$0xff]   ;;  %v13533_v9 = vld [vmem:[#allocation2 + $0x154] ss:$8 sps:$4 sm:$0xff]  }
  0xfe   : > { %1354 = vmatpush1.bf16.msra.mxu0 %v13459_v21  ;;  %1477 = vmatpush1.bf16.msra.mxu1 %v13462_v23  ;;  %v15169_v6 = vld [vmem:[%s15911_s23] sm:$0xff]   ;;  %v1522_v8 = vsel %vm1520_vm7, 1.0, %v15567_v1  ;;  %v13501_v10 = vld [vmem:[#allocation2 + $0x1f0] ss:$8 sps:$4 sm:$0xff]   ;;  %v13509_v16 = vld [vmem:[#allocation2 + $0x1d4] ss:$8 sps:$4 sm:$0xff]  }
  0xff   : > { %1355 = vmatprep.subr.bf16.mxu0 %v13467_v24  ;;  %1478 = vmatprep.subr.bf16.mxu1 %v13470_v25  ;;  %v15942_v11 = vpack.c.bf16 %v1522_v8, %v15937_v7  ;;  %v13506_v12 = vld [vmem:[#allocation2 + $0x1e4] ss:$8 sps:$4 sm:$0xff]   ;;  %v13531_v13 = vld [vmem:[#allocation2 + $0x150] ss:$8 sps:$4 sm:$0xff]   ;;  %v13504_v15 = vld [vmem:[#allocation2 + $0x1e0] ss:$8 sps:$4 sm:$0xff]  }
 0x100   : > { %v13536_v14 = vld [vmem:[#allocation2 + $0x144] ss:$8 sps:$4 sm:$0xff]   ;;  %v13534_v17 = vld [vmem:[#allocation2 + $0x140] ss:$8 sps:$4 sm:$0xff]   ;;  %v13539_v18 = vld [vmem:[#allocation2 + $0x134] ss:$8 sps:$4 sm:$0xff]  }
 0x101   : > { %v13507_v19 = vld [vmem:[#allocation2 + $0x1d0] ss:$8 sps:$4 sm:$0xff]   ;;  %v13512_v20 = vld [vmem:[#allocation2 + $0x1c4] ss:$8 sps:$4 sm:$0xff]   ;;  %v13510_v22 = vld [vmem:[#allocation2 + $0x1c0] ss:$8 sps:$4 sm:$0xff]  }
 0x102   : > { %1356 = vmatpush1.bf16.msra.mxu0 %v13465_v26  ;;  %1479 = vmatpush1.bf16.msra.mxu1 %v13468_v27  ;;  %v13537_v21 = vld [vmem:[#allocation2 + $0x130] ss:$8 sps:$4 sm:$0xff]   ;;  %v13515_v23 = vld [vmem:[#allocation2 + $0x1b4] ss:$8 sps:$4 sm:$0xff]   ;;  %v13518_v25 = vld [vmem:[#allocation2 + $0x1a4] ss:$8 sps:$4 sm:$0xff]  }
 0x103   : > { %1357 = vmatprep.subr.bf16.mxu0 %v13473_v28  ;;  %1480 = vmatprep.subr.bf16.mxu1 %v13476_v29  ;;  %v13513_v24 = vld [vmem:[#allocation2 + $0x1b0] ss:$8 sps:$4 sm:$0xff]   ;;  %v13516_v26 = vld [vmem:[#allocation2 + $0x1a0] ss:$8 sps:$4 sm:$0xff]   ;;  %v13521_v27 = vld [vmem:[#allocation2 + $0x194] ss:$8 sps:$4 sm:$0xff]  }
 0x104   : > { %v13519_v28 = vld [vmem:[#allocation2 + $0x190] ss:$8 sps:$4 sm:$0xff]   ;;  %v13524_v29 = vld [vmem:[#allocation2 + $0x184] ss:$8 sps:$4 sm:$0xff]   ;;  %vm5723_vm2 = vcmask 1043456   ;;  %vm5719_vm3 = vcmask 64512  }
 0x105   : > { %v13561_v52 = vld [vmem:[#allocation2 + $0x230] ss:$8 sps:$4 sm:$0xff]   ;;  %v13566_v53 = vld [vmem:[#allocation2 + $0x224] ss:$8 sps:$4 sm:$0xff]   ;;  %s16529_s2 = sld [smem:[#allocation32_spill]]  ;;  %vm7883_vm5 = vcmask 31744  }
 0x106   : > { %1358 = vmatpush1.bf16.msra.mxu0 %v13471_v30  ;;  %1481 = vmatpush1.bf16.msra.mxu1 %v13474_v31  ;;  %v13522_v30 = vld [vmem:[#allocation2 + $0x180] ss:$8 sps:$4 sm:$0xff]   ;;  %v1857_v31 = vadd.s32 1, %v15900_v2  ;;  %s16530_s10 = sld [smem:[#allocation30_spill]]  ;;  %vm9814_vm6 = vcmask 1040384   ;;  %vm9811_vm7 = vcmask 15360  }
 0x107   : > { %1359 = vmatprep.subr.bf16.mxu0 %v13479_v32  ;;  %1482 = vmatprep.subr.bf16.mxu1 %v13482_v33  ;;  %v1858_v32 = vadd.s32 1, %v15906_v4  ;;  %s16531_s28 = sld [smem:[#allocation33_spill]] }
 0x108   : > { %vm1859_vm8 = vcmp.eq.s32.totalorder %v15902_v3, %v1857_v31  ;;  %v13585_v31 = vld [vmem:[#allocation2 + $0x2b0] ss:$8 sps:$4 sm:$0xff]   ;;  %s16532_s11 = sld [smem:[#allocation35_spill]] }
 0x109   : > { %vm1860_vm9 = vcmp.eq.s32.totalorder %v15902_v3, %v1858_v32  ;;  %v15955_v33 = vsel %vm1859_vm8, 1.0, %v15567_v1  ;;  %s16533_s26 = sld [smem:[#allocation34_spill]] }
 0x10a   : > { %1360 = vmatpush1.bf16.msra.mxu0 %v13477_v34  ;;  %1483 = vmatpush1.bf16.msra.mxu1 %v13480_v35  ;;  %v1862_v34 = vsel %vm1860_vm9, 1.0, %v15567_v1  ;;  %s16534_s3 = sld [smem:[#allocation36_spill]] }
 0x10b   : > { %1361 = vmatprep.subr.bf16.mxu0 %v13485_v36  ;;  %1484 = vmatprep.subr.bf16.mxu1 %v13488_v37  ;;  %v15959_v35 = vpack.c.bf16 %v1862_v34, %v15955_v33  ;;  %v13542_v36 = vld [vmem:[#allocation2 + $0x124] ss:$8 sps:$4 sm:$0xff]   ;;  %v13540_v37 = vld [vmem:[#allocation2 + $0x120] ss:$8 sps:$4 sm:$0xff]   ;;  %s16535_s16 = sld [smem:[#allocation39_spill]] }
 0x10c   : > { %s16536_s1 = sld [smem:[#allocation38_spill]] }
 0x10d   : > { %s16537_s22 = sld [smem:[#allocation37_spill]] }
 0x10e   : > { %1362 = vmatpush1.bf16.msra.mxu0 %v13483_v38  ;;  %1485 = vmatpush1.bf16.msra.mxu1 %v13486_v39  ;;  %v13545_v38 = vld [vmem:[#allocation2 + $0x114] ss:$8 sps:$4 sm:$0xff]   ;;  %v13543_v39 = vld [vmem:[#allocation2 + $0x110] ss:$8 sps:$4 sm:$0xff]  }
 0x10f   : > { %1363 = vmatprep.subr.bf16.mxu0 %v13491_v40  ;;  %1486 = vmatprep.subr.bf16.mxu1 %v13494_v41  ;;  %v13546_v40 = vld [vmem:[#allocation2 + $0x100] ss:$8 sps:$4 sm:$0xff]   ;;  %v13548_v41 = vld [vmem:[#allocation2 + $0x104] ss:$8 sps:$4 sm:$0xff]  }
 0x112   : > { %1364 = vmatpush1.bf16.msra.mxu0 %v13489_v42  ;;  %1487 = vmatpush1.bf16.msra.mxu1 %v13492_v43  ;;  %v13549_v42 = vld [vmem:[#allocation2 + $0x270] ss:$8 sps:$4 sm:$0xff]   ;;  %v13551_v43 = vld [vmem:[#allocation2 + $0x274] ss:$8 sps:$4 sm:$0xff]  }
 0x113   : > { %1365 = vmatprep.subr.bf16.mxu0 %v13497_v44  ;;  %1488 = vmatprep.subr.bf16.mxu1 %v13500_v45  ;;  %v13552_v44 = vld [vmem:[#allocation2 + $0x260] ss:$8 sps:$4 sm:$0xff]   ;;  %v13554_v45 = vld [vmem:[#allocation2 + $0x264] ss:$8 sps:$4 sm:$0xff]  }
 0x116   : > { %1366 = vmatpush1.bf16.msra.mxu0 %v13495_v46  ;;  %1489 = vmatpush1.bf16.msra.mxu1 %v13498_v47  ;;  %v13557_v46 = vld [vmem:[#allocation2 + $0x254] ss:$8 sps:$4 sm:$0xff]   ;;  %v13555_v47 = vld [vmem:[#allocation2 + $0x250] ss:$8 sps:$4 sm:$0xff]  }
 0x117   : > { %13140 = vmatprep.subr.bf16.mxu0 %v15567_v1  ;;  %1666 = vmatprep.subr.bf16.mxu1 %v13527_v49  ;;  %v13560_v49 = vld [vmem:[#allocation2 + $0x244] ss:$8 sps:$4 sm:$0xff]  }
 0x1b9   : > { %v1178_v50 = vpop.f32.mrf.mxu0  ;;  %v1246_v51 = vpop.f32.mrf.mxu1 }
 0x1bb   : > { %v13132_v54 = vpop.f32.mrf.mxu0  ;;  %v13138_v55 = vpop.f32.mrf.mxu1 }
 0x1bc   : > { %v13564_v54 = vld [vmem:[#allocation2 + $0x220] ss:$8 sps:$4 sm:$0xff]   ;;  %v13569_v55 = vld [vmem:[#allocation2 + $0x214] ss:$8 sps:$4 sm:$0xff]  }
 0x1bd   : > { %v1181_v58 = vpop.f32.mrf.mxu0  ;;  %v1249_v59 = vpop.f32.mrf.mxu1 }
 0x1be   : > { %v1185_v61 = vpack.c.bf16 %v1181_v58, %v1178_v50  ;;  %v1253_v62 = vpack.c.bf16 %v1249_v59, %v1246_v51  ;;  %v13558_v50 = vld [vmem:[#allocation2 + $0x240] ss:$8 sps:$4 sm:$0xff]   ;;  %v13563_v51 = vld [vmem:[#allocation2 + $0x234] ss:$8 sps:$4 sm:$0xff]   ;;  %v2053_v59 = vadd.s32 2, %v15900_v2 }
 0x1bf   : > { %v13139_v63 = vpop.f32.mrf.mxu1  ;;  %v13133_v0 = vpop.f32.mrf.mxu0  ;;  %v13570_v58 = vld [vmem:[#allocation2 + $0x200] ss:$8 sps:$4 sm:$0xff]  }
 0x1c0   : > { %1384 = vmatmul.mubr.bf16.vlgmr.msra.gmra.mxu0 %v1253_v62  ;;  %1507 = vmatmul.mubr.bf16.vlgmr.msra.gmra.mxu1 %v1185_v61  ;;  %vm2055_vm10 = vcmp.eq.s32.totalorder %v15902_v3, %v2053_v59  ;;  %v13603_v59 = vld [vmem:[#allocation2 + $0x350] ss:$8 sps:$4 sm:$0xff]  }
 0x1c1   : > { %13141 = vmatpush3.bf16.msra.mxu0 %v15169_v6  ;;  %13142 = vmatprep.mubr.msk.bf16.mxu0 %vm15568_vm0, %v15567_v1 }
 0x1c2   : > { %1810 = vmatprep.subr.bf16.mxu0 %v13503_v56  ;;  %1667 = vmatpush1.bf16.msra.mxu1 %v13525_v57  ;;  %v13567_v56 = vld [vmem:[#allocation2 + $0x210] ss:$8 sps:$4 sm:$0xff]   ;;  %v13572_v57 = vld [vmem:[#allocation2 + $0x204] ss:$8 sps:$4 sm:$0xff]  }
 0x1c3   : > { %1668 = vmatprep.subr.bf16.mxu1 %v13530_v60  ;;  %1698 = vmatprep.mubr.bf16.mxu1 %v15569_v48  ;;  %v2054_v60 = vadd.s32 2, %v15906_v4 }
 0x1c5   : > { %vm2056_vm11 = vcmp.eq.s32.totalorder %v15902_v3, %v2054_v60  ;;  %v13608_v60 = vld [vmem:[#allocation2 + $0x344] ss:$8 sps:$4 sm:$0xff]  }
 0x1c6   : > { %1669 = vmatpush1.bf16.msra.mxu1 %v13528_v5 }
 0x1c7   : > { %1670 = vmatprep.subr.bf16.mxu1 %v13533_v9  ;;  %v2058_v9 = vsel %vm2056_vm11, 1.0, %v15567_v1 }
 0x1c8   : > { %13143 = vmatmul.mubr.msk.bf16.vlgmr.msra.gmra.mxu0 %vm1140_vm4, %v15942_v11 }
 0x1c9   : > { %1811 = vmatpush1.bf16.msra.mxu0 %v13501_v10  ;;  %1842 = vmatprep.mubr.bf16.mxu0 %v15569_v48 }
 0x1ca   : > { %1812 = vmatprep.subr.bf16.mxu0 %v13506_v12  ;;  %1671 = vmatpush1.bf16.msra.mxu1 %v13531_v13 }
 0x1cb   : > { %1672 = vmatprep.subr.bf16.mxu1 %v13536_v14 }
 0x1cd   : > { %1813 = vmatpush1.bf16.msra.mxu0 %v13504_v15 }
 0x1ce   : > { %1814 = vmatprep.subr.bf16.mxu0 %v13509_v16  ;;  %1673 = vmatpush1.bf16.msra.mxu1 %v13534_v17  ;;  %v13575_v17 = vld [vmem:[#allocation2 + $0x2f4] ss:$8 sps:$4 sm:$0xff]  }
 0x1cf   : > { %1674 = vmatprep.subr.bf16.mxu1 %v13539_v18 }
 0x1d1   : > { %1815 = vmatpush1.bf16.msra.mxu0 %v13507_v19 }
 0x1d2   : > { %1816 = vmatprep.subr.bf16.mxu0 %v13512_v20  ;;  %1675 = vmatpush1.bf16.msra.mxu1 %v13537_v21  ;;  %v15170_v21 = vld [vmem:[%s15911_s23] sm:$0xff]   ;;  %s16538_s23 = sld [smem:[#allocation40_spill]] }
 0x1d3   : > { %1676 = vmatprep.subr.bf16.mxu1 %v13542_v36 }
 0x1d5   : > { %1817 = vmatpush1.bf16.msra.mxu0 %v13510_v22  ;;  %v13573_v22 = vld [vmem:[#allocation2 + $0x2f0] ss:$8 sps:$4 sm:$0xff]  }
 0x1d6   : > { %1818 = vmatprep.subr.bf16.mxu0 %v13515_v23  ;;  %1677 = vmatpush1.bf16.msra.mxu1 %v13540_v37 }
 0x1d7   : > { %1678 = vmatprep.subr.bf16.mxu1 %v13545_v38 }
 0x1d9   : > { %1819 = vmatpush1.bf16.msra.mxu0 %v13513_v24  ;;  %v13578_v24 = vld [vmem:[#allocation2 + $0x2e4] ss:$8 sps:$4 sm:$0xff]  }
 0x1da   : > { %1820 = vmatprep.subr.bf16.mxu0 %v13518_v25  ;;  %1679 = vmatpush1.bf16.msra.mxu1 %v13543_v39  ;;  %v13576_v25 = vld [vmem:[#allocation2 + $0x2e0] ss:$8 sps:$4 sm:$0xff]   ;;  %v2249_v39 = vadd.s32 3, %v15900_v2 }
 0x1db   : > { %1680 = vmatprep.subr.bf16.mxu1 %v13548_v41 }
 0x1dc   : > { %vm2251_vm12 = vcmp.eq.s32.totalorder %v15902_v3, %v2249_v39 }
 0x1dd   : > { %1821 = vmatpush1.bf16.msra.mxu0 %v13516_v26  ;;  %v13581_v26 = vld [vmem:[#allocation2 + $0x2d4] ss:$8 sps:$4 sm:$0xff]  }
 0x1de   : > { %1822 = vmatprep.subr.bf16.mxu0 %v13521_v27  ;;  %1681 = vmatpush1.bf16.msra.mxu1 %v13546_v40  ;;  %v13579_v27 = vld [vmem:[#allocation2 + $0x2d0] ss:$8 sps:$4 sm:$0xff]   ;;  %v2250_v40 = vadd.s32 3, %v15906_v4  ;;  %v13590_v4 = vld [vmem:[#allocation2 + $0x2a4] ss:$8 sps:$4 sm:$0xff]  }
 0x1df   : > { %13152 = vmatprep.subr.bf16.mxu1 %v15567_v1 }
 0x1e0   : > { %vm2252_vm13 = vcmp.eq.s32.totalorder %v15902_v3, %v2250_v40 }
 0x1e1   : > { %1823 = vmatpush1.bf16.msra.mxu0 %v13519_v28  ;;  %v13584_v28 = vld [vmem:[#allocation2 + $0x2c4] ss:$8 sps:$4 sm:$0xff]  }
 0x1e2   : > { %1824 = vmatprep.subr.bf16.mxu0 %v13524_v29  ;;  %v13582_v29 = vld [vmem:[#allocation2 + $0x2c0] ss:$8 sps:$4 sm:$0xff]  }
 0x1e5   : > { %1825 = vmatpush1.bf16.msra.mxu0 %v13522_v30  ;;  %v13587_v30 = vld [vmem:[#allocation2 + $0x2b4] ss:$8 sps:$4 sm:$0xff]  }
 0x1e6   : > { %13146 = vmatprep.subr.bf16.mxu0 %v15567_v1 }
 0x1e8   : > { %1843 = vmatmul.mubr.bf16.vlgmr.msra.gmra.mxu0 %v15169_v6 }
 0x1e9   : > { %13147 = vmatpush3.bf16.msra.mxu0 %v15169_v6  ;;  %13148 = vmatprep.mubr.msk.bf16.mxu0 %vm15568_vm0, %v15567_v1  ;;  %v2057_v6 = vsel %vm2055_vm10, 1.0, %v15567_v1 }
 0x1ea   : > { %2006 = vmatprep.subr.bf16.mxu0 %v13551_v43  ;;  %v2059_v23 = vpack.c.bf16 %v2058_v9, %v2057_v6  ;;  %v13612_v6 = vld [vmem:[#allocation2 + $0x320] ss:$8 sps:$4 sm:$0xff]   ;;  %v13617_v9 = vld [vmem:[#allocation2 + $0x314] ss:$8 sps:$4 sm:$0xff]  }
 0x1f0   : > { %13149 = vmatmul.mubr.msk.bf16.vlgmr.msra.gmra.mxu0 %vm1140_vm4, %v15959_v35 }
 0x1f1   : > { %2038 = vmatprep.mubr.bf16.mxu0 %v15569_v48  ;;  %2007 = vmatpush1.bf16.msra.mxu0 %v13549_v42 }
 0x1f2   : > { %2008 = vmatprep.subr.bf16.mxu0 %v13554_v45  ;;  %v2253_v45 = vsel %vm2251_vm12, 1.0, %v15567_v1 }
 0x1f5   : > { %2009 = vmatpush1.bf16.msra.mxu0 %v13552_v44 }
 0x1f6   : > { %2010 = vmatprep.subr.bf16.mxu0 %v13557_v46  ;;  %v2254_v46 = vsel %vm2252_vm13, 1.0, %v15567_v1 }
 0x1f9   : > { %2011 = vmatpush1.bf16.msra.mxu0 %v13555_v47  ;;  %v2255_v47 = vpack.c.bf16 %v2254_v46, %v2253_v45  ;;  %v13621_v46 = vld [vmem:[#allocation4 + $0x2e8] ss:$16 sps:$4 sm:$0xff]  }
 0x1fa   : > { %2012 = vmatprep.subr.bf16.mxu0 %v13560_v49  ;;  %v13588_v49 = vld [vmem:[#allocation2 + $0x2a0] ss:$8 sps:$4 sm:$0xff]  }
 0x1fd   : > { %2013 = vmatpush1.bf16.msra.mxu0 %v13558_v50  ;;  %v13593_v50 = vld [vmem:[#allocation2 + $0x294] ss:$8 sps:$4 sm:$0xff]  }
 0x1fe   : > { %2014 = vmatprep.subr.bf16.mxu0 %v13563_v51  ;;  %v13591_v51 = vld [vmem:[#allocation2 + $0x290] ss:$8 sps:$4 sm:$0xff]  }
 0x201   : > { %2015 = vmatpush1.bf16.msra.mxu0 %v13561_v52  ;;  %v13594_v52 = vld [vmem:[#allocation2 + $0x280] ss:$8 sps:$4 sm:$0xff]  }
 0x202   : > { %2016 = vmatprep.subr.bf16.mxu0 %v13566_v53  ;;  %v13596_v53 = vld [vmem:[#allocation2 + $0x284] ss:$8 sps:$4 sm:$0xff]  }
 0x205   : > { %2017 = vmatpush1.bf16.msra.mxu0 %v13564_v54  ;;  %v13597_v54 = vld [vmem:[#allocation2 + $0x370] ss:$8 sps:$4 sm:$0xff]  }
 0x206   : > { %2018 = vmatprep.subr.bf16.mxu0 %v13569_v55  ;;  %v13599_v55 = vld [vmem:[#allocation2 + $0x374] ss:$8 sps:$4 sm:$0xff]  }
 0x209   : > { %2019 = vmatpush1.bf16.msra.mxu0 %v13567_v56  ;;  %v13602_v56 = vld [vmem:[#allocation2 + $0x364] ss:$8 sps:$4 sm:$0xff]  }
 0x20a   : > { %2020 = vmatprep.subr.bf16.mxu0 %v13572_v57  ;;  %v13600_v57 = vld [vmem:[#allocation2 + $0x360] ss:$8 sps:$4 sm:$0xff]  }
 0x20d   : > { %2021 = vmatpush1.bf16.msra.mxu0 %v13570_v58  ;;  %v13605_v58 = vld [vmem:[#allocation2 + $0x354] ss:$8 sps:$4 sm:$0xff]  }
 0x20e   : > { %13158 = vmatprep.subr.bf16.mxu0 %v15567_v1 }
 0x280   : > { %v1385_v61 = vpop.f32.mrf.mxu0  ;;  %v1508_v62 = vpop.f32.mrf.mxu1 }
 0x281   : > { %v15970_v63 = vadd.f32 %v1508_v62, %v1385_v61  ;;  %v13606_v61 = vld [vmem:[#allocation2 + $0x340] ss:$8 sps:$4 sm:$0xff]   ;;  %v13611_v62 = vld [vmem:[#allocation2 + $0x334] ss:$8 sps:$4 sm:$0xff]  }
 0x282   : > { %v1387_v0 = vpop.f32.mrf.mxu0  ;;  %v1510_v5 = vpop.f32.mrf.mxu1 }
 0x283   : > { %v15973_v8 = vadd.f32 %v1510_v5, %v1387_v0  ;;  %v13609_v0 = vld [vmem:[#allocation2 + $0x330] ss:$8 sps:$4 sm:$0xff]   ;;  %v13614_v5 = vld [vmem:[#allocation2 + $0x324] ss:$8 sps:$4 sm:$0xff]  }
 0x284   : > { %v1389_v10 = vpop.f32.mrf.mxu0  ;;  %v1512_v12 = vpop.f32.mrf.mxu1 }
 0x285   : > { %v15976_v13 = vadd.f32 %v1512_v12, %v1389_v10  ;;  %v13615_v10 = vld [vmem:[#allocation2 + $0x310] ss:$8 sps:$4 sm:$0xff]   ;;  %v13620_v12 = vld [vmem:[#allocation2 + $0x304] ss:$8 sps:$4 sm:$0xff]  }
 0x286   : > { %v15978_v14 = vpop.f32.mrf.mxu0 }
 0x288   : > { %v1561_v15 = vpop.f32.mrf.mxu0 }
 0x28a   : > { %v13144_v16 = vpop.f32.mrf.mxu0 }
 0x28b   : > { %v13623_v16 = vld [vmem:[#allocation4 + $0x2ec] ss:$16 sps:$4 sm:$0xff]  }
 0x28c   : > { %v1564_v18 = vpop.f32.mrf.mxu0 }
 0x28d   : > { %v1568_v19 = vpack.c.bf16 %v1564_v18, %v1561_v15  ;;  %v13618_v15 = vld [vmem:[#allocation2 + $0x300] ss:$8 sps:$4 sm:$0xff]  }
 0x28e   : > { %v13145_v20 = vpop.f32.mrf.mxu0 }
 0x28f   : > { %1699 = vmatmul.mubr.bf16.vlgmr.msra.gmra.mxu1 %v1568_v19 }
 0x290   : > { %13153 = vmatpush3.bf16.msra.mxu1 %v15170_v21  ;;  %13154 = vmatprep.mubr.msk.bf16.mxu1 %vm15568_vm0, %v15567_v1 }
 0x291   : > { %2202 = vmatprep.subr.bf16.mxu1 %v13575_v17  ;;  %v16003_v17 = vpop.f32.mrf.mxu1 }
 0x297   : > { %13155 = vmatmul.mubr.msk.bf16.vlgmr.msra.gmra.mxu1 %vm1140_vm4, %v2059_v23 }
 0x298   : > { %2203 = vmatpush1.bf16.msra.mxu1 %v13573_v22  ;;  %2234 = vmatprep.mubr.bf16.mxu1 %v15569_v48 }
 0x299   : > { %2204 = vmatprep.subr.bf16.mxu1 %v13578_v24 }
 0x29c   : > { %2205 = vmatpush1.bf16.msra.mxu1 %v13576_v25 }
 0x29d   : > { %2206 = vmatprep.subr.bf16.mxu1 %v13581_v26 }
 0x2a0   : > { %2207 = vmatpush1.bf16.msra.mxu1 %v13579_v27 }
 0x2a1   : > { %2208 = vmatprep.subr.bf16.mxu1 %v13584_v28 }
 0x2a4   : > { %2209 = vmatpush1.bf16.msra.mxu1 %v13582_v29 }
 0x2a5   : > { %2210 = vmatprep.subr.bf16.mxu1 %v13587_v30 }
 0x2a8   : > { %v15985_v32 = vpop.f32.mrf.mxu0  ;;  %2211 = vmatpush1.bf16.msra.mxu1 %v13585_v31 }
 0x2a9   : > { %2212 = vmatprep.subr.bf16.mxu1 %v13590_v4 }
 0x2aa   : > { %v15987_v34 = vpop.f32.mrf.mxu0 }
 0x2ac   : > { %v15989_v36 = vpop.f32.mrf.mxu0  ;;  %2213 = vmatpush1.bf16.msra.mxu1 %v13588_v49  ;;  %v13629_v49 = vld [vmem:[#allocation4 + $0x2ac] ss:$16 sps:$4 sm:$0xff]  }
 0x2ad   : > { %2214 = vmatprep.subr.bf16.mxu1 %v13593_v50  ;;  %v13627_v50 = vld [vmem:[#allocation4 + $0x2a8] ss:$16 sps:$4 sm:$0xff]  }
 0x2ae   : > { %v15991_v37 = vpop.f32.mrf.mxu0 }
 0x2b0   : > { %v1901_v38 = vpop.f32.mrf.mxu0  ;;  %2215 = vmatpush1.bf16.msra.mxu1 %v13591_v51  ;;  %v13630_v51 = vld [vmem:[#allocation4 + $0x288] ss:$16 sps:$4 sm:$0xff]  }
 0x2b1   : > { %2216 = vmatprep.subr.bf16.mxu1 %v13596_v53  ;;  %v13633_v53 = vld [vmem:[#allocation4 + $0x268] ss:$16 sps:$4 sm:$0xff]  }
 0x2b2   : > { %v13150_v41 = vpop.f32.mrf.mxu0 }
 0x2b4   : > { %v1904_v42 = vpop.f32.mrf.mxu0  ;;  %2217 = vmatpush1.bf16.msra.mxu1 %v13594_v52  ;;  %v13635_v52 = vld [vmem:[#allocation4 + $0x26c] ss:$16 sps:$4 sm:$0xff]  }
 0x2b5   : > { %v1908_v43 = vpack.c.bf16 %v1904_v42, %v1901_v38 }
 0x2b6   : > { %v13151_v44 = vpop.f32.mrf.mxu0 }
 0x2b7   : > { %2039 = vmatmul.mubr.bf16.vlgmr.msra.gmra.mxu0 %v1908_v43 }
 0x2b8   : > { %13159 = vmatpush3.bf16.msra.mxu0 %v15170_v21  ;;  %13160 = vmatprep.mubr.msk.bf16.mxu0 %vm15568_vm0, %v15567_v1 }
 0x2b9   : > { %2398 = vmatprep.subr.bf16.mxu0 %v13599_v55  ;;  %v13636_v55 = vld [vmem:[#allocation4 + $0x248] ss:$16 sps:$4 sm:$0xff]  }
 0x2bf   : > { %13161 = vmatmul.mubr.msk.bf16.vlgmr.msra.gmra.mxu0 %vm1140_vm4, %v2255_v47  ;;  %v13626_v47 = vld [vmem:[#allocation4 + $0x2cc] ss:$16 sps:$4 sm:$0xff]  }
 0x2c0   : > { %2430 = vmatprep.mubr.bf16.mxu0 %v15569_v48  ;;  %2399 = vmatpush1.bf16.msra.mxu0 %v13597_v54  ;;  %v13638_v54 = vld [vmem:[#allocation4 + $0x24c] ss:$16 sps:$4 sm:$0xff]  }
 0x2c1   : > { %2400 = vmatprep.subr.bf16.mxu0 %v13602_v56  ;;  %v13641_v56 = vld [vmem:[#allocation4 + $0x22c] ss:$16 sps:$4 sm:$0xff]  }
 0x2c4   : > { %2401 = vmatpush1.bf16.msra.mxu0 %v13600_v57  ;;  %v13639_v57 = vld [vmem:[#allocation4 + $0x228] ss:$16 sps:$4 sm:$0xff]  }
 0x2c5   : > { %2402 = vmatprep.subr.bf16.mxu0 %v13605_v58  ;;  %v13644_v58 = vld [vmem:[#allocation4 + $0x20c] ss:$16 sps:$4 sm:$0xff]  }
 0x2c8   : > { %2403 = vmatpush1.bf16.msra.mxu0 %v13603_v59  ;;  %v13642_v59 = vld [vmem:[#allocation4 + $0x208] ss:$16 sps:$4 sm:$0xff]  }
 0x2c9   : > { %2404 = vmatprep.subr.bf16.mxu0 %v13608_v60  ;;  %v13647_v60 = vld [vmem:[#allocation4 + $0x3ec] ss:$16 sps:$4 sm:$0xff]  }
 0x2cc   : > { %2405 = vmatpush1.bf16.msra.mxu0 %v13606_v61  ;;  %v13645_v61 = vld [vmem:[#allocation4 + $0x3e8] ss:$16 sps:$4 sm:$0xff]  }
 0x2cd   : > { %2406 = vmatprep.subr.bf16.mxu0 %v13611_v62  ;;  %v13650_v62 = vld [vmem:[#allocation4 + $0x3cc] ss:$16 sps:$4 sm:$0xff]  }
 0x2d0   : > { %2407 = vmatpush1.bf16.msra.mxu0 %v13609_v0  ;;  %v13648_v0 = vld [vmem:[#allocation4 + $0x3c8] ss:$16 sps:$4 sm:$0xff]  }
 0x2d1   : > { %2408 = vmatprep.subr.bf16.mxu0 %v13614_v5  ;;  %v13653_v5 = vld [vmem:[#allocation4 + $0x3ac] ss:$16 sps:$4 sm:$0xff]  }
 0x2d4   : > { %2409 = vmatpush1.bf16.msra.mxu0 %v13612_v6  ;;  %v13651_v6 = vld [vmem:[#allocation4 + $0x3a8] ss:$16 sps:$4 sm:$0xff]  }
 0x2d5   : > { %2410 = vmatprep.subr.bf16.mxu0 %v13617_v9  ;;  %v13656_v9 = vld [vmem:[#allocation4 + $0x38c] ss:$16 sps:$4 sm:$0xff]  }
 0x2d8   : > { %2411 = vmatpush1.bf16.msra.mxu0 %v13615_v10  ;;  %v13654_v10 = vld [vmem:[#allocation4 + $0x388] ss:$16 sps:$4 sm:$0xff]  }
 0x2d9   : > { %2412 = vmatprep.subr.bf16.mxu0 %v13620_v12  ;;  %v13659_v12 = vld [vmem:[#allocation4 + $0x36c] ss:$16 sps:$4 sm:$0xff]  }
 0x2dc   : > { %2413 = vmatpush1.bf16.msra.mxu0 %v13618_v15  ;;  %v13657_v15 = vld [vmem:[#allocation4 + $0x368] ss:$16 sps:$4 sm:$0xff]  }
 0x2dd   : > { %3004 = vmatprep.subr.bf16.mxu0 %v13623_v16  ;;  %v13662_v16 = vld [vmem:[#allocation4 + $0x34c] ss:$16 sps:$4 sm:$0xff]  }
 0x34f   : > { %v1700_v18 = vpop.f32.mrf.mxu1 }
 0x350   : > { %v1709_v19 = vadd.f32 %v1700_v18, %v15970_v63  ;;  %v13660_v18 = vld [vmem:[#allocation4 + $0x348] ss:$16 sps:$4 sm:$0xff]  }
 0x351   : > { %v1702_v20 = vpop.f32.mrf.mxu1 }
 0x352   : > { %v1710_v21 = vadd.f32 %v1702_v20, %v15973_v8  ;;  %v1853_v30 = vadd.f32 %v15985_v32, %v1709_v19  ;;  %v13665_v19 = vld [vmem:[#allocation4 + $0x32c] ss:$16 sps:$4 sm:$0xff]   ;;  %v13663_v20 = vld [vmem:[#allocation4 + $0x328] ss:$16 sps:$4 sm:$0xff]  }
 0x353   : > { %v1704_v22 = vpop.f32.mrf.mxu1 }
 0x354   : > { %v1711_v23 = vadd.f32 %v1704_v22, %v15976_v13  ;;  %v1854_v8 = vadd.f32 %v15987_v34, %v1710_v21  ;;  %v13624_v34 = vld [vmem:[#allocation4 + $0x2c8] ss:$16 sps:$4 sm:$0xff]   ;;  %v13668_v21 = vld [vmem:[#allocation4 + $0x30c] ss:$16 sps:$4 sm:$0xff]  }
 0x355   : > { %v16008_v24 = vpop.f32.mrf.mxu1  ;;  %v13666_v22 = vld [vmem:[#allocation4 + $0x308] ss:$16 sps:$4 sm:$0xff]  }
 0x356   : > { %v1855_v13 = vadd.f32 %v15989_v36, %v1711_v23  ;;  %v13632_v36 = vld [vmem:[#allocation4 + $0x28c] ss:$16 sps:$4 sm:$0xff]  }
 0x357   : > { %v2097_v25 = vpop.f32.mrf.mxu1 }
 0x359   : > { %v13156_v26 = vpop.f32.mrf.mxu1 }
 0x35a   : > { %v1515_v26 = vadd.f32 %v16003_v17, %v15978_v14 }
 0x35b   : > { %v2100_v27 = vpop.f32.mrf.mxu1 }
 0x35c   : > { %v2104_v28 = vpack.c.bf16 %v2100_v27, %v2097_v25  ;;  %v1712_v27 = vadd.f32 %v16008_v24, %v1515_v26  ;;  %v13780_v26 = vld [vmem:[#allocation4 + $0x48] ss:$16 sps:$4 sm:$0xff]  }
 0x35d   : > { %v13157_v29 = vpop.f32.mrf.mxu1 }
 0x35e   : > { %2235 = vmatmul.mubr.bf16.vlgmr.msra.gmra.mxu1 %v2104_v28  ;;  %v16026_v28 = vsub.s32 0, %v15900_v2 }
 0x35f   : > { %2499 = vmatprep.mubr.bf16.mxu1 %v15569_v48 }
 0x377   : > { %v2040_v31 = vpop.f32.mrf.mxu0 }
 0x378   : > { %v16012_v63 = vadd.f32 %v2040_v31, %v1853_v30  ;;  %v2445_v30 = vld [vmem:[%s15588_s13] sm:$0x3] }
 0x379   : > { %v2042_v38 = vpop.f32.mrf.mxu0  ;;  %v2450_v14 = vrot.slane %v2445_v30, %v16026_v28 }
 0x37a   : > { %v16015_v39 = vadd.f32 %v2042_v38, %v1854_v8  ;;  %v16031_v8 = vsub.s32 1, %v15900_v2 }
 0x37b   : > { %v2044_v40 = vpop.f32.mrf.mxu0 }
 0x37c   : > { %v16018_v41 = vadd.f32 %v2044_v40, %v1855_v13  ;;  %v1856_v13 = vadd.f32 %v15991_v37, %v1712_v27  ;;  %v13785_v27 = vld [vmem:[#allocation4 + $0x2c] ss:$16 sps:$4 sm:$0xff]  }
 0x37d   : > { %v16020_v42 = vpop.f32.mrf.mxu0 }
 0x37f   : > { %v2293_v43 = vpop.f32.mrf.mxu0 }
 0x381   : > { %v13162_v44 = vpop.f32.mrf.mxu0 }
 0x382   : > { %v2052_v44 = vadd.f32 %v16020_v42, %v1856_v13  ;;  %v13690_v13 = vld [vmem:[#allocation4 + $0x200] ss:$16 sps:$4 sm:$0xff]  }
 0x383   : > { %v2296_v45 = vpop.f32.mrf.mxu0 }
 0x384   : > { %v2300_v32 = vpack.c.bf16 %v2296_v45, %v2293_v43 }
 0x385   : > { %v13163_v4 = vpop.f32.mrf.mxu0 }
 0x386   : > { %2431 = vmatmul.mubr.bf16.vlgmr.msra.gmra.mxu0 %v2300_v32 }
 0x387   : > { %3005 = vmatpush1.bf16.msra.mxu0 %v13621_v46 }
 0x388   : > { %3006 = vmatprep.subr.bf16.mxu0 %v13626_v47 }
 0x38b   : > { %3007 = vmatpush1.bf16.msra.mxu0 %v13624_v34 }
 0x38c   : > { %3008 = vmatprep.subr.bf16.mxu0 %v13629_v49 }
 0x38f   : > { %3009 = vmatpush1.bf16.msra.mxu0 %v13627_v50 }
 0x390   : > { %3010 = vmatprep.subr.bf16.mxu0 %v13632_v36 }
 0x393   : > { %3011 = vmatpush1.bf16.msra.mxu0 %v13630_v51 }
 0x394   : > { %3012 = vmatprep.subr.bf16.mxu0 %v13635_v52 }
 0x397   : > { %3013 = vmatpush1.bf16.msra.mxu0 %v13633_v53 }
 0x398   : > { %3014 = vmatprep.subr.bf16.mxu0 %v13638_v54 }
 0x39b   : > { %3015 = vmatpush1.bf16.msra.mxu0 %v13636_v55 }
 0x39c   : > { %3016 = vmatprep.subr.bf16.mxu0 %v13641_v56  ;;  %v13669_v56 = vld [vmem:[#allocation4 + $0x2e0] ss:$16 sps:$4 sm:$0xff]  }
 0x39f   : > { %3017 = vmatpush1.bf16.msra.mxu0 %v13639_v57  ;;  %v13674_v57 = vld [vmem:[#allocation4 + $0x2c4] ss:$16 sps:$4 sm:$0xff]  }
 0x3a0   : > { %3018 = vmatprep.subr.bf16.mxu0 %v13644_v58  ;;  %v13765_v58 = vld [vmem:[#allocation4 + $0xe8] ss:$16 sps:$4 sm:$0xff]  }
 0x3a3   : > { %3019 = vmatpush1.bf16.msra.mxu0 %v13642_v59  ;;  %v13767_v59 = vld [vmem:[#allocation4 + $0xec] ss:$16 sps:$4 sm:$0xff]  }
 0x3a4   : > { %3020 = vmatprep.subr.bf16.mxu0 %v13647_v60  ;;  %v13770_v60 = vld [vmem:[#allocation4 + $0xcc] ss:$16 sps:$4 sm:$0xff]  }
 0x3a7   : > { %3021 = vmatpush2.bf16.msra.mxu0 %v13645_v61  ;;  %v13672_v61 = vld [vmem:[#allocation4 + $0x2c0] ss:$16 sps:$4 sm:$0xff]  }
 0x3a8   : > { %3022 = vmatprep.subr.bf16.mxu0 %v13650_v62  ;;  %v13677_v62 = vld [vmem:[#allocation4 + $0x2a4] ss:$16 sps:$4 sm:$0xff]  }
 0x3ab   : > { %3023 = vmatpush2.bf16.msra.mxu0 %v13648_v0  ;;  %v13768_v0 = vld [vmem:[#allocation4 + $0xc8] ss:$16 sps:$4 sm:$0xff]  }
 0x3ac   : > { %3024 = vmatprep.subr.bf16.mxu0 %v13653_v5  ;;  %v13773_v5 = vld [vmem:[#allocation4 + $0xac] ss:$16 sps:$4 sm:$0xff]  }
 0x3af   : > { %3025 = vmatpush2.bf16.msra.mxu0 %v13651_v6  ;;  %v13675_v6 = vld [vmem:[#allocation4 + $0x2a0] ss:$16 sps:$4 sm:$0xff]  }
 0x3b0   : > { %3026 = vmatprep.subr.bf16.mxu0 %v13656_v9  ;;  %v13680_v9 = vld [vmem:[#allocation4 + $0x284] ss:$16 sps:$4 sm:$0xff]  }
 0x3b3   : > { %3027 = vmatpush2.bf16.msra.mxu0 %v13654_v10  ;;  %v13771_v10 = vld [vmem:[#allocation4 + $0xa8] ss:$16 sps:$4 sm:$0xff]  }
 0x3b4   : > { %3028 = vmatprep.subr.bf16.mxu0 %v13659_v12  ;;  %v13776_v12 = vld [vmem:[#allocation4 + $0x8c] ss:$16 sps:$4 sm:$0xff]  }
 0x3b7   : > { %3029 = vmatpush2.bf16.msra.mxu0 %v13657_v15  ;;  %v13683_v15 = vld [vmem:[#allocation4 + $0x264] ss:$16 sps:$4 sm:$0xff]  }
 0x3b8   : > { %3030 = vmatprep.subr.bf16.mxu0 %v13662_v16  ;;  %v13774_v16 = vld [vmem:[#allocation4 + $0x88] ss:$16 sps:$4 sm:$0xff]  }
 0x3bb   : > { %3031 = vmatpush2.bf16.msra.mxu0 %v13660_v18  ;;  %v13779_v18 = vld [vmem:[#allocation4 + $0x6c] ss:$16 sps:$4 sm:$0xff]  }
 0x3bc   : > { %3032 = vmatprep.subr.bf16.mxu0 %v13665_v19  ;;  %v13681_v19 = vld [vmem:[#allocation4 + $0x260] ss:$16 sps:$4 sm:$0xff]  }
 0x3bf   : > { %3033 = vmatpush2.bf16.msra.mxu0 %v13663_v20  ;;  %v13686_v20 = vld [vmem:[#allocation4 + $0x244] ss:$16 sps:$4 sm:$0xff]  }
 0x3c0   : > { %3034 = vmatprep.subr.bf16.mxu0 %v13668_v21  ;;  %v13777_v21 = vld [vmem:[#allocation4 + $0x68] ss:$16 sps:$4 sm:$0xff]  }
 0x3c3   : > { %3035 = vmatpush2.bf16.msra.mxu0 %v13666_v22  ;;  %v13782_v22 = vld [vmem:[#allocation4 + $0x4c] ss:$16 sps:$4 sm:$0xff]  }
 0x3c4   : > { %3410 = vmatprep.subr.bf16.mxu0 %v13767_v59  ;;  %v13714_v59 = vld [vmem:[#allocation4 + $0x300] ss:$16 sps:$4 sm:$0xff]  }
 0x41e   : > { %v2236_v23 = vpop.f32.mrf.mxu1 }
 0x41f   : > { %v2245_v31 = vadd.f32 %v2236_v23, %v16012_v63  ;;  %v2454_v63 = vrot.slane %v2445_v30, %v16031_v8  ;;  %v13684_v23 = vld [vmem:[#allocation4 + $0x240] ss:$16 sps:$4 sm:$0xff]   ;;  %v13692_v30 = vld [vmem:[#allocation4 + $0x204] ss:$16 sps:$4 sm:$0xff]  }
 0x420   : > { %v2238_v25 = vpop.f32.mrf.mxu1 }
 0x421   : > { %v2246_v40 = vadd.f32 %v2238_v25, %v16015_v39  ;;  %v13689_v25 = vld [vmem:[#allocation4 + $0x224] ss:$16 sps:$4 sm:$0xff]  }
 0x422   : > { %v2240_v29 = vpop.f32.mrf.mxu1 }
 0x423   : > { %v2247_v45 = vadd.f32 %v2240_v29, %v16018_v41  ;;  %v13671_v41 = vld [vmem:[#allocation4 + $0x2e4] ss:$16 sps:$4 sm:$0xff]   ;;  %v13687_v29 = vld [vmem:[#allocation4 + $0x220] ss:$16 sps:$4 sm:$0xff]  }
 0x424   : > { %v2242_v17 = vpop.f32.mrf.mxu1 }
 0x425   : > { %v2248_v47 = vadd.f32 %v2242_v17, %v2052_v44  ;;  %v13693_v17 = vld [vmem:[#allocation4 + $0x3e0] ss:$16 sps:$4 sm:$0xff]   ;;  %v13789_v44 = vld [vmem:[#allocation4 + $0x1e8] ss:$16 sps:$4 sm:$0xff]  }
 0x446   : > { %v2432_v38 = vpop.f32.mrf.mxu0 }
 0x447   : > { %v2441_v43 = vadd.f32 %v2432_v38, %v2245_v31  ;;  %v13783_v31 = vld [vmem:[#allocation4 + $0x28] ss:$16 sps:$4 sm:$0xff]   ;;  %v13788_v38 = vld [vmem:[#allocation4 + $0xc] ss:$16 sps:$4 sm:$0xff]  }
 0x448   : > { %v2434_v24 = vpop.f32.mrf.mxu0 }
 0x449   : > { %v2442_v46 = vadd.f32 %v2434_v24, %v2246_v40  ;;  %v2457_v4 = vadd.f32 %v2450_v14, %v2441_v43  ;;  %v13695_v40 = vld [vmem:[#allocation4 + $0x3e4] ss:$16 sps:$4 sm:$0xff]   ;;  %v13786_v43 = vld [vmem:[#allocation4 + $0x8] ss:$16 sps:$4 sm:$0xff]  }
 0x44a   : > { %v2436_v32 = vpop.f32.mrf.mxu0  ;;  %v13698_v24 = vld [vmem:[#allocation4 + $0x3c4] ss:$16 sps:$4 sm:$0xff]  }
 0x44b   : > { %v2443_v34 = vadd.f32 %v2436_v32, %v2247_v45  ;;  %v2458_v37 = vadd.f32 %v2454_v63, %v2442_v46  ;;  %v2461_v36 = vmax.f32 %v2457_v4, 0.0  ;;  %v13794_v45 = vld [vmem:[#allocation4 + $0x1cc] ss:$16 sps:$4 sm:$0xff]   ;;  %v13696_v46 = vld [vmem:[#allocation4 + $0x3c0] ss:$16 sps:$4 sm:$0xff]  }
 0x44c   : > { %v2438_v49 = vpop.f32.mrf.mxu0  ;;  %v13792_v32 = vld [vmem:[#allocation4 + $0x1c8] ss:$16 sps:$4 sm:$0xff]   ;;  %v13699_v4 = vld [vmem:[#allocation4 + $0x3a0] ss:$16 sps:$4 sm:$0xff]  }
 0x44d   : > { %v2459_v50 = vadd.f32 %v2450_v14, %v2443_v34  ;;  %v2444_v39 = vadd.f32 %v2438_v49, %v2248_v47  ;;  %v2462_v53 = vmax.f32 %v2458_v37, 0.0  ;;  %v13791_v14 = vld [vmem:[#allocation4 + $0x1ec] ss:$16 sps:$4 sm:$0xff]   ;;  %v13704_v34 = vld [vmem:[#allocation4 + $0x384] ss:$16 sps:$4 sm:$0xff]  }
 0x44e   : > { %v13797_v47 = vld [vmem:[#allocation4 + $0x1ac] ss:$16 sps:$4 sm:$0xff]   ;;  %v13795_v49 = vld [vmem:[#allocation4 + $0x1a8] ss:$16 sps:$4 sm:$0xff]  }
 0x44f   : > { %v2463_v51 = vmax.f32 %v2459_v50, 0.0  ;;  %v2460_v52 = vadd.f32 %v2454_v63, %v2444_v39  ;;  %v13701_v63 = vld [vmem:[#allocation4 + $0x3a4] ss:$16 sps:$4 sm:$0xff]   ;;  %v13800_v37 = vld [vmem:[#allocation4 + $0x18c] ss:$16 sps:$4 sm:$0xff]  }
 0x450   : > { %v13702_v50 = vld [vmem:[#allocation4 + $0x380] ss:$16 sps:$4 sm:$0xff]   ;;  %v13707_v39 = vld [vmem:[#allocation4 + $0x364] ss:$16 sps:$4 sm:$0xff]  }
 0x451   : > { %v16039_v54 = vpack.c.bf16 %v2463_v51, %v2461_v36  ;;  %v2464_v42 = vmax.f32 %v2460_v52, 0.0  ;;  %v13798_v36 = vld [vmem:[#allocation4 + $0x188] ss:$16 sps:$4 sm:$0xff]   ;;  %v13803_v51 = vld [vmem:[#allocation4 + $0x16c] ss:$16 sps:$4 sm:$0xff]  }
 0x452   : > { %v13705_v52 = vld [vmem:[#allocation4 + $0x360] ss:$16 sps:$4 sm:$0xff]  }
 0x453   : > { %v16041_v55 = vpack.c.bf16 %v2464_v42, %v2462_v53  ;;  %v13710_v53 = vld [vmem:[#allocation4 + $0x344] ss:$16 sps:$4 sm:$0xff]   ;;  %v13801_v42 = vld [vmem:[#allocation4 + $0x168] ss:$16 sps:$4 sm:$0xff]  }
 0x455   : > { %2481 = vmatprep.subr.bf16.mxu1 %v16041_v55  ;;  %3036 = vmatprep.mubr.bf16.mxu0 %v16041_v55 }
 0x456   : > { %2482 = vmatpush1.bf16.msra.mxu1 %v16039_v54  ;;  %3037 = vmatmul.mubr.bf16.vlgmr.msra.gmra.mxu0 %v16039_v54 }
 0x457   : > { %2961 = vmatprep.subr.bf16.mxu1 %v13671_v41  ;;  %3411 = vmatpush1.bf16.msra.mxu0 %v13765_v58  ;;  %v13708_v41 = vld [vmem:[#allocation4 + $0x340] ss:$16 sps:$4 sm:$0xff]   ;;  %v13716_v58 = vld [vmem:[#allocation4 + $0x304] ss:$16 sps:$4 sm:$0xff]  }
 0x458   : > { %3412 = vmatprep.subr.bf16.mxu0 %v13770_v60  ;;  %v13719_v60 = vld [vmem:[#allocation4 + $0xe4] ss:$16 sps:$4 sm:$0xff]  }
 0x459   : > { %11977 = vmatmul.mubr.msk.bf16.vlgmr.msra.gmra.mxu1 %vm1140_vm4, %v15942_v11  ;;  %v13678_v11 = vld [vmem:[#allocation4 + $0x280] ss:$16 sps:$4 sm:$0xff]  }
 0x45a   : > { %2962 = vmatpush1.bf16.msra.mxu1 %v13669_v56  ;;  %2993 = vmatprep.mubr.bf16.mxu1 %v16041_v55  ;;  %v13713_v56 = vld [vmem:[#allocation4 + $0x324] ss:$16 sps:$4 sm:$0xff]  }
 0x45b   : > { %2963 = vmatprep.subr.bf16.mxu1 %v13674_v57  ;;  %3413 = vmatpush1.bf16.msra.mxu0 %v13768_v0  ;;  %v13711_v57 = vld [vmem:[#allocation4 + $0x320] ss:$16 sps:$4 sm:$0xff]   ;;  %v13804_v0 = vld [vmem:[#allocation4 + $0x148] ss:$16 sps:$4 sm:$0xff]  }
 0x45c   : > { %3414 = vmatprep.subr.bf16.mxu0 %v13773_v5  ;;  %v13722_v5 = vld [vmem:[#allocation4 + $0xc4] ss:$16 sps:$4 sm:$0xff]  }
 0x45e   : > { %2964 = vmatpush1.bf16.msra.mxu1 %v13672_v61  ;;  %v13806_v61 = vld [vmem:[#allocation4 + $0x14c] ss:$16 sps:$4 sm:$0xff]  }
 0x45f   : > { %2965 = vmatprep.subr.bf16.mxu1 %v13677_v62  ;;  %3415 = vmatpush1.bf16.msra.mxu0 %v13771_v10  ;;  %v13717_v62 = vld [vmem:[#allocation4 + $0xe0] ss:$16 sps:$4 sm:$0xff]   ;;  %v13807_v10 = vld [vmem:[#allocation4 + $0x128] ss:$16 sps:$4 sm:$0xff]  }
 0x460   : > { %3416 = vmatprep.subr.bf16.mxu0 %v13776_v12  ;;  %v13725_v12 = vld [vmem:[#allocation4 + $0xa4] ss:$16 sps:$4 sm:$0xff]  }
 0x462   : > { %2966 = vmatpush1.bf16.msra.mxu1 %v13675_v6  ;;  %v13809_v6 = vld [vmem:[#allocation4 + $0x12c] ss:$16 sps:$4 sm:$0xff]  }
 0x463   : > { %2967 = vmatprep.subr.bf16.mxu1 %v13680_v9  ;;  %3417 = vmatpush1.bf16.msra.mxu0 %v13774_v16  ;;  %v13720_v9 = vld [vmem:[#allocation4 + $0xc0] ss:$16 sps:$4 sm:$0xff]   ;;  %v13810_v16 = vld [vmem:[#allocation4 + $0x108] ss:$16 sps:$4 sm:$0xff]  }
 0x464   : > { %3418 = vmatprep.subr.bf16.mxu0 %v13779_v18  ;;  %v13728_v18 = vld [vmem:[#allocation4 + $0x84] ss:$16 sps:$4 sm:$0xff]  }
 0x466   : > { %2968 = vmatpush1.bf16.msra.mxu1 %v13678_v11  ;;  %v13812_v11 = vld [vmem:[#allocation4 + $0x10c] ss:$16 sps:$4 sm:$0xff]  }
 0x467   : > { %2969 = vmatprep.subr.bf16.mxu1 %v13683_v15  ;;  %3419 = vmatpush1.bf16.msra.mxu0 %v13777_v21  ;;  %v13723_v15 = vld [vmem:[#allocation4 + $0xa0] ss:$16 sps:$4 sm:$0xff]  }
 0x468   : > { %3420 = vmatprep.subr.bf16.mxu0 %v13782_v22  ;;  %v13729_v21 = vld [vmem:[#allocation4 + $0x60] ss:$16 sps:$4 sm:$0xff]   ;;  %v13734_v22 = vld [vmem:[#allocation4 + $0x44] ss:$16 sps:$4 sm:$0xff]  }
 0x46a   : > { %2970 = vmatpush1.bf16.msra.mxu1 %v13681_v19  ;;  %v13726_v19 = vld [vmem:[#allocation4 + $0x80] ss:$16 sps:$4 sm:$0xff]  }
 0x46b   : > { %2971 = vmatprep.subr.bf16.mxu1 %v13686_v20  ;;  %3421 = vmatpush1.bf16.msra.mxu0 %v13780_v26  ;;  %v13731_v20 = vld [vmem:[#allocation4 + $0x64] ss:$16 sps:$4 sm:$0xff]   ;;  %v13735_v26 = vld [vmem:[#allocation4 + $0x20] ss:$16 sps:$4 sm:$0xff]  }
 0x46c   : > { %3422 = vmatprep.subr.bf16.mxu0 %v13785_v27  ;;  %v13740_v27 = vld [vmem:[#allocation4 + $0x4] ss:$16 sps:$4 sm:$0xff]  }
 0x46e   : > { %2972 = vmatpush1.bf16.msra.mxu1 %v13684_v23  ;;  %v13732_v23 = vld [vmem:[#allocation4 + $0x40] ss:$16 sps:$4 sm:$0xff]  }
 0x46f   : > { %2973 = vmatprep.subr.bf16.mxu1 %v13689_v25  ;;  %3423 = vmatpush1.bf16.msra.mxu0 %v13783_v31  ;;  %v13737_v25 = vld [vmem:[#allocation4 + $0x24] ss:$16 sps:$4 sm:$0xff]   ;;  %v13741_v31 = vld [vmem:[#allocation4 + $0x1e0] ss:$16 sps:$4 sm:$0xff]  }
 0x470   : > { %3424 = vmatprep.subr.bf16.mxu0 %v13788_v38  ;;  %v13746_v38 = vld [vmem:[#allocation4 + $0x1c4] ss:$16 sps:$4 sm:$0xff]  }
 0x472   : > { %2974 = vmatpush1.bf16.msra.mxu1 %v13687_v29  ;;  %v13738_v29 = vld [vmem:[#allocation4] ss:$16 sps:$4 sm:$0xff]  }
 0x473   : > { %2975 = vmatprep.subr.bf16.mxu1 %v13692_v30  ;;  %3425 = vmatpush1.bf16.msra.mxu0 %v13786_v43  ;;  %v13743_v30 = vld [vmem:[#allocation4 + $0x1e4] ss:$16 sps:$4 sm:$0xff]   ;;  %v13747_v43 = vld [vmem:[#allocation4 + $0x1a0] ss:$16 sps:$4 sm:$0xff]  }
 0x474   : > { %3426 = vmatprep.subr.bf16.mxu0 %v13791_v14  ;;  %v13752_v14 = vld [vmem:[#allocation4 + $0x184] ss:$16 sps:$4 sm:$0xff]  }
 0x476   : > { %2976 = vmatpush1.bf16.msra.mxu1 %v13690_v13  ;;  %v13744_v13 = vld [vmem:[#allocation4 + $0x1c0] ss:$16 sps:$4 sm:$0xff]  }
 0x477   : > { %2977 = vmatprep.subr.bf16.mxu1 %v13695_v40  ;;  %3427 = vmatpush2.bf16.msra.mxu0 %v13789_v44  ;;  %v13749_v40 = vld [vmem:[#allocation4 + $0x1a4] ss:$16 sps:$4 sm:$0xff]   ;;  %v13753_v44 = vld [vmem:[#allocation4 + $0x160] ss:$16 sps:$4 sm:$0xff]  }
 0x478   : > { %3428 = vmatprep.subr.bf16.mxu0 %v13794_v45  ;;  %v13758_v45 = vld [vmem:[#allocation4 + $0x144] ss:$16 sps:$4 sm:$0xff]  }
 0x47a   : > { %2978 = vmatpush2.bf16.msra.mxu1 %v13693_v17  ;;  %v13750_v17 = vld [vmem:[#allocation4 + $0x180] ss:$16 sps:$4 sm:$0xff]  }
 0x47b   : > { %2979 = vmatprep.subr.bf16.mxu1 %v13698_v24  ;;  %3429 = vmatpush2.bf16.msra.mxu0 %v13792_v32  ;;  %v13755_v24 = vld [vmem:[#allocation4 + $0x164] ss:$16 sps:$4 sm:$0xff]   ;;  %v13759_v32 = vld [vmem:[#allocation4 + $0x120] ss:$16 sps:$4 sm:$0xff]  }
 0x47c   : > { %3430 = vmatprep.subr.bf16.mxu0 %v13797_v47  ;;  %v13764_v47 = vld [vmem:[#allocation4 + $0x104] ss:$16 sps:$4 sm:$0xff]  }
 0x47e   : > { %2980 = vmatpush2.bf16.msra.mxu1 %v13696_v46  ;;  %v13756_v46 = vld [vmem:[#allocation4 + $0x140] ss:$16 sps:$4 sm:$0xff]  }
 0x47f   : > { %2981 = vmatprep.subr.bf16.mxu1 %v13701_v63  ;;  %3431 = vmatpush2.bf16.msra.mxu0 %v13795_v49  ;;  %v13761_v63 = vld [vmem:[#allocation4 + $0x124] ss:$16 sps:$4 sm:$0xff]  }
 0x480   : > { %3432 = vmatprep.subr.bf16.mxu0 %v13800_v37 }
 0x482   : > { %2982 = vmatpush2.bf16.msra.mxu1 %v13699_v4  ;;  %v13762_v4 = vld [vmem:[#allocation4 + $0x100] ss:$16 sps:$4 sm:$0xff]  }
 0x483   : > { %2983 = vmatprep.subr.bf16.mxu1 %v13704_v34  ;;  %3433 = vmatpush2.bf16.msra.mxu0 %v13798_v36  ;;  %v13818_v34 = vld [vmem:[#allocation4 + $0x4ec] ss:$16 sps:$4 sm:$0xff]  }
 0x484   : > { %3434 = vmatprep.subr.bf16.mxu0 %v13803_v51 }
 0x486   : > { %2984 = vmatpush2.bf16.msra.mxu1 %v13702_v50 }
 0x487   : > { %2985 = vmatprep.subr.bf16.mxu1 %v13707_v39  ;;  %3435 = vmatpush2.bf16.msra.mxu0 %v13801_v42  ;;  %v13824_v42 = vld [vmem:[#allocation4 + $0x4cc] ss:$16 sps:$4 sm:$0xff]  }
 0x488   : > { %3436 = vmatprep.subr.bf16.mxu0 %v13806_v61  ;;  %v13834_v61 = vld [vmem:[#allocation4 + $0x488] ss:$16 sps:$4 sm:$0xff]  }
 0x48a   : > { %2986 = vmatpush2.bf16.msra.mxu1 %v13705_v52  ;;  %v13815_v52 = vld [vmem:[#allocation4 + $0x4e4] ss:$16 sps:$4 sm:$0xff]  }
 0x48b   : > { %2987 = vmatprep.subr.bf16.mxu1 %v13710_v53  ;;  %3437 = vmatpush2.bf16.msra.mxu0 %v13804_v0  ;;  %v13816_v53 = vld [vmem:[#allocation4 + $0x4e8] ss:$16 sps:$4 sm:$0xff]   ;;  %v13825_v0 = vld [vmem:[#allocation4 + $0x4a0] ss:$16 sps:$4 sm:$0xff]  }
 0x48c   : > { %3438 = vmatprep.subr.bf16.mxu0 %v13809_v6  ;;  %v13840_v6 = vld [vmem:[#allocation4 + $0x468] ss:$16 sps:$4 sm:$0xff]  }
 0x48e   : > { %2988 = vmatpush2.bf16.msra.mxu1 %v13708_v41  ;;  %v13830_v41 = vld [vmem:[#allocation4 + $0x4ac] ss:$16 sps:$4 sm:$0xff]  }
 0x48f   : > { %2989 = vmatprep.subr.bf16.mxu1 %v13713_v56  ;;  %3439 = vmatpush2.bf16.msra.mxu0 %v13807_v10  ;;  %v13813_v56 = vld [vmem:[#allocation4 + $0x4e0] ss:$16 sps:$4 sm:$0xff]  }
 0x490   : > { %3440 = vmatprep.subr.bf16.mxu0 %v13812_v11  ;;  %v13831_v10 = vld [vmem:[#allocation4 + $0x480] ss:$16 sps:$4 sm:$0xff]   ;;  %v13854_v11 = vld [vmem:[#allocation4 + $0x42c] ss:$16 sps:$4 sm:$0xff]  }
 0x492   : > { %2990 = vmatpush2.bf16.msra.mxu1 %v13711_v57  ;;  %v13821_v57 = vld [vmem:[#allocation4 + $0x4c4] ss:$16 sps:$4 sm:$0xff]  }
 0x493   : > { %2991 = vmatprep.subr.bf16.mxu1 %v13716_v58  ;;  %3441 = vmatpush2.bf16.msra.mxu0 %v13810_v16  ;;  %v13828_v58 = vld [vmem:[#allocation4 + $0x4a8] ss:$16 sps:$4 sm:$0xff]   ;;  %v13845_v16 = vld [vmem:[#allocation4 + $0x444] ss:$16 sps:$4 sm:$0xff]  }
 0x494   : > { %3926 = vmatprep.subr.bf16.mxu0 %v13818_v34  ;;  %v13885_v34 = vld [vmem:[#allocation4 + $0x560] ss:$16 sps:$4 sm:$0xff]  }
 0x496   : > { %2992 = vmatpush2.bf16.msra.mxu1 %v13714_v59  ;;  %v13836_v59 = vld [vmem:[#allocation4 + $0x48c] ss:$16 sps:$4 sm:$0xff]  }
 0x497   : > { %3367 = vmatprep.subr.bf16.mxu1 %v13719_v60  ;;  %v13819_v60 = vld [vmem:[#allocation4 + $0x4c0] ss:$16 sps:$4 sm:$0xff]  }
 0x499   : > { %2994 = vmatmul.mubr.bf16.vlgmr.msra.gmra.mxu1 %v16039_v54 }
 0x49a   : > { %3368 = vmatpush1.bf16.msra.mxu1 %v13717_v62  ;;  %v13842_v62 = vld [vmem:[#allocation4 + $0x46c] ss:$16 sps:$4 sm:$0xff]  }
 0x49b   : > { %3369 = vmatprep.subr.bf16.mxu1 %v13722_v5  ;;  %v13833_v5 = vld [vmem:[#allocation4 + $0x484] ss:$16 sps:$4 sm:$0xff]  }
 0x49e   : > { %3370 = vmatpush1.bf16.msra.mxu1 %v13720_v9  ;;  %v13848_v9 = vld [vmem:[#allocation4 + $0x44c] ss:$16 sps:$4 sm:$0xff]  }
 0x49f   : > { %3371 = vmatprep.subr.bf16.mxu1 %v13725_v12  ;;  %v13846_v12 = vld [vmem:[#allocation4 + $0x448] ss:$16 sps:$4 sm:$0xff]  }
 0x4a2   : > { %3372 = vmatpush1.bf16.msra.mxu1 %v13723_v15  ;;  %v13837_v15 = vld [vmem:[#allocation4 + $0x460] ss:$16 sps:$4 sm:$0xff]  }
 0x4a3   : > { %3373 = vmatprep.subr.bf16.mxu1 %v13728_v18  ;;  %v13852_v18 = vld [vmem:[#allocation4 + $0x428] ss:$16 sps:$4 sm:$0xff]  }
 0x4a6   : > { %3374 = vmatpush1.bf16.msra.mxu1 %v13726_v19  ;;  %v13860_v19 = vld [vmem:[#allocation4 + $0x40c] ss:$16 sps:$4 sm:$0xff]  }
 0x4a7   : > { %3375 = vmatprep.subr.bf16.mxu1 %v13731_v20  ;;  %v13843_v20 = vld [vmem:[#allocation4 + $0x440] ss:$16 sps:$4 sm:$0xff]  }
 0x4aa   : > { %3376 = vmatpush1.bf16.msra.mxu1 %v13729_v21  ;;  %v13851_v21 = vld [vmem:[#allocation4 + $0x424] ss:$16 sps:$4 sm:$0xff]  }
 0x4ab   : > { %3377 = vmatprep.subr.bf16.mxu1 %v13734_v22  ;;  %v13858_v22 = vld [vmem:[#allocation4 + $0x408] ss:$16 sps:$4 sm:$0xff]  }
 0x4ae   : > { %3378 = vmatpush1.bf16.msra.mxu1 %v13732_v23  ;;  %v13866_v23 = vld [vmem:[#allocation4 + $0x5ec] ss:$16 sps:$4 sm:$0xff]  }
 0x4af   : > { %3379 = vmatprep.subr.bf16.mxu1 %v13737_v25  ;;  %v13849_v25 = vld [vmem:[#allocation4 + $0x420] ss:$16 sps:$4 sm:$0xff]  }
 0x4b2   : > { %3380 = vmatpush1.bf16.msra.mxu1 %v13735_v26  ;;  %v13857_v26 = vld [vmem:[#allocation4 + $0x404] ss:$16 sps:$4 sm:$0xff]  }
 0x4b3   : > { %3381 = vmatprep.subr.bf16.mxu1 %v13740_v27  ;;  %v13864_v27 = vld [vmem:[#allocation4 + $0x5e8] ss:$16 sps:$4 sm:$0xff]  }
 0x4b6   : > { %3382 = vmatpush1.bf16.msra.mxu1 %v13738_v29  ;;  %v13872_v29 = vld [vmem:[#allocation4 + $0x5cc] ss:$16 sps:$4 sm:$0xff]  }
 0x4b7   : > { %3383 = vmatprep.subr.bf16.mxu1 %v13743_v30  ;;  %v13855_v30 = vld [vmem:[#allocation4 + $0x400] ss:$16 sps:$4 sm:$0xff]  }
 0x4ba   : > { %3384 = vmatpush2.bf16.msra.mxu1 %v13741_v31  ;;  %v13863_v31 = vld [vmem:[#allocation4 + $0x5e4] ss:$16 sps:$4 sm:$0xff]  }
 0x4bb   : > { %3385 = vmatprep.subr.bf16.mxu1 %v13746_v38  ;;  %v13870_v38 = vld [vmem:[#allocation4 + $0x5c8] ss:$16 sps:$4 sm:$0xff]  }
 0x4be   : > { %3386 = vmatpush2.bf16.msra.mxu1 %v13744_v13  ;;  %v13878_v13 = vld [vmem:[#allocation4 + $0x5ac] ss:$16 sps:$4 sm:$0xff]  }
 0x4bf   : > { %3387 = vmatprep.subr.bf16.mxu1 %v13749_v40  ;;  %v13861_v40 = vld [vmem:[#allocation4 + $0x5e0] ss:$16 sps:$4 sm:$0xff]  }
 0x4c2   : > { %3388 = vmatpush2.bf16.msra.mxu1 %v13747_v43  ;;  %v13869_v43 = vld [vmem:[#allocation4 + $0x5c4] ss:$16 sps:$4 sm:$0xff]  }
 0x4c3   : > { %3389 = vmatprep.subr.bf16.mxu1 %v13752_v14  ;;  %v13876_v14 = vld [vmem:[#allocation4 + $0x5a8] ss:$16 sps:$4 sm:$0xff]  }
 0x4c6   : > { %3390 = vmatpush2.bf16.msra.mxu1 %v13750_v17  ;;  %v13884_v17 = vld [vmem:[#allocation4 + $0x58c] ss:$16 sps:$4 sm:$0xff]  }
 0x4c7   : > { %3391 = vmatprep.subr.bf16.mxu1 %v13755_v24  ;;  %v13867_v24 = vld [vmem:[#allocation4 + $0x5c0] ss:$16 sps:$4 sm:$0xff]  }
 0x4ca   : > { %3392 = vmatpush2.bf16.msra.mxu1 %v13753_v44  ;;  %v13875_v44 = vld [vmem:[#allocation4 + $0x5a4] ss:$16 sps:$4 sm:$0xff]  }
 0x4cb   : > { %3393 = vmatprep.subr.bf16.mxu1 %v13758_v45  ;;  %v13882_v45 = vld [vmem:[#allocation4 + $0x588] ss:$16 sps:$4 sm:$0xff]  }
 0x4ce   : > { %3394 = vmatpush2.bf16.msra.mxu1 %v13756_v46  ;;  %v13873_v46 = vld [vmem:[#allocation4 + $0x5a0] ss:$16 sps:$4 sm:$0xff]  }
 0x4cf   : > { %3395 = vmatprep.subr.bf16.mxu1 %v13761_v63  ;;  %v13881_v63 = vld [vmem:[#allocation4 + $0x584] ss:$16 sps:$4 sm:$0xff]  }
 0x4d2   : > { %3396 = vmatpush2.bf16.msra.mxu1 %v13759_v32  ;;  %v13879_v32 = vld [vmem:[#allocation4 + $0x580] ss:$16 sps:$4 sm:$0xff]  }
 0x4d3   : > { %3397 = vmatprep.subr.bf16.mxu1 %v13764_v47  ;;  %v13887_v47 = vld [vmem:[#allocation4 + $0x564] ss:$16 sps:$4 sm:$0xff]  }
 0x4d6   : > { %3398 = vmatpush2.bf16.msra.mxu1 %v13762_v4  ;;  %v13890_v4 = vld [vmem:[#allocation4 + $0x56c] ss:$16 sps:$4 sm:$0xff]  }
 0x4d7   : > { %3467 = vmatprep.subr.bf16.mxu1 %v16041_v55  ;;  %v13822_v55 = vld [vmem:[#allocation4 + $0x4c8] ss:$16 sps:$4 sm:$0xff]  }
 0x519   : > { %v2501_v49 = vpop.f32.mrf.mxu1 }
 0x51b   : > { %v2503_v37 = vpop.f32.mrf.mxu1 }
 0x51d   : > { %v2505_v50 = vpop.f32.mrf.mxu1 }
 0x51e   : > { %v2510_v51 = vpack.c.bf16 %v2505_v50, %v2501_v49  ;;  %v13888_v49 = vld [vmem:[#allocation4 + $0x568] ss:$16 sps:$4 sm:$0xff]   ;;  %v13896_v50 = vld [vmem:[#allocation4 + $0x54c] ss:$16 sps:$4 sm:$0xff]  }
 0x51f   : > { %v2507_v39 = vpop.f32.mrf.mxu1 }
 0x520   : > { %v2511_v36 = vpack.c.bf16 %v2507_v39, %v2503_v37  ;;  %v13893_v37 = vld [vmem:[#allocation4 + $0x544] ss:$16 sps:$4 sm:$0xff]   ;;  %v13891_v39 = vld [vmem:[#allocation4 + $0x540] ss:$16 sps:$4 sm:$0xff]  }
 0x522   : > { %3399 = vmatprep.mubr.bf16.mxu1 %v2511_v36  ;;  %3442 = vmatprep.mubr.bf16.mxu0 %v2511_v36  ;;  %v13894_v36 = vld [vmem:[#allocation4 + $0x548] ss:$16 sps:$4 sm:$0xff]  }
 0x523   : > { %3400 = vmatmul.mubr.bf16.vlgmr.msra.gmra.mxu1 %v2510_v51  ;;  %3443 = vmatmul.mubr.bf16.vlgmr.msra.gmra.mxu0 %v2510_v51  ;;  %v13899_v51 = vld [vmem:[#allocation4 + $0x524] ss:$16 sps:$4 sm:$0xff]  }
 0x524   : > { %3468 = vmatpush1.bf16.msra.mxu1 %v16039_v54  ;;  %3485 = vmatprep.mubr.bf16.mxu1 %v15569_v48  ;;  %v13827_v54 = vld [vmem:[#allocation4 + $0x4a4] ss:$16 sps:$4 sm:$0xff]  }
 0x525   : > { %3883 = vmatprep.subr.bf16.mxu1 %v13815_v52  ;;  %3927 = vmatpush1.bf16.msra.mxu0 %v13816_v53  ;;  %v13902_v52 = vld [vmem:[#allocation4 + $0x52c] ss:$16 sps:$4 sm:$0xff]   ;;  %v13897_v53 = vld [vmem:[#allocation4 + $0x520] ss:$16 sps:$4 sm:$0xff]  }
 0x526   : > { %3928 = vmatprep.subr.bf16.mxu0 %v13824_v42  ;;  %v13900_v42 = vld [vmem:[#allocation4 + $0x528] ss:$16 sps:$4 sm:$0xff]  }
 0x529   : > { %3929 = vmatpush1.bf16.msra.mxu0 %v13822_v55  ;;  %v13905_v55 = vld [vmem:[#allocation4 + $0x504] ss:$16 sps:$4 sm:$0xff]  }
 0x52a   : > { %3930 = vmatprep.subr.bf16.mxu0 %v13830_v41  ;;  %v13908_v41 = vld [vmem:[#allocation4 + $0x50c] ss:$16 sps:$4 sm:$0xff]  }
 0x52b   : > { %12106 = vmatmul.mubr.msk.bf16.vlgmr.msra.gmra.mxu1 %vm1140_vm4, %v15959_v35  ;;  %v13839_v35 = vld [vmem:[#allocation4 + $0x464] ss:$16 sps:$4 sm:$0xff]  }
 0x52c   : > { %3884 = vmatpush1.bf16.msra.mxu1 %v13813_v56  ;;  %v13903_v56 = vld [vmem:[#allocation4 + $0x500] ss:$16 sps:$4 sm:$0xff]  }
 0x52d   : > { %3885 = vmatprep.subr.bf16.mxu1 %v13821_v57  ;;  %3931 = vmatpush1.bf16.msra.mxu0 %v13828_v58  ;;  %v13906_v57 = vld [vmem:[#allocation4 + $0x508] ss:$16 sps:$4 sm:$0xff]  }
 0x52e   : > { %3932 = vmatprep.subr.bf16.mxu0 %v13836_v59 }
 0x530   : > { %3886 = vmatpush1.bf16.msra.mxu1 %v13819_v60 }
 0x531   : > { %3887 = vmatprep.subr.bf16.mxu1 %v13827_v54  ;;  %3933 = vmatpush1.bf16.msra.mxu0 %v13834_v61 }
 0x532   : > { %3934 = vmatprep.subr.bf16.mxu0 %v13842_v62 }
 0x534   : > { %3888 = vmatpush1.bf16.msra.mxu1 %v13825_v0 }
 0x535   : > { %3889 = vmatprep.subr.bf16.mxu1 %v13833_v5  ;;  %3935 = vmatpush1.bf16.msra.mxu0 %v13840_v6 }
 0x536   : > { %3936 = vmatprep.subr.bf16.mxu0 %v13848_v9 }
 0x538   : > { %3890 = vmatpush1.bf16.msra.mxu1 %v13831_v10 }
 0x539   : > { %3891 = vmatprep.subr.bf16.mxu1 %v13839_v35  ;;  %3937 = vmatpush1.bf16.msra.mxu0 %v13846_v12 }
 0x53a   : > { %3938 = vmatprep.subr.bf16.mxu0 %v13854_v11 }
 0x53c   : > { %3892 = vmatpush1.bf16.msra.mxu1 %v13837_v15  ;;  %v3038_v15 = vpop.f32.mrf.mxu0 }
 0x53d   : > { %3893 = vmatprep.subr.bf16.mxu1 %v13845_v16  ;;  %3939 = vmatpush1.bf16.msra.mxu0 %v13852_v18 }
 0x53e   : > { %3940 = vmatprep.subr.bf16.mxu0 %v13860_v19  ;;  %v3040_v16 = vpop.f32.mrf.mxu0 }
 0x540   : > { %3894 = vmatpush1.bf16.msra.mxu1 %v13843_v20  ;;  %v3042_v18 = vpop.f32.mrf.mxu0 }
 0x541   : > { %3895 = vmatprep.subr.bf16.mxu1 %v13851_v21  ;;  %3941 = vmatpush1.bf16.msra.mxu0 %v13858_v22 }
 0x542   : > { %3942 = vmatprep.subr.bf16.mxu0 %v13866_v23  ;;  %v3044_v19 = vpop.f32.mrf.mxu0 }
 0x544   : > { %3896 = vmatpush1.bf16.msra.mxu1 %v13849_v25  ;;  %v3977_v25 = vld [vmem:[%s15598_s21] sm:$0xf] }
 0x545   : > { %3897 = vmatprep.subr.bf16.mxu1 %v13857_v26  ;;  %3943 = vmatpush2.bf16.msra.mxu0 %v13864_v27 }
 0x546   : > { %3944 = vmatprep.subr.bf16.mxu0 %v13872_v29 }
 0x548   : > { %3898 = vmatpush1.bf16.msra.mxu1 %v13855_v30  ;;  %v16060_v30 = vmul.u32 2, %v15900_v2 }
 0x549   : > { %3899 = vmatprep.subr.bf16.mxu1 %v13863_v31  ;;  %3945 = vmatpush2.bf16.msra.mxu0 %v13870_v38  ;;  %v3993_v38 = vsub.s32 3, %v15900_v2 }
 0x54a   : > { %3946 = vmatprep.subr.bf16.mxu0 %v13878_v13  ;;  %vm4177_vm15 = vcmp.eq.s32.totalorder %v15902_v3, %v16060_v30 }
 0x54c   : > { %3900 = vmatpush2.bf16.msra.mxu1 %v13861_v40  ;;  %v3982_v40 = vrot.slane %v3977_v25, %v16026_v28 }
 0x54d   : > { %3901 = vmatprep.subr.bf16.mxu1 %v13869_v43  ;;  %3947 = vmatpush2.bf16.msra.mxu0 %v13876_v14 }
 0x54e   : > { %3948 = vmatprep.subr.bf16.mxu0 %v13884_v17 }
 0x550   : > { %3902 = vmatpush2.bf16.msra.mxu1 %v13867_v24 }
 0x551   : > { %3903 = vmatprep.subr.bf16.mxu1 %v13875_v44  ;;  %3949 = vmatpush2.bf16.msra.mxu0 %v13882_v45  ;;  %v3986_v44 = vrot.slane %v3977_v25, %v16031_v8 }
 0x552   : > { %3950 = vmatprep.subr.bf16.mxu0 %v13890_v4  ;;  %v4020_v4 = vadd.s32 4294967295, %v16060_v30 }
 0x554   : > { %3904 = vmatpush2.bf16.msra.mxu1 %v13873_v46  ;;  %vm4021_vm14 = vcmp.eq.s32.totalorder %v15902_v3, %v4020_v4  ;;  %v13936_v4 = vld [vmem:[#allocation6 + $0x350] ss:$8 sps:$4 sm:$0xff]  }
 0x555   : > { %3905 = vmatprep.subr.bf16.mxu1 %v13881_v63  ;;  %3951 = vmatpush2.bf16.msra.mxu0 %v13888_v49  ;;  %v3989_v63 = vsub.s32 2, %v15900_v2 }
 0x556   : > { %3952 = vmatprep.subr.bf16.mxu0 %v13896_v50  ;;  %v3994_v50 = vrot.slane %v3977_v25, %v3993_v38  ;;  %v13915_v38 = vld [vmem:[#allocation6 + $0x250] ss:$8 sps:$4 sm:$0xff]  }
 0x558   : > { %3906 = vmatpush2.bf16.msra.mxu1 %v13879_v32 }
 0x559   : > { %3907 = vmatprep.subr.bf16.mxu1 %v13887_v47  ;;  %3953 = vmatpush2.bf16.msra.mxu0 %v13894_v36  ;;  %v2995_v58 = vpop.f32.mrf.mxu1 }
 0x55a   : > { %3954 = vmatprep.subr.bf16.mxu0 %v13902_v52 }
 0x55b   : > { %v2997_v59 = vpop.f32.mrf.mxu1 }
 0x55c   : > { %3908 = vmatpush2.bf16.msra.mxu1 %v13885_v34 }
 0x55d   : > { %3909 = vmatprep.subr.bf16.mxu1 %v13893_v37  ;;  %3955 = vmatpush2.bf16.msra.mxu0 %v13900_v42  ;;  %v2999_v60 = vpop.f32.mrf.mxu1 }
 0x55e   : > { %3956 = vmatprep.subr.bf16.mxu0 %v13908_v41 }
 0x55f   : > { %v3001_v54 = vpop.f32.mrf.mxu1 }
 0x560   : > { %3910 = vmatpush2.bf16.msra.mxu1 %v13891_v39 }
 0x561   : > { %3911 = vmatprep.subr.bf16.mxu1 %v13899_v51  ;;  %3957 = vmatpush2.bf16.msra.mxu0 %v13906_v57 }
 0x564   : > { %3912 = vmatpush2.bf16.msra.mxu1 %v13897_v53 }
 0x565   : > { %3913 = vmatprep.subr.bf16.mxu1 %v13905_v55 }
 0x568   : > { %3914 = vmatpush2.bf16.msra.mxu1 %v13903_v56 }
 0x5e3   : > { %v3401_v61 = vpop.f32.mrf.mxu1  ;;  %v3444_v20 = vpop.f32.mrf.mxu0 }
 0x5e4   : > { %v3402_v26 = vadd.f32 %v3401_v61, %v2995_v58  ;;  %v3445_v39 = vadd.f32 %v3444_v20, %v3038_v15  ;;  %v3990_v58 = vrot.slane %v3977_v25, %v3989_v63  ;;  %v13909_v25 = vld [vmem:[#allocation6 + $0x270] ss:$8 sps:$4 sm:$0xff]   ;;  %v13927_v63 = vld [vmem:[#allocation6 + $0x220] ss:$8 sps:$4 sm:$0xff]  }
 0x5e5   : > { %v3403_v62 = vpop.f32.mrf.mxu1  ;;  %v3446_v21 = vpop.f32.mrf.mxu0 }
 0x5e6   : > { %v3404_v31 = vadd.f32 %v3403_v62, %v2997_v59  ;;  %v3447_v17 = vadd.f32 %v3446_v21, %v3040_v16 }
 0x5e7   : > { %v3405_v0 = vpop.f32.mrf.mxu1  ;;  %v3448_v22 = vpop.f32.mrf.mxu0 }
 0x5e8   : > { %v3406_v45 = vadd.f32 %v3405_v0, %v2999_v60  ;;  %v3449_v46 = vadd.f32 %v3448_v22, %v3042_v18  ;;  %v13911_v18 = vld [vmem:[#allocation6 + $0x274] ss:$8 sps:$4 sm:$0xff]  }
 0x5e9   : > { %v3407_v5 = vpop.f32.mrf.mxu1  ;;  %v3450_v23 = vpop.f32.mrf.mxu0 }
 0x5ea   : > { %v3408_v34 = vadd.f32 %v3407_v5, %v3001_v54  ;;  %v3451_v49 = vadd.f32 %v3450_v23, %v3044_v19 }
 0x5eb   : > { %v3487_v6 = vpop.f32.mrf.mxu1 }
 0x5ed   : > { %v3489_v9 = vpop.f32.mrf.mxu1 }
 0x5ef   : > { %v3491_v10 = vpop.f32.mrf.mxu1 }
 0x5f0   : > { %v3496_v11 = vpack.c.bf16 %v3491_v10, %v3487_v6 }
 0x5f1   : > { %v3493_v35 = vpop.f32.mrf.mxu1 }
 0x5f2   : > { %v3497_v12 = vpack.c.bf16 %v3493_v35, %v3489_v9 }
 0x5f4   : > { %3915 = vmatprep.mubr.bf16.mxu1 %v3497_v12  ;;  %3958 = vmatprep.mubr.bf16.mxu0 %v3497_v12  ;;  %v4022_v12 = vsel %vm4021_vm14, 1.0, %v15567_v1 }
 0x5f5   : > { %3916 = vmatmul.mubr.bf16.vlgmr.msra.gmra.mxu1 %v3496_v11  ;;  %3959 = vmatmul.mubr.bf16.vlgmr.msra.gmra.mxu0 %v3496_v11  ;;  %v4178_v11 = vsel %vm4177_vm15, 1.0, %v15567_v1  ;;  %v16080_v21 = vpack.c.bf16 %v4022_v12, %v4022_v12  ;;  %v13977_v12 = vld [vmem:[#allocation6 + $0x2a4] ss:$8 sps:$4 sm:$0xff]  }
 0x5f6   : > { %4059 = vmatprep.mubr.bf16.mxu1 %v15569_v48  ;;  %4215 = vmatprep.mubr.bf16.mxu0 %v15569_v48  ;;  %v16082_v22 = vpack.c.bf16 %v4178_v11, %v4178_v11  ;;  %v13978_v11 = vld [vmem:[#allocation6 + $0x3e0] ss:$8 sps:$4 sm:$0xff]  }
 0x6b5   : > { %v3917_v27 = vpop.f32.mrf.mxu1  ;;  %v3960_v29 = vpop.f32.mrf.mxu0 }
 0x6b6   : > { %v3969_v13 = vadd.f32 %v3917_v27, %v3402_v26  ;;  %v3971_v57 = vadd.f32 %v3960_v29, %v3445_v39  ;;  %v13914_v27 = vld [vmem:[#allocation6 + $0x264] ss:$8 sps:$4 sm:$0xff]   ;;  %v13912_v29 = vld [vmem:[#allocation6 + $0x260] ss:$8 sps:$4 sm:$0xff]  }
 0x6b7   : > { %v3919_v43 = vpop.f32.mrf.mxu1  ;;  %v3962_v14 = vpop.f32.mrf.mxu0  ;;  %v13939_v39 = vld [vmem:[#allocation6 + $0x200] ss:$8 sps:$4 sm:$0xff]  }
 0x6b8   : > { %v3970_v24 = vadd.f32 %v3919_v43, %v3404_v31  ;;  %v3972_v37 = vadd.f32 %v3962_v14, %v3447_v17  ;;  %v3999_v36 = vadd.f32 %v3982_v40, %v3969_v13  ;;  %v4001_v10 = vadd.f32 %v3990_v58, %v3971_v57  ;;  %v13917_v31 = vld [vmem:[#allocation6 + $0x254] ss:$8 sps:$4 sm:$0xff]   ;;  %v13918_v43 = vld [vmem:[#allocation6 + $0x240] ss:$8 sps:$4 sm:$0xff]   ;;  %v13924_v17 = vld [vmem:[#allocation6 + $0x370] ss:$8 sps:$4 sm:$0xff]  }
 0x6b9   : > { %v3921_v32 = vpop.f32.mrf.mxu1  ;;  %v3964_v47 = vpop.f32.mrf.mxu0  ;;  %v13926_v13 = vld [vmem:[#allocation6 + $0x374] ss:$8 sps:$4 sm:$0xff]  }
 0x6ba   : > { %v3973_v51 = vadd.f32 %v3921_v32, %v3406_v45  ;;  %v3975_v52 = vadd.f32 %v3964_v47, %v3449_v46  ;;  %v4000_v55 = vadd.f32 %v3986_v44, %v3970_v24  ;;  %v4002_v59 = vadd.f32 %v3994_v50, %v3972_v37  ;;  %v13923_v14 = vld [vmem:[#allocation6 + $0x234] ss:$8 sps:$4 sm:$0xff]   ;;  %v13921_v24 = vld [vmem:[#allocation6 + $0x230] ss:$8 sps:$4 sm:$0xff]   ;;  %v13929_v45 = vld [vmem:[#allocation6 + $0x224] ss:$8 sps:$4 sm:$0xff]  }
 0x6bb   : > { %v3923_v53 = vpop.f32.mrf.mxu1  ;;  %v3966_v42 = vpop.f32.mrf.mxu0  ;;  %v4007_v61 = vmax.f32 %v3999_v36, 0.0  ;;  %v4009_v23 = vmax.f32 %v4001_v10, 0.0  ;;  %v13930_v46 = vld [vmem:[#allocation6 + $0x360] ss:$8 sps:$4 sm:$0xff]   ;;  %v13938_v32 = vld [vmem:[#allocation6 + $0x354] ss:$8 sps:$4 sm:$0xff]  }
 0x6bc   : > { %v3974_v41 = vadd.f32 %v3923_v53, %v3408_v34  ;;  %v3976_v56 = vadd.f32 %v3966_v42, %v3451_v49  ;;  %v4003_v2 = vadd.f32 %v3982_v40, %v3973_v51  ;;  %v4005_v0 = vadd.f32 %v3990_v58, %v3975_v52  ;;  %v13920_v40 = vld [vmem:[#allocation6 + $0x244] ss:$8 sps:$4 sm:$0xff]   ;;  %v13935_v47 = vld [vmem:[#allocation6 + $0x214] ss:$8 sps:$4 sm:$0xff]   ;;  %v13933_v34 = vld [vmem:[#allocation6 + $0x210] ss:$8 sps:$4 sm:$0xff]  }
 0x6bd   : > { %v4008_v5 = vmax.f32 %v4000_v55, 0.0  ;;  %v4010_v15 = vmax.f32 %v4002_v59, 0.0  ;;  %v13944_v49 = vld [vmem:[#allocation6 + $0x344] ss:$8 sps:$4 sm:$0xff]   ;;  %v13950_v36 = vld [vmem:[#allocation6 + $0x334] ss:$8 sps:$4 sm:$0xff]  }
 0x6be   : > { %v4004_v60 = vadd.f32 %v3986_v44, %v3974_v41  ;;  %v4006_v54 = vadd.f32 %v3994_v50, %v3976_v56  ;;  %v4011_v62 = vmax.f32 %v4003_v2, 0.0  ;;  %v4013_v19 = vmax.f32 %v4005_v0, 0.0  ;;  %v13932_v44 = vld [vmem:[#allocation6 + $0x364] ss:$8 sps:$4 sm:$0xff]   ;;  %v13942_v50 = vld [vmem:[#allocation6 + $0x340] ss:$8 sps:$4 sm:$0xff]  }
 0x6bf   : > { %v13941_v37 = vld [vmem:[#allocation6 + $0x204] ss:$8 sps:$4 sm:$0xff]   ;;  %v13947_v51 = vld [vmem:[#allocation6 + $0x2f4] ss:$8 sps:$4 sm:$0xff]   ;;  %v13948_v52 = vld [vmem:[#allocation6 + $0x330] ss:$8 sps:$4 sm:$0xff]  }
 0x6c0   : > { %v4012_v6 = vmax.f32 %v4004_v60, 0.0  ;;  %v4014_v9 = vmax.f32 %v4006_v54, 0.0  ;;  %v16070_v35 = vpack.c.bf16 %v4011_v62, %v4007_v61  ;;  %v16087_v26 = vpack.c.bf16 %v4013_v19, %v4009_v23  ;;  %v13945_v53 = vld [vmem:[#allocation6 + $0x2f0] ss:$8 sps:$4 sm:$0xff]   ;;  %v13956_v42 = vld [vmem:[#allocation6 + $0x324] ss:$8 sps:$4 sm:$0xff]  }
 0x6c1   : > { %v13953_v55 = vld [vmem:[#allocation6 + $0x2e4] ss:$8 sps:$4 sm:$0xff]   ;;  %v13954_v41 = vld [vmem:[#allocation6 + $0x320] ss:$8 sps:$4 sm:$0xff]   ;;  %v13962_v57 = vld [vmem:[#allocation6 + $0x314] ss:$8 sps:$4 sm:$0xff]  }
 0x6c2   : > { %v16074_v16 = vpack.c.bf16 %v4012_v6, %v4008_v5  ;;  %v16078_v20 = vpack.c.bf16 %v4014_v9, %v4010_v15  ;;  %v13951_v56 = vld [vmem:[#allocation6 + $0x2e0] ss:$8 sps:$4 sm:$0xff]   ;;  %v13959_v58 = vld [vmem:[#allocation6 + $0x2d4] ss:$8 sps:$4 sm:$0xff]   ;;  %v13960_v2 = vld [vmem:[#allocation6 + $0x310] ss:$8 sps:$4 sm:$0xff]  }
 0x6c3   : > { %v13957_v59 = vld [vmem:[#allocation6 + $0x2d0] ss:$8 sps:$4 sm:$0xff]   ;;  %v13968_v60 = vld [vmem:[#allocation6 + $0x304] ss:$8 sps:$4 sm:$0xff]   ;;  %v13966_v61 = vld [vmem:[#allocation6 + $0x300] ss:$8 sps:$4 sm:$0xff]  }
 0x6c4   : > { %4041 = vmatprep.subr.bf16.mxu1 %v16074_v16  ;;  %4197 = vmatprep.subr.bf16.mxu0 %v16074_v16  ;;  %v13965_v54 = vld [vmem:[#allocation6 + $0x2c4] ss:$8 sps:$4 sm:$0xff]   ;;  %v13963_v62 = vld [vmem:[#allocation6 + $0x2c0] ss:$8 sps:$4 sm:$0xff]   ;;  %v13974_v0 = vld [vmem:[#allocation6 + $0x3f4] ss:$8 sps:$4 sm:$0xff]  }
 0x6c5   : > { %4042 = vmatpush1.bf16.msra.mxu1 %v16070_v35  ;;  %4198 = vmatpush1.bf16.msra.mxu0 %v16070_v35  ;;  %v13971_v5 = vld [vmem:[#allocation6 + $0x2b4] ss:$8 sps:$4 sm:$0xff]   ;;  %v13972_v6 = vld [vmem:[#allocation6 + $0x3f0] ss:$8 sps:$4 sm:$0xff]   ;;  %v13980_v10 = vld [vmem:[#allocation6 + $0x3e4] ss:$8 sps:$4 sm:$0xff]  }
 0x6c6   : > { %4082 = vmatprep.subr.bf16.mxu1 %v16078_v20  ;;  %4654 = vmatprep.subr.bf16.mxu0 %v13911_v18  ;;  %v13969_v9 = vld [vmem:[#allocation6 + $0x2b0] ss:$8 sps:$4 sm:$0xff]   ;;  %v13975_v15 = vld [vmem:[#allocation6 + $0x2a0] ss:$8 sps:$4 sm:$0xff]   ;;  %v13986_v18 = vld [vmem:[#allocation6 + $0x3d4] ss:$8 sps:$4 sm:$0xff]  }
 0x6c7   : > { %v13983_v19 = vld [vmem:[#allocation6 + $0x294] ss:$8 sps:$4 sm:$0xff]   ;;  %v13984_v23 = vld [vmem:[#allocation6 + $0x3d0] ss:$8 sps:$4 sm:$0xff]  }
 0x6c8   : > { %12171 = vmatmul.mubr.msk.bf16.vlgmr.msra.gmra.mxu1 %vm1140_vm4, %v16080_v21  ;;  %12173 = vmatmul.mubr.msk.bf16.vlgmr.msra.gmra.mxu0 %vm1140_vm4, %v16082_v22 }
 0x6c9   : > { %4083 = vmatpush1.bf16.msra.mxu1 %v16087_v26  ;;  %4100 = vmatprep.mubr.bf16.mxu1 %v15569_v48 }
 0x6ca   : > { %4238 = vmatprep.subr.bf16.mxu1 %v16078_v20  ;;  %4655 = vmatpush1.bf16.msra.mxu0 %v13909_v25  ;;  %v13981_v25 = vld [vmem:[#allocation6 + $0x290] ss:$8 sps:$4 sm:$0xff]  }
 0x6cb   : > { %4656 = vmatprep.subr.bf16.mxu0 %v13914_v27  ;;  %v13989_v27 = vld [vmem:[#allocation6 + $0x284] ss:$8 sps:$4 sm:$0xff]  }
 0x6ce   : > { %4657 = vmatpush1.bf16.msra.mxu0 %v13912_v29  ;;  %v13992_v29 = vld [vmem:[#allocation6 + $0x3c4] ss:$8 sps:$4 sm:$0xff]  }
 0x6cf   : > { %4658 = vmatprep.subr.bf16.mxu0 %v13917_v31  ;;  %v13987_v31 = vld [vmem:[#allocation6 + $0x280] ss:$8 sps:$4 sm:$0xff]  }
 0x6d0   : > { %12172 = vmatmul.mubr.msk.bf16.vlgmr.msra.gmra.mxu1 %vm1140_vm4, %v16080_v21 }
 0x6d1   : > { %4239 = vmatpush1.bf16.msra.mxu1 %v16087_v26  ;;  %4256 = vmatprep.mubr.bf16.mxu1 %v15569_v48 }
 0x6d2   : > { %4659 = vmatpush1.bf16.msra.mxu0 %v13915_v38  ;;  %4695 = vmatprep.subr.bf16.mxu1 %v13926_v13  ;;  %v13990_v38 = vld [vmem:[#allocation6 + $0x3c0] ss:$8 sps:$4 sm:$0xff]   ;;  %v13995_v13 = vld [vmem:[#allocation6 + $0x3b4] ss:$8 sps:$4 sm:$0xff]  }
 0x6d3   : > { %4660 = vmatprep.subr.bf16.mxu0 %v13920_v40  ;;  %v13998_v40 = vld [vmem:[#allocation6 + $0x74] ss:$8 sps:$4 sm:$0xff]  }
 0x6d6   : > { %4661 = vmatpush1.bf16.msra.mxu0 %v13918_v43  ;;  %v13993_v43 = vld [vmem:[#allocation6 + $0x3b0] ss:$8 sps:$4 sm:$0xff]  }
 0x6d7   : > { %4662 = vmatprep.subr.bf16.mxu0 %v13923_v14  ;;  %v14001_v14 = vld [vmem:[#allocation6 + $0x3a4] ss:$8 sps:$4 sm:$0xff]  }
 0x6d8   : > { %12174 = vmatmul.mubr.msk.bf16.vlgmr.msra.gmra.mxu1 %vm1140_vm4, %v16082_v22 }
 0x6d9   : > { %4696 = vmatpush1.bf16.msra.mxu1 %v13924_v17  ;;  %v13999_v17 = vld [vmem:[#allocation6 + $0x3a0] ss:$8 sps:$4 sm:$0xff]  }
 0x6da   : > { %4663 = vmatpush1.bf16.msra.mxu0 %v13921_v24  ;;  %4697 = vmatprep.subr.bf16.mxu1 %v13932_v44  ;;  %v14005_v24 = vld [vmem:[#allocation6 + $0x390] ss:$8 sps:$4 sm:$0xff]   ;;  %v14007_v44 = vld [vmem:[#allocation6 + $0x394] ss:$8 sps:$4 sm:$0xff]  }
 0x6db   : > { %4664 = vmatprep.subr.bf16.mxu0 %v13929_v45  ;;  %v14013_v45 = vld [vmem:[#allocation6 + $0x384] ss:$8 sps:$4 sm:$0xff]  }
 0x6dd   : > { %4698 = vmatpush1.bf16.msra.mxu1 %v13930_v46  ;;  %v14011_v46 = vld [vmem:[#allocation6 + $0x380] ss:$8 sps:$4 sm:$0xff]  }
 0x6de   : > { %4665 = vmatpush1.bf16.msra.mxu0 %v13927_v63  ;;  %4699 = vmatprep.subr.bf16.mxu1 %v13938_v32  ;;  %v14022_v63 = vld [vmem:[#allocation6 + $0x174] ss:$8 sps:$4 sm:$0xff]  }
 0x6df   : > { %4666 = vmatprep.subr.bf16.mxu0 %v13935_v47 }
 0x6e1   : > { %4700 = vmatpush1.bf16.msra.mxu1 %v13936_v4 }
 0x6e2   : > { %4667 = vmatpush1.bf16.msra.mxu0 %v13933_v34  ;;  %4701 = vmatprep.subr.bf16.mxu1 %v13944_v49 }
 0x6e3   : > { %4668 = vmatprep.subr.bf16.mxu0 %v13941_v37 }
 0x6e5   : > { %4702 = vmatpush1.bf16.msra.mxu1 %v13942_v50  ;;  %v13996_v50 = vld [vmem:[#allocation6 + $0x70] ss:$8 sps:$4 sm:$0xff]  }
 0x6e6   : > { %4669 = vmatpush1.bf16.msra.mxu0 %v13939_v39  ;;  %4703 = vmatprep.subr.bf16.mxu1 %v13950_v36  ;;  %v14004_v36 = vld [vmem:[#allocation6 + $0x64] ss:$8 sps:$4 sm:$0xff]  }
 0x6e7   : > { %4670 = vmatprep.subr.bf16.mxu0 %v13947_v51 }
 0x6e9   : > { %4704 = vmatpush1.bf16.msra.mxu1 %v13948_v52 }
 0x6ea   : > { %4671 = vmatpush2.bf16.msra.mxu0 %v13945_v53  ;;  %4705 = vmatprep.subr.bf16.mxu1 %v13956_v42 }
 0x6eb   : > { %4672 = vmatprep.subr.bf16.mxu0 %v13953_v55  ;;  %v14002_v55 = vld [vmem:[#allocation6 + $0x60] ss:$8 sps:$4 sm:$0xff]  }
 0x6ed   : > { %4706 = vmatpush1.bf16.msra.mxu1 %v13954_v41 }
 0x6ee   : > { %4673 = vmatpush2.bf16.msra.mxu0 %v13951_v56  ;;  %4707 = vmatprep.subr.bf16.mxu1 %v13962_v57  ;;  %v14010_v56 = vld [vmem:[#allocation6 + $0x54] ss:$8 sps:$4 sm:$0xff]  }
 0x6ef   : > { %4674 = vmatprep.subr.bf16.mxu0 %v13959_v58  ;;  %v14008_v58 = vld [vmem:[#allocation6 + $0x50] ss:$8 sps:$4 sm:$0xff]  }
 0x6f1   : > { %4708 = vmatpush1.bf16.msra.mxu1 %v13960_v2 }
 0x6f2   : > { %4675 = vmatpush2.bf16.msra.mxu0 %v13957_v59  ;;  %4709 = vmatprep.subr.bf16.mxu1 %v13968_v60  ;;  %v14016_v59 = vld [vmem:[#allocation6 + $0x44] ss:$8 sps:$4 sm:$0xff]  }
 0x6f3   : > { %4676 = vmatprep.subr.bf16.mxu0 %v13965_v54  ;;  %v14014_v54 = vld [vmem:[#allocation6 + $0x40] ss:$8 sps:$4 sm:$0xff]  }
 0x6f5   : > { %4710 = vmatpush1.bf16.msra.mxu1 %v13966_v61 }
 0x6f6   : > { %4677 = vmatpush2.bf16.msra.mxu0 %v13963_v62  ;;  %4711 = vmatprep.subr.bf16.mxu1 %v13974_v0  ;;  %v14019_v62 = vld [vmem:[#allocation6 + $0x34] ss:$8 sps:$4 sm:$0xff]  }
 0x6f7   : > { %4678 = vmatprep.subr.bf16.mxu0 %v13971_v5 }
 0x6f9   : > { %4712 = vmatpush2.bf16.msra.mxu1 %v13972_v6  ;;  %v14017_v6 = vld [vmem:[#allocation6 + $0x30] ss:$8 sps:$4 sm:$0xff]  }
 0x6fa   : > { %4679 = vmatpush2.bf16.msra.mxu0 %v13969_v9  ;;  %4713 = vmatprep.subr.bf16.mxu1 %v13980_v10  ;;  %v14020_v9 = vld [vmem:[#allocation6 + $0x170] ss:$8 sps:$4 sm:$0xff]  }
 0x6fb   : > { %4680 = vmatprep.subr.bf16.mxu0 %v13977_v12 }
 0x6fd   : > { %4714 = vmatpush2.bf16.msra.mxu1 %v13978_v11  ;;  %v14025_v11 = vld [vmem:[#allocation6 + $0x24] ss:$8 sps:$4 sm:$0xff]  }
 0x6fe   : > { %4681 = vmatpush2.bf16.msra.mxu0 %v13975_v15  ;;  %4715 = vmatprep.subr.bf16.mxu1 %v13986_v18  ;;  %v14028_v15 = vld [vmem:[#allocation6 + $0x164] ss:$8 sps:$4 sm:$0xff]  }
 0x6ff   : > { %4682 = vmatprep.subr.bf16.mxu0 %v13983_v19 }
 0x701   : > { %4716 = vmatpush2.bf16.msra.mxu1 %v13984_v23  ;;  %v14023_v23 = vld [vmem:[#allocation6 + $0x20] ss:$8 sps:$4 sm:$0xff]  }
 0x702   : > { %4683 = vmatpush2.bf16.msra.mxu0 %v13981_v25  ;;  %4717 = vmatprep.subr.bf16.mxu1 %v13992_v29  ;;  %v14026_v25 = vld [vmem:[#allocation6 + $0x160] ss:$8 sps:$4 sm:$0xff]   ;;  %v14034_v29 = vld [vmem:[#allocation6 + $0x154] ss:$8 sps:$4 sm:$0xff]  }
 0x703   : > { %4684 = vmatprep.subr.bf16.mxu0 %v13989_v27  ;;  %v14031_v27 = vld [vmem:[#allocation6 + $0x14] ss:$8 sps:$4 sm:$0xff]  }
 0x705   : > { %4718 = vmatpush2.bf16.msra.mxu1 %v13990_v38  ;;  %v14032_v38 = vld [vmem:[#allocation6 + $0x150] ss:$8 sps:$4 sm:$0xff]  }
 0x706   : > { %4685 = vmatpush2.bf16.msra.mxu0 %v13987_v31  ;;  %4719 = vmatprep.subr.bf16.mxu1 %v13995_v13  ;;  %v14029_v31 = vld [vmem:[#allocation6 + $0x10] ss:$8 sps:$4 sm:$0xff]   ;;  %v14037_v13 = vld [vmem:[#allocation6 + $0x4] ss:$8 sps:$4 sm:$0xff]  }
 0x707   : > { %5056 = vmatprep.subr.bf16.mxu0 %v13998_v40  ;;  %v14040_v40 = vld [vmem:[#allocation6 + $0x144] ss:$8 sps:$4 sm:$0xff]  }
 0x709   : > { %4720 = vmatpush2.bf16.msra.mxu1 %v13993_v43  ;;  %v14035_v43 = vld [vmem:[#allocation6] ss:$8 sps:$4 sm:$0xff]  }
 0x70a   : > { %4721 = vmatprep.subr.bf16.mxu1 %v14001_v14  ;;  %v14038_v14 = vld [vmem:[#allocation6 + $0x140] ss:$8 sps:$4 sm:$0xff]  }
 0x70d   : > { %4722 = vmatpush2.bf16.msra.mxu1 %v13999_v17  ;;  %v14043_v17 = vld [vmem:[#allocation6 + $0xf4] ss:$8 sps:$4 sm:$0xff]  }
 0x70e   : > { %4723 = vmatprep.subr.bf16.mxu1 %v14007_v44  ;;  %v14041_v44 = vld [vmem:[#allocation6 + $0xf0] ss:$8 sps:$4 sm:$0xff]  }
 0x711   : > { %4724 = vmatpush2.bf16.msra.mxu1 %v14005_v24  ;;  %v14046_v24 = vld [vmem:[#allocation6 + $0x134] ss:$8 sps:$4 sm:$0xff]  }
 0x712   : > { %4725 = vmatprep.subr.bf16.mxu1 %v14013_v45  ;;  %v14044_v45 = vld [vmem:[#allocation6 + $0x130] ss:$8 sps:$4 sm:$0xff]  }
 0x715   : > { %4726 = vmatpush2.bf16.msra.mxu1 %v14011_v46  ;;  %v14049_v46 = vld [vmem:[#allocation6 + $0xe4] ss:$8 sps:$4 sm:$0xff]  }
 0x716   : > { %5097 = vmatprep.subr.bf16.mxu1 %v14022_v63  ;;  %v14052_v63 = vld [vmem:[#allocation6 + $0x124] ss:$8 sps:$4 sm:$0xff]  }
 0x788   : > { %v16102_v32 = vpop.f32.mrf.mxu1  ;;  %v4217_v47 = vpop.f32.mrf.mxu0 }
 0x789   : > { %v16104_v4 = vpack.c.bf16 %v4217_v47, %v4217_v47  ;;  %v14047_v47 = vld [vmem:[#allocation6 + $0xe0] ss:$8 sps:$4 sm:$0xff]  }
 0x78a   : > { %v4063_v34 = vpop.f32.mrf.mxu1  ;;  %v4219_v49 = vpop.f32.mrf.mxu0 }
 0x78b   : > { %v16106_v37 = vpack.c.bf16 %v4219_v49, %v4219_v49  ;;  %v4110_v52 = vpack.c.bf16 %v4063_v34, %v4063_v34  ;;  %v14050_v34 = vld [vmem:[#allocation6 + $0x120] ss:$8 sps:$4 sm:$0xff]   ;;  %v14055_v49 = vld [vmem:[#allocation6 + $0xd4] ss:$8 sps:$4 sm:$0xff]  }
 0x78c   : > { %v4065_v39 = vpop.f32.mrf.mxu1  ;;  %v4221_v51 = vpop.f32.mrf.mxu0 }
 0x78d   : > { %4686 = vmatprep.mubr.bf16.mxu0 %v16106_v37  ;;  %v14053_v39 = vld [vmem:[#allocation6 + $0xd0] ss:$8 sps:$4 sm:$0xff]   ;;  %v14061_v51 = vld [vmem:[#allocation6 + $0xc4] ss:$8 sps:$4 sm:$0xff]  }
 0x78e   : > { %v4066_v53 = vpop.f32.mrf.mxu1  ;;  %4687 = vmatmul.mubr.bf16.vlgmr.msra.gmra.mxu0 %v16104_v4  ;;  %v4222_v42 = vpop.f32.mrf.mxu0 }
 0x78f   : > { %5057 = vmatpush1.bf16.msra.mxu0 %v13996_v50  ;;  %5088 = vmatprep.mubr.bf16.mxu0 %v4110_v52  ;;  %v14058_v50 = vld [vmem:[#allocation6 + $0x114] ss:$8 sps:$4 sm:$0xff]   ;;  %v14064_v52 = vld [vmem:[#allocation6 + $0x104] ss:$8 sps:$4 sm:$0xff]   ;;  %v14059_v53 = vld [vmem:[#allocation6 + $0xc0] ss:$8 sps:$4 sm:$0xff]  }
 0x790   : > { %v16110_v41 = vpop.f32.mrf.mxu1  ;;  %5058 = vmatprep.subr.bf16.mxu0 %v14004_v36  ;;  %v14056_v36 = vld [vmem:[#allocation6 + $0x110] ss:$8 sps:$4 sm:$0xff]   ;;  %v14062_v42 = vld [vmem:[#allocation6 + $0x100] ss:$8 sps:$4 sm:$0xff]  }
 0x792   : > { %v4104_v57 = vpop.f32.mrf.mxu1 }
 0x793   : > { %5059 = vmatpush1.bf16.msra.mxu0 %v14002_v55  ;;  %v4112_v18 = vpack.c.bf16 %v4104_v57, %v4104_v57  ;;  %v14067_v55 = vld [vmem:[#allocation6 + $0xb4] ss:$8 sps:$4 sm:$0xff]   ;;  %v14065_v57 = vld [vmem:[#allocation6 + $0xb0] ss:$8 sps:$4 sm:$0xff]  }
 0x794   : > { %v4106_v2 = vpop.f32.mrf.mxu1  ;;  %5060 = vmatprep.subr.bf16.mxu0 %v14010_v56  ;;  %v14070_v56 = vld [vmem:[#allocation6 + $0x1f4] ss:$8 sps:$4 sm:$0xff]  }
 0x795   : > { %v14073_v2 = vld [vmem:[#allocation6 + $0xa4] ss:$8 sps:$4 sm:$0xff]  }
 0x796   : > { %v4107_v60 = vpop.f32.mrf.mxu1 }
 0x797   : > { %5061 = vmatpush1.bf16.msra.mxu0 %v14008_v58  ;;  %v14068_v58 = vld [vmem:[#allocation6 + $0x1f0] ss:$8 sps:$4 sm:$0xff]   ;;  %v14071_v60 = vld [vmem:[#allocation6 + $0xa0] ss:$8 sps:$4 sm:$0xff]  }
 0x798   : > { %v4258_v61 = vpop.f32.mrf.mxu1  ;;  %5062 = vmatprep.subr.bf16.mxu0 %v14016_v59  ;;  %v14076_v59 = vld [vmem:[#allocation6 + $0x1e4] ss:$8 sps:$4 sm:$0xff]  }
 0x799   : > { %v16114_v10 = vpack.c.bf16 %v4258_v61, %v4258_v61  ;;  %v14079_v61 = vld [vmem:[#allocation6 + $0x94] ss:$8 sps:$4 sm:$0xff]  }
 0x79a   : > { %v4260_v0 = vpop.f32.mrf.mxu1 }
 0x79b   : > { %v16112_v5 = vpack.c.bf16 %v4260_v0, %v4260_v0  ;;  %5063 = vmatpush1.bf16.msra.mxu0 %v14014_v54  ;;  %v14074_v54 = vld [vmem:[#allocation6 + $0x1e0] ss:$8 sps:$4 sm:$0xff]   ;;  %v14077_v0 = vld [vmem:[#allocation6 + $0x90] ss:$8 sps:$4 sm:$0xff]  }
 0x79c   : > { %v4262_v12 = vpop.f32.mrf.mxu1  ;;  %5064 = vmatprep.subr.bf16.mxu0 %v14019_v62  ;;  %v14082_v62 = vld [vmem:[#allocation6 + $0x1d4] ss:$8 sps:$4 sm:$0xff]  }
 0x79d   : > { %4727 = vmatprep.mubr.bf16.mxu1 %v16112_v5  ;;  %v14088_v12 = vld [vmem:[#allocation6 + $0x1c4] ss:$8 sps:$4 sm:$0xff]  }
 0x79e   : > { %v4263_v19 = vpop.f32.mrf.mxu1  ;;  %4728 = vmatmul.mubr.bf16.vlgmr.msra.gmra.mxu1 %v16114_v10 }
 0x79f   : > { %5065 = vmatpush1.bf16.msra.mxu0 %v14017_v6  ;;  %5098 = vmatpush1.bf16.msra.mxu1 %v14020_v9  ;;  %v14080_v6 = vld [vmem:[#allocation6 + $0x1d0] ss:$8 sps:$4 sm:$0xff]   ;;  %v14085_v9 = vld [vmem:[#allocation6 + $0x84] ss:$8 sps:$4 sm:$0xff]   ;;  %v5138_v19 = vadd.s32 1, %v16060_v30 }
 0x7a0   : > { %5129 = vmatprep.mubr.bf16.mxu1 %v4112_v18  ;;  %5066 = vmatprep.subr.bf16.mxu0 %v14025_v11  ;;  %v14083_v11 = vld [vmem:[#allocation6 + $0x80] ss:$8 sps:$4 sm:$0xff]   ;;  %v14091_v18 = vld [vmem:[#allocation6 + $0x1b4] ss:$8 sps:$4 sm:$0xff]  }
 0x7a1   : > { %5099 = vmatprep.subr.bf16.mxu1 %v14028_v15  ;;  %v14086_v15 = vld [vmem:[#allocation6 + $0x1c0] ss:$8 sps:$4 sm:$0xff]   ;;  %vm5139_vm1 = vcmp.eq.s32.totalorder %v15902_v3, %v5138_v19  ;;  %v14097_v30 = vld [vmem:[#allocation6 + $0x194] ss:$8 sps:$4 sm:$0xff]   ;;  %v14155_v19 = vld [vmem:[#allocation6 + $0x4d0] ss:$8 sps:$4 sm:$0xff]  }
 0x7a3   : > { %5067 = vmatpush1.bf16.msra.mxu0 %v14023_v23  ;;  %5100 = vmatpush1.bf16.msra.mxu1 %v14026_v25  ;;  %v14089_v23 = vld [vmem:[#allocation6 + $0x1b0] ss:$8 sps:$4 sm:$0xff]   ;;  %v4109_v25 = vpack.c.bf16 %v16102_v32, %v16102_v32 }
 0x7a4   : > { %5068 = vmatprep.subr.bf16.mxu0 %v14031_v27  ;;  %5101 = vmatprep.subr.bf16.mxu1 %v14034_v29  ;;  %v14094_v27 = vld [vmem:[#allocation6 + $0x1a4] ss:$8 sps:$4 sm:$0xff]   ;;  %v14092_v29 = vld [vmem:[#allocation6 + $0x1a0] ss:$8 sps:$4 sm:$0xff]   ;;  %v14095_v32 = vld [vmem:[#allocation6 + $0x190] ss:$8 sps:$4 sm:$0xff]  }
 0x7a7   : > { %5069 = vmatpush1.bf16.msra.mxu0 %v14029_v31  ;;  %5102 = vmatpush1.bf16.msra.mxu1 %v14032_v38  ;;  %v5140_v31 = vsel %vm5139_vm1, 1.0, %v15567_v1 }
 0x7a8   : > { %5070 = vmatprep.subr.bf16.mxu0 %v14037_v13  ;;  %5103 = vmatprep.subr.bf16.mxu1 %v14040_v40  ;;  %v16126_v38 = vpack.c.bf16 %v5140_v31, %v5140_v31  ;;  %v14098_v13 = vld [vmem:[#allocation6 + $0x180] ss:$8 sps:$4 sm:$0xff]   ;;  %v14103_v40 = vld [vmem:[#allocation6 + $0x474] ss:$8 sps:$4 sm:$0xff]  }
 0x7a9   : > { %v14169_v31 = vld [vmem:[#allocation6 + $0x4b4] ss:$8 sps:$4 sm:$0xff]  }
 0x7ab   : > { %5071 = vmatpush1.bf16.msra.mxu0 %v14035_v43  ;;  %5104 = vmatpush1.bf16.msra.mxu1 %v14038_v14  ;;  %v14101_v43 = vld [vmem:[#allocation6 + $0x470] ss:$8 sps:$4 sm:$0xff]   ;;  %v14104_v14 = vld [vmem:[#allocation6 + $0x460] ss:$8 sps:$4 sm:$0xff]  }
 0x7ac   : > { %5072 = vmatprep.subr.bf16.mxu0 %v14043_v17  ;;  %5105 = vmatprep.subr.bf16.mxu1 %v14046_v24  ;;  %v14106_v17 = vld [vmem:[#allocation6 + $0x464] ss:$8 sps:$4 sm:$0xff]   ;;  %v14109_v24 = vld [vmem:[#allocation6 + $0x454] ss:$8 sps:$4 sm:$0xff]  }
 0x7af   : > { %5073 = vmatpush2.bf16.msra.mxu0 %v14041_v44  ;;  %5106 = vmatpush1.bf16.msra.mxu1 %v14044_v45  ;;  %v14110_v44 = vld [vmem:[#allocation6 + $0x570] ss:$8 sps:$4 sm:$0xff]   ;;  %v14112_v45 = vld [vmem:[#allocation6 + $0x574] ss:$8 sps:$4 sm:$0xff]  }
 0x7b0   : > { %5074 = vmatprep.subr.bf16.mxu0 %v14049_v46  ;;  %5107 = vmatprep.subr.bf16.mxu1 %v14052_v63  ;;  %v14115_v46 = vld [vmem:[#allocation6 + $0x444] ss:$8 sps:$4 sm:$0xff]   ;;  %v14124_v63 = vld [vmem:[#allocation6 + $0x554] ss:$8 sps:$4 sm:$0xff]  }
 0x7b3   : > { %5075 = vmatpush2.bf16.msra.mxu0 %v14047_v47  ;;  %5108 = vmatpush1.bf16.msra.mxu1 %v14050_v34  ;;  %v14113_v47 = vld [vmem:[#allocation6 + $0x440] ss:$8 sps:$4 sm:$0xff]   ;;  %v14122_v34 = vld [vmem:[#allocation6 + $0x550] ss:$8 sps:$4 sm:$0xff]  }
 0x7b4   : > { %5076 = vmatprep.subr.bf16.mxu0 %v14055_v49  ;;  %5109 = vmatprep.subr.bf16.mxu1 %v14058_v50  ;;  %v14121_v49 = vld [vmem:[#allocation6 + $0x434] ss:$8 sps:$4 sm:$0xff]   ;;  %v14130_v50 = vld [vmem:[#allocation6 + $0x544] ss:$8 sps:$4 sm:$0xff]  }
 0x7b7   : > { %5077 = vmatpush2.bf16.msra.mxu0 %v14053_v39  ;;  %5110 = vmatpush1.bf16.msra.mxu1 %v14056_v36  ;;  %v14119_v39 = vld [vmem:[#allocation6 + $0x430] ss:$8 sps:$4 sm:$0xff]   ;;  %v14128_v36 = vld [vmem:[#allocation6 + $0x540] ss:$8 sps:$4 sm:$0xff]  }
 0x7b8   : > { %5078 = vmatprep.subr.bf16.mxu0 %v14061_v51  ;;  %5111 = vmatprep.subr.bf16.mxu1 %v14064_v52  ;;  %v14127_v51 = vld [vmem:[#allocation6 + $0x424] ss:$8 sps:$4 sm:$0xff]   ;;  %v14136_v52 = vld [vmem:[#allocation6 + $0x534] ss:$8 sps:$4 sm:$0xff]  }
 0x7bb   : > { %5079 = vmatpush2.bf16.msra.mxu0 %v14059_v53  ;;  %5112 = vmatpush1.bf16.msra.mxu1 %v14062_v42  ;;  %v14125_v53 = vld [vmem:[#allocation6 + $0x420] ss:$8 sps:$4 sm:$0xff]   ;;  %v14134_v42 = vld [vmem:[#allocation6 + $0x530] ss:$8 sps:$4 sm:$0xff]  }
 0x7bc   : > { %5080 = vmatprep.subr.bf16.mxu0 %v14067_v55  ;;  %5113 = vmatprep.subr.bf16.mxu1 %v14070_v56  ;;  %v14133_v55 = vld [vmem:[#allocation6 + $0x414] ss:$8 sps:$4 sm:$0xff]   ;;  %v14142_v56 = vld [vmem:[#allocation6 + $0x524] ss:$8 sps:$4 sm:$0xff]  }
 0x7bf   : > { %5081 = vmatpush2.bf16.msra.mxu0 %v14065_v57  ;;  %5114 = vmatpush2.bf16.msra.mxu1 %v14068_v58  ;;  %v14131_v57 = vld [vmem:[#allocation6 + $0x410] ss:$8 sps:$4 sm:$0xff]   ;;  %v14140_v58 = vld [vmem:[#allocation6 + $0x520] ss:$8 sps:$4 sm:$0xff]  }
 0x7c0   : > { %5082 = vmatprep.subr.bf16.mxu0 %v14073_v2  ;;  %5115 = vmatprep.subr.bf16.mxu1 %v14076_v59  ;;  %v14139_v2 = vld [vmem:[#allocation6 + $0x404] ss:$8 sps:$4 sm:$0xff]   ;;  %v14148_v59 = vld [vmem:[#allocation6 + $0x514] ss:$8 sps:$4 sm:$0xff]  }
 0x7c3   : > { %5083 = vmatpush2.bf16.msra.mxu0 %v14071_v60  ;;  %5116 = vmatpush2.bf16.msra.mxu1 %v14074_v54  ;;  %v14137_v60 = vld [vmem:[#allocation6 + $0x400] ss:$8 sps:$4 sm:$0xff]   ;;  %v14146_v54 = vld [vmem:[#allocation6 + $0x510] ss:$8 sps:$4 sm:$0xff]  }
 0x7c4   : > { %5084 = vmatprep.subr.bf16.mxu0 %v14079_v61  ;;  %5117 = vmatprep.subr.bf16.mxu1 %v14082_v62  ;;  %v14145_v61 = vld [vmem:[#allocation6 + $0x4f4] ss:$8 sps:$4 sm:$0xff]   ;;  %v14154_v62 = vld [vmem:[#allocation6 + $0x504] ss:$8 sps:$4 sm:$0xff]  }
 0x7c7   : > { %5085 = vmatpush2.bf16.msra.mxu0 %v14077_v0  ;;  %5118 = vmatpush2.bf16.msra.mxu1 %v14080_v6  ;;  %v14143_v0 = vld [vmem:[#allocation6 + $0x4f0] ss:$8 sps:$4 sm:$0xff]   ;;  %v14152_v6 = vld [vmem:[#allocation6 + $0x500] ss:$8 sps:$4 sm:$0xff]  }
 0x7c8   : > { %5086 = vmatprep.subr.bf16.mxu0 %v14085_v9  ;;  %5119 = vmatprep.subr.bf16.mxu1 %v14088_v12  ;;  %v14151_v9 = vld [vmem:[#allocation6 + $0x4e4] ss:$8 sps:$4 sm:$0xff]   ;;  %v14160_v12 = vld [vmem:[#allocation6 + $0x5f4] ss:$8 sps:$4 sm:$0xff]  }
 0x7cb   : > { %5087 = vmatpush2.bf16.msra.mxu0 %v14083_v11  ;;  %5120 = vmatpush2.bf16.msra.mxu1 %v14086_v15  ;;  %v14149_v11 = vld [vmem:[#allocation6 + $0x4e0] ss:$8 sps:$4 sm:$0xff]   ;;  %v14158_v15 = vld [vmem:[#allocation6 + $0x5f0] ss:$8 sps:$4 sm:$0xff]  }
 0x7cc   : > { %5159 = vmatprep.subr.bf16.mxu0 %v16074_v16  ;;  %5121 = vmatprep.subr.bf16.mxu1 %v14091_v18  ;;  %v14100_v16 = vld [vmem:[#allocation6 + $0x184] ss:$8 sps:$4 sm:$0xff]   ;;  %v14157_v18 = vld [vmem:[#allocation6 + $0x4d4] ss:$8 sps:$4 sm:$0xff]  }
 0x7ce   : > { %5089 = vmatmul.mubr.bf16.vlgmr.msra.gmra.mxu0 %v4109_v25  ;;  %v14161_v25 = vld [vmem:[#allocation6 + $0x4c0] ss:$8 sps:$4 sm:$0xff]  }
 0x7cf   : > { %5122 = vmatpush2.bf16.msra.mxu1 %v14089_v23  ;;  %5160 = vmatpush1.bf16.msra.mxu0 %v16070_v35  ;;  %v4111_v35 = vpack.c.bf16 %v16110_v41, %v16110_v41  ;;  %v14107_v41 = vld [vmem:[#allocation6 + $0x450] ss:$8 sps:$4 sm:$0xff]   ;;  %v14163_v23 = vld [vmem:[#allocation6 + $0x4c4] ss:$8 sps:$4 sm:$0xff]  }
 0x7d0   : > { %5123 = vmatprep.subr.bf16.mxu1 %v14094_v27  ;;  %5177 = vmatprep.mubr.bf16.mxu0 %v15569_v48  ;;  %v14166_v27 = vld [vmem:[#allocation6 + $0x5e4] ss:$8 sps:$4 sm:$0xff]  }
 0x7d1   : > { %5616 = vmatprep.subr.bf16.mxu0 %v14103_v40  ;;  %v14176_v40 = vld [vmem:[#allocation6 + $0x5c0] ss:$8 sps:$4 sm:$0xff]  }
 0x7d3   : > { %5124 = vmatpush2.bf16.msra.mxu1 %v14092_v29  ;;  %v14164_v29 = vld [vmem:[#allocation6 + $0x5e0] ss:$8 sps:$4 sm:$0xff]  }
 0x7d4   : > { %5125 = vmatprep.subr.bf16.mxu1 %v14097_v30  ;;  %v14167_v30 = vld [vmem:[#allocation6 + $0x4b0] ss:$8 sps:$4 sm:$0xff]  }
 0x7d6   : > { %12303 = vmatmul.mubr.msk.bf16.vlgmr.msra.gmra.mxu0 %vm1140_vm4, %v16126_v38 }
 0x7d7   : > { %5126 = vmatpush2.bf16.msra.mxu1 %v14095_v32  ;;  %5617 = vmatpush1.bf16.msra.mxu0 %v14101_v43  ;;  %v14172_v32 = vld [vmem:[#allocation6 + $0x5d4] ss:$8 sps:$4 sm:$0xff]   ;;  %v14178_v43 = vld [vmem:[#allocation6 + $0x5c4] ss:$8 sps:$4 sm:$0xff]  }
 0x7d8   : > { %5127 = vmatprep.subr.bf16.mxu1 %v14100_v16  ;;  %5618 = vmatprep.subr.bf16.mxu0 %v14106_v17  ;;  %v14170_v16 = vld [vmem:[#allocation6 + $0x5d0] ss:$8 sps:$4 sm:$0xff]   ;;  %v14184_v17 = vld [vmem:[#allocation6 + $0x5b4] ss:$8 sps:$4 sm:$0xff]  }
 0x7db   : > { %5128 = vmatpush2.bf16.msra.mxu1 %v14098_v13  ;;  %5619 = vmatpush1.bf16.msra.mxu0 %v14104_v14  ;;  %v14173_v13 = vld [vmem:[#allocation6 + $0x4a0] ss:$8 sps:$4 sm:$0xff]   ;;  %v14181_v14 = vld [vmem:[#allocation6 + $0x494] ss:$8 sps:$4 sm:$0xff]  }
 0x7dc   : > { %5200 = vmatprep.subr.bf16.mxu1 %v16078_v20  ;;  %v14118_v20 = vld [vmem:[#allocation6 + $0x564] ss:$8 sps:$4 sm:$0xff]   ;;  %5620 = vmatprep.subr.bf16.mxu0 %v14109_v24  ;;  %v14179_v24 = vld [vmem:[#allocation6 + $0x490] ss:$8 sps:$4 sm:$0xff]  }
 0x7de   : > { %5130 = vmatmul.mubr.bf16.vlgmr.msra.gmra.mxu1 %v4111_v35  ;;  %v14175_v35 = vld [vmem:[#allocation6 + $0x4a4] ss:$8 sps:$4 sm:$0xff]  }
 0x7df   : > { %5201 = vmatpush1.bf16.msra.mxu1 %v16087_v26  ;;  %5218 = vmatprep.mubr.bf16.mxu1 %v15569_v48  ;;  %v14116_v26 = vld [vmem:[#allocation6 + $0x560] ss:$8 sps:$4 sm:$0xff]  }
 0x7e0   : > { %5657 = vmatprep.subr.bf16.mxu1 %v14112_v45  ;;  %5621 = vmatpush1.bf16.msra.mxu0 %v14107_v41  ;;  %v14187_v45 = vld [vmem:[#allocation6 + $0x484] ss:$8 sps:$4 sm:$0xff]  }
 0x7e1   : > { %5622 = vmatprep.subr.bf16.mxu0 %v14115_v46  ;;  %v14190_v41 = vld [vmem:[#allocation6 + $0x5a4] ss:$8 sps:$4 sm:$0xff]   ;;  %v14193_v46 = vld [vmem:[#allocation6 + $0x594] ss:$8 sps:$4 sm:$0xff]  }
 0x7e4   : > { %5623 = vmatpush1.bf16.msra.mxu0 %v14113_v47  ;;  %v14196_v47 = vld [vmem:[#allocation6 + $0x584] ss:$8 sps:$4 sm:$0xff]  }
 0x7e5   : > { %5624 = vmatprep.subr.bf16.mxu0 %v14121_v49  ;;  %v14199_v49 = vld [vmem:[#allocation7 + $0x174] ss:$8 sps:$4 sm:$0xff]  }
 0x7e6   : > { %12304 = vmatmul.mubr.msk.bf16.vlgmr.msra.gmra.mxu1 %vm1140_vm4, %v16126_v38  ;;  %vm7886_vm4 = vcmask 1041408  }
 0x7e7   : > { %5658 = vmatpush1.bf16.msra.mxu1 %v14110_v44  ;;  %v14182_v44 = vld [vmem:[#allocation6 + $0x5b0] ss:$8 sps:$4 sm:$0xff]  }
 0x7e8   : > { %5659 = vmatprep.subr.bf16.mxu1 %v14118_v20  ;;  %5625 = vmatpush1.bf16.msra.mxu0 %v14119_v39  ;;  %v14185_v20 = vld [vmem:[#allocation6 + $0x480] ss:$8 sps:$4 sm:$0xff]  }
 0x7e9   : > { %5626 = vmatprep.subr.bf16.mxu0 %v14127_v51 }
 0x7eb   : > { %5660 = vmatpush1.bf16.msra.mxu1 %v14116_v26  ;;  %v14188_v26 = vld [vmem:[#allocation6 + $0x5a0] ss:$8 sps:$4 sm:$0xff]  }
 0x7ec   : > { %5661 = vmatprep.subr.bf16.mxu1 %v14124_v63  ;;  %5627 = vmatpush1.bf16.msra.mxu0 %v14125_v53  ;;  %v14191_v63 = vld [vmem:[#allocation6 + $0x590] ss:$8 sps:$4 sm:$0xff]  }
 0x7ed   : > { %5628 = vmatprep.subr.bf16.mxu0 %v14133_v55 }
 0x7ef   : > { %5662 = vmatpush1.bf16.msra.mxu1 %v14122_v34  ;;  %v14194_v34 = vld [vmem:[#allocation6 + $0x580] ss:$8 sps:$4 sm:$0xff]  }
 0x7f0   : > { %5663 = vmatprep.subr.bf16.mxu1 %v14130_v50  ;;  %5629 = vmatpush1.bf16.msra.mxu0 %v14131_v57 }
 0x7f1   : > { %5630 = vmatprep.subr.bf16.mxu0 %v14139_v2 }
 0x7f3   : > { %5664 = vmatpush1.bf16.msra.mxu1 %v14128_v36 }
 0x7f4   : > { %5665 = vmatprep.subr.bf16.mxu1 %v14136_v52  ;;  %5631 = vmatpush1.bf16.msra.mxu0 %v14137_v60 }
 0x7f5   : > { %5632 = vmatprep.subr.bf16.mxu0 %v14145_v61 }
 0x7f7   : > { %5666 = vmatpush1.bf16.msra.mxu1 %v14134_v42 }
 0x7f8   : > { %5667 = vmatprep.subr.bf16.mxu1 %v14142_v56  ;;  %5633 = vmatpush2.bf16.msra.mxu0 %v14143_v0 }
 0x7f9   : > { %5634 = vmatprep.subr.bf16.mxu0 %v14151_v9 }
 0x7fb   : > { %5668 = vmatpush1.bf16.msra.mxu1 %v14140_v58 }
 0x7fc   : > { %5669 = vmatprep.subr.bf16.mxu1 %v14148_v59  ;;  %5635 = vmatpush2.bf16.msra.mxu0 %v14149_v11 }
 0x7fd   : > { %5636 = vmatprep.subr.bf16.mxu0 %v14157_v18 }
 0x7ff   : > { %5670 = vmatpush1.bf16.msra.mxu1 %v14146_v54 }
 0x800   : > { %5671 = vmatprep.subr.bf16.mxu1 %v14154_v62  ;;  %5637 = vmatpush2.bf16.msra.mxu0 %v14155_v19 }
 0x801   : > { %5638 = vmatprep.subr.bf16.mxu0 %v14163_v23 }
 0x803   : > { %5672 = vmatpush1.bf16.msra.mxu1 %v14152_v6 }
 0x804   : > { %5673 = vmatprep.subr.bf16.mxu1 %v14160_v12  ;;  %5639 = vmatpush2.bf16.msra.mxu0 %v14161_v25 }
 0x805   : > { %5640 = vmatprep.subr.bf16.mxu0 %v14169_v31 }
 0x807   : > { %5674 = vmatpush2.bf16.msra.mxu1 %v14158_v15 }
 0x808   : > { %5675 = vmatprep.subr.bf16.mxu1 %v14166_v27  ;;  %5641 = vmatpush2.bf16.msra.mxu0 %v14167_v30 }
 0x809   : > { %5642 = vmatprep.subr.bf16.mxu0 %v14175_v35  ;;  %v14202_v35 = vld [vmem:[#allocation7 + $0x164] ss:$8 sps:$4 sm:$0xff]  }
 0x80b   : > { %5676 = vmatpush2.bf16.msra.mxu1 %v14164_v29 }
 0x80c   : > { %5677 = vmatprep.subr.bf16.mxu1 %v14172_v32  ;;  %5643 = vmatpush2.bf16.msra.mxu0 %v14173_v13  ;;  %v14197_v32 = vld [vmem:[#allocation7 + $0x170] ss:$8 sps:$4 sm:$0xff]  }
 0x80d   : > { %5644 = vmatprep.subr.bf16.mxu0 %v14181_v14  ;;  %v14205_v14 = vld [vmem:[#allocation7 + $0x154] ss:$8 sps:$4 sm:$0xff]  }
 0x80f   : > { %5678 = vmatpush2.bf16.msra.mxu1 %v14170_v16 }
 0x810   : > { %5679 = vmatprep.subr.bf16.mxu1 %v14178_v43  ;;  %5645 = vmatpush2.bf16.msra.mxu0 %v14179_v24  ;;  %v14200_v43 = vld [vmem:[#allocation7 + $0x160] ss:$8 sps:$4 sm:$0xff]   ;;  %v14208_v24 = vld [vmem:[#allocation7 + $0x144] ss:$8 sps:$4 sm:$0xff]  }
 0x811   : > { %5646 = vmatprep.subr.bf16.mxu0 %v14187_v45  ;;  %v14211_v45 = vld [vmem:[#allocation7 + $0x134] ss:$8 sps:$4 sm:$0xff]  }
 0x813   : > { %5680 = vmatpush2.bf16.msra.mxu1 %v14176_v40 }
 0x814   : > { %5681 = vmatprep.subr.bf16.mxu1 %v14184_v17  ;;  %5647 = vmatpush2.bf16.msra.mxu0 %v14185_v20  ;;  %v14203_v17 = vld [vmem:[#allocation7 + $0x150] ss:$8 sps:$4 sm:$0xff]  }
 0x815   : > { %v14209_v20 = vld [vmem:[#allocation7 + $0x130] ss:$8 sps:$4 sm:$0xff]  }
 0x817   : > { %5682 = vmatpush2.bf16.msra.mxu1 %v14182_v44  ;;  %v14206_v44 = vld [vmem:[#allocation7 + $0x140] ss:$8 sps:$4 sm:$0xff]  }
 0x818   : > { %5683 = vmatprep.subr.bf16.mxu1 %v14190_v41  ;;  %v14214_v41 = vld [vmem:[#allocation7 + $0x124] ss:$8 sps:$4 sm:$0xff]  }
 0x81b   : > { %5684 = vmatpush2.bf16.msra.mxu1 %v14188_v26  ;;  %v14212_v26 = vld [vmem:[#allocation7 + $0x120] ss:$8 sps:$4 sm:$0xff]  }
 0x81c   : > { %5685 = vmatprep.subr.bf16.mxu1 %v14193_v46  ;;  %v14217_v46 = vld [vmem:[#allocation7 + $0x114] ss:$8 sps:$4 sm:$0xff]  }
 0x81f   : > { %5686 = vmatpush2.bf16.msra.mxu1 %v14191_v63  ;;  %v14215_v63 = vld [vmem:[#allocation7 + $0x110] ss:$8 sps:$4 sm:$0xff]  }
 0x820   : > { %5687 = vmatprep.subr.bf16.mxu1 %v14196_v47  ;;  %v14220_v47 = vld [vmem:[#allocation7 + $0x104] ss:$8 sps:$4 sm:$0xff]  }
 0x823   : > { %5688 = vmatpush2.bf16.msra.mxu1 %v14194_v34  ;;  %v14218_v34 = vld [vmem:[#allocation7 + $0x100] ss:$8 sps:$4 sm:$0xff]  }
 0x824   : > { %5998 = vmatprep.subr.bf16.mxu1 %v14199_v49  ;;  %v14223_v49 = vld [vmem:[#allocation7 + $0x1f4] ss:$8 sps:$4 sm:$0xff]  }
 0x84e   : > { %v4688_v50 = vpop.f32.mrf.mxu0 }
 0x850   : > { %v4690_v39 = vpop.f32.mrf.mxu0 }
 0x852   : > { %v4692_v36 = vpop.f32.mrf.mxu0 }
 0x853   : > { %v14224_v36 = vld [vmem:[#allocation7 + $0x1e0] ss:$8 sps:$4 sm:$0xff]  }
 0x854   : > { %v4693_v51 = vpop.f32.mrf.mxu0 }
 0x855   : > { %v14229_v51 = vld [vmem:[#allocation7 + $0x1d4] ss:$8 sps:$4 sm:$0xff]  }
 0x85e   : > { %v4729_v52 = vpop.f32.mrf.mxu1 }
 0x85f   : > { %v4730_v53 = vadd.f32 %v4729_v52, %v4688_v50  ;;  %v14221_v50 = vld [vmem:[#allocation7 + $0x1f0] ss:$8 sps:$4 sm:$0xff]  }
 0x860   : > { %v4731_v42 = vpop.f32.mrf.mxu1  ;;  %v14227_v52 = vld [vmem:[#allocation7 + $0x1d0] ss:$8 sps:$4 sm:$0xff]  }
 0x861   : > { %v4732_v55 = vadd.f32 %v4731_v42, %v4690_v39  ;;  %v14226_v39 = vld [vmem:[#allocation7 + $0x1e4] ss:$8 sps:$4 sm:$0xff]  }
 0x862   : > { %v4733_v56 = vpop.f32.mrf.mxu1  ;;  %v14232_v42 = vld [vmem:[#allocation7 + $0x1c4] ss:$8 sps:$4 sm:$0xff]  }
 0x863   : > { %v14235_v56 = vld [vmem:[#allocation7 + $0x1b4] ss:$8 sps:$4 sm:$0xff]  }
 0x864   : > { %v4734_v57 = vpop.f32.mrf.mxu1 }
 0x865   : > { %v14238_v57 = vld [vmem:[#allocation7 + $0x1a4] ss:$8 sps:$4 sm:$0xff]  }
 0x88e   : > { %v5090_v58 = vpop.f32.mrf.mxu0 }
 0x88f   : > { %v5091_v2 = vadd.f32 %v5090_v58, %v4730_v53  ;;  %v14230_v53 = vld [vmem:[#allocation7 + $0x1c0] ss:$8 sps:$4 sm:$0xff]  }
 0x890   : > { %v5092_v59 = vpop.f32.mrf.mxu0  ;;  %v14236_v58 = vld [vmem:[#allocation7 + $0x1a0] ss:$8 sps:$4 sm:$0xff]  }
 0x891   : > { %v5093_v60 = vadd.f32 %v5092_v59, %v4732_v55  ;;  %v14233_v55 = vld [vmem:[#allocation7 + $0x1b0] ss:$8 sps:$4 sm:$0xff]  }
 0x892   : > { %v5094_v54 = vpop.f32.mrf.mxu0  ;;  %v14239_v59 = vld [vmem:[#allocation7 + $0x190] ss:$8 sps:$4 sm:$0xff]  }
 0x893   : > { %v14242_v54 = vld [vmem:[#allocation7 + $0x180] ss:$8 sps:$4 sm:$0xff]  }
 0x894   : > { %v5095_v61 = vpop.f32.mrf.mxu0 }
 0x896   : > { %v5179_v62 = vpop.f32.mrf.mxu0 }
 0x897   : > { %v5227_v0 = vpack.c.bf16 %v5179_v62, %v5179_v62 }
 0x898   : > { %v5181_v6 = vpop.f32.mrf.mxu0 }
 0x899   : > { %v5228_v9 = vpack.c.bf16 %v5181_v6, %v5181_v6 }
 0x89a   : > { %v5183_v12 = vpop.f32.mrf.mxu0 }
 0x89b   : > { %5648 = vmatprep.mubr.bf16.mxu0 %v5228_v9  ;;  %v5700_v9 = vld [vmem:[%s16527_s7] sm:$0x3]  ;;  %s16539_s7 = sld [smem:[#allocation41_spill]] }
 0x89c   : > { %5649 = vmatmul.mubr.bf16.vlgmr.msra.gmra.mxu0 %v5227_v0  ;;  %v5184_v11 = vpop.f32.mrf.mxu0 }
 0x89d   : > { %5762 = vmatprep.mubr.bf16.mxu0 %v15569_v48 }
 0x89e   : > { %v5131_v15 = vpop.f32.mrf.mxu1 }
 0x89f   : > { %v16138_v18 = vadd.f32 %v5131_v15, %v5091_v2  ;;  %v14241_v2 = vld [vmem:[#allocation7 + $0x194] ss:$8 sps:$4 sm:$0xff]   ;;  %v5705_v15 = vrot.slane %v5700_v9, %v16026_v28 }
 0x8a0   : > { %v5133_v19 = vpop.f32.mrf.mxu1 }
 0x8a1   : > { %v16140_v23 = vadd.f32 %v5133_v19, %v5093_v60  ;;  %v14244_v60 = vld [vmem:[#allocation7 + $0x184] ss:$8 sps:$4 sm:$0xff]  }
 0x8a2   : > { %v5135_v25 = vpop.f32.mrf.mxu1 }
 0x8a4   : > { %v5136_v27 = vpop.f32.mrf.mxu1 }
 0x8a6   : > { %v5220_v29 = vpop.f32.mrf.mxu1 }
 0x8a7   : > { %v5229_v16 = vpack.c.bf16 %v5220_v29, %v5220_v29  ;;  %v5709_v29 = vrot.slane %v5700_v9, %v16031_v8  ;;  %v14322_v9 = vld [vmem:[#allocation7 + $0xe4] ss:$8 sps:$4 sm:$0xff]  }
 0x8a8   : > { %v5222_v31 = vpop.f32.mrf.mxu1 }
 0x8a9   : > { %v5230_v30 = vpack.c.bf16 %v5222_v31, %v5222_v31 }
 0x8aa   : > { %v5224_v13 = vpop.f32.mrf.mxu1 }
 0x8ab   : > { %5689 = vmatprep.mubr.bf16.mxu1 %v5230_v30 }
 0x8ac   : > { %v5225_v40 = vpop.f32.mrf.mxu1  ;;  %5690 = vmatmul.mubr.bf16.vlgmr.msra.gmra.mxu1 %v5229_v16 }
 0x8ad   : > { %5999 = vmatpush1.bf16.msra.mxu1 %v14197_v32 }
 0x8ae   : > { %6000 = vmatprep.subr.bf16.mxu1 %v14202_v35 }
 0x8b1   : > { %6001 = vmatpush1.bf16.msra.mxu1 %v14200_v43 }
 0x8b2   : > { %6002 = vmatprep.subr.bf16.mxu1 %v14205_v14 }
 0x8b5   : > { %6003 = vmatpush1.bf16.msra.mxu1 %v14203_v17  ;;  %v14295_v17 = vld [vmem:[#allocation7 + $0x74] ss:$8 sps:$4 sm:$0xff]  }
 0x8b6   : > { %6004 = vmatprep.subr.bf16.mxu1 %v14208_v24  ;;  %v16151_v24 = vpack.c.bf16 %v15937_v7, %v15937_v7  ;;  %v14296_v7 = vld [vmem:[#allocation7 + $0x60] ss:$8 sps:$4 sm:$0xff]  }
 0x8b9   : > { %6005 = vmatpush1.bf16.msra.mxu1 %v14206_v44  ;;  %v14247_v44 = vld [vmem:[%s16528_s0 + $0x74] ss:$8 sps:$4 sm:$0xff]  }
 0x8ba   : > { %6006 = vmatprep.subr.bf16.mxu1 %v14211_v45  ;;  %v14298_v45 = vld [vmem:[#allocation7 + $0x64] ss:$8 sps:$4 sm:$0xff]  }
 0x8bd   : > { %6007 = vmatpush1.bf16.msra.mxu1 %v14209_v20  ;;  %v16160_v20 = vpack.c.bf16 %v15955_v33, %v15955_v33  ;;  %v14253_v33 = vld [vmem:[%s16528_s0 + $0x54] ss:$8 sps:$4 sm:$0xff]  }
 0x8be   : > { %6008 = vmatprep.subr.bf16.mxu1 %v14214_v41  ;;  %v14301_v41 = vld [vmem:[#allocation7 + $0x54] ss:$8 sps:$4 sm:$0xff]  }
 0x8c1   : > { %6009 = vmatpush1.bf16.msra.mxu1 %v14212_v26  ;;  %v14245_v26 = vld [vmem:[%s16528_s0 + $0x70] ss:$8 sps:$4 sm:$0xff]  }
 0x8c2   : > { %6010 = vmatprep.subr.bf16.mxu1 %v14217_v46  ;;  %v14250_v46 = vld [vmem:[%s16528_s0 + $0x64] ss:$8 sps:$4 sm:$0xff]  }
 0x8c5   : > { %6011 = vmatpush1.bf16.msra.mxu1 %v14215_v63  ;;  %v14299_v63 = vld [vmem:[#allocation7 + $0x50] ss:$8 sps:$4 sm:$0xff]  }
 0x8c6   : > { %6012 = vmatprep.subr.bf16.mxu1 %v14220_v47  ;;  %v14304_v47 = vld [vmem:[#allocation7 + $0x44] ss:$8 sps:$4 sm:$0xff]  }
 0x8c9   : > { %6013 = vmatpush1.bf16.msra.mxu1 %v14218_v34  ;;  %v14248_v34 = vld [vmem:[%s16528_s0 + $0x60] ss:$8 sps:$4 sm:$0xff]  }
 0x8ca   : > { %6014 = vmatprep.subr.bf16.mxu1 %v14223_v49  ;;  %v14302_v49 = vld [vmem:[#allocation7 + $0x40] ss:$8 sps:$4 sm:$0xff]  }
 0x8cd   : > { %6015 = vmatpush2.bf16.msra.mxu1 %v14221_v50  ;;  %v14307_v50 = vld [vmem:[#allocation7 + $0x34] ss:$8 sps:$4 sm:$0xff]  }
 0x8ce   : > { %6016 = vmatprep.subr.bf16.mxu1 %v14226_v39  ;;  %v14251_v39 = vld [vmem:[%s16528_s0 + $0x50] ss:$8 sps:$4 sm:$0xff]  }
 0x8d1   : > { %6017 = vmatpush2.bf16.msra.mxu1 %v14224_v36  ;;  %v14256_v36 = vld [vmem:[%s16528_s0 + $0x44] ss:$8 sps:$4 sm:$0xff]  }
 0x8d2   : > { %6018 = vmatprep.subr.bf16.mxu1 %v14229_v51  ;;  %v14305_v51 = vld [vmem:[#allocation7 + $0x30] ss:$8 sps:$4 sm:$0xff]  }
 0x8d5   : > { %6019 = vmatpush2.bf16.msra.mxu1 %v14227_v52  ;;  %v14310_v52 = vld [vmem:[#allocation7 + $0x24] ss:$8 sps:$4 sm:$0xff]  }
 0x8d6   : > { %6020 = vmatprep.subr.bf16.mxu1 %v14232_v42  ;;  %v14308_v42 = vld [vmem:[#allocation7 + $0x20] ss:$8 sps:$4 sm:$0xff]  }
 0x8d9   : > { %6021 = vmatpush2.bf16.msra.mxu1 %v14230_v53  ;;  %v14259_v53 = vld [vmem:[%s16528_s0 + $0x34] ss:$8 sps:$4 sm:$0xff]  }
 0x8da   : > { %6022 = vmatprep.subr.bf16.mxu1 %v14235_v56  ;;  %v14257_v56 = vld [vmem:[%s16528_s0 + $0x30] ss:$8 sps:$4 sm:$0xff]  }
 0x8dd   : > { %6023 = vmatpush2.bf16.msra.mxu1 %v14233_v55  ;;  %v14313_v55 = vld [vmem:[#allocation7 + $0x14] ss:$8 sps:$4 sm:$0xff]  }
 0x8de   : > { %6024 = vmatprep.subr.bf16.mxu1 %v14238_v57  ;;  %v14262_v57 = vld [vmem:[%s16528_s0 + $0x24] ss:$8 sps:$4 sm:$0xff]  }
 0x8e1   : > { %6025 = vmatpush2.bf16.msra.mxu1 %v14236_v58  ;;  %v14311_v58 = vld [vmem:[#allocation7 + $0x10] ss:$8 sps:$4 sm:$0xff]  }
 0x8e2   : > { %6026 = vmatprep.subr.bf16.mxu1 %v14241_v2  ;;  %v14316_v2 = vld [vmem:[#allocation7 + $0x4] ss:$8 sps:$4 sm:$0xff]  }
 0x8e5   : > { %6027 = vmatpush2.bf16.msra.mxu1 %v14239_v59  ;;  %v14260_v59 = vld [vmem:[%s16528_s0 + $0x20] ss:$8 sps:$4 sm:$0xff]  }
 0x8e6   : > { %6028 = vmatprep.subr.bf16.mxu1 %v14244_v60  ;;  %v14265_v60 = vld [vmem:[%s16528_s0 + $0x14] ss:$8 sps:$4 sm:$0xff]  }
 0x8e9   : > { %6029 = vmatpush2.bf16.msra.mxu1 %v14242_v54  ;;  %v14314_v54 = vld [vmem:[#allocation7] ss:$8 sps:$4 sm:$0xff]  }
 0x95c   : > { %v5650_v61 = vpop.f32.mrf.mxu0 }
 0x95e   : > { %v5652_v62 = vpop.f32.mrf.mxu0 }
 0x960   : > { %v5654_v0 = vpop.f32.mrf.mxu0 }
 0x961   : > { %v14268_v0 = vld [vmem:[%s16528_s0 + $0x4] ss:$8 sps:$4 sm:$0xff]  }
 0x962   : > { %v5655_v6 = vpop.f32.mrf.mxu0 }
 0x963   : > { %v14317_v6 = vld [vmem:[#allocation7 + $0xf0] ss:$8 sps:$4 sm:$0xff]  }
 0x96c   : > { %v5691_v12 = vpop.f32.mrf.mxu1 }
 0x96d   : > { %v5692_v11 = vadd.f32 %v5691_v12, %v5650_v61  ;;  %v14319_v61 = vld [vmem:[#allocation7 + $0xf4] ss:$8 sps:$4 sm:$0xff]   ;;  %v14266_v12 = vld [vmem:[%s16528_s0] ss:$8 sps:$4 sm:$0xff]  }
 0x96e   : > { %v5693_v19 = vpop.f32.mrf.mxu1 }
 0x96f   : > { %v5698_v25 = vadd.f32 %v5692_v11, %v16138_v18  ;;  %v5694_v27 = vadd.f32 %v5693_v19, %v5652_v62  ;;  %v14263_v62 = vld [vmem:[%s16528_s0 + $0x10] ss:$8 sps:$4 sm:$0xff]   ;;  %v14271_v11 = vld [vmem:[%s16528_s0 + $0xf4] ss:$8 sps:$4 sm:$0xff]  }
 0x970   : > { %v5695_v31 = vpop.f32.mrf.mxu1  ;;  %v14325_v19 = vld [vmem:[#allocation7 + $0xd4] ss:$8 sps:$4 sm:$0xff]  }
 0x971   : > { %v5712_v30 = vadd.f32 %v5705_v15, %v5698_v25  ;;  %v5699_v32 = vadd.f32 %v5694_v27, %v16140_v23  ;;  %v14293_v23 = vld [vmem:[#allocation7 + $0x70] ss:$8 sps:$4 sm:$0xff]   ;;  %v14320_v15 = vld [vmem:[#allocation7 + $0xe0] ss:$8 sps:$4 sm:$0xff]   ;;  %v14274_v27 = vld [vmem:[%s16528_s0 + $0xe4] ss:$8 sps:$4 sm:$0xff]  }
 0x972   : > { %v5696_v16 = vpop.f32.mrf.mxu1  ;;  %v14269_v25 = vld [vmem:[%s16528_s0 + $0xf0] ss:$8 sps:$4 sm:$0xff]   ;;  %v14328_v31 = vld [vmem:[#allocation7 + $0xc4] ss:$8 sps:$4 sm:$0xff]  }
 0x973   : > { %v5714_v13 = vmax.f32 %v5712_v30, 0.0  ;;  %v5713_v35 = vadd.f32 %v5709_v29, %v5699_v32  ;;  %v14323_v29 = vld [vmem:[#allocation7 + $0xd0] ss:$8 sps:$4 sm:$0xff]   ;;  %v14272_v30 = vld [vmem:[%s16528_s0 + $0xe0] ss:$8 sps:$4 sm:$0xff]  }
 0x974   : > { %v14277_v32 = vld [vmem:[%s16528_s0 + $0xd4] ss:$8 sps:$4 sm:$0xff]   ;;  %v14326_v16 = vld [vmem:[#allocation7 + $0xc0] ss:$8 sps:$4 sm:$0xff]  }
 0x975   : > { %v5715_v40 = vmax.f32 %v5713_v35, 0.0  ;;  %v5716_v43 = vpack.c.bf16 %v5714_v13, %v5714_v13  ;;  %v14331_v13 = vld [vmem:[#allocation7 + $0xb4] ss:$8 sps:$4 sm:$0xff]   ;;  %v14275_v35 = vld [vmem:[%s16528_s0 + $0xd0] ss:$8 sps:$4 sm:$0xff]  }
 0x977   : > { %v5717_v14 = vpack.c.bf16 %v5715_v40, %v5715_v40  ;;  %v5725_v18 = vsel %vm5723_vm2, %v5716_v43, 0  ;;  %v14280_v40 = vld [vmem:[%s16528_s0 + $0xc4] ss:$8 sps:$4 sm:$0xff]  }
 0x979   : > { %12369 = vmatprep.subr.msk.bf16.mxu0 %vm5723_vm2, %v5717_v14  ;;  %6030 = vmatprep.mubr.bf16.mxu1 %v5717_v14 }
 0x97a   : > { %12435 = vmatprep.subr.msk.bf16.mxu1 %vm5723_vm2, %v5717_v14  ;;  %5745 = vmatpush1.bf16.msra.mxu0 %v5725_v18  ;;  %v14334_v14 = vld [vmem:[#allocation7 + $0xa4] ss:$8 sps:$4 sm:$0xff]  }
 0x97b   : > { %6031 = vmatmul.mubr.bf16.vlgmr.msra.gmra.mxu1 %v5716_v43  ;;  %6199 = vmatprep.subr.bf16.mxu0 %v14295_v17  ;;  %v14329_v43 = vld [vmem:[#allocation7 + $0xb0] ss:$8 sps:$4 sm:$0xff]   ;;  %v14278_v17 = vld [vmem:[%s16528_s0 + $0xc0] ss:$8 sps:$4 sm:$0xff]  }
 0x97c   : > { %6259 = vmatpush1.bf16.msra.mxu1 %v5725_v18  ;;  %6276 = vmatprep.mubr.bf16.mxu1 %v15569_v48  ;;  %v14283_v18 = vld [vmem:[%s16528_s0 + $0xb4] ss:$8 sps:$4 sm:$0xff]  }
 0x97d   : > { %12370 = vmatmul.mubr.msk.bf16.vlgmr.msra.gmra.mxu0 %vm5719_vm3, %v16151_v24  ;;  %6933 = vmatprep.subr.bf16.mxu1 %v14247_v44  ;;  %v14332_v44 = vld [vmem:[#allocation7 + $0xa0] ss:$8 sps:$4 sm:$0xff]  }
 0x97e   : > { %6200 = vmatpush1.bf16.msra.mxu0 %v14293_v23  ;;  %v14281_v23 = vld [vmem:[%s16528_s0 + $0xb0] ss:$8 sps:$4 sm:$0xff]  }
 0x97f   : > { %6201 = vmatprep.subr.bf16.mxu0 %v14298_v45  ;;  %v14286_v45 = vld [vmem:[%s16528_s0 + $0xa4] ss:$8 sps:$4 sm:$0xff]  }
 0x982   : > { %6202 = vmatpush1.bf16.msra.mxu0 %v14296_v7  ;;  %v14284_v7 = vld [vmem:[%s16528_s0 + $0xa0] ss:$8 sps:$4 sm:$0xff]  }
 0x983   : > { %12436 = vmatmul.mubr.msk.bf16.vlgmr.msra.gmra.mxu1 %vm5719_vm3, %v16160_v20  ;;  %6203 = vmatprep.subr.bf16.mxu0 %v14301_v41  ;;  %v14289_v41 = vld [vmem:[%s16528_s0 + $0x94] ss:$8 sps:$4 sm:$0xff]  }
 0x984   : > { %6934 = vmatpush1.bf16.msra.mxu1 %v14245_v26  ;;  %6965 = vmatprep.mubr.bf16.mxu1 %v16106_v37  ;;  %v14254_v37 = vld [vmem:[%s16528_s0 + $0x40] ss:$8 sps:$4 sm:$0xff]   ;;  %v14287_v26 = vld [vmem:[%s16528_s0 + $0x90] ss:$8 sps:$4 sm:$0xff]  }
 0x985   : > { %6935 = vmatprep.subr.bf16.mxu1 %v14250_v46  ;;  %v14292_v46 = vld [vmem:[%s16528_s0 + $0x84] ss:$8 sps:$4 sm:$0xff]  }
 0x986   : > { %6204 = vmatpush1.bf16.msra.mxu0 %v14299_v63  ;;  %v14337_v63 = vld [vmem:[#allocation7 + $0x94] ss:$8 sps:$4 sm:$0xff]  }
 0x987   : > { %6205 = vmatprep.subr.bf16.mxu0 %v14304_v47  ;;  %v14335_v47 = vld [vmem:[#allocation7 + $0x90] ss:$8 sps:$4 sm:$0xff]  }
 0x988   : > { %6936 = vmatpush1.bf16.msra.mxu1 %v14248_v34  ;;  %v14290_v34 = vld [vmem:[%s16528_s0 + $0x80] ss:$8 sps:$4 sm:$0xff]  }
 0x989   : > { %6937 = vmatprep.subr.bf16.mxu1 %v14253_v33  ;;  %v14340_v33 = vld [vmem:[#allocation7 + $0x84] ss:$8 sps:$4 sm:$0xff]  }
 0x98a   : > { %6206 = vmatpush1.bf16.msra.mxu0 %v14302_v49  ;;  %v14338_v49 = vld [vmem:[#allocation7 + $0x80] ss:$8 sps:$4 sm:$0xff]  }
 0x98b   : > { %6207 = vmatprep.subr.bf16.mxu0 %v14307_v50  ;;  %v14343_v50 = vld [vmem:[#allocation7 + $0x274] ss:$8 sps:$4 sm:$0xff]  }
 0x98c   : > { %6938 = vmatpush1.bf16.msra.mxu1 %v14251_v39 }
 0x98d   : > { %6939 = vmatprep.subr.bf16.mxu1 %v14256_v36 }
 0x98e   : > { %6208 = vmatpush1.bf16.msra.mxu0 %v14305_v51 }
 0x98f   : > { %6209 = vmatprep.subr.bf16.mxu0 %v14310_v52 }
 0x990   : > { %6940 = vmatpush1.bf16.msra.mxu1 %v14254_v37 }
 0x991   : > { %6941 = vmatprep.subr.bf16.mxu1 %v14259_v53 }
 0x992   : > { %6210 = vmatpush1.bf16.msra.mxu0 %v14308_v42  ;;  %v14341_v42 = vld [vmem:[#allocation7 + $0x270] ss:$8 sps:$4 sm:$0xff]  }
 0x993   : > { %6211 = vmatprep.subr.bf16.mxu0 %v14313_v55 }
 0x994   : > { %6942 = vmatpush1.bf16.msra.mxu1 %v14257_v56 }
 0x995   : > { %6943 = vmatprep.subr.bf16.mxu1 %v14262_v57 }
 0x996   : > { %6212 = vmatpush1.bf16.msra.mxu0 %v14311_v58  ;;  %v14346_v58 = vld [vmem:[#allocation7 + $0x264] ss:$8 sps:$4 sm:$0xff]  }
 0x997   : > { %6213 = vmatprep.subr.bf16.mxu0 %v14316_v2 }
 0x998   : > { %6944 = vmatpush1.bf16.msra.mxu1 %v14260_v59  ;;  %v14344_v59 = vld [vmem:[#allocation7 + $0x260] ss:$8 sps:$4 sm:$0xff]  }
 0x999   : > { %6945 = vmatprep.subr.bf16.mxu1 %v14265_v60  ;;  %v14349_v60 = vld [vmem:[#allocation7 + $0x254] ss:$8 sps:$4 sm:$0xff]  }
 0x99a   : > { %6214 = vmatpush1.bf16.msra.mxu0 %v14314_v54 }
 0x99b   : > { %6215 = vmatprep.subr.bf16.mxu0 %v14319_v61 }
 0x99c   : > { %6946 = vmatpush1.bf16.msra.mxu1 %v14263_v62 }
 0x99d   : > { %6947 = vmatprep.subr.bf16.mxu1 %v14268_v0  ;;  %v14347_v0 = vld [vmem:[#allocation7 + $0x250] ss:$8 sps:$4 sm:$0xff]  }
 0x99e   : > { %6216 = vmatpush2.bf16.msra.mxu0 %v14317_v6  ;;  %v14352_v6 = vld [vmem:[#allocation7 + $0x244] ss:$8 sps:$4 sm:$0xff]  }
 0x99f   : > { %6217 = vmatprep.subr.bf16.mxu0 %v14322_v9 }
 0x9a0   : > { %6948 = vmatpush1.bf16.msra.mxu1 %v14266_v12  ;;  %v14350_v12 = vld [vmem:[#allocation7 + $0x240] ss:$8 sps:$4 sm:$0xff]  }
 0x9a1   : > { %6949 = vmatprep.subr.bf16.mxu1 %v14271_v11  ;;  %v14355_v11 = vld [vmem:[#allocation7 + $0x234] ss:$8 sps:$4 sm:$0xff]  }
 0x9a2   : > { %6218 = vmatpush2.bf16.msra.mxu0 %v14320_v15  ;;  %v14353_v15 = vld [vmem:[#allocation7 + $0x230] ss:$8 sps:$4 sm:$0xff]  }
 0x9a3   : > { %6219 = vmatprep.subr.bf16.mxu0 %v14325_v19  ;;  %v14358_v19 = vld [vmem:[#allocation7 + $0x224] ss:$8 sps:$4 sm:$0xff]  }
 0x9a4   : > { %6950 = vmatpush2.bf16.msra.mxu1 %v14269_v25  ;;  %v14356_v25 = vld [vmem:[#allocation7 + $0x220] ss:$8 sps:$4 sm:$0xff]  }
 0x9a5   : > { %6951 = vmatprep.subr.bf16.mxu1 %v14274_v27  ;;  %v14361_v27 = vld [vmem:[#allocation7 + $0x214] ss:$8 sps:$4 sm:$0xff]  }
 0x9a6   : > { %6220 = vmatpush2.bf16.msra.mxu0 %v14323_v29  ;;  %v14359_v29 = vld [vmem:[#allocation7 + $0x210] ss:$8 sps:$4 sm:$0xff]  }
 0x9a7   : > { %6221 = vmatprep.subr.bf16.mxu0 %v14328_v31  ;;  %v14364_v31 = vld [vmem:[#allocation7 + $0x204] ss:$8 sps:$4 sm:$0xff]  }
 0x9a8   : > { %6952 = vmatpush2.bf16.msra.mxu1 %v14272_v30  ;;  %v14362_v30 = vld [vmem:[#allocation7 + $0x200] ss:$8 sps:$4 sm:$0xff]  }
 0x9a9   : > { %6953 = vmatprep.subr.bf16.mxu1 %v14277_v32  ;;  %v14367_v32 = vld [vmem:[#allocation7 + $0x2f4] ss:$8 sps:$4 sm:$0xff]  }
 0x9aa   : > { %6222 = vmatpush2.bf16.msra.mxu0 %v14326_v16  ;;  %v14365_v16 = vld [vmem:[#allocation7 + $0x2f0] ss:$8 sps:$4 sm:$0xff]  }
 0x9ab   : > { %6223 = vmatprep.subr.bf16.mxu0 %v14331_v13  ;;  %v14370_v13 = vld [vmem:[#allocation7 + $0x2e4] ss:$8 sps:$4 sm:$0xff]  }
 0x9ac   : > { %6954 = vmatpush2.bf16.msra.mxu1 %v14275_v35  ;;  %v14368_v35 = vld [vmem:[#allocation7 + $0x2e0] ss:$8 sps:$4 sm:$0xff]  }
 0x9ad   : > { %6955 = vmatprep.subr.bf16.mxu1 %v14280_v40  ;;  %v14373_v40 = vld [vmem:[#allocation7 + $0x2d4] ss:$8 sps:$4 sm:$0xff]  }
 0x9ae   : > { %6224 = vmatpush2.bf16.msra.mxu0 %v14329_v43  ;;  %v14371_v43 = vld [vmem:[#allocation7 + $0x2d0] ss:$8 sps:$4 sm:$0xff]  }
 0x9af   : > { %6225 = vmatprep.subr.bf16.mxu0 %v14334_v14  ;;  %v14376_v14 = vld [vmem:[#allocation7 + $0x2c4] ss:$8 sps:$4 sm:$0xff]  }
 0x9b0   : > { %6956 = vmatpush2.bf16.msra.mxu1 %v14278_v17  ;;  %v14374_v17 = vld [vmem:[#allocation7 + $0x2c0] ss:$8 sps:$4 sm:$0xff]  }
 0x9b1   : > { %6957 = vmatprep.subr.bf16.mxu1 %v14283_v18  ;;  %v14379_v18 = vld [vmem:[#allocation7 + $0x2b4] ss:$8 sps:$4 sm:$0xff]  }
 0x9b2   : > { %6226 = vmatpush2.bf16.msra.mxu0 %v14332_v44  ;;  %v14377_v44 = vld [vmem:[#allocation7 + $0x2b0] ss:$8 sps:$4 sm:$0xff]  }
 0x9b3   : > { %6227 = vmatprep.subr.bf16.mxu0 %v14337_v63  ;;  %v14391_v63 = vld [vmem:[%s16528_s0 + $0x174] ss:$8 sps:$4 sm:$0xff]  }
 0x9b4   : > { %6958 = vmatpush2.bf16.msra.mxu1 %v14281_v23  ;;  %v14382_v23 = vld [vmem:[#allocation7 + $0x2a4] ss:$8 sps:$4 sm:$0xff]  }
 0x9b5   : > { %6959 = vmatprep.subr.bf16.mxu1 %v14286_v45  ;;  %v14380_v45 = vld [vmem:[#allocation7 + $0x2a0] ss:$8 sps:$4 sm:$0xff]  }
 0x9b6   : > { %6228 = vmatpush2.bf16.msra.mxu0 %v14335_v47  ;;  %v14389_v47 = vld [vmem:[%s16528_s0 + $0x170] ss:$8 sps:$4 sm:$0xff]  }
 0x9b7   : > { %6229 = vmatprep.subr.bf16.mxu0 %v14340_v33  ;;  %v14394_v33 = vld [vmem:[%s16528_s0 + $0x164] ss:$8 sps:$4 sm:$0xff]  }
 0x9b8   : > { %6960 = vmatpush2.bf16.msra.mxu1 %v14284_v7  ;;  %v14385_v7 = vld [vmem:[#allocation7 + $0x294] ss:$8 sps:$4 sm:$0xff]  }
 0x9b9   : > { %6961 = vmatprep.subr.bf16.mxu1 %v14289_v41  ;;  %v14383_v41 = vld [vmem:[#allocation7 + $0x290] ss:$8 sps:$4 sm:$0xff]  }
 0x9ba   : > { %6230 = vmatpush2.bf16.msra.mxu0 %v14338_v49 }
 0x9bb   : > { %6480 = vmatprep.subr.bf16.mxu0 %v14343_v50  ;;  %v14392_v50 = vld [vmem:[%s16528_s0 + $0x160] ss:$8 sps:$4 sm:$0xff]  }
 0x9bc   : > { %6962 = vmatpush2.bf16.msra.mxu1 %v14287_v26  ;;  %v14388_v26 = vld [vmem:[#allocation7 + $0x284] ss:$8 sps:$4 sm:$0xff]  }
 0x9bd   : > { %6963 = vmatprep.subr.bf16.mxu1 %v14292_v46  ;;  %v14386_v46 = vld [vmem:[#allocation7 + $0x280] ss:$8 sps:$4 sm:$0xff]  }
 0x9c0   : > { %6964 = vmatpush2.bf16.msra.mxu1 %v14290_v34 }
 0x9c3   : > { %6966 = vmatmul.mubr.bf16.vlgmr.msra.gmra.mxu1 %v16104_v4 }
 0x9c4   : > { %7061 = vmatprep.mubr.bf16.mxu1 %v15569_v48 }
 0xa3b   : > { %v16198_v39 = vpop.f32.mrf.mxu1 }
 0xa3d   : > { %v16200_v36 = vpop.f32.mrf.mxu1  ;;  %v5764_v51 = vpop.f32.mrf.mxu0 }
 0xa3e   : > { %v5771_v55 = vpack.c.bf16 %v5764_v51, %v5764_v51 }
 0xa3f   : > { %v6036_v52 = vpop.f32.mrf.mxu1  ;;  %v5766_v37 = vpop.f32.mrf.mxu0 }
 0xa40   : > { %v5772_v53 = vpack.c.bf16 %v5766_v37, %v5766_v37  ;;  %v14397_v52 = vld [vmem:[%s16528_s0 + $0x154] ss:$8 sps:$4 sm:$0xff]  }
 0xa41   : > { %v6037_v56 = vpop.f32.mrf.mxu1  ;;  %v5768_v57 = vpop.f32.mrf.mxu0 }
 0xa42   : > { %6231 = vmatprep.mubr.bf16.mxu0 %v5772_v53  ;;  %v14395_v53 = vld [vmem:[%s16528_s0 + $0x150] ss:$8 sps:$4 sm:$0xff]   ;;  %v14398_v56 = vld [vmem:[%s16528_s0 + $0x140] ss:$8 sps:$4 sm:$0xff]  }
 0xa43   : > { %v5769_v2 = vpop.f32.mrf.mxu0  ;;  %6232 = vmatmul.mubr.bf16.vlgmr.msra.gmra.mxu0 %v5771_v55  ;;  %v16202_v4 = vpop.f32.mrf.mxu1  ;;  %v14400_v55 = vld [vmem:[%s16528_s0 + $0x144] ss:$8 sps:$4 sm:$0xff]   ;;  %v14401_v57 = vld [vmem:[%s16528_s0 + $0x130] ss:$8 sps:$4 sm:$0xff]  }
 0xa44   : > { %6481 = vmatpush1.bf16.msra.mxu0 %v14341_v42  ;;  %v6285_v34 = vpack.c.bf16 %v16202_v4, %v16202_v4  ;;  %v14404_v2 = vld [vmem:[%s16528_s0 + $0x120] ss:$8 sps:$4 sm:$0xff]   ;;  %v14409_v4 = vld [vmem:[%s16528_s0 + $0x114] ss:$8 sps:$4 sm:$0xff]  }
 0xa45   : > { %6482 = vmatprep.subr.bf16.mxu0 %v14346_v58  ;;  %v6280_v54 = vpop.f32.mrf.mxu1  ;;  %v14406_v58 = vld [vmem:[%s16528_s0 + $0x124] ss:$8 sps:$4 sm:$0xff]  }
 0xa46   : > { %v6286_v61 = vpack.c.bf16 %v6280_v54, %v6280_v54  ;;  %v14410_v54 = vld [vmem:[%s16528_s0 + $0x100] ss:$8 sps:$4 sm:$0xff]  }
 0xa47   : > { %v6282_v62 = vpop.f32.mrf.mxu1 }
 0xa48   : > { %6483 = vmatpush1.bf16.msra.mxu0 %v14344_v59  ;;  %6512 = vmatprep.mubr.bf16.mxu0 %v6286_v61  ;;  %v14407_v59 = vld [vmem:[%s16528_s0 + $0x110] ss:$8 sps:$4 sm:$0xff]   ;;  %v14415_v61 = vld [vmem:[%s16528_s0 + $0x1f4] ss:$8 sps:$4 sm:$0xff]  }
 0xa49   : > { %6484 = vmatprep.subr.bf16.mxu0 %v14349_v60  ;;  %v6283_v9 = vpop.f32.mrf.mxu1  ;;  %v14412_v60 = vld [vmem:[%s16528_s0 + $0x104] ss:$8 sps:$4 sm:$0xff]   ;;  %v14413_v62 = vld [vmem:[%s16528_s0 + $0x1f0] ss:$8 sps:$4 sm:$0xff]  }
 0xa4a   : > { %v14421_v9 = vld [vmem:[%s16528_s0 + $0x1d4] ss:$8 sps:$4 sm:$0xff]  }
 0xa4c   : > { %6485 = vmatpush1.bf16.msra.mxu0 %v14347_v0  ;;  %v14418_v0 = vld [vmem:[%s16528_s0 + $0x1e4] ss:$8 sps:$4 sm:$0xff]  }
 0xa4d   : > { %6486 = vmatprep.subr.bf16.mxu0 %v14352_v6  ;;  %v14416_v6 = vld [vmem:[%s16528_s0 + $0x1e0] ss:$8 sps:$4 sm:$0xff]  }
 0xa50   : > { %6487 = vmatpush1.bf16.msra.mxu0 %v14350_v12  ;;  %v14419_v12 = vld [vmem:[%s16528_s0 + $0x1d0] ss:$8 sps:$4 sm:$0xff]  }
 0xa51   : > { %6488 = vmatprep.subr.bf16.mxu0 %v14355_v11  ;;  %v14424_v11 = vld [vmem:[%s16528_s0 + $0x1c4] ss:$8 sps:$4 sm:$0xff]  }
 0xa54   : > { %6489 = vmatpush1.bf16.msra.mxu0 %v14353_v15  ;;  %v14422_v15 = vld [vmem:[%s16528_s0 + $0x1c0] ss:$8 sps:$4 sm:$0xff]  }
 0xa55   : > { %6490 = vmatprep.subr.bf16.mxu0 %v14358_v19  ;;  %v14427_v19 = vld [vmem:[%s16528_s0 + $0x1b4] ss:$8 sps:$4 sm:$0xff]  }
 0xa58   : > { %6491 = vmatpush1.bf16.msra.mxu0 %v14356_v25  ;;  %v14425_v25 = vld [vmem:[%s16528_s0 + $0x1b0] ss:$8 sps:$4 sm:$0xff]  }
 0xa59   : > { %6492 = vmatprep.subr.bf16.mxu0 %v14361_v27  ;;  %v14430_v27 = vld [vmem:[%s16528_s0 + $0x1a4] ss:$8 sps:$4 sm:$0xff]  }
 0xa5c   : > { %6493 = vmatpush1.bf16.msra.mxu0 %v14359_v29  ;;  %v14428_v29 = vld [vmem:[%s16528_s0 + $0x1a0] ss:$8 sps:$4 sm:$0xff]  }
 0xa5d   : > { %6494 = vmatprep.subr.bf16.mxu0 %v14364_v31  ;;  %v14433_v31 = vld [vmem:[%s16528_s0 + $0x194] ss:$8 sps:$4 sm:$0xff]  }
 0xa60   : > { %6495 = vmatpush1.bf16.msra.mxu0 %v14362_v30  ;;  %v14431_v30 = vld [vmem:[%s16528_s0 + $0x190] ss:$8 sps:$4 sm:$0xff]  }
 0xa61   : > { %6496 = vmatprep.subr.bf16.mxu0 %v14367_v32  ;;  %v14436_v32 = vld [vmem:[%s16528_s0 + $0x184] ss:$8 sps:$4 sm:$0xff]  }
 0xa64   : > { %6497 = vmatpush2.bf16.msra.mxu0 %v14365_v16  ;;  %v14434_v16 = vld [vmem:[%s16528_s0 + $0x180] ss:$8 sps:$4 sm:$0xff]  }
 0xa65   : > { %6498 = vmatprep.subr.bf16.mxu0 %v14370_v13 }
 0xa68   : > { %6499 = vmatpush2.bf16.msra.mxu0 %v14368_v35 }
 0xa69   : > { %6500 = vmatprep.subr.bf16.mxu0 %v14373_v40 }
 0xa6c   : > { %6501 = vmatpush2.bf16.msra.mxu0 %v14371_v43 }
 0xa6d   : > { %6502 = vmatprep.subr.bf16.mxu0 %v14376_v14 }
 0xa70   : > { %6503 = vmatpush2.bf16.msra.mxu0 %v14374_v17 }
 0xa71   : > { %6504 = vmatprep.subr.bf16.mxu0 %v14379_v18 }
 0xa74   : > { %6505 = vmatpush2.bf16.msra.mxu0 %v14377_v44 }
 0xa75   : > { %6506 = vmatprep.subr.bf16.mxu0 %v14382_v23 }
 0xa78   : > { %6507 = vmatpush2.bf16.msra.mxu0 %v14380_v45 }
 0xa79   : > { %6508 = vmatprep.subr.bf16.mxu0 %v14385_v7  ;;  %v14485_v7 = vld [vmem:[#allocation9 + $0x70] ss:$8 sps:$4 sm:$0xff]  }
 0xa7c   : > { %6509 = vmatpush2.bf16.msra.mxu0 %v14383_v41  ;;  %v14487_v41 = vld [vmem:[#allocation9 + $0x74] ss:$8 sps:$4 sm:$0xff]  }
 0xa7d   : > { %6510 = vmatprep.subr.bf16.mxu0 %v14388_v26  ;;  %v14490_v26 = vld [vmem:[#allocation9 + $0x64] ss:$8 sps:$4 sm:$0xff]  }
 0xa80   : > { %6511 = vmatpush2.bf16.msra.mxu0 %v14386_v46  ;;  %v14488_v46 = vld [vmem:[#allocation9 + $0x60] ss:$8 sps:$4 sm:$0xff]  }
 0xa81   : > { %6974 = vmatprep.subr.bf16.mxu0 %v14391_v63  ;;  %v14493_v63 = vld [vmem:[#allocation9 + $0x54] ss:$8 sps:$4 sm:$0xff]  }
 0xa83   : > { %v16209_v49 = vpop.f32.mrf.mxu1  ;;  %6513 = vmatmul.mubr.bf16.vlgmr.msra.gmra.mxu0 %v6285_v34  ;;  %v14494_v34 = vld [vmem:[#allocation9 + $0x40] ss:$8 sps:$4 sm:$0xff]  }
 0xa84   : > { %6975 = vmatpush1.bf16.msra.mxu0 %v14389_v47  ;;  %7006 = vmatprep.mubr.bf16.mxu0 %v16112_v5  ;;  %v14403_v5 = vld [vmem:[%s16528_s0 + $0x134] ss:$8 sps:$4 sm:$0xff]   ;;  %v14496_v47 = vld [vmem:[#allocation9 + $0x44] ss:$8 sps:$4 sm:$0xff]  }
 0xa85   : > { %v16213_v51 = vpop.f32.mrf.mxu1  ;;  %6976 = vmatprep.subr.bf16.mxu0 %v14394_v33  ;;  %v14497_v33 = vld [vmem:[#allocation9 + $0x30] ss:$8 sps:$4 sm:$0xff]  }
 0xa87   : > { %v6971_v37 = vpop.f32.mrf.mxu1 }
 0xa88   : > { %6977 = vmatpush1.bf16.msra.mxu0 %v14392_v50  ;;  %v14502_v50 = vld [vmem:[#allocation9 + $0x24] ss:$8 sps:$4 sm:$0xff]   ;;  %v14505_v37 = vld [vmem:[#allocation9 + $0x14] ss:$8 sps:$4 sm:$0xff]  }
 0xa89   : > { %v6972_v42 = vpop.f32.mrf.mxu1  ;;  %6978 = vmatprep.subr.bf16.mxu0 %v14397_v52  ;;  %v14500_v52 = vld [vmem:[#allocation9 + $0x20] ss:$8 sps:$4 sm:$0xff]  }
 0xa8a   : > { %v14508_v42 = vld [vmem:[#allocation9 + $0x4] ss:$8 sps:$4 sm:$0xff]  }
 0xa8c   : > { %6979 = vmatpush1.bf16.msra.mxu0 %v14395_v53  ;;  %v14503_v53 = vld [vmem:[#allocation9 + $0x10] ss:$8 sps:$4 sm:$0xff]  }
 0xa8d   : > { %6980 = vmatprep.subr.bf16.mxu0 %v14400_v55  ;;  %v14506_v55 = vld [vmem:[#allocation9] ss:$8 sps:$4 sm:$0xff]  }
 0xa90   : > { %6981 = vmatpush1.bf16.msra.mxu0 %v14398_v56  ;;  %v14511_v56 = vld [vmem:[#allocation9 + $0xf4] ss:$8 sps:$4 sm:$0xff]  }
 0xa91   : > { %6982 = vmatprep.subr.bf16.mxu0 %v14403_v5  ;;  %v14509_v5 = vld [vmem:[#allocation9 + $0xf0] ss:$8 sps:$4 sm:$0xff]  }
 0xa94   : > { %6983 = vmatpush1.bf16.msra.mxu0 %v14401_v57  ;;  %v14514_v57 = vld [vmem:[#allocation9 + $0xe4] ss:$8 sps:$4 sm:$0xff]  }
 0xa95   : > { %6984 = vmatprep.subr.bf16.mxu0 %v14406_v58  ;;  %v6601_v58 = vld [vmem:[%s16529_s2] sm:$0x3]  ;;  %s13060_s2 = sshll.u32 %s16541_s18, 2 }
 0xa98   : > { %6985 = vmatpush1.bf16.msra.mxu0 %v14404_v2  ;;  %v14512_v2 = vld [vmem:[#allocation9 + $0xe0] ss:$8 sps:$4 sm:$0xff]  }
 0xa99   : > { %6986 = vmatprep.subr.bf16.mxu0 %v14409_v4  ;;  %v14517_v4 = vld [vmem:[#allocation9 + $0xd4] ss:$8 sps:$4 sm:$0xff]  }
 0xa9c   : > { %6987 = vmatpush1.bf16.msra.mxu0 %v14407_v59  ;;  %v6523_v59 = vld [vmem:[%s16530_s10] sm:$0x3]  ;;  %s1113_s10 = scalar_lea.vmem %s15723_s29, %s13060_s2 }
 0xa9d   : > { %6988 = vmatprep.subr.bf16.mxu0 %v14412_v60  ;;  %v6606_v60 = vrot.slane %v6601_v58, %v16026_v28 }
 0xaa0   : > { %6989 = vmatpush1.bf16.msra.mxu0 %v14410_v54  ;;  %v14515_v54 = vld [vmem:[#allocation9 + $0xd0] ss:$8 sps:$4 sm:$0xff]  }
 0xaa1   : > { %6990 = vmatprep.subr.bf16.mxu0 %v14415_v61  ;;  %v6610_v61 = vrot.slane %v6601_v58, %v16031_v8  ;;  %v14466_v58 = vld [vmem:[#allocation9 + $0x1e4] ss:$8 sps:$4 sm:$0xff]  }
 0xaa4   : > { %6991 = vmatpush2.bf16.msra.mxu0 %v14413_v62 }
 0xaa5   : > { %6992 = vmatprep.subr.bf16.mxu0 %v14418_v0  ;;  %v6528_v0 = vrot.slane %v6523_v59, %v16026_v28 }
 0xaa8   : > { %6993 = vmatpush2.bf16.msra.mxu0 %v14416_v6  ;;  %v14520_v6 = vld [vmem:[#allocation9 + $0xc4] ss:$8 sps:$4 sm:$0xff]  }
 0xaa9   : > { %6994 = vmatprep.subr.bf16.mxu0 %v14421_v9  ;;  %v6968_v9 = vadd.f32 %v16209_v49, %v6606_v60  ;;  %v14472_v60 = vld [vmem:[#allocation9 + $0x1c4] ss:$8 sps:$4 sm:$0xff]  }
 0xaac   : > { %6995 = vmatpush2.bf16.msra.mxu0 %v14419_v12 }
 0xaad   : > { %6996 = vmatprep.subr.bf16.mxu0 %v14424_v11  ;;  %v6532_v11 = vrot.slane %v6523_v59, %v16031_v8  ;;  %v14467_v59 = vld [vmem:[#allocation9 + $0x1d0] ss:$8 sps:$4 sm:$0xff]  }
 0xab0   : > { %6997 = vmatpush2.bf16.msra.mxu0 %v14422_v15 }
 0xab1   : > { %6998 = vmatprep.subr.bf16.mxu0 %v14427_v19  ;;  %v14518_v19 = vld [vmem:[#allocation9 + $0xc0] ss:$8 sps:$4 sm:$0xff]  }
 0xab4   : > { %6999 = vmatpush2.bf16.msra.mxu0 %v14425_v25  ;;  %v6970_v25 = vadd.f32 %v16213_v51, %v6610_v61  ;;  %v14524_v51 = vld [vmem:[#allocation9 + $0xa0] ss:$8 sps:$4 sm:$0xff]   ;;  %v14475_v61 = vld [vmem:[#allocation9 + $0x1b4] ss:$8 sps:$4 sm:$0xff]  }
 0xab5   : > { %7000 = vmatprep.subr.bf16.mxu0 %v14430_v27 }
 0xab8   : > { %7001 = vmatpush2.bf16.msra.mxu0 %v14428_v29 }
 0xab9   : > { %7002 = vmatprep.subr.bf16.mxu0 %v14433_v31  ;;  %v14523_v31 = vld [vmem:[#allocation9 + $0xb4] ss:$8 sps:$4 sm:$0xff]  }
 0xabc   : > { %7003 = vmatpush2.bf16.msra.mxu0 %v14431_v30 }
 0xabd   : > { %7004 = vmatprep.subr.bf16.mxu0 %v14436_v32 }
 0xac0   : > { %7005 = vmatpush2.bf16.msra.mxu0 %v14434_v16 }
 0xac1   : > { %7543 = vmatprep.subr.bf16.mxu0 %v14487_v41  ;;  %v14527_v41 = vld [vmem:[#allocation9 + $0x90] ss:$8 sps:$4 sm:$0xff]  }
 0xac3   : > { %7007 = vmatmul.mubr.bf16.vlgmr.msra.gmra.mxu0 %v16114_v10  ;;  %v14491_v10 = vld [vmem:[#allocation9 + $0x50] ss:$8 sps:$4 sm:$0xff]  }
 0xac4   : > { %7544 = vmatpush1.bf16.msra.mxu0 %v14485_v7  ;;  %v14439_v7 = vld [vmem:[#allocation9 + $0x174] ss:$8 sps:$4 sm:$0xff]  }
 0xac5   : > { %7545 = vmatprep.subr.bf16.mxu0 %v14490_v26  ;;  %v14437_v26 = vld [vmem:[#allocation9 + $0x170] ss:$8 sps:$4 sm:$0xff]  }
 0xac8   : > { %7546 = vmatpush1.bf16.msra.mxu0 %v14488_v46  ;;  %v14442_v46 = vld [vmem:[#allocation9 + $0x164] ss:$8 sps:$4 sm:$0xff]  }
 0xac9   : > { %7547 = vmatprep.subr.bf16.mxu0 %v14493_v63  ;;  %v14440_v63 = vld [vmem:[#allocation9 + $0x160] ss:$8 sps:$4 sm:$0xff]  }
 0xacc   : > { %7548 = vmatpush1.bf16.msra.mxu0 %v14491_v10  ;;  %v14445_v10 = vld [vmem:[#allocation9 + $0x154] ss:$8 sps:$4 sm:$0xff]  }
 0xacd   : > { %7549 = vmatprep.subr.bf16.mxu0 %v14496_v47  ;;  %v14443_v47 = vld [vmem:[#allocation9 + $0x150] ss:$8 sps:$4 sm:$0xff]  }
 0xad0   : > { %7550 = vmatpush1.bf16.msra.mxu0 %v14494_v34  ;;  %v14448_v34 = vld [vmem:[#allocation9 + $0x144] ss:$8 sps:$4 sm:$0xff]  }
 0xb03   : > { %v6233_v13 = vpop.f32.mrf.mxu0 }
 0xb04   : > { %v6234_v14 = vadd.f32 %v6233_v13, %v16198_v39  ;;  %v14499_v39 = vld [vmem:[#allocation9 + $0x34] ss:$8 sps:$4 sm:$0xff]  }
 0xb05   : > { %v6235_v35 = vpop.f32.mrf.mxu0  ;;  %7551 = vmatprep.subr.bf16.mxu0 %v14499_v39  ;;  %v14446_v39 = vld [vmem:[#allocation9 + $0x140] ss:$8 sps:$4 sm:$0xff]  }
 0xb06   : > { %7552 = vmatpush1.bf16.msra.mxu0 %v14497_v33  ;;  %v6236_v62 = vadd.f32 %v6235_v35, %v16200_v36  ;;  %v14521_v35 = vld [vmem:[#allocation9 + $0xb0] ss:$8 sps:$4 sm:$0xff]   ;;  %v14451_v33 = vld [vmem:[#allocation9 + $0x134] ss:$8 sps:$4 sm:$0xff]  }
 0xb07   : > { %v6237_v40 = vpop.f32.mrf.mxu0  ;;  %7553 = vmatprep.subr.bf16.mxu0 %v14502_v50  ;;  %v14449_v50 = vld [vmem:[#allocation9 + $0x130] ss:$8 sps:$4 sm:$0xff]  }
 0xb09   : > { %v6238_v43 = vpop.f32.mrf.mxu0 }
 0xb0a   : > { %7554 = vmatpush1.bf16.msra.mxu0 %v14500_v52  ;;  %v14526_v43 = vld [vmem:[#allocation9 + $0xa4] ss:$8 sps:$4 sm:$0xff]  }
 0xb0b   : > { %7555 = vmatprep.subr.bf16.mxu0 %v14505_v37  ;;  %v14454_v52 = vld [vmem:[#allocation9 + $0x124] ss:$8 sps:$4 sm:$0xff]   ;;  %v14452_v37 = vld [vmem:[#allocation9 + $0x120] ss:$8 sps:$4 sm:$0xff]  }
 0xb0e   : > { %7556 = vmatpush1.bf16.msra.mxu0 %v14503_v53  ;;  %v14457_v53 = vld [vmem:[#allocation9 + $0x114] ss:$8 sps:$4 sm:$0xff]  }
 0xb0f   : > { %7557 = vmatprep.subr.bf16.mxu0 %v14508_v42  ;;  %v14455_v42 = vld [vmem:[#allocation9 + $0x110] ss:$8 sps:$4 sm:$0xff]  }
 0xb12   : > { %7558 = vmatpush1.bf16.msra.mxu0 %v14506_v55  ;;  %v14460_v55 = vld [vmem:[#allocation9 + $0x104] ss:$8 sps:$4 sm:$0xff]  }
 0xb13   : > { %7559 = vmatprep.subr.bf16.mxu0 %v14511_v56  ;;  %v14458_v56 = vld [vmem:[#allocation9 + $0x100] ss:$8 sps:$4 sm:$0xff]  }
 0xb16   : > { %7560 = vmatpush2.bf16.msra.mxu0 %v14509_v5  ;;  %v14463_v5 = vld [vmem:[#allocation9 + $0x1f4] ss:$8 sps:$4 sm:$0xff]  }
 0xb17   : > { %7561 = vmatprep.subr.bf16.mxu0 %v14514_v57  ;;  %v14461_v57 = vld [vmem:[#allocation9 + $0x1f0] ss:$8 sps:$4 sm:$0xff]  }
 0xb1a   : > { %7562 = vmatpush2.bf16.msra.mxu0 %v14512_v2  ;;  %v14464_v2 = vld [vmem:[#allocation9 + $0x1e0] ss:$8 sps:$4 sm:$0xff]  }
 0xb1b   : > { %7563 = vmatprep.subr.bf16.mxu0 %v14517_v4  ;;  %v14469_v4 = vld [vmem:[#allocation9 + $0x1d4] ss:$8 sps:$4 sm:$0xff]  }
 0xb1e   : > { %7564 = vmatpush2.bf16.msra.mxu0 %v14515_v54  ;;  %v14470_v54 = vld [vmem:[#allocation9 + $0x1c0] ss:$8 sps:$4 sm:$0xff]  }
 0xb1f   : > { %7565 = vmatprep.subr.bf16.mxu0 %v14520_v6  ;;  %v14476_v6 = vld [vmem:[#allocation9 + $0x1a0] ss:$8 sps:$4 sm:$0xff]  }
 0xb22   : > { %7566 = vmatpush2.bf16.msra.mxu0 %v14518_v19  ;;  %v14532_v19 = vld [vmem:[#allocation9 + $0x84] ss:$8 sps:$4 sm:$0xff]  }
 0xb23   : > { %7567 = vmatprep.subr.bf16.mxu0 %v14523_v31 }
 0xb26   : > { %7568 = vmatpush2.bf16.msra.mxu0 %v14521_v35 }
 0xb27   : > { %7569 = vmatprep.subr.bf16.mxu0 %v14526_v43  ;;  %v14535_v43 = vld [vmem:[#allocation9 + $0x274] ss:$8 sps:$4 sm:$0xff]  }
 0xb2a   : > { %7570 = vmatpush2.bf16.msra.mxu0 %v14524_v51  ;;  %v14536_v51 = vld [vmem:[#allocation9 + $0x260] ss:$8 sps:$4 sm:$0xff]  }
 0xb43   : > { %v6514_v17 = vpop.f32.mrf.mxu0 }
 0xb44   : > { %v6521_v18 = vadd.f32 %v6514_v17, %v6234_v14 }
 0xb45   : > { %v6516_v44 = vpop.f32.mrf.mxu0 }
 0xb46   : > { %v6522_v12 = vadd.f32 %v6516_v44, %v6236_v62  ;;  %v6535_v27 = vadd.f32 %v6528_v0, %v6521_v18  ;;  %v14473_v62 = vld [vmem:[#allocation9 + $0x1b0] ss:$8 sps:$4 sm:$0xff]   ;;  %v14478_v0 = vld [vmem:[#allocation9 + $0x1a4] ss:$8 sps:$4 sm:$0xff]  }
 0xb47   : > { %v6518_v23 = vpop.f32.mrf.mxu0 }
 0xb48   : > { %v6536_v36 = vadd.f32 %v6532_v11, %v6522_v12  ;;  %v14529_v23 = vld [vmem:[#allocation9 + $0x94] ss:$8 sps:$4 sm:$0xff]   ;;  %v14479_v12 = vld [vmem:[#allocation9 + $0x190] ss:$8 sps:$4 sm:$0xff]   ;;  %v14484_v11 = vld [vmem:[#allocation9 + $0x184] ss:$8 sps:$4 sm:$0xff]  }
 0xb49   : > { %v6519_v45 = vpop.f32.mrf.mxu0  ;;  %7571 = vmatprep.subr.bf16.mxu0 %v14529_v23  ;;  %v14539_v23 = vld [vmem:[#allocation9 + $0x250] ss:$8 sps:$4 sm:$0xff]  }
 0xb4a   : > { %7572 = vmatpush2.bf16.msra.mxu0 %v14527_v41  ;;  %v14542_v41 = vld [vmem:[#allocation9 + $0x240] ss:$8 sps:$4 sm:$0xff]  }
 0xb4b   : > { %7573 = vmatprep.subr.bf16.mxu0 %v14532_v19 }
 0xb83   : > { %v7008_v15 = vpop.f32.mrf.mxu0 }
 0xb84   : > { %v7009_v29 = vadd.f32 %v7008_v15, %v6968_v9  ;;  %v14481_v9 = vld [vmem:[#allocation9 + $0x194] ss:$8 sps:$4 sm:$0xff]   ;;  %v14482_v15 = vld [vmem:[#allocation9 + $0x180] ss:$8 sps:$4 sm:$0xff]  }
 0xb85   : > { %v7010_v30 = vpop.f32.mrf.mxu0 }
 0xb86   : > { %v7015_v32 = vadd.f32 %v7009_v29, %v6535_v27  ;;  %v7011_v16 = vadd.f32 %v7010_v30, %v6970_v25  ;;  %v14530_v25 = vld [vmem:[#allocation9 + $0x80] ss:$8 sps:$4 sm:$0xff]  }
 0xb87   : > { %v7012_v13 = vpop.f32.mrf.mxu0  ;;  %7574 = vmatpush2.bf16.msra.mxu0 %v14530_v25 }
 0xb88   : > { %v7017_v49 = vmax.f32 %v7015_v32, 0.0  ;;  %v7016_v40 = vadd.f32 %v7011_v16, %v6536_v36 }
 0xb89   : > { %v7013_v14 = vpop.f32.mrf.mxu0 }
 0xb8a   : > { %v7019_v17 = vpack.c.bf16 %v7017_v49, %v7017_v49  ;;  %v7018_v44 = vmax.f32 %v7016_v40, 0.0 }
 0xb8c   : > { %v16254_v18 = vpack.c.bf16 %v7018_v44, %v7018_v44  ;;  %v16259_v45 = vsel %vm5723_vm2, %v7019_v17, 0  ;;  %v14533_v17 = vld [vmem:[#allocation9 + $0x270] ss:$8 sps:$4 sm:$0xff]   ;;  %v14538_v44 = vld [vmem:[#allocation9 + $0x264] ss:$8 sps:$4 sm:$0xff]  }
 0xb8e   : > { %12533 = vmatprep.subr.msk.bf16.mxu1 %vm5723_vm2, %v16254_v18 }
 0xb8f   : > { %7044 = vmatpush1.bf16.msra.mxu1 %v16259_v45 }
 0xb90   : > { %12535 = vmatprep.subr.msk.bf16.mxu1 %vm5723_vm2, %v16254_v18 }
 0xb92   : > { %12534 = vmatmul.mubr.msk.bf16.vlgmr.msra.gmra.mxu1 %vm5719_vm3, %v16080_v21 }
 0xb93   : > { %7121 = vmatpush1.bf16.msra.mxu1 %v16259_v45  ;;  %7138 = vmatprep.mubr.bf16.mxu1 %v15569_v48 }
 0xb94   : > { %7342 = vmatprep.subr.bf16.mxu1 %v14439_v7  ;;  %v14544_v7 = vld [vmem:[#allocation9 + $0x244] ss:$8 sps:$4 sm:$0xff]  }
 0xb9a   : > { %12536 = vmatmul.mubr.msk.bf16.vlgmr.msra.gmra.mxu1 %vm5719_vm3, %v16082_v22 }
 0xb9b   : > { %7343 = vmatpush1.bf16.msra.mxu1 %v14437_v26  ;;  %v14545_v26 = vld [vmem:[#allocation9 + $0x230] ss:$8 sps:$4 sm:$0xff]  }
 0xb9c   : > { %7344 = vmatprep.subr.bf16.mxu1 %v14442_v46  ;;  %v14550_v46 = vld [vmem:[#allocation9 + $0x224] ss:$8 sps:$4 sm:$0xff]  }
 0xb9f   : > { %7345 = vmatpush1.bf16.msra.mxu1 %v14440_v63  ;;  %v14548_v63 = vld [vmem:[#allocation9 + $0x220] ss:$8 sps:$4 sm:$0xff]  }
 0xba0   : > { %7346 = vmatprep.subr.bf16.mxu1 %v14445_v10  ;;  %v14553_v10 = vld [vmem:[#allocation9 + $0x214] ss:$8 sps:$4 sm:$0xff]  }
 0xba3   : > { %7347 = vmatpush1.bf16.msra.mxu1 %v14443_v47  ;;  %v14551_v47 = vld [vmem:[#allocation9 + $0x210] ss:$8 sps:$4 sm:$0xff]  }
 0xba4   : > { %7348 = vmatprep.subr.bf16.mxu1 %v14448_v34  ;;  %v14556_v34 = vld [vmem:[#allocation9 + $0x204] ss:$8 sps:$4 sm:$0xff]  }
 0xba7   : > { %7349 = vmatpush1.bf16.msra.mxu1 %v14446_v39  ;;  %v14554_v39 = vld [vmem:[#allocation9 + $0x200] ss:$8 sps:$4 sm:$0xff]  }
 0xba8   : > { %7350 = vmatprep.subr.bf16.mxu1 %v14451_v33  ;;  %v14559_v33 = vld [vmem:[#allocation9 + $0x2f4] ss:$8 sps:$4 sm:$0xff]  }
 0xbab   : > { %7351 = vmatpush1.bf16.msra.mxu1 %v14449_v50  ;;  %v14557_v50 = vld [vmem:[#allocation9 + $0x2f0] ss:$8 sps:$4 sm:$0xff]  }
 0xbac   : > { %7352 = vmatprep.subr.bf16.mxu1 %v14454_v52  ;;  %v14562_v52 = vld [vmem:[#allocation9 + $0x2e4] ss:$8 sps:$4 sm:$0xff]  }
 0xbaf   : > { %7353 = vmatpush1.bf16.msra.mxu1 %v14452_v37  ;;  %v14560_v37 = vld [vmem:[#allocation9 + $0x2e0] ss:$8 sps:$4 sm:$0xff]  }
 0xbb0   : > { %7354 = vmatprep.subr.bf16.mxu1 %v14457_v53  ;;  %v14565_v53 = vld [vmem:[#allocation9 + $0x2d4] ss:$8 sps:$4 sm:$0xff]  }
 0xbb3   : > { %7355 = vmatpush1.bf16.msra.mxu1 %v14455_v42  ;;  %v14563_v42 = vld [vmem:[#allocation9 + $0x2d0] ss:$8 sps:$4 sm:$0xff]  }
 0xbb4   : > { %7356 = vmatprep.subr.bf16.mxu1 %v14460_v55  ;;  %v14568_v55 = vld [vmem:[#allocation9 + $0x2c4] ss:$8 sps:$4 sm:$0xff]  }
 0xbb7   : > { %7357 = vmatpush1.bf16.msra.mxu1 %v14458_v56  ;;  %v14566_v56 = vld [vmem:[#allocation9 + $0x2c0] ss:$8 sps:$4 sm:$0xff]  }
 0xbb8   : > { %7358 = vmatprep.subr.bf16.mxu1 %v14463_v5  ;;  %v14571_v5 = vld [vmem:[#allocation9 + $0x2b4] ss:$8 sps:$4 sm:$0xff]  }
 0xbbb   : > { %7359 = vmatpush2.bf16.msra.mxu1 %v14461_v57  ;;  %v14569_v57 = vld [vmem:[#allocation9 + $0x2b0] ss:$8 sps:$4 sm:$0xff]  }
 0xbbc   : > { %7360 = vmatprep.subr.bf16.mxu1 %v14466_v58  ;;  %v14574_v58 = vld [vmem:[#allocation9 + $0x2a4] ss:$8 sps:$4 sm:$0xff]  }
 0xbbf   : > { %7361 = vmatpush2.bf16.msra.mxu1 %v14464_v2  ;;  %v14572_v2 = vld [vmem:[#allocation9 + $0x2a0] ss:$8 sps:$4 sm:$0xff]  }
 0xbc0   : > { %7362 = vmatprep.subr.bf16.mxu1 %v14469_v4  ;;  %v14577_v4 = vld [vmem:[#allocation9 + $0x294] ss:$8 sps:$4 sm:$0xff]  }
 0xbc3   : > { %7363 = vmatpush2.bf16.msra.mxu1 %v14467_v59  ;;  %v14575_v59 = vld [vmem:[#allocation9 + $0x290] ss:$8 sps:$4 sm:$0xff]  }
 0xbc4   : > { %7364 = vmatprep.subr.bf16.mxu1 %v14472_v60  ;;  %v14580_v60 = vld [vmem:[#allocation9 + $0x284] ss:$8 sps:$4 sm:$0xff]  }
 0xbc7   : > { %7365 = vmatpush2.bf16.msra.mxu1 %v14470_v54  ;;  %v14578_v54 = vld [vmem:[#allocation9 + $0x280] ss:$8 sps:$4 sm:$0xff]  }
 0xbc8   : > { %7366 = vmatprep.subr.bf16.mxu1 %v14475_v61 }
 0xbcb   : > { %7367 = vmatpush2.bf16.msra.mxu1 %v14473_v62 }
 0xbcc   : > { %7368 = vmatprep.subr.bf16.mxu1 %v14478_v0 }
 0xbcf   : > { %7369 = vmatpush2.bf16.msra.mxu1 %v14476_v6 }
 0xbd0   : > { %7370 = vmatprep.subr.bf16.mxu1 %v14481_v9 }
 0xbd3   : > { %7371 = vmatpush2.bf16.msra.mxu1 %v14479_v12 }
 0xbd4   : > { %7372 = vmatprep.subr.bf16.mxu1 %v14484_v11 }
 0xbd7   : > { %7373 = vmatpush2.bf16.msra.mxu1 %v14482_v15 }
 0xbd8   : > { %12601 = vmatprep.subr.msk.bf16.mxu1 %vm5723_vm2, %v16254_v18  ;;  %v14541_v18 = vld [vmem:[#allocation9 + $0x254] ss:$8 sps:$4 sm:$0xff]  }
 0xc52   : > { %v7063_v27 = vpop.f32.mrf.mxu1 }
 0xc53   : > { %v7070_v30 = vpack.c.bf16 %v7063_v27, %v7063_v27 }
 0xc54   : > { %v7065_v29 = vpop.f32.mrf.mxu1 }
 0xc55   : > { %v7071_v31 = vpack.c.bf16 %v7065_v29, %v7065_v29 }
 0xc56   : > { %v7067_v36 = vpop.f32.mrf.mxu1 }
 0xc57   : > { %7575 = vmatprep.mubr.bf16.mxu0 %v7071_v31 }
 0xc58   : > { %v7068_v32 = vpop.f32.mrf.mxu1  ;;  %7576 = vmatmul.mubr.bf16.vlgmr.msra.gmra.mxu0 %v7070_v30 }
 0xc59   : > { %7925 = vmatprep.mubr.bf16.mxu0 %v15569_v48 }
 0xc5a   : > { %v7140_v16 = vpop.f32.mrf.mxu1 }
 0xc5b   : > { %v16275_v49 = vpack.c.bf16 %v7140_v16, %v7140_v16  ;;  %v14629_v16 = vld [vmem:[#allocation10 + $0x70] ss:$8 sps:$4 sm:$0xff]  }
 0xc5c   : > { %v7142_v13 = vpop.f32.mrf.mxu1 }
 0xc5d   : > { %v16273_v35 = vpack.c.bf16 %v7142_v13, %v7142_v13  ;;  %v14631_v13 = vld [vmem:[#allocation10 + $0x74] ss:$8 sps:$4 sm:$0xff]  }
 0xc5e   : > { %v7144_v40 = vpop.f32.mrf.mxu1 }
 0xc5f   : > { %7374 = vmatprep.mubr.bf16.mxu1 %v16273_v35  ;;  %v14634_v40 = vld [vmem:[#allocation10 + $0x64] ss:$8 sps:$4 sm:$0xff]  }
 0xc60   : > { %v7145_v14 = vpop.f32.mrf.mxu1  ;;  %7375 = vmatmul.mubr.bf16.vlgmr.msra.gmra.mxu1 %v16275_v49 }
 0xc61   : > { %7601 = vmatpush1.bf16.msra.mxu1 %v16259_v45  ;;  %7618 = vmatprep.mubr.bf16.mxu1 %v15569_v48  ;;  %v14547_v45 = vld [vmem:[#allocation9 + $0x234] ss:$8 sps:$4 sm:$0xff]  }
 0xc62   : > { %7822 = vmatprep.subr.bf16.mxu1 %v14535_v43  ;;  %v14632_v43 = vld [vmem:[#allocation10 + $0x60] ss:$8 sps:$4 sm:$0xff]   ;;  %v14637_v14 = vld [vmem:[#allocation10 + $0x54] ss:$8 sps:$4 sm:$0xff]  }
 0xc68   : > { %12602 = vmatmul.mubr.msk.bf16.vlgmr.msra.gmra.mxu1 %vm5719_vm3, %v16126_v38 }
 0xc69   : > { %7823 = vmatpush1.bf16.msra.mxu1 %v14533_v17  ;;  %v14635_v17 = vld [vmem:[#allocation10 + $0x50] ss:$8 sps:$4 sm:$0xff]  }
 0xc6a   : > { %7824 = vmatprep.subr.bf16.mxu1 %v14538_v44  ;;  %v14640_v44 = vld [vmem:[#allocation10 + $0x44] ss:$8 sps:$4 sm:$0xff]  }
 0xc6d   : > { %7825 = vmatpush1.bf16.msra.mxu1 %v14536_v51  ;;  %v14638_v51 = vld [vmem:[#allocation10 + $0x40] ss:$8 sps:$4 sm:$0xff]  }
 0xc6e   : > { %7826 = vmatprep.subr.bf16.mxu1 %v14541_v18  ;;  %v14643_v18 = vld [vmem:[#allocation10 + $0x34] ss:$8 sps:$4 sm:$0xff]  }
 0xc71   : > { %7827 = vmatpush1.bf16.msra.mxu1 %v14539_v23  ;;  %v14641_v23 = vld [vmem:[#allocation10 + $0x30] ss:$8 sps:$4 sm:$0xff]  }
 0xc72   : > { %7828 = vmatprep.subr.bf16.mxu1 %v14544_v7  ;;  %v14646_v7 = vld [vmem:[#allocation10 + $0x24] ss:$8 sps:$4 sm:$0xff]  }
 0xc75   : > { %7829 = vmatpush1.bf16.msra.mxu1 %v14542_v41  ;;  %v14644_v41 = vld [vmem:[#allocation10 + $0x20] ss:$8 sps:$4 sm:$0xff]  }
 0xc76   : > { %7830 = vmatprep.subr.bf16.mxu1 %v14547_v45  ;;  %v14649_v45 = vld [vmem:[#allocation10 + $0x14] ss:$8 sps:$4 sm:$0xff]  }
 0xc79   : > { %7831 = vmatpush1.bf16.msra.mxu1 %v14545_v26  ;;  %v14647_v26 = vld [vmem:[#allocation10 + $0x10] ss:$8 sps:$4 sm:$0xff]  }
 0xc7a   : > { %7832 = vmatprep.subr.bf16.mxu1 %v14550_v46  ;;  %v14652_v46 = vld [vmem:[#allocation10 + $0x4] ss:$8 sps:$4 sm:$0xff]  }
 0xc7d   : > { %7833 = vmatpush1.bf16.msra.mxu1 %v14548_v63  ;;  %v14650_v63 = vld [vmem:[#allocation10] ss:$8 sps:$4 sm:$0xff]  }
 0xc7e   : > { %7834 = vmatprep.subr.bf16.mxu1 %v14553_v10  ;;  %v14655_v10 = vld [vmem:[#allocation10 + $0xf4] ss:$8 sps:$4 sm:$0xff]  }
 0xc81   : > { %7835 = vmatpush1.bf16.msra.mxu1 %v14551_v47  ;;  %v14653_v47 = vld [vmem:[#allocation10 + $0xf0] ss:$8 sps:$4 sm:$0xff]  }
 0xc82   : > { %7836 = vmatprep.subr.bf16.mxu1 %v14556_v34  ;;  %v14658_v34 = vld [vmem:[#allocation10 + $0xe4] ss:$8 sps:$4 sm:$0xff]  }
 0xc85   : > { %7837 = vmatpush1.bf16.msra.mxu1 %v14554_v39  ;;  %v14656_v39 = vld [vmem:[#allocation10 + $0xe0] ss:$8 sps:$4 sm:$0xff]  }
 0xc86   : > { %7838 = vmatprep.subr.bf16.mxu1 %v14559_v33  ;;  %v14661_v33 = vld [vmem:[#allocation10 + $0xd4] ss:$8 sps:$4 sm:$0xff]  }
 0xc89   : > { %7839 = vmatpush2.bf16.msra.mxu1 %v14557_v50  ;;  %v7865_v50 = vld [vmem:[%s16531_s28] sm:$0x3]  ;;  %s1118_s28 = scalar_lea.vmem %s15728_s12, %s13060_s2 }
 0xc8a   : > { %7840 = vmatprep.subr.bf16.mxu1 %v14562_v52  ;;  %v14659_v52 = vld [vmem:[#allocation10 + $0xd0] ss:$8 sps:$4 sm:$0xff]  }
 0xc8d   : > { %7841 = vmatpush2.bf16.msra.mxu1 %v14560_v37  ;;  %v7870_v37 = vrot.slane %v7865_v50, %v16026_v28 }
 0xc8e   : > { %7842 = vmatprep.subr.bf16.mxu1 %v14565_v53  ;;  %v14664_v53 = vld [vmem:[#allocation10 + $0xc4] ss:$8 sps:$4 sm:$0xff]  }
 0xc91   : > { %7843 = vmatpush2.bf16.msra.mxu1 %v14563_v42 }
 0xc92   : > { %7844 = vmatprep.subr.bf16.mxu1 %v14568_v55 }
 0xc95   : > { %7845 = vmatpush2.bf16.msra.mxu1 %v14566_v56  ;;  %v7874_v56 = vrot.slane %v7865_v50, %v16031_v8  ;;  %v14620_v50 = vld [vmem:[#allocation10 + $0x1a0] ss:$8 sps:$4 sm:$0xff]  }
 0xc96   : > { %7846 = vmatprep.subr.bf16.mxu1 %v14571_v5 }
 0xc99   : > { %7847 = vmatpush2.bf16.msra.mxu1 %v14569_v57  ;;  %v14662_v57 = vld [vmem:[#allocation10 + $0xc0] ss:$8 sps:$4 sm:$0xff]  }
 0xc9a   : > { %7848 = vmatprep.subr.bf16.mxu1 %v14574_v58 }
 0xc9d   : > { %7849 = vmatpush2.bf16.msra.mxu1 %v14572_v2 }
 0xc9e   : > { %7850 = vmatprep.subr.bf16.mxu1 %v14577_v4  ;;  %v14667_v4 = vld [vmem:[#allocation10 + $0xb4] ss:$8 sps:$4 sm:$0xff]  }
 0xca1   : > { %7851 = vmatpush2.bf16.msra.mxu1 %v14575_v59 }
 0xca2   : > { %7852 = vmatprep.subr.bf16.mxu1 %v14580_v60 }
 0xca5   : > { %7853 = vmatpush2.bf16.msra.mxu1 %v14578_v54 }
 0xca6   : > { %8362 = vmatprep.subr.bf16.mxu1 %v14631_v13  ;;  %v14590_v13 = vld [vmem:[#allocation10 + $0x140] ss:$8 sps:$4 sm:$0xff]  }
 0xd18   : > { %v7577_v61 = vpop.f32.mrf.mxu0 }
 0xd1a   : > { %v7579_v62 = vpop.f32.mrf.mxu0 }
 0xd1c   : > { %v7581_v0 = vpop.f32.mrf.mxu0 }
 0xd1e   : > { %v7582_v6 = vpop.f32.mrf.mxu0 }
 0xd20   : > { %v7376_v9 = vpop.f32.mrf.mxu1 }
 0xd21   : > { %v7578_v12 = vadd.f32 %v7577_v61, %v7376_v9  ;;  %v14670_v9 = vld [vmem:[#allocation10 + $0xa4] ss:$8 sps:$4 sm:$0xff]  }
 0xd22   : > { %v7378_v11 = vpop.f32.mrf.mxu1 }
 0xd23   : > { %v16283_v15 = vadd.f32 %v7579_v62, %v7378_v11  ;;  %v14665_v62 = vld [vmem:[#allocation10 + $0xb0] ss:$8 sps:$4 sm:$0xff]   ;;  %v14583_v11 = vld [vmem:[#allocation10 + $0x174] ss:$8 sps:$4 sm:$0xff]  }
 0xd24   : > { %v7380_v19 = vpop.f32.mrf.mxu1 }
 0xd25   : > { %v14668_v19 = vld [vmem:[#allocation10 + $0xa0] ss:$8 sps:$4 sm:$0xff]  }
 0xd26   : > { %v7381_v25 = vpop.f32.mrf.mxu1 }
 0xd27   : > { %v14673_v25 = vld [vmem:[#allocation10 + $0x94] ss:$8 sps:$4 sm:$0xff]  }
 0xd28   : > { %v7620_v27 = vpop.f32.mrf.mxu1 }
 0xd29   : > { %v7627_v30 = vpack.c.bf16 %v7620_v27, %v7620_v27  ;;  %v14581_v27 = vld [vmem:[#allocation10 + $0x170] ss:$8 sps:$4 sm:$0xff]  }
 0xd2a   : > { %v7622_v29 = vpop.f32.mrf.mxu1 }
 0xd2b   : > { %v7628_v31 = vpack.c.bf16 %v7622_v29, %v7622_v29  ;;  %v14586_v29 = vld [vmem:[#allocation10 + $0x164] ss:$8 sps:$4 sm:$0xff]  }
 0xd2c   : > { %v7624_v36 = vpop.f32.mrf.mxu1 }
 0xd2d   : > { %7854 = vmatprep.mubr.bf16.mxu1 %v7628_v31  ;;  %v14671_v31 = vld [vmem:[#allocation10 + $0x90] ss:$8 sps:$4 sm:$0xff]   ;;  %v14589_v36 = vld [vmem:[#allocation10 + $0x154] ss:$8 sps:$4 sm:$0xff]  }
 0xd2e   : > { %v7625_v32 = vpop.f32.mrf.mxu1  ;;  %7855 = vmatmul.mubr.bf16.vlgmr.msra.gmra.mxu1 %v7627_v30  ;;  %v14584_v30 = vld [vmem:[#allocation10 + $0x160] ss:$8 sps:$4 sm:$0xff]  }
 0xd2f   : > { %8363 = vmatpush1.bf16.msra.mxu1 %v14629_v16  ;;  %v14587_v32 = vld [vmem:[#allocation10 + $0x150] ss:$8 sps:$4 sm:$0xff]   ;;  %v14592_v16 = vld [vmem:[#allocation10 + $0x144] ss:$8 sps:$4 sm:$0xff]  }
 0xd30   : > { %8364 = vmatprep.subr.bf16.mxu1 %v14634_v40  ;;  %v14595_v40 = vld [vmem:[#allocation10 + $0x134] ss:$8 sps:$4 sm:$0xff]  }
 0xd33   : > { %8365 = vmatpush1.bf16.msra.mxu1 %v14632_v43  ;;  %v14593_v43 = vld [vmem:[#allocation10 + $0x130] ss:$8 sps:$4 sm:$0xff]  }
 0xd34   : > { %8366 = vmatprep.subr.bf16.mxu1 %v14637_v14  ;;  %v14598_v14 = vld [vmem:[#allocation10 + $0x124] ss:$8 sps:$4 sm:$0xff]  }
 0xd37   : > { %8367 = vmatpush1.bf16.msra.mxu1 %v14635_v17  ;;  %v14596_v17 = vld [vmem:[#allocation10 + $0x120] ss:$8 sps:$4 sm:$0xff]  }
 0xd38   : > { %8368 = vmatprep.subr.bf16.mxu1 %v14640_v44  ;;  %v14601_v44 = vld [vmem:[#allocation10 + $0x114] ss:$8 sps:$4 sm:$0xff]  }
 0xd3b   : > { %8369 = vmatpush1.bf16.msra.mxu1 %v14638_v51  ;;  %v14599_v51 = vld [vmem:[#allocation10 + $0x110] ss:$8 sps:$4 sm:$0xff]  }
 0xd3c   : > { %8370 = vmatprep.subr.bf16.mxu1 %v14643_v18  ;;  %v14604_v18 = vld [vmem:[#allocation10 + $0x104] ss:$8 sps:$4 sm:$0xff]  }
 0xd3f   : > { %8371 = vmatpush1.bf16.msra.mxu1 %v14641_v23  ;;  %v14602_v23 = vld [vmem:[#allocation10 + $0x100] ss:$8 sps:$4 sm:$0xff]  }
 0xd40   : > { %8372 = vmatprep.subr.bf16.mxu1 %v14646_v7  ;;  %v14607_v7 = vld [vmem:[#allocation10 + $0x1f4] ss:$8 sps:$4 sm:$0xff]  }
 0xd43   : > { %8373 = vmatpush1.bf16.msra.mxu1 %v14644_v41  ;;  %v14605_v41 = vld [vmem:[#allocation10 + $0x1f0] ss:$8 sps:$4 sm:$0xff]  }
 0xd44   : > { %8374 = vmatprep.subr.bf16.mxu1 %v14649_v45  ;;  %v14610_v45 = vld [vmem:[#allocation10 + $0x1e4] ss:$8 sps:$4 sm:$0xff]  }
 0xd47   : > { %8375 = vmatpush1.bf16.msra.mxu1 %v14647_v26  ;;  %v14608_v26 = vld [vmem:[#allocation10 + $0x1e0] ss:$8 sps:$4 sm:$0xff]  }
 0xd48   : > { %8376 = vmatprep.subr.bf16.mxu1 %v14652_v46  ;;  %v14613_v46 = vld [vmem:[#allocation10 + $0x1d4] ss:$8 sps:$4 sm:$0xff]  }
 0xd4b   : > { %8377 = vmatpush1.bf16.msra.mxu1 %v14650_v63  ;;  %v14611_v63 = vld [vmem:[#allocation10 + $0x1d0] ss:$8 sps:$4 sm:$0xff]  }
 0xd4c   : > { %8378 = vmatprep.subr.bf16.mxu1 %v14655_v10  ;;  %v14616_v10 = vld [vmem:[#allocation10 + $0x1c4] ss:$8 sps:$4 sm:$0xff]  }
 0xd4f   : > { %8379 = vmatpush2.bf16.msra.mxu1 %v14653_v47  ;;  %v14614_v47 = vld [vmem:[#allocation10 + $0x1c0] ss:$8 sps:$4 sm:$0xff]  }
 0xd50   : > { %8380 = vmatprep.subr.bf16.mxu1 %v14658_v34  ;;  %v14619_v34 = vld [vmem:[#allocation10 + $0x1b4] ss:$8 sps:$4 sm:$0xff]  }
 0xd53   : > { %8381 = vmatpush2.bf16.msra.mxu1 %v14656_v39  ;;  %v14617_v39 = vld [vmem:[#allocation10 + $0x1b0] ss:$8 sps:$4 sm:$0xff]  }
 0xd54   : > { %8382 = vmatprep.subr.bf16.mxu1 %v14661_v33  ;;  %v14622_v33 = vld [vmem:[#allocation10 + $0x1a4] ss:$8 sps:$4 sm:$0xff]  }
 0xd57   : > { %8383 = vmatpush2.bf16.msra.mxu1 %v14659_v52  ;;  %v14625_v52 = vld [vmem:[#allocation10 + $0x194] ss:$8 sps:$4 sm:$0xff]  }
 0xd58   : > { %8384 = vmatprep.subr.bf16.mxu1 %v14664_v53  ;;  %v14628_v53 = vld [vmem:[#allocation10 + $0x184] ss:$8 sps:$4 sm:$0xff]  }
 0xd5b   : > { %8385 = vmatpush2.bf16.msra.mxu1 %v14662_v57  ;;  %v14686_v57 = vld [vmem:[#allocation10 + $0x270] ss:$8 sps:$4 sm:$0xff]  }
 0xd5c   : > { %8386 = vmatprep.subr.bf16.mxu1 %v14667_v4  ;;  %v14694_v4 = vld [vmem:[#allocation10 + $0x264] ss:$8 sps:$4 sm:$0xff]  }
 0xd5f   : > { %8387 = vmatpush2.bf16.msra.mxu1 %v14665_v62  ;;  %v14710_v62 = vld [vmem:[#allocation10 + $0x230] ss:$8 sps:$4 sm:$0xff]  }
 0xd60   : > { %8388 = vmatprep.subr.bf16.mxu1 %v14670_v9  ;;  %v14718_v9 = vld [vmem:[#allocation10 + $0x224] ss:$8 sps:$4 sm:$0xff]  }
 0xd63   : > { %8389 = vmatpush2.bf16.msra.mxu1 %v14668_v19  ;;  %v14728_v19 = vld [vmem:[#allocation10 + $0x200] ss:$8 sps:$4 sm:$0xff]  }
 0xd64   : > { %8390 = vmatprep.subr.bf16.mxu1 %v14673_v25  ;;  %v14734_v25 = vld [vmem:[#allocation10 + $0x2f0] ss:$8 sps:$4 sm:$0xff]  }
 0xd67   : > { %8391 = vmatpush2.bf16.msra.mxu1 %v14671_v31  ;;  %v14742_v31 = vld [vmem:[#allocation10 + $0x2e4] ss:$8 sps:$4 sm:$0xff]  }
 0xdee   : > { %v7856_v42 = vpop.f32.mrf.mxu1 }
 0xdef   : > { %v7863_v55 = vadd.f32 %v7856_v42, %v7578_v12  ;;  %v14626_v42 = vld [vmem:[#allocation10 + $0x180] ss:$8 sps:$4 sm:$0xff]  }
 0xdf0   : > { %v7858_v5 = vpop.f32.mrf.mxu1 }
 0xdf1   : > { %v7877_v58 = vadd.f32 %v7870_v37, %v7863_v55  ;;  %v7864_v2 = vadd.f32 %v7858_v5, %v16283_v15  ;;  %v14623_v37 = vld [vmem:[#allocation10 + $0x190] ss:$8 sps:$4 sm:$0xff]   ;;  %v14676_v55 = vld [vmem:[#allocation10 + $0x84] ss:$8 sps:$4 sm:$0xff]   ;;  %v14679_v5 = vld [vmem:[#allocation12 + $0x74] ss:$8 sps:$4 sm:$0xff]  }
 0xdf2   : > { %v7860_v59 = vpop.f32.mrf.mxu1  ;;  %8392 = vmatprep.subr.bf16.mxu1 %v14676_v55  ;;  %v14709_v55 = vld [vmem:[#allocation12 + $0x14] ss:$8 sps:$4 sm:$0xff]  }
 0xdf3   : > { %v7879_v60 = vmax.f32 %v7877_v58, 0.0  ;;  %v7878_v54 = vadd.f32 %v7874_v56, %v7864_v2  ;;  %v14674_v56 = vld [vmem:[#allocation10 + $0x80] ss:$8 sps:$4 sm:$0xff]   ;;  %v14688_v58 = vld [vmem:[#allocation10 + $0x274] ss:$8 sps:$4 sm:$0xff]  }
 0xdf4   : > { %v7861_v61 = vpop.f32.mrf.mxu1  ;;  %8393 = vmatpush2.bf16.msra.mxu1 %v14674_v56  ;;  %v14692_v2 = vld [vmem:[#allocation10 + $0x260] ss:$8 sps:$4 sm:$0xff]   ;;  %v14698_v59 = vld [vmem:[#allocation10 + $0x250] ss:$8 sps:$4 sm:$0xff]   ;;  %v14715_v56 = vld [vmem:[#allocation12 + $0x4] ss:$8 sps:$4 sm:$0xff]  }
 0xdf5   : > { %v16289_v0 = vpack.c.bf16 %v7879_v60, %v7879_v60  ;;  %v7880_v6 = vmax.f32 %v7878_v54, 0.0  ;;  %8902 = vmatprep.subr.bf16.mxu1 %v14679_v5  ;;  %v14700_v60 = vld [vmem:[#allocation10 + $0x254] ss:$8 sps:$4 sm:$0xff]   ;;  %v14704_v54 = vld [vmem:[#allocation10 + $0x240] ss:$8 sps:$4 sm:$0xff]  }
 0xdf6   : > { %v14706_v61 = vld [vmem:[#allocation10 + $0x244] ss:$8 sps:$4 sm:$0xff]   ;;  %v14713_v5 = vld [vmem:[#allocation12] ss:$8 sps:$4 sm:$0xff]  }
 0xdf7   : > { %v16291_v12 = vpack.c.bf16 %v7880_v6, %v7880_v6  ;;  %v16297_v15 = vsel %vm7886_vm4, %v16289_v0, 0  ;;  %v14716_v6 = vld [vmem:[#allocation10 + $0x220] ss:$8 sps:$4 sm:$0xff]  }
 0xdf9   : > { %12635 = vmatprep.subr.msk.bf16.mxu0 %vm7886_vm4, %v16291_v12 }
 0xdfa   : > { %7908 = vmatpush1.bf16.msra.mxu0 %v16297_v15 }
 0xdfb   : > { %8161 = vmatprep.subr.bf16.mxu0 %v14583_v11  ;;  %v14724_v11 = vld [vmem:[#allocation10 + $0x214] ss:$8 sps:$4 sm:$0xff]  }
 0xdfd   : > { %12636 = vmatmul.mubr.msk.bf16.vlgmr.msra.gmra.mxu0 %vm7883_vm5, %v16151_v24 }
 0xdfe   : > { %8162 = vmatpush1.bf16.msra.mxu0 %v14581_v27  ;;  %8193 = vmatprep.mubr.bf16.mxu0 %v16291_v12  ;;  %v14736_v27 = vld [vmem:[#allocation10 + $0x2f4] ss:$8 sps:$4 sm:$0xff]  }
 0xdff   : > { %8163 = vmatprep.subr.bf16.mxu0 %v14586_v29  ;;  %v14740_v29 = vld [vmem:[#allocation10 + $0x2e0] ss:$8 sps:$4 sm:$0xff]  }
 0xe02   : > { %8164 = vmatpush1.bf16.msra.mxu0 %v14584_v30  ;;  %v14746_v30 = vld [vmem:[#allocation10 + $0x2d0] ss:$8 sps:$4 sm:$0xff]  }
 0xe03   : > { %8165 = vmatprep.subr.bf16.mxu0 %v14589_v36  ;;  %v14748_v36 = vld [vmem:[#allocation10 + $0x2d4] ss:$8 sps:$4 sm:$0xff]  }
 0xe06   : > { %8166 = vmatpush1.bf16.msra.mxu0 %v14587_v32  ;;  %v14752_v32 = vld [vmem:[#allocation10 + $0x2c0] ss:$8 sps:$4 sm:$0xff]  }
 0xe07   : > { %8167 = vmatprep.subr.bf16.mxu0 %v14592_v16  ;;  %v14754_v16 = vld [vmem:[#allocation10 + $0x2c4] ss:$8 sps:$4 sm:$0xff]  }
 0xe0a   : > { %8168 = vmatpush1.bf16.msra.mxu0 %v14590_v13  ;;  %v14758_v13 = vld [vmem:[#allocation10 + $0x2b0] ss:$8 sps:$4 sm:$0xff]  }
 0xe0b   : > { %8169 = vmatprep.subr.bf16.mxu0 %v14595_v40  ;;  %v14760_v40 = vld [vmem:[#allocation10 + $0x2b4] ss:$8 sps:$4 sm:$0xff]  }
 0xe0e   : > { %8170 = vmatpush1.bf16.msra.mxu0 %v14593_v43  ;;  %v14766_v43 = vld [vmem:[#allocation10 + $0x2a4] ss:$8 sps:$4 sm:$0xff]  }
 0xe0f   : > { %8171 = vmatprep.subr.bf16.mxu0 %v14598_v14  ;;  %v14764_v14 = vld [vmem:[#allocation10 + $0x2a0] ss:$8 sps:$4 sm:$0xff]  }
 0xe12   : > { %8172 = vmatpush1.bf16.msra.mxu0 %v14596_v17  ;;  %v14769_v17 = vld [vmem:[#allocation10 + $0x294] ss:$8 sps:$4 sm:$0xff]  }
 0xe13   : > { %8173 = vmatprep.subr.bf16.mxu0 %v14601_v44  ;;  %v14767_v44 = vld [vmem:[#allocation10 + $0x290] ss:$8 sps:$4 sm:$0xff]  }
 0xe16   : > { %8174 = vmatpush1.bf16.msra.mxu0 %v14599_v51  ;;  %v14772_v51 = vld [vmem:[#allocation10 + $0x284] ss:$8 sps:$4 sm:$0xff]  }
 0xe17   : > { %8175 = vmatprep.subr.bf16.mxu0 %v14604_v18  ;;  %v14770_v18 = vld [vmem:[#allocation10 + $0x280] ss:$8 sps:$4 sm:$0xff]  }
 0xe1a   : > { %8176 = vmatpush1.bf16.msra.mxu0 %v14602_v23 }
 0xe1b   : > { %8177 = vmatprep.subr.bf16.mxu0 %v14607_v7 }
 0xe1e   : > { %8178 = vmatpush2.bf16.msra.mxu0 %v14605_v41 }
 0xe1f   : > { %8179 = vmatprep.subr.bf16.mxu0 %v14610_v45  ;;  %v14677_v45 = vld [vmem:[#allocation12 + $0x70] ss:$8 sps:$4 sm:$0xff]  }
 0xe22   : > { %8180 = vmatpush2.bf16.msra.mxu0 %v14608_v26 }
 0xe23   : > { %8181 = vmatprep.subr.bf16.mxu0 %v14613_v46 }
 0xe26   : > { %8182 = vmatpush2.bf16.msra.mxu0 %v14611_v63  ;;  %v14682_v63 = vld [vmem:[#allocation12 + $0x64] ss:$8 sps:$4 sm:$0xff]  }
 0xe27   : > { %8183 = vmatprep.subr.bf16.mxu0 %v14616_v10 }
 0xe2a   : > { %8184 = vmatpush2.bf16.msra.mxu0 %v14614_v47  ;;  %v14680_v47 = vld [vmem:[#allocation12 + $0x60] ss:$8 sps:$4 sm:$0xff]  }
 0xe2b   : > { %8185 = vmatprep.subr.bf16.mxu0 %v14619_v34  ;;  %v14685_v34 = vld [vmem:[#allocation12 + $0x54] ss:$8 sps:$4 sm:$0xff]  }
 0xe2e   : > { %8186 = vmatpush2.bf16.msra.mxu0 %v14617_v39  ;;  %v14683_v39 = vld [vmem:[#allocation12 + $0x50] ss:$8 sps:$4 sm:$0xff]  }
 0xe2f   : > { %8187 = vmatprep.subr.bf16.mxu0 %v14622_v33  ;;  %v14691_v33 = vld [vmem:[#allocation12 + $0x44] ss:$8 sps:$4 sm:$0xff]  }
 0xe32   : > { %8188 = vmatpush2.bf16.msra.mxu0 %v14620_v50  ;;  %v14689_v50 = vld [vmem:[#allocation12 + $0x40] ss:$8 sps:$4 sm:$0xff]  }
 0xe33   : > { %8189 = vmatprep.subr.bf16.mxu0 %v14625_v52  ;;  %v14697_v52 = vld [vmem:[#allocation12 + $0x34] ss:$8 sps:$4 sm:$0xff]  }
 0xe36   : > { %8190 = vmatpush2.bf16.msra.mxu0 %v14623_v37  ;;  %v14695_v37 = vld [vmem:[#allocation12 + $0x30] ss:$8 sps:$4 sm:$0xff]  }
 0xe37   : > { %8191 = vmatprep.subr.bf16.mxu0 %v14628_v53  ;;  %v14703_v53 = vld [vmem:[#allocation12 + $0x24] ss:$8 sps:$4 sm:$0xff]  }
 0xe3a   : > { %8192 = vmatpush2.bf16.msra.mxu0 %v14626_v42  ;;  %v14701_v42 = vld [vmem:[#allocation12 + $0x20] ss:$8 sps:$4 sm:$0xff]  }
 0xe3b   : > { %12701 = vmatprep.subr.msk.bf16.mxu0 %vm7886_vm4, %v16291_v12  ;;  %v14722_v12 = vld [vmem:[#allocation10 + $0x210] ss:$8 sps:$4 sm:$0xff]  }
 0xe3d   : > { %8194 = vmatmul.mubr.bf16.vlgmr.msra.gmra.mxu0 %v16289_v0  ;;  %v14712_v0 = vld [vmem:[#allocation10 + $0x234] ss:$8 sps:$4 sm:$0xff]  }
 0xe3e   : > { %8420 = vmatpush1.bf16.msra.mxu0 %v16297_v15  ;;  %8437 = vmatprep.mubr.bf16.mxu0 %v15569_v48  ;;  %v14730_v15 = vld [vmem:[#allocation10 + $0x204] ss:$8 sps:$4 sm:$0xff]  }
 0xe3f   : > { %8641 = vmatprep.subr.bf16.mxu0 %v14688_v58  ;;  %v14719_v58 = vld [vmem:[#allocation12 + $0xf0] ss:$8 sps:$4 sm:$0xff]  }
 0xe45   : > { %12702 = vmatmul.mubr.msk.bf16.vlgmr.msra.gmra.mxu0 %vm7883_vm5, %v16160_v20 }
 0xe46   : > { %8642 = vmatpush1.bf16.msra.mxu0 %v14686_v57  ;;  %v14721_v57 = vld [vmem:[#allocation12 + $0xf4] ss:$8 sps:$4 sm:$0xff]  }
 0xe47   : > { %8643 = vmatprep.subr.bf16.mxu0 %v14694_v4  ;;  %v14725_v4 = vld [vmem:[#allocation12 + $0xe0] ss:$8 sps:$4 sm:$0xff]  }
 0xe4a   : > { %8644 = vmatpush1.bf16.msra.mxu0 %v14692_v2  ;;  %v14727_v2 = vld [vmem:[#allocation12 + $0xe4] ss:$8 sps:$4 sm:$0xff]  }
 0xe4b   : > { %8645 = vmatprep.subr.bf16.mxu0 %v14700_v60  ;;  %v14731_v60 = vld [vmem:[#allocation12 + $0xd0] ss:$8 sps:$4 sm:$0xff]  }
 0xe4e   : > { %8646 = vmatpush1.bf16.msra.mxu0 %v14698_v59  ;;  %v14733_v59 = vld [vmem:[#allocation12 + $0xd4] ss:$8 sps:$4 sm:$0xff]  }
 0xe4f   : > { %8647 = vmatprep.subr.bf16.mxu0 %v14706_v61  ;;  %v14737_v61 = vld [vmem:[#allocation12 + $0xc0] ss:$8 sps:$4 sm:$0xff]  }
 0xe52   : > { %8648 = vmatpush1.bf16.msra.mxu0 %v14704_v54  ;;  %v14739_v54 = vld [vmem:[#allocation12 + $0xc4] ss:$8 sps:$4 sm:$0xff]  }
 0xe53   : > { %8649 = vmatprep.subr.bf16.mxu0 %v14712_v0  ;;  %v14743_v0 = vld [vmem:[#allocation12 + $0xb0] ss:$8 sps:$4 sm:$0xff]  }
 0xe56   : > { %8650 = vmatpush1.bf16.msra.mxu0 %v14710_v62  ;;  %v14745_v62 = vld [vmem:[#allocation12 + $0xb4] ss:$8 sps:$4 sm:$0xff]  }
 0xe57   : > { %8651 = vmatprep.subr.bf16.mxu0 %v14718_v9  ;;  %v14749_v9 = vld [vmem:[#allocation12 + $0xa0] ss:$8 sps:$4 sm:$0xff]  }
 0xe5a   : > { %8652 = vmatpush1.bf16.msra.mxu0 %v14716_v6  ;;  %v14751_v6 = vld [vmem:[#allocation12 + $0xa4] ss:$8 sps:$4 sm:$0xff]  }
 0xe5b   : > { %8653 = vmatprep.subr.bf16.mxu0 %v14724_v11  ;;  %v14755_v11 = vld [vmem:[#allocation12 + $0x90] ss:$8 sps:$4 sm:$0xff]  }
 0xe5e   : > { %8654 = vmatpush1.bf16.msra.mxu0 %v14722_v12  ;;  %v14757_v12 = vld [vmem:[#allocation12 + $0x94] ss:$8 sps:$4 sm:$0xff]  }
 0xe5f   : > { %8655 = vmatprep.subr.bf16.mxu0 %v14730_v15  ;;  %v14761_v15 = vld [vmem:[#allocation12 + $0x80] ss:$8 sps:$4 sm:$0xff]  }
 0xe62   : > { %8656 = vmatpush1.bf16.msra.mxu0 %v14728_v19  ;;  %v14763_v19 = vld [vmem:[#allocation12 + $0x84] ss:$8 sps:$4 sm:$0xff]  }
 0xe63   : > { %8657 = vmatprep.subr.bf16.mxu0 %v14736_v27 }
 0xe66   : > { %8658 = vmatpush2.bf16.msra.mxu0 %v14734_v25 }
 0xe67   : > { %8659 = vmatprep.subr.bf16.mxu0 %v14742_v31 }
 0xe6a   : > { %8660 = vmatpush2.bf16.msra.mxu0 %v14740_v29 }
 0xe6b   : > { %8661 = vmatprep.subr.bf16.mxu0 %v14748_v36 }
 0xe6e   : > { %8662 = vmatpush2.bf16.msra.mxu0 %v14746_v30 }
 0xe6f   : > { %8663 = vmatprep.subr.bf16.mxu0 %v14754_v16 }
 0xe72   : > { %8664 = vmatpush2.bf16.msra.mxu0 %v14752_v32 }
 0xe73   : > { %8665 = vmatprep.subr.bf16.mxu0 %v14760_v40  ;;  %v14773_v40 = vld [vmem:[#allocation13 + $0x170] ss:$8 sps:$4 sm:$0xff]  }
 0xe76   : > { %8666 = vmatpush2.bf16.msra.mxu0 %v14758_v13 }
 0xe77   : > { %8667 = vmatprep.subr.bf16.mxu0 %v14766_v43  ;;  %v14775_v43 = vld [vmem:[#allocation13 + $0x174] ss:$8 sps:$4 sm:$0xff]  }
 0xe7a   : > { %8668 = vmatpush2.bf16.msra.mxu0 %v14764_v14  ;;  %v14778_v14 = vld [vmem:[#allocation13 + $0x164] ss:$8 sps:$4 sm:$0xff]  }
 0xe7b   : > { %8669 = vmatprep.subr.bf16.mxu0 %v14769_v17 }
 0xe7e   : > { %8670 = vmatpush2.bf16.msra.mxu0 %v14767_v44  ;;  %v14776_v44 = vld [vmem:[#allocation13 + $0x160] ss:$8 sps:$4 sm:$0xff]  }
 0xe7f   : > { %8671 = vmatprep.subr.bf16.mxu0 %v14772_v51  ;;  %v14781_v51 = vld [vmem:[#allocation13 + $0x154] ss:$8 sps:$4 sm:$0xff]  }
 0xe82   : > { %8672 = vmatpush2.bf16.msra.mxu0 %v14770_v18  ;;  %v14784_v18 = vld [vmem:[#allocation13 + $0x144] ss:$8 sps:$4 sm:$0xff]  }
 0xebd   : > { %v7927_v23 = vpop.f32.mrf.mxu0 }
 0xebe   : > { %v7934_v26 = vpack.c.bf16 %v7927_v23, %v7927_v23  ;;  %v14782_v23 = vld [vmem:[#allocation13 + $0x140] ss:$8 sps:$4 sm:$0xff]  }
 0xebf   : > { %v7929_v7 = vpop.f32.mrf.mxu0 }
 0xec0   : > { %v7935_v41 = vpack.c.bf16 %v7929_v7, %v7929_v7  ;;  %v14787_v7 = vld [vmem:[#allocation13 + $0x134] ss:$8 sps:$4 sm:$0xff]  }
 0xec1   : > { %v7931_v46 = vpop.f32.mrf.mxu0 }
 0xec2   : > { %8394 = vmatprep.mubr.bf16.mxu1 %v7935_v41  ;;  %v14785_v41 = vld [vmem:[#allocation13 + $0x130] ss:$8 sps:$4 sm:$0xff]   ;;  %v14793_v46 = vld [vmem:[#allocation13 + $0x114] ss:$8 sps:$4 sm:$0xff]  }
 0xec3   : > { %v7932_v10 = vpop.f32.mrf.mxu0  ;;  %8395 = vmatmul.mubr.bf16.vlgmr.msra.gmra.mxu1 %v7934_v26  ;;  %v14788_v26 = vld [vmem:[#allocation13 + $0x120] ss:$8 sps:$4 sm:$0xff]  }
 0xec4   : > { %8903 = vmatpush1.bf16.msra.mxu1 %v14677_v45  ;;  %8934 = vmatprep.mubr.bf16.mxu1 %v16273_v35  ;;  %v14707_v35 = vld [vmem:[#allocation12 + $0x10] ss:$8 sps:$4 sm:$0xff]   ;;  %v14790_v45 = vld [vmem:[#allocation13 + $0x124] ss:$8 sps:$4 sm:$0xff]  }
 0xec5   : > { %8904 = vmatprep.subr.bf16.mxu1 %v14682_v63  ;;  %v14791_v63 = vld [vmem:[#allocation13 + $0x110] ss:$8 sps:$4 sm:$0xff]   ;;  %v14796_v10 = vld [vmem:[#allocation13 + $0x104] ss:$8 sps:$4 sm:$0xff]  }
 0xec8   : > { %8905 = vmatpush1.bf16.msra.mxu1 %v14680_v47  ;;  %v14794_v47 = vld [vmem:[#allocation13 + $0x100] ss:$8 sps:$4 sm:$0xff]  }
 0xec9   : > { %8906 = vmatprep.subr.bf16.mxu1 %v14685_v34  ;;  %v14799_v34 = vld [vmem:[#allocation13 + $0x1f4] ss:$8 sps:$4 sm:$0xff]  }
 0xecc   : > { %8907 = vmatpush1.bf16.msra.mxu1 %v14683_v39  ;;  %v14797_v39 = vld [vmem:[#allocation13 + $0x1f0] ss:$8 sps:$4 sm:$0xff]  }
 0xecd   : > { %8908 = vmatprep.subr.bf16.mxu1 %v14691_v33  ;;  %v14802_v33 = vld [vmem:[#allocation13 + $0x1e4] ss:$8 sps:$4 sm:$0xff]  }
 0xed0   : > { %8909 = vmatpush1.bf16.msra.mxu1 %v14689_v50  ;;  %v14800_v50 = vld [vmem:[#allocation13 + $0x1e0] ss:$8 sps:$4 sm:$0xff]  }
 0xed1   : > { %8910 = vmatprep.subr.bf16.mxu1 %v14697_v52  ;;  %v14805_v52 = vld [vmem:[#allocation13 + $0x1d4] ss:$8 sps:$4 sm:$0xff]  }
 0xed4   : > { %8911 = vmatpush1.bf16.msra.mxu1 %v14695_v37  ;;  %v14803_v37 = vld [vmem:[#allocation13 + $0x1d0] ss:$8 sps:$4 sm:$0xff]  }
 0xed5   : > { %8912 = vmatprep.subr.bf16.mxu1 %v14703_v53  ;;  %v14808_v53 = vld [vmem:[#allocation13 + $0x1c4] ss:$8 sps:$4 sm:$0xff]  }
 0xed8   : > { %8913 = vmatpush1.bf16.msra.mxu1 %v14701_v42  ;;  %v14806_v42 = vld [vmem:[#allocation13 + $0x1c0] ss:$8 sps:$4 sm:$0xff]  }
 0xed9   : > { %8914 = vmatprep.subr.bf16.mxu1 %v14709_v55  ;;  %v14809_v55 = vld [vmem:[#allocation13 + $0x1b0] ss:$8 sps:$4 sm:$0xff]  }
 0xedc   : > { %8915 = vmatpush1.bf16.msra.mxu1 %v14707_v35  ;;  %v14811_v35 = vld [vmem:[#allocation13 + $0x1b4] ss:$8 sps:$4 sm:$0xff]  }
 0xedd   : > { %8916 = vmatprep.subr.bf16.mxu1 %v14715_v56  ;;  %v14814_v56 = vld [vmem:[#allocation13 + $0x1a4] ss:$8 sps:$4 sm:$0xff]  }
 0xee0   : > { %8917 = vmatpush1.bf16.msra.mxu1 %v14713_v5  ;;  %v14812_v5 = vld [vmem:[#allocation13 + $0x1a0] ss:$8 sps:$4 sm:$0xff]  }
 0xee1   : > { %8918 = vmatprep.subr.bf16.mxu1 %v14721_v57  ;;  %v14817_v57 = vld [vmem:[#allocation13 + $0x194] ss:$8 sps:$4 sm:$0xff]  }
 0xee4   : > { %8919 = vmatpush2.bf16.msra.mxu1 %v14719_v58  ;;  %v14815_v58 = vld [vmem:[#allocation13 + $0x190] ss:$8 sps:$4 sm:$0xff]  }
 0xee5   : > { %8920 = vmatprep.subr.bf16.mxu1 %v14727_v2  ;;  %v14820_v2 = vld [vmem:[#allocation13 + $0x184] ss:$8 sps:$4 sm:$0xff]  }
 0xee8   : > { %8921 = vmatpush2.bf16.msra.mxu1 %v14725_v4  ;;  %v14818_v4 = vld [vmem:[#allocation13 + $0x180] ss:$8 sps:$4 sm:$0xff]  }
 0xee9   : > { %8922 = vmatprep.subr.bf16.mxu1 %v14733_v59 }
 0xeec   : > { %8923 = vmatpush2.bf16.msra.mxu1 %v14731_v60 }
 0xeed   : > { %8924 = vmatprep.subr.bf16.mxu1 %v14739_v54 }
 0xef0   : > { %8925 = vmatpush2.bf16.msra.mxu1 %v14737_v61 }
 0xef1   : > { %8926 = vmatprep.subr.bf16.mxu1 %v14745_v62 }
 0xef4   : > { %8927 = vmatpush2.bf16.msra.mxu1 %v14743_v0 }
 0xef5   : > { %8928 = vmatprep.subr.bf16.mxu1 %v14751_v6  ;;  %v8730_v6 = vld [vmem:[%s16532_s11] sm:$0x3] }
 0xef8   : > { %8929 = vmatpush2.bf16.msra.mxu1 %v14749_v9 }
 0xef9   : > { %8930 = vmatprep.subr.bf16.mxu1 %v14757_v12  ;;  %v8684_v12 = vld [vmem:[%s16533_s26] sm:$0x3] }
 0xefc   : > { %8931 = vmatpush2.bf16.msra.mxu1 %v14755_v11 }
 0xefd   : > { %v16311_v25 = vpop.f32.mrf.mxu0  ;;  %8932 = vmatprep.subr.bf16.mxu1 %v14763_v19 }
 0xeff   : > { %v16313_v27 = vpop.f32.mrf.mxu0 }
 0xf00   : > { %8933 = vmatpush2.bf16.msra.mxu1 %v14761_v15  ;;  %v8735_v15 = vrot.slane %v8730_v6, %v16026_v28 }
 0xf01   : > { %v8199_v29 = vpop.f32.mrf.mxu0  ;;  %9270 = vmatprep.subr.bf16.mxu1 %v14775_v43 }
 0xf02   : > { %v8689_v29 = vrot.slane %v8684_v12, %v16026_v28 }
 0xf03   : > { %8935 = vmatmul.mubr.bf16.vlgmr.msra.gmra.mxu1 %v16275_v49  ;;  %v8200_v31 = vpop.f32.mrf.mxu0  ;;  %v14779_v49 = vld [vmem:[#allocation13 + $0x150] ss:$8 sps:$4 sm:$0xff]  }
 0xf04   : > { %9271 = vmatpush1.bf16.msra.mxu1 %v14773_v40 }
 0xf05   : > { %v8439_v30 = vpop.f32.mrf.mxu0  ;;  %9272 = vmatprep.subr.bf16.mxu1 %v14778_v14 }
 0xf06   : > { %v8446_v16 = vpack.c.bf16 %v8439_v30, %v8439_v30 }
 0xf07   : > { %v8441_v36 = vpop.f32.mrf.mxu0 }
 0xf08   : > { %v8447_v32 = vpack.c.bf16 %v8441_v36, %v8441_v36  ;;  %9273 = vmatpush1.bf16.msra.mxu1 %v14776_v44  ;;  %v8739_v36 = vrot.slane %v8730_v6, %v16031_v8  ;;  %v14863_v6 = vld [vmem:[#allocation13 + $0x90] ss:$8 sps:$4 sm:$0xff]  }
 0xf09   : > { %v8443_v13 = vpop.f32.mrf.mxu0  ;;  %9274 = vmatprep.subr.bf16.mxu1 %v14781_v51 }
 0xf0a   : > { %8673 = vmatprep.mubr.bf16.mxu0 %v8447_v32 }
 0xf0b   : > { %v8444_v17 = vpop.f32.mrf.mxu0  ;;  %8674 = vmatmul.mubr.bf16.vlgmr.msra.gmra.mxu0 %v8446_v16  ;;  %v8693_v16 = vrot.slane %v8684_v12, %v16031_v8  ;;  %v14866_v12 = vld [vmem:[#allocation13 + $0x80] ss:$8 sps:$4 sm:$0xff]  }
 0xf0c   : > { %8989 = vmatprep.mubr.bf16.mxu0 %v15569_v48  ;;  %9275 = vmatpush1.bf16.msra.mxu1 %v14779_v49 }
 0xf0d   : > { %9276 = vmatprep.subr.bf16.mxu1 %v14784_v18 }
 0xf10   : > { %9277 = vmatpush1.bf16.msra.mxu1 %v14782_v23 }
 0xf11   : > { %9278 = vmatprep.subr.bf16.mxu1 %v14787_v7 }
 0xf14   : > { %9279 = vmatpush1.bf16.msra.mxu1 %v14785_v41 }
 0xf15   : > { %9280 = vmatprep.subr.bf16.mxu1 %v14790_v45 }
 0xf18   : > { %9281 = vmatpush1.bf16.msra.mxu1 %v14788_v26  ;;  %v14823_v26 = vld [vmem:[#allocation13 + $0x74] ss:$8 sps:$4 sm:$0xff]  }
 0xf19   : > { %9282 = vmatprep.subr.bf16.mxu1 %v14793_v46  ;;  %v14821_v46 = vld [vmem:[#allocation13 + $0x70] ss:$8 sps:$4 sm:$0xff]  }
 0xf1c   : > { %9283 = vmatpush1.bf16.msra.mxu1 %v14791_v63  ;;  %v14826_v63 = vld [vmem:[#allocation13 + $0x64] ss:$8 sps:$4 sm:$0xff]  }
 0xf1d   : > { %9284 = vmatprep.subr.bf16.mxu1 %v14796_v10  ;;  %v14824_v10 = vld [vmem:[#allocation13 + $0x60] ss:$8 sps:$4 sm:$0xff]  }
 0xf20   : > { %9285 = vmatpush1.bf16.msra.mxu1 %v14794_v47  ;;  %v14829_v47 = vld [vmem:[#allocation13 + $0x54] ss:$8 sps:$4 sm:$0xff]  }
 0xf21   : > { %9286 = vmatprep.subr.bf16.mxu1 %v14799_v34  ;;  %v14827_v34 = vld [vmem:[#allocation13 + $0x50] ss:$8 sps:$4 sm:$0xff]  }
 0xf24   : > { %9287 = vmatpush2.bf16.msra.mxu1 %v14797_v39  ;;  %v14832_v39 = vld [vmem:[#allocation13 + $0x44] ss:$8 sps:$4 sm:$0xff]  }
 0xf25   : > { %9288 = vmatprep.subr.bf16.mxu1 %v14802_v33  ;;  %v14835_v33 = vld [vmem:[#allocation13 + $0x34] ss:$8 sps:$4 sm:$0xff]  }
 0xf28   : > { %9289 = vmatpush2.bf16.msra.mxu1 %v14800_v50  ;;  %v14833_v50 = vld [vmem:[#allocation13 + $0x30] ss:$8 sps:$4 sm:$0xff]  }
 0xf29   : > { %9290 = vmatprep.subr.bf16.mxu1 %v14805_v52  ;;  %v14838_v52 = vld [vmem:[#allocation13 + $0x24] ss:$8 sps:$4 sm:$0xff]  }
 0xf2c   : > { %9291 = vmatpush2.bf16.msra.mxu1 %v14803_v37  ;;  %v14836_v37 = vld [vmem:[#allocation13 + $0x20] ss:$8 sps:$4 sm:$0xff]  }
 0xf2d   : > { %9292 = vmatprep.subr.bf16.mxu1 %v14808_v53  ;;  %v14839_v53 = vld [vmem:[#allocation13 + $0x10] ss:$8 sps:$4 sm:$0xff]  }
 0xf30   : > { %9293 = vmatpush2.bf16.msra.mxu1 %v14806_v42  ;;  %v14844_v42 = vld [vmem:[#allocation13 + $0x4] ss:$8 sps:$4 sm:$0xff]  }
 0xf31   : > { %9294 = vmatprep.subr.bf16.mxu1 %v14811_v35  ;;  %v14847_v35 = vld [vmem:[#allocation13 + $0xf4] ss:$8 sps:$4 sm:$0xff]  }
 0xf34   : > { %9295 = vmatpush2.bf16.msra.mxu1 %v14809_v55  ;;  %v14842_v55 = vld [vmem:[#allocation13] ss:$8 sps:$4 sm:$0xff]  }
 0xf35   : > { %9296 = vmatprep.subr.bf16.mxu1 %v14814_v56  ;;  %v14845_v56 = vld [vmem:[#allocation13 + $0xf0] ss:$8 sps:$4 sm:$0xff]  }
 0xf38   : > { %9297 = vmatpush2.bf16.msra.mxu1 %v14812_v5  ;;  %v14850_v5 = vld [vmem:[#allocation13 + $0xe4] ss:$8 sps:$4 sm:$0xff]  }
 0xf39   : > { %9298 = vmatprep.subr.bf16.mxu1 %v14817_v57  ;;  %v14848_v57 = vld [vmem:[#allocation13 + $0xe0] ss:$8 sps:$4 sm:$0xff]  }
 0xf3c   : > { %9299 = vmatpush2.bf16.msra.mxu1 %v14815_v58  ;;  %v14853_v58 = vld [vmem:[#allocation13 + $0xd4] ss:$8 sps:$4 sm:$0xff]  }
 0xf3d   : > { %9300 = vmatprep.subr.bf16.mxu1 %v14820_v2  ;;  %v14851_v2 = vld [vmem:[#allocation13 + $0xd0] ss:$8 sps:$4 sm:$0xff]  }
 0xf40   : > { %9301 = vmatpush2.bf16.msra.mxu1 %v14818_v4  ;;  %v14856_v4 = vld [vmem:[#allocation13 + $0xc4] ss:$8 sps:$4 sm:$0xff]  }
 0xf83   : > { %v8396_v59 = vpop.f32.mrf.mxu1 }
 0xf84   : > { %v8397_v19 = vadd.f32 %v8396_v59, %v16311_v25  ;;  %v14854_v59 = vld [vmem:[#allocation13 + $0xc0] ss:$8 sps:$4 sm:$0xff]  }
 0xf85   : > { %v8398_v60 = vpop.f32.mrf.mxu1 }
 0xf86   : > { %v8399_v30 = vadd.f32 %v8398_v60, %v16313_v27  ;;  %v14859_v60 = vld [vmem:[#allocation13 + $0xb4] ss:$8 sps:$4 sm:$0xff]  }
 0xf87   : > { %v8400_v54 = vpop.f32.mrf.mxu1 }
 0xf88   : > { %v14857_v54 = vld [vmem:[#allocation13 + $0xb0] ss:$8 sps:$4 sm:$0xff]  }
 0xf89   : > { %v8401_v61 = vpop.f32.mrf.mxu1 }
 0xf8a   : > { %v14862_v61 = vld [vmem:[#allocation13 + $0xa4] ss:$8 sps:$4 sm:$0xff]  }
 0xfc3   : > { %v8936_v62 = vpop.f32.mrf.mxu1 }
 0xfc4   : > { %v8937_v40 = vadd.f32 %v8936_v62, %v8735_v15  ;;  %v14860_v62 = vld [vmem:[#allocation13 + $0xa0] ss:$8 sps:$4 sm:$0xff]  }
 0xfc5   : > { %v8938_v0 = vpop.f32.mrf.mxu1 }
 0xfc6   : > { %v8939_v44 = vadd.f32 %v8938_v0, %v8739_v36  ;;  %v14865_v0 = vld [vmem:[#allocation13 + $0x94] ss:$8 sps:$4 sm:$0xff]  }
 0xfc7   : > { %v8940_v9 = vpop.f32.mrf.mxu1 }
 0xfc8   : > { %v14868_v9 = vld [vmem:[#allocation13 + $0x84] ss:$8 sps:$4 sm:$0xff]  }
 0xfc9   : > { %v8941_v11 = vpop.f32.mrf.mxu1 }
 0xfca   : > { %v14871_v11 = vld [vmem:[#allocation13 + $0x274] ss:$8 sps:$4 sm:$0xff]  }
 0xfcb   : > { %v8675_v31 = vpop.f32.mrf.mxu0 }
 0xfcc   : > { %v8682_v32 = vadd.f32 %v8675_v31, %v8397_v19  ;;  %v14869_v31 = vld [vmem:[#allocation13 + $0x270] ss:$8 sps:$4 sm:$0xff]  }
 0xfcd   : > { %v8677_v13 = vpop.f32.mrf.mxu0 }
 0xfce   : > { %v8696_v43 = vadd.f32 %v8689_v29, %v8682_v32  ;;  %v8683_v14 = vadd.f32 %v8677_v13, %v8399_v30  ;;  %v14874_v32 = vld [vmem:[#allocation13 + $0x264] ss:$8 sps:$4 sm:$0xff]   ;;  %v14872_v13 = vld [vmem:[#allocation13 + $0x260] ss:$8 sps:$4 sm:$0xff]  }
 0xfcf   : > { %v8679_v17 = vpop.f32.mrf.mxu0 }
 0xfd0   : > { %v8943_v51 = vadd.f32 %v8937_v40, %v8696_v43  ;;  %v8697_v25 = vadd.f32 %v8693_v16, %v8683_v14  ;;  %v14877_v43 = vld [vmem:[#allocation13 + $0x254] ss:$8 sps:$4 sm:$0xff]  }
 0xfd1   : > { %v8680_v49 = vpop.f32.mrf.mxu0 }
 0xfd2   : > { %v8945_v18 = vmax.f32 %v8943_v51, 0.0  ;;  %v8944_v23 = vadd.f32 %v8939_v44, %v8697_v25  ;;  %v14875_v25 = vld [vmem:[#allocation13 + $0x250] ss:$8 sps:$4 sm:$0xff]   ;;  %v14880_v49 = vld [vmem:[#allocation13 + $0x244] ss:$8 sps:$4 sm:$0xff]  }
 0xfd4   : > { %v8946_v7 = vmax.f32 %v8944_v23, 0.0  ;;  %v8947_v41 = vpack.c.bf16 %v8945_v18, %v8945_v18  ;;  %v14878_v23 = vld [vmem:[#allocation13 + $0x240] ss:$8 sps:$4 sm:$0xff]  }
 0xfd6   : > { %v8948_v45 = vpack.c.bf16 %v8946_v7, %v8946_v7  ;;  %v16328_v27 = vsel %vm7886_vm4, %v8947_v41, 0  ;;  %v14883_v7 = vld [vmem:[#allocation13 + $0x234] ss:$8 sps:$4 sm:$0xff]   ;;  %v14881_v41 = vld [vmem:[#allocation13 + $0x230] ss:$8 sps:$4 sm:$0xff]  }
 0xfd8   : > { %12767 = vmatprep.subr.msk.bf16.mxu0 %vm7886_vm4, %v8948_v45  ;;  %12835 = vmatprep.subr.msk.bf16.mxu1 %vm7886_vm4, %v8948_v45 }
 0xfd9   : > { %8972 = vmatpush1.bf16.msra.mxu0 %v16328_v27 }
 0xfda   : > { %12769 = vmatprep.subr.msk.bf16.mxu0 %vm7886_vm4, %v8948_v45  ;;  %v14886_v45 = vld [vmem:[#allocation13 + $0x224] ss:$8 sps:$4 sm:$0xff]  }
 0xfdc   : > { %12768 = vmatmul.mubr.msk.bf16.vlgmr.msra.gmra.mxu0 %vm7883_vm5, %v16080_v21  ;;  %v14830_v21 = vld [vmem:[#allocation13 + $0x40] ss:$8 sps:$4 sm:$0xff]  }
 0xfdd   : > { %9049 = vmatpush1.bf16.msra.mxu0 %v16328_v27  ;;  %9066 = vmatprep.mubr.bf16.mxu0 %v15569_v48 }
 0xfde   : > { %9471 = vmatprep.subr.bf16.mxu0 %v14823_v26  ;;  %v14884_v26 = vld [vmem:[#allocation13 + $0x220] ss:$8 sps:$4 sm:$0xff]  }
 0xfe4   : > { %12770 = vmatmul.mubr.msk.bf16.vlgmr.msra.gmra.mxu0 %vm7883_vm5, %v16082_v22  ;;  %v14841_v22 = vld [vmem:[#allocation13 + $0x14] ss:$8 sps:$4 sm:$0xff]  }
 0xfe5   : > { %9472 = vmatpush1.bf16.msra.mxu0 %v14821_v46  ;;  %v14889_v46 = vld [vmem:[#allocation13 + $0x214] ss:$8 sps:$4 sm:$0xff]  }
 0xfe6   : > { %9473 = vmatprep.subr.bf16.mxu0 %v14826_v63  ;;  %v14892_v63 = vld [vmem:[#allocation13 + $0x204] ss:$8 sps:$4 sm:$0xff]  }
 0xfe9   : > { %9474 = vmatpush1.bf16.msra.mxu0 %v14824_v10  ;;  %v14890_v10 = vld [vmem:[#allocation13 + $0x200] ss:$8 sps:$4 sm:$0xff]  }
 0xfea   : > { %9475 = vmatprep.subr.bf16.mxu0 %v14829_v47  ;;  %v14895_v47 = vld [vmem:[#allocation13 + $0x2f4] ss:$8 sps:$4 sm:$0xff]  }
 0xfed   : > { %9476 = vmatpush1.bf16.msra.mxu0 %v14827_v34  ;;  %v14893_v34 = vld [vmem:[#allocation13 + $0x2f0] ss:$8 sps:$4 sm:$0xff]  }
 0xfee   : > { %9477 = vmatprep.subr.bf16.mxu0 %v14832_v39  ;;  %v14898_v39 = vld [vmem:[#allocation13 + $0x2e4] ss:$8 sps:$4 sm:$0xff]  }
 0xff1   : > { %9478 = vmatpush1.bf16.msra.mxu0 %v14830_v21  ;;  %v14901_v21 = vld [vmem:[#allocation13 + $0x2d4] ss:$8 sps:$4 sm:$0xff]  }
 0xff2   : > { %9479 = vmatprep.subr.bf16.mxu0 %v14835_v33  ;;  %v14899_v33 = vld [vmem:[#allocation13 + $0x2d0] ss:$8 sps:$4 sm:$0xff]  }
 0xff5   : > { %9480 = vmatpush1.bf16.msra.mxu0 %v14833_v50  ;;  %v14904_v50 = vld [vmem:[#allocation13 + $0x2c4] ss:$8 sps:$4 sm:$0xff]  }
 0xff6   : > { %9481 = vmatprep.subr.bf16.mxu0 %v14838_v52  ;;  %v14902_v52 = vld [vmem:[#allocation13 + $0x2c0] ss:$8 sps:$4 sm:$0xff]  }
 0xff9   : > { %9482 = vmatpush1.bf16.msra.mxu0 %v14836_v37  ;;  %v14907_v37 = vld [vmem:[#allocation13 + $0x2b4] ss:$8 sps:$4 sm:$0xff]  }
 0xffa   : > { %9483 = vmatprep.subr.bf16.mxu0 %v14841_v22  ;;  %v14905_v22 = vld [vmem:[#allocation13 + $0x2b0] ss:$8 sps:$4 sm:$0xff]  }
 0xffd   : > { %9484 = vmatpush1.bf16.msra.mxu0 %v14839_v53  ;;  %v14910_v53 = vld [vmem:[#allocation13 + $0x2a4] ss:$8 sps:$4 sm:$0xff]  }
 0xffe   : > { %9485 = vmatprep.subr.bf16.mxu0 %v14844_v42  ;;  %v14908_v42 = vld [vmem:[#allocation13 + $0x2a0] ss:$8 sps:$4 sm:$0xff]  }
0x1001   : > { %9486 = vmatpush1.bf16.msra.mxu0 %v14842_v55  ;;  %v14913_v55 = vld [vmem:[#allocation13 + $0x294] ss:$8 sps:$4 sm:$0xff]  }
0x1002   : > { %9487 = vmatprep.subr.bf16.mxu0 %v14847_v35  ;;  %v14911_v35 = vld [vmem:[#allocation13 + $0x290] ss:$8 sps:$4 sm:$0xff]  }
0x1005   : > { %9488 = vmatpush2.bf16.msra.mxu0 %v14845_v56  ;;  %v14916_v56 = vld [vmem:[#allocation13 + $0x284] ss:$8 sps:$4 sm:$0xff]  }
0x1006   : > { %9489 = vmatprep.subr.bf16.mxu0 %v14850_v5  ;;  %v14914_v5 = vld [vmem:[#allocation13 + $0x280] ss:$8 sps:$4 sm:$0xff]  }
0x1009   : > { %9490 = vmatpush2.bf16.msra.mxu0 %v14848_v57 }
0x100a   : > { %9491 = vmatprep.subr.bf16.mxu0 %v14853_v58 }
0x100d   : > { %9492 = vmatpush2.bf16.msra.mxu0 %v14851_v2 }
0x100e   : > { %9493 = vmatprep.subr.bf16.mxu0 %v14856_v4 }
0x1011   : > { %9494 = vmatpush2.bf16.msra.mxu0 %v14854_v59 }
0x1012   : > { %9495 = vmatprep.subr.bf16.mxu0 %v14859_v60 }
0x1015   : > { %9496 = vmatpush2.bf16.msra.mxu0 %v14857_v54 }
0x1016   : > { %9497 = vmatprep.subr.bf16.mxu0 %v14862_v61 }
0x1019   : > { %9498 = vmatpush2.bf16.msra.mxu0 %v14860_v62 }
0x101a   : > { %9499 = vmatprep.subr.bf16.mxu0 %v14865_v0 }
0x101d   : > { %9500 = vmatpush2.bf16.msra.mxu0 %v14863_v6 }
0x101e   : > { %9501 = vmatprep.subr.bf16.mxu0 %v14868_v9 }
0x1021   : > { %9502 = vmatpush2.bf16.msra.mxu0 %v14866_v12 }
0x1022   : > { %9750 = vmatprep.subr.bf16.mxu0 %v14871_v11 }
0x109c   : > { %v8991_v19 = vpop.f32.mrf.mxu0 }
0x109d   : > { %v8998_v30 = vpack.c.bf16 %v8991_v19, %v8991_v19 }
0x109e   : > { %v8993_v15 = vpop.f32.mrf.mxu0 }
0x109f   : > { %v8999_v29 = vpack.c.bf16 %v8993_v15, %v8993_v15 }
0x10a0   : > { %v8995_v36 = vpop.f32.mrf.mxu0 }
0x10a1   : > { %9503 = vmatprep.mubr.bf16.mxu0 %v8999_v29  ;;  %v14965_v29 = vld [vmem:[#allocation15 + $0x70] ss:$8 sps:$4 sm:$0xff]   ;;  %v14968_v36 = vld [vmem:[#allocation15 + $0x60] ss:$8 sps:$4 sm:$0xff]  }
0x10a2   : > { %v8996_v16 = vpop.f32.mrf.mxu0  ;;  %9504 = vmatmul.mubr.bf16.vlgmr.msra.gmra.mxu0 %v8998_v30  ;;  %v14970_v30 = vld [vmem:[#allocation15 + $0x64] ss:$8 sps:$4 sm:$0xff]  }
0x10a3   : > { %9751 = vmatpush1.bf16.msra.mxu0 %v14869_v31  ;;  %v14967_v31 = vld [vmem:[#allocation15 + $0x74] ss:$8 sps:$4 sm:$0xff]   ;;  %v14971_v16 = vld [vmem:[#allocation15 + $0x50] ss:$8 sps:$4 sm:$0xff]  }
0x10a4   : > { %v9068_v40 = vpop.f32.mrf.mxu0  ;;  %9752 = vmatprep.subr.bf16.mxu0 %v14874_v32  ;;  %v14973_v32 = vld [vmem:[#allocation15 + $0x54] ss:$8 sps:$4 sm:$0xff]  }
0x10a5   : > { %v16340_v44 = vpack.c.bf16 %v9068_v40, %v9068_v40  ;;  %v14974_v40 = vld [vmem:[#allocation15 + $0x40] ss:$8 sps:$4 sm:$0xff]  }
0x10a6   : > { %v9070_v14 = vpop.f32.mrf.mxu0 }
0x10a7   : > { %v16338_v17 = vpack.c.bf16 %v9070_v14, %v9070_v14  ;;  %9753 = vmatpush1.bf16.msra.mxu0 %v14872_v13  ;;  %v14976_v13 = vld [vmem:[#allocation15 + $0x44] ss:$8 sps:$4 sm:$0xff]   ;;  %v14977_v14 = vld [vmem:[#allocation15 + $0x30] ss:$8 sps:$4 sm:$0xff]  }
0x10a8   : > { %v9072_v51 = vpop.f32.mrf.mxu0  ;;  %9754 = vmatprep.subr.bf16.mxu0 %v14877_v43  ;;  %v14979_v43 = vld [vmem:[#allocation15 + $0x34] ss:$8 sps:$4 sm:$0xff]  }
0x10a9   : > { %9302 = vmatprep.mubr.bf16.mxu1 %v16338_v17  ;;  %v14982_v51 = vld [vmem:[#allocation15 + $0x24] ss:$8 sps:$4 sm:$0xff]  }
0x10aa   : > { %v9073_v18 = vpop.f32.mrf.mxu0  ;;  %9303 = vmatmul.mubr.bf16.vlgmr.msra.gmra.mxu1 %v16340_v44 }
0x10ab   : > { %9529 = vmatpush1.bf16.msra.mxu1 %v16328_v27  ;;  %9546 = vmatprep.mubr.bf16.mxu1 %v15569_v48  ;;  %v14887_v27 = vld [vmem:[#allocation13 + $0x210] ss:$8 sps:$4 sm:$0xff]  }
0x10ac   : > { %9755 = vmatpush1.bf16.msra.mxu0 %v14875_v25  ;;  %v14980_v25 = vld [vmem:[#allocation15 + $0x20] ss:$8 sps:$4 sm:$0xff]   ;;  %v14983_v18 = vld [vmem:[#allocation15 + $0x10] ss:$8 sps:$4 sm:$0xff]  }
0x10ad   : > { %9756 = vmatprep.subr.bf16.mxu0 %v14880_v49  ;;  %v14985_v49 = vld [vmem:[#allocation15 + $0x14] ss:$8 sps:$4 sm:$0xff]  }
0x10b0   : > { %9757 = vmatpush1.bf16.msra.mxu0 %v14878_v23  ;;  %v14988_v23 = vld [vmem:[#allocation15 + $0x4] ss:$8 sps:$4 sm:$0xff]  }
0x10b1   : > { %9758 = vmatprep.subr.bf16.mxu0 %v14883_v7  ;;  %v14986_v7 = vld [vmem:[#allocation15] ss:$8 sps:$4 sm:$0xff]  }
0x10b2   : > { %12836 = vmatmul.mubr.msk.bf16.vlgmr.msra.gmra.mxu1 %vm7883_vm5, %v16126_v38  ;;  %v14896_v38 = vld [vmem:[#allocation13 + $0x2e0] ss:$8 sps:$4 sm:$0xff]  }
0x10b3   : > { %9853 = vmatprep.mubr.bf16.mxu1 %v15569_v48 }
0x10b4   : > { %9759 = vmatpush1.bf16.msra.mxu0 %v14881_v41  ;;  %v14991_v41 = vld [vmem:[#allocation15 + $0xf4] ss:$8 sps:$4 sm:$0xff]  }
0x10b5   : > { %9760 = vmatprep.subr.bf16.mxu0 %v14886_v45  ;;  %v14989_v45 = vld [vmem:[#allocation15 + $0xf0] ss:$8 sps:$4 sm:$0xff]  }
0x10b8   : > { %9761 = vmatpush1.bf16.msra.mxu0 %v14884_v26  ;;  %v14994_v26 = vld [vmem:[#allocation15 + $0xe4] ss:$8 sps:$4 sm:$0xff]  }
0x10b9   : > { %9762 = vmatprep.subr.bf16.mxu0 %v14889_v46  ;;  %v14992_v46 = vld [vmem:[#allocation15 + $0xe0] ss:$8 sps:$4 sm:$0xff]  }
0x10bc   : > { %9763 = vmatpush1.bf16.msra.mxu0 %v14887_v27  ;;  %v14997_v27 = vld [vmem:[#allocation15 + $0xd4] ss:$8 sps:$4 sm:$0xff]  }
0x10bd   : > { %9764 = vmatprep.subr.bf16.mxu0 %v14892_v63  ;;  %v9793_v63 = vld [vmem:[%s16534_s3] sm:$0x3] }
0x10c0   : > { %9765 = vmatpush1.bf16.msra.mxu0 %v14890_v10  ;;  %v14995_v10 = vld [vmem:[#allocation15 + $0xd0] ss:$8 sps:$4 sm:$0xff]  }
0x10c1   : > { %9766 = vmatprep.subr.bf16.mxu0 %v14895_v47  ;;  %v9798_v47 = vrot.slane %v9793_v63, %v16026_v28 }
0x10c4   : > { %9767 = vmatpush2.bf16.msra.mxu0 %v14893_v34  ;;  %v15000_v34 = vld [vmem:[#allocation15 + $0xc4] ss:$8 sps:$4 sm:$0xff]  }
0x10c5   : > { %9768 = vmatprep.subr.bf16.mxu0 %v14898_v39 }
0x10c8   : > { %9769 = vmatpush2.bf16.msra.mxu0 %v14896_v38 }
0x10c9   : > { %9770 = vmatprep.subr.bf16.mxu0 %v14901_v21  ;;  %v9802_v21 = vrot.slane %v9793_v63, %v16031_v8  ;;  %v14962_v63 = vld [vmem:[#allocation15 + $0x180] ss:$8 sps:$4 sm:$0xff]  }
0x10cc   : > { %9771 = vmatpush2.bf16.msra.mxu0 %v14899_v33 }
0x10cd   : > { %9772 = vmatprep.subr.bf16.mxu0 %v14904_v50  ;;  %v14998_v50 = vld [vmem:[#allocation15 + $0xc0] ss:$8 sps:$4 sm:$0xff]  }
0x10d0   : > { %9773 = vmatpush2.bf16.msra.mxu0 %v14902_v52 }
0x10d1   : > { %9774 = vmatprep.subr.bf16.mxu0 %v14907_v37 }
0x10d4   : > { %9775 = vmatpush2.bf16.msra.mxu0 %v14905_v22  ;;  %v15003_v22 = vld [vmem:[#allocation15 + $0xb4] ss:$8 sps:$4 sm:$0xff]  }
0x10d5   : > { %9776 = vmatprep.subr.bf16.mxu0 %v14910_v53 }
0x10d8   : > { %9777 = vmatpush2.bf16.msra.mxu0 %v14908_v42 }
0x10d9   : > { %9778 = vmatprep.subr.bf16.mxu0 %v14913_v55 }
0x10dc   : > { %9779 = vmatpush2.bf16.msra.mxu0 %v14911_v35 }
0x10dd   : > { %9780 = vmatprep.subr.bf16.mxu0 %v14916_v56  ;;  %v15001_v56 = vld [vmem:[#allocation15 + $0xb0] ss:$8 sps:$4 sm:$0xff]  }
0x10e0   : > { %9781 = vmatpush2.bf16.msra.mxu0 %v14914_v5 }
0x10e1   : > { %10290 = vmatprep.subr.bf16.mxu0 %v14967_v31  ;;  %v14932_v31 = vld [vmem:[#allocation15 + $0x120] ss:$8 sps:$4 sm:$0xff]  }
0x1162   : > { %v9505_v57 = vpop.f32.mrf.mxu0 }
0x1164   : > { %v9507_v58 = vpop.f32.mrf.mxu0 }
0x1166   : > { %v9509_v2 = vpop.f32.mrf.mxu0 }
0x1168   : > { %v9510_v4 = vpop.f32.mrf.mxu0 }
0x1169   : > { %v14919_v4 = vld [vmem:[#allocation15 + $0x174] ss:$8 sps:$4 sm:$0xff]  }
0x116a   : > { %v9304_v59 = vpop.f32.mrf.mxu1 }
0x116b   : > { %v9506_v60 = vadd.f32 %v9505_v57, %v9304_v59  ;;  %v15004_v59 = vld [vmem:[#allocation15 + $0xa0] ss:$8 sps:$4 sm:$0xff]  }
0x116c   : > { %v9306_v54 = vpop.f32.mrf.mxu1 }
0x116d   : > { %v16349_v61 = vadd.f32 %v9507_v58, %v9306_v54  ;;  %v15006_v58 = vld [vmem:[#allocation15 + $0xa4] ss:$8 sps:$4 sm:$0xff]   ;;  %v15009_v54 = vld [vmem:[#allocation15 + $0x94] ss:$8 sps:$4 sm:$0xff]  }
0x116e   : > { %v9308_v62 = vpop.f32.mrf.mxu1 }
0x116f   : > { %v14922_v62 = vld [vmem:[#allocation15 + $0x164] ss:$8 sps:$4 sm:$0xff]  }
0x1170   : > { %v9309_v0 = vpop.f32.mrf.mxu1 }
0x1171   : > { %v15007_v0 = vld [vmem:[#allocation15 + $0x90] ss:$8 sps:$4 sm:$0xff]  }
0x1172   : > { %v9548_v6 = vpop.f32.mrf.mxu1 }
0x1173   : > { %v9555_v11 = vpack.c.bf16 %v9548_v6, %v9548_v6  ;;  %v14920_v6 = vld [vmem:[#allocation15 + $0x160] ss:$8 sps:$4 sm:$0xff]  }
0x1174   : > { %v9550_v9 = vpop.f32.mrf.mxu1 }
0x1175   : > { %v9556_v12 = vpack.c.bf16 %v9550_v9, %v9550_v9  ;;  %v14925_v9 = vld [vmem:[#allocation15 + $0x154] ss:$8 sps:$4 sm:$0xff]  }
0x1176   : > { %v9552_v19 = vpop.f32.mrf.mxu1 }
0x1177   : > { %9782 = vmatprep.mubr.bf16.mxu0 %v9556_v12  ;;  %v14923_v12 = vld [vmem:[#allocation15 + $0x150] ss:$8 sps:$4 sm:$0xff]   ;;  %v14926_v19 = vld [vmem:[#allocation15 + $0x140] ss:$8 sps:$4 sm:$0xff]  }
0x1178   : > { %v9553_v15 = vpop.f32.mrf.mxu1  ;;  %9783 = vmatmul.mubr.bf16.vlgmr.msra.gmra.mxu0 %v9555_v11  ;;  %v14928_v11 = vld [vmem:[#allocation15 + $0x144] ss:$8 sps:$4 sm:$0xff]  }
0x1179   : > { %10291 = vmatpush1.bf16.msra.mxu0 %v14965_v29  ;;  %v14931_v15 = vld [vmem:[#allocation15 + $0x134] ss:$8 sps:$4 sm:$0xff]   ;;  %v14929_v29 = vld [vmem:[#allocation15 + $0x130] ss:$8 sps:$4 sm:$0xff]  }
0x117a   : > { %10292 = vmatprep.subr.bf16.mxu0 %v14970_v30  ;;  %v14937_v30 = vld [vmem:[#allocation15 + $0x114] ss:$8 sps:$4 sm:$0xff]  }
0x117d   : > { %10293 = vmatpush1.bf16.msra.mxu0 %v14968_v36  ;;  %v14935_v36 = vld [vmem:[#allocation15 + $0x110] ss:$8 sps:$4 sm:$0xff]  }
0x117e   : > { %10294 = vmatprep.subr.bf16.mxu0 %v14973_v32  ;;  %v14940_v32 = vld [vmem:[#allocation15 + $0x104] ss:$8 sps:$4 sm:$0xff]  }
0x1181   : > { %10295 = vmatpush1.bf16.msra.mxu0 %v14971_v16  ;;  %v14938_v16 = vld [vmem:[#allocation15 + $0x100] ss:$8 sps:$4 sm:$0xff]  }
0x1182   : > { %10296 = vmatprep.subr.bf16.mxu0 %v14976_v13  ;;  %v14943_v13 = vld [vmem:[#allocation15 + $0x1f4] ss:$8 sps:$4 sm:$0xff]  }
0x1185   : > { %10297 = vmatpush1.bf16.msra.mxu0 %v14974_v40  ;;  %v14941_v40 = vld [vmem:[#allocation15 + $0x1f0] ss:$8 sps:$4 sm:$0xff]  }
0x1186   : > { %10298 = vmatprep.subr.bf16.mxu0 %v14979_v43  ;;  %v14946_v43 = vld [vmem:[#allocation15 + $0x1e4] ss:$8 sps:$4 sm:$0xff]  }
0x1189   : > { %10299 = vmatpush1.bf16.msra.mxu0 %v14977_v14  ;;  %v14944_v14 = vld [vmem:[#allocation15 + $0x1e0] ss:$8 sps:$4 sm:$0xff]  }
0x118a   : > { %10300 = vmatprep.subr.bf16.mxu0 %v14982_v51  ;;  %v14949_v51 = vld [vmem:[#allocation15 + $0x1d4] ss:$8 sps:$4 sm:$0xff]  }
0x118d   : > { %10301 = vmatpush1.bf16.msra.mxu0 %v14980_v25  ;;  %v14947_v25 = vld [vmem:[#allocation15 + $0x1d0] ss:$8 sps:$4 sm:$0xff]  }
0x118e   : > { %10302 = vmatprep.subr.bf16.mxu0 %v14985_v49  ;;  %v14952_v49 = vld [vmem:[#allocation15 + $0x1c4] ss:$8 sps:$4 sm:$0xff]  }
0x1191   : > { %10303 = vmatpush1.bf16.msra.mxu0 %v14983_v18  ;;  %v14950_v18 = vld [vmem:[#allocation15 + $0x1c0] ss:$8 sps:$4 sm:$0xff]  }
0x1192   : > { %10304 = vmatprep.subr.bf16.mxu0 %v14988_v23  ;;  %v14955_v23 = vld [vmem:[#allocation15 + $0x1b4] ss:$8 sps:$4 sm:$0xff]  }
0x1195   : > { %10305 = vmatpush1.bf16.msra.mxu0 %v14986_v7  ;;  %v14953_v7 = vld [vmem:[#allocation15 + $0x1b0] ss:$8 sps:$4 sm:$0xff]  }
0x1196   : > { %10306 = vmatprep.subr.bf16.mxu0 %v14991_v41  ;;  %v14958_v41 = vld [vmem:[#allocation15 + $0x1a4] ss:$8 sps:$4 sm:$0xff]  }
0x1199   : > { %10307 = vmatpush2.bf16.msra.mxu0 %v14989_v45  ;;  %v14956_v45 = vld [vmem:[#allocation15 + $0x1a0] ss:$8 sps:$4 sm:$0xff]  }
0x119a   : > { %10308 = vmatprep.subr.bf16.mxu0 %v14994_v26  ;;  %v14961_v26 = vld [vmem:[#allocation15 + $0x194] ss:$8 sps:$4 sm:$0xff]  }
0x119d   : > { %10309 = vmatpush2.bf16.msra.mxu0 %v14992_v46  ;;  %v14959_v46 = vld [vmem:[#allocation15 + $0x190] ss:$8 sps:$4 sm:$0xff]  }
0x119e   : > { %10310 = vmatprep.subr.bf16.mxu0 %v14997_v27  ;;  %v14964_v27 = vld [vmem:[#allocation15 + $0x184] ss:$8 sps:$4 sm:$0xff]  }
0x11a1   : > { %10311 = vmatpush2.bf16.msra.mxu0 %v14995_v10  ;;  %v15012_v10 = vld [vmem:[#allocation15 + $0x84] ss:$8 sps:$4 sm:$0xff]  }
0x11a2   : > { %10312 = vmatprep.subr.bf16.mxu0 %v15000_v34  ;;  %v15015_v34 = vld [vmem:[#allocation16 + $0x74] ss:$8 sps:$4 sm:$0xff]  }
0x11a5   : > { %10313 = vmatpush2.bf16.msra.mxu0 %v14998_v50  ;;  %v15034_v50 = vld [vmem:[#allocation15 + $0x250] ss:$8 sps:$4 sm:$0xff]  }
0x11a6   : > { %10314 = vmatprep.subr.bf16.mxu0 %v15003_v22  ;;  %v15046_v22 = vld [vmem:[#allocation15 + $0x230] ss:$8 sps:$4 sm:$0xff]  }
0x11a9   : > { %10315 = vmatpush2.bf16.msra.mxu0 %v15001_v56  ;;  %v15064_v56 = vld [vmem:[#allocation15 + $0x200] ss:$8 sps:$4 sm:$0xff]  }
0x11aa   : > { %10316 = vmatprep.subr.bf16.mxu0 %v15006_v58  ;;  %v15072_v58 = vld [vmem:[#allocation15 + $0x2f4] ss:$8 sps:$4 sm:$0xff]  }
0x11ad   : > { %10317 = vmatpush2.bf16.msra.mxu0 %v15004_v59  ;;  %v15082_v59 = vld [vmem:[#allocation15 + $0x2d0] ss:$8 sps:$4 sm:$0xff]  }
0x11ae   : > { %10318 = vmatprep.subr.bf16.mxu0 %v15009_v54  ;;  %v15088_v54 = vld [vmem:[#allocation15 + $0x2c0] ss:$8 sps:$4 sm:$0xff]  }
0x11b1   : > { %10319 = vmatpush2.bf16.msra.mxu0 %v15007_v0  ;;  %v15096_v0 = vld [vmem:[#allocation15 + $0x2b4] ss:$8 sps:$4 sm:$0xff]  }
0x11b2   : > { %10320 = vmatprep.subr.bf16.mxu0 %v15012_v10  ;;  %v15061_v10 = vld [vmem:[#allocation16 + $0xe0] ss:$8 sps:$4 sm:$0xff]  }
0x1238   : > { %v9784_v39 = vpop.f32.mrf.mxu0 }
0x1239   : > { %v9791_v38 = vadd.f32 %v9784_v39, %v9506_v60  ;;  %v15022_v39 = vld [vmem:[#allocation15 + $0x270] ss:$8 sps:$4 sm:$0xff]  }
0x123a   : > { %v9786_v33 = vpop.f32.mrf.mxu0 }
0x123b   : > { %v9805_v52 = vadd.f32 %v9798_v47, %v9791_v38  ;;  %v9792_v37 = vadd.f32 %v9786_v33, %v16349_v61  ;;  %v14917_v61 = vld [vmem:[#allocation15 + $0x170] ss:$8 sps:$4 sm:$0xff]   ;;  %v15010_v47 = vld [vmem:[#allocation15 + $0x80] ss:$8 sps:$4 sm:$0xff]   ;;  %v15024_v38 = vld [vmem:[#allocation15 + $0x274] ss:$8 sps:$4 sm:$0xff]  }
0x123c   : > { %v9788_v53 = vpop.f32.mrf.mxu0  ;;  %10321 = vmatpush2.bf16.msra.mxu0 %v15010_v47  ;;  %v15030_v33 = vld [vmem:[#allocation15 + $0x264] ss:$8 sps:$4 sm:$0xff]   ;;  %v15069_v47 = vld [vmem:[#allocation16 + $0xd4] ss:$8 sps:$4 sm:$0xff]  }
0x123d   : > { %v9807_v42 = vmax.f32 %v9805_v52, 0.0  ;;  %v9806_v55 = vadd.f32 %v9802_v21, %v9792_v37  ;;  %10830 = vmatprep.subr.bf16.mxu0 %v15015_v34  ;;  %v15028_v21 = vld [vmem:[#allocation15 + $0x260] ss:$8 sps:$4 sm:$0xff]   ;;  %v15036_v52 = vld [vmem:[#allocation15 + $0x254] ss:$8 sps:$4 sm:$0xff]  }
0x123e   : > { %v9789_v35 = vpop.f32.mrf.mxu0  ;;  %v15042_v37 = vld [vmem:[#allocation15 + $0x244] ss:$8 sps:$4 sm:$0xff]   ;;  %v15048_v53 = vld [vmem:[#allocation15 + $0x234] ss:$8 sps:$4 sm:$0xff]   ;;  %v15067_v34 = vld [vmem:[#allocation16 + $0xd0] ss:$8 sps:$4 sm:$0xff]  }
0x123f   : > { %v16355_v5 = vpack.c.bf16 %v9807_v42, %v9807_v42  ;;  %v9808_v57 = vmax.f32 %v9806_v55, 0.0  ;;  %v15054_v42 = vld [vmem:[#allocation15 + $0x224] ss:$8 sps:$4 sm:$0xff]   ;;  %v15058_v55 = vld [vmem:[#allocation15 + $0x210] ss:$8 sps:$4 sm:$0xff]  }
0x1240   : > { %v15060_v35 = vld [vmem:[#allocation15 + $0x214] ss:$8 sps:$4 sm:$0xff]  }
0x1241   : > { %v16357_v2 = vpack.c.bf16 %v9808_v57, %v9808_v57  ;;  %v16363_v60 = vsel %vm9814_vm6, %v16355_v5, 0  ;;  %v15070_v57 = vld [vmem:[#allocation15 + $0x2f0] ss:$8 sps:$4 sm:$0xff]  }
0x1243   : > { %12869 = vmatprep.subr.msk.bf16.mxu1 %vm9814_vm6, %v16357_v2 }
0x1244   : > { %9836 = vmatpush1.bf16.msra.mxu1 %v16363_v60 }
0x1245   : > { %10089 = vmatprep.subr.bf16.mxu1 %v14919_v4  ;;  %v15078_v4 = vld [vmem:[#allocation15 + $0x2e4] ss:$8 sps:$4 sm:$0xff]  }
0x1247   : > { %12870 = vmatmul.mubr.msk.bf16.vlgmr.msra.gmra.mxu1 %vm9811_vm7, %v16151_v24  ;;  %v14934_v24 = vld [vmem:[#allocation15 + $0x124] ss:$8 sps:$4 sm:$0xff]  }
0x1248   : > { %10090 = vmatpush1.bf16.msra.mxu1 %v14917_v61  ;;  %10121 = vmatprep.mubr.bf16.mxu1 %v16357_v2  ;;  %v15090_v61 = vld [vmem:[#allocation15 + $0x2c4] ss:$8 sps:$4 sm:$0xff]  }
0x1249   : > { %10091 = vmatprep.subr.bf16.mxu1 %v14922_v62  ;;  %v15094_v62 = vld [vmem:[#allocation15 + $0x2b0] ss:$8 sps:$4 sm:$0xff]  }
0x124c   : > { %10092 = vmatpush1.bf16.msra.mxu1 %v14920_v6  ;;  %v15102_v6 = vld [vmem:[#allocation15 + $0x2a4] ss:$8 sps:$4 sm:$0xff]  }
0x124d   : > { %10093 = vmatprep.subr.bf16.mxu1 %v14925_v9  ;;  %v15100_v9 = vld [vmem:[#allocation15 + $0x2a0] ss:$8 sps:$4 sm:$0xff]  }
0x1250   : > { %10094 = vmatpush1.bf16.msra.mxu1 %v14923_v12  ;;  %v15105_v12 = vld [vmem:[#allocation15 + $0x294] ss:$8 sps:$4 sm:$0xff]  }
0x1251   : > { %10095 = vmatprep.subr.bf16.mxu1 %v14928_v11  ;;  %v15103_v11 = vld [vmem:[#allocation15 + $0x290] ss:$8 sps:$4 sm:$0xff]  }
0x1254   : > { %10096 = vmatpush1.bf16.msra.mxu1 %v14926_v19  ;;  %v15108_v19 = vld [vmem:[#allocation15 + $0x284] ss:$8 sps:$4 sm:$0xff]  }
0x1255   : > { %10097 = vmatprep.subr.bf16.mxu1 %v14931_v15  ;;  %v15106_v15 = vld [vmem:[#allocation15 + $0x280] ss:$8 sps:$4 sm:$0xff]  }
0x1258   : > { %10098 = vmatpush1.bf16.msra.mxu1 %v14929_v29 }
0x1259   : > { %10099 = vmatprep.subr.bf16.mxu1 %v14934_v24 }
0x125c   : > { %10100 = vmatpush1.bf16.msra.mxu1 %v14932_v31 }
0x125d   : > { %10101 = vmatprep.subr.bf16.mxu1 %v14937_v30  ;;  %v15013_v30 = vld [vmem:[#allocation16 + $0x70] ss:$8 sps:$4 sm:$0xff]  }
0x1260   : > { %10102 = vmatpush1.bf16.msra.mxu1 %v14935_v36 }
0x1261   : > { %10103 = vmatprep.subr.bf16.mxu1 %v14940_v32 }
0x1264   : > { %10104 = vmatpush1.bf16.msra.mxu1 %v14938_v16  ;;  %v15018_v16 = vld [vmem:[#allocation16 + $0x64] ss:$8 sps:$4 sm:$0xff]  }
0x1265   : > { %10105 = vmatprep.subr.bf16.mxu1 %v14943_v13 }
0x1268   : > { %10106 = vmatpush2.bf16.msra.mxu1 %v14941_v40  ;;  %v15016_v40 = vld [vmem:[#allocation16 + $0x60] ss:$8 sps:$4 sm:$0xff]  }
0x1269   : > { %10107 = vmatprep.subr.bf16.mxu1 %v14946_v43  ;;  %v15021_v43 = vld [vmem:[#allocation16 + $0x54] ss:$8 sps:$4 sm:$0xff]  }
0x126c   : > { %10108 = vmatpush2.bf16.msra.mxu1 %v14944_v14  ;;  %v15019_v14 = vld [vmem:[#allocation16 + $0x50] ss:$8 sps:$4 sm:$0xff]  }
0x126d   : > { %10109 = vmatprep.subr.bf16.mxu1 %v14949_v51  ;;  %v15027_v51 = vld [vmem:[#allocation16 + $0x44] ss:$8 sps:$4 sm:$0xff]  }
0x1270   : > { %10110 = vmatpush2.bf16.msra.mxu1 %v14947_v25  ;;  %v15025_v25 = vld [vmem:[#allocation16 + $0x40] ss:$8 sps:$4 sm:$0xff]  }
0x1271   : > { %10111 = vmatprep.subr.bf16.mxu1 %v14952_v49  ;;  %v15033_v49 = vld [vmem:[#allocation16 + $0x34] ss:$8 sps:$4 sm:$0xff]  }
0x1274   : > { %10112 = vmatpush2.bf16.msra.mxu1 %v14950_v18  ;;  %v15031_v18 = vld [vmem:[#allocation16 + $0x30] ss:$8 sps:$4 sm:$0xff]  }
0x1275   : > { %10113 = vmatprep.subr.bf16.mxu1 %v14955_v23  ;;  %v15039_v23 = vld [vmem:[#allocation16 + $0x24] ss:$8 sps:$4 sm:$0xff]  }
0x1278   : > { %10114 = vmatpush2.bf16.msra.mxu1 %v14953_v7  ;;  %v15037_v7 = vld [vmem:[#allocation16 + $0x20] ss:$8 sps:$4 sm:$0xff]  }
0x1279   : > { %10115 = vmatprep.subr.bf16.mxu1 %v14958_v41  ;;  %v15045_v41 = vld [vmem:[#allocation16 + $0x14] ss:$8 sps:$4 sm:$0xff]  }
0x127c   : > { %10116 = vmatpush2.bf16.msra.mxu1 %v14956_v45  ;;  %v15051_v45 = vld [vmem:[#allocation16 + $0x4] ss:$8 sps:$4 sm:$0xff]  }
0x127d   : > { %10117 = vmatprep.subr.bf16.mxu1 %v14961_v26  ;;  %v15049_v26 = vld [vmem:[#allocation16] ss:$8 sps:$4 sm:$0xff]  }
0x1280   : > { %10118 = vmatpush2.bf16.msra.mxu1 %v14959_v46  ;;  %v15057_v46 = vld [vmem:[#allocation16 + $0xf4] ss:$8 sps:$4 sm:$0xff]  }
0x1281   : > { %10119 = vmatprep.subr.bf16.mxu1 %v14964_v27  ;;  %v15055_v27 = vld [vmem:[#allocation16 + $0xf0] ss:$8 sps:$4 sm:$0xff]  }
0x1284   : > { %10120 = vmatpush2.bf16.msra.mxu1 %v14962_v63  ;;  %v15063_v63 = vld [vmem:[#allocation16 + $0xe4] ss:$8 sps:$4 sm:$0xff]  }
0x1285   : > { %12935 = vmatprep.subr.msk.bf16.mxu1 %vm9814_vm6, %v16357_v2  ;;  %v15076_v2 = vld [vmem:[#allocation15 + $0x2e0] ss:$8 sps:$4 sm:$0xff]  }
0x1287   : > { %10122 = vmatmul.mubr.bf16.vlgmr.msra.gmra.mxu1 %v16355_v5  ;;  %v15066_v5 = vld [vmem:[#allocation15 + $0x204] ss:$8 sps:$4 sm:$0xff]  }
0x1288   : > { %10348 = vmatpush1.bf16.msra.mxu1 %v16363_v60  ;;  %10365 = vmatprep.mubr.bf16.mxu1 %v15569_v48  ;;  %v15040_v48 = vld [vmem:[#allocation15 + $0x240] ss:$8 sps:$4 sm:$0xff]   ;;  %v15084_v60 = vld [vmem:[#allocation15 + $0x2d4] ss:$8 sps:$4 sm:$0xff]  }
0x1289   : > { %10569 = vmatprep.subr.bf16.mxu1 %v15024_v38  ;;  %v15073_v38 = vld [vmem:[#allocation16 + $0xc0] ss:$8 sps:$4 sm:$0xff]  }
0x128f   : > { %12936 = vmatmul.mubr.msk.bf16.vlgmr.msra.gmra.mxu1 %vm9811_vm7, %v16160_v20  ;;  %v15052_v20 = vld [vmem:[#allocation15 + $0x220] ss:$8 sps:$4 sm:$0xff]  }
0x1290   : > { %10570 = vmatpush1.bf16.msra.mxu1 %v15022_v39  ;;  %v15075_v39 = vld [vmem:[#allocation16 + $0xc4] ss:$8 sps:$4 sm:$0xff]  }
0x1291   : > { %10571 = vmatprep.subr.bf16.mxu1 %v15030_v33  ;;  %v15079_v33 = vld [vmem:[#allocation16 + $0xb0] ss:$8 sps:$4 sm:$0xff]  }
0x1294   : > { %10572 = vmatpush1.bf16.msra.mxu1 %v15028_v21  ;;  %v15081_v21 = vld [vmem:[#allocation16 + $0xb4] ss:$8 sps:$4 sm:$0xff]  }
0x1295   : > { %10573 = vmatprep.subr.bf16.mxu1 %v15036_v52  ;;  %v15085_v52 = vld [vmem:[#allocation16 + $0xa0] ss:$8 sps:$4 sm:$0xff]  }
0x1298   : > { %10574 = vmatpush1.bf16.msra.mxu1 %v15034_v50  ;;  %v15087_v50 = vld [vmem:[#allocation16 + $0xa4] ss:$8 sps:$4 sm:$0xff]  }
0x1299   : > { %10575 = vmatprep.subr.bf16.mxu1 %v15042_v37  ;;  %v15091_v37 = vld [vmem:[#allocation16 + $0x90] ss:$8 sps:$4 sm:$0xff]  }
0x129c   : > { %10576 = vmatpush1.bf16.msra.mxu1 %v15040_v48  ;;  %v15093_v48 = vld [vmem:[#allocation16 + $0x94] ss:$8 sps:$4 sm:$0xff]  }
0x129d   : > { %10577 = vmatprep.subr.bf16.mxu1 %v15048_v53  ;;  %v15097_v53 = vld [vmem:[#allocation16 + $0x80] ss:$8 sps:$4 sm:$0xff]  }
0x12a0   : > { %10578 = vmatpush1.bf16.msra.mxu1 %v15046_v22  ;;  %v15099_v22 = vld [vmem:[#allocation16 + $0x84] ss:$8 sps:$4 sm:$0xff]  }
0x12a1   : > { %10579 = vmatprep.subr.bf16.mxu1 %v15054_v42 }
0x12a4   : > { %10580 = vmatpush1.bf16.msra.mxu1 %v15052_v20 }
0x12a5   : > { %10581 = vmatprep.subr.bf16.mxu1 %v15060_v35 }
0x12a8   : > { %10582 = vmatpush1.bf16.msra.mxu1 %v15058_v55 }
0x12a9   : > { %10583 = vmatprep.subr.bf16.mxu1 %v15066_v5 }
0x12ac   : > { %10584 = vmatpush1.bf16.msra.mxu1 %v15064_v56 }
0x12ad   : > { %10585 = vmatprep.subr.bf16.mxu1 %v15072_v58 }
0x12b0   : > { %10586 = vmatpush2.bf16.msra.mxu1 %v15070_v57 }
0x12b1   : > { %10587 = vmatprep.subr.bf16.mxu1 %v15078_v4  ;;  %v15109_v4 = vld [vmem:[%s16535_s16 + $0x38] sm:$0xff]  }
0x12b4   : > { %10588 = vmatpush2.bf16.msra.mxu1 %v15076_v2 }
0x12b5   : > { %10589 = vmatprep.subr.bf16.mxu1 %v15084_v60  ;;  %v15110_v60 = vld [vmem:[%s16535_s16 + $0x30] sm:$0xff]  }
0x12b8   : > { %10590 = vmatpush2.bf16.msra.mxu1 %v15082_v59 }
0x12b9   : > { %10591 = vmatprep.subr.bf16.mxu1 %v15090_v61  ;;  %v15113_v61 = vld [vmem:[%s16535_s16 + $0x18] sm:$0xff]  }
0x12bc   : > { %10592 = vmatpush2.bf16.msra.mxu1 %v15088_v54  ;;  %v15112_v54 = vld [vmem:[%s16535_s16 + $0x20] sm:$0xff]  }
0x12bd   : > { %10593 = vmatprep.subr.bf16.mxu1 %v15096_v0  ;;  %v15115_v0 = vld [vmem:[%s16535_s16 + $0x8] sm:$0xff]  }
0x12c0   : > { %10594 = vmatpush2.bf16.msra.mxu1 %v15094_v62  ;;  %v15114_v62 = vld [vmem:[%s16535_s16 + $0x10] sm:$0xff]  }
0x12c1   : > { %10595 = vmatprep.subr.bf16.mxu1 %v15102_v6  ;;  %v15116_v6 = vld [vmem:[%s16535_s16] sm:$0xff]  }
0x12c4   : > { %10596 = vmatpush2.bf16.msra.mxu1 %v15100_v9 }
0x12c5   : > { %10597 = vmatprep.subr.bf16.mxu1 %v15105_v12 }
0x12c8   : > { %10598 = vmatpush2.bf16.msra.mxu1 %v15103_v11 }
0x12c9   : > { %10599 = vmatprep.subr.bf16.mxu1 %v15108_v19 }
0x12cc   : > { %10600 = vmatpush2.bf16.msra.mxu1 %v15106_v15  ;;  %v10658_v15 = vld [vmem:[%s16536_s1] sm:$0x3] }
0x12cd   : > { %13164 = vmatprep.subr.bf16.mxu1 %v15567_v1 }
0x1307   : > { %v9855_v29 = vpop.f32.mrf.mxu1 }
0x1308   : > { %v9862_v36 = vpack.c.bf16 %v9855_v29, %v9855_v29  ;;  %v10667_v29 = vrot.slane %v10658_v15, %v16031_v8 }
0x1309   : > { %v9857_v24 = vpop.f32.mrf.mxu1 }
0x130a   : > { %v9863_v31 = vpack.c.bf16 %v9857_v24, %v9857_v24 }
0x130b   : > { %v9859_v32 = vpop.f32.mrf.mxu1 }
0x130c   : > { %10322 = vmatprep.mubr.bf16.mxu0 %v9863_v31  ;;  %v10612_v32 = vld [vmem:[%s16537_s22] sm:$0x3] }
0x130d   : > { %v9860_v13 = vpop.f32.mrf.mxu1  ;;  %10323 = vmatmul.mubr.bf16.vlgmr.msra.gmra.mxu0 %v9862_v36 }
0x130e   : > { %10831 = vmatpush1.bf16.msra.mxu0 %v15013_v30  ;;  %10862 = vmatprep.mubr.bf16.mxu0 %v16338_v17  ;;  %v15043_v17 = vld [vmem:[#allocation16 + $0x10] ss:$8 sps:$4 sm:$0xff]  }
0x130f   : > { %10832 = vmatprep.subr.bf16.mxu0 %v15018_v16 }
0x1312   : > { %10833 = vmatpush1.bf16.msra.mxu0 %v15016_v40  ;;  %v10663_v40 = vrot.slane %v10658_v15, %v16026_v28 }
0x1313   : > { %10834 = vmatprep.subr.bf16.mxu0 %v15021_v43  ;;  %v10617_v43 = vrot.slane %v10612_v32, %v16026_v28  ;;  %v15118_v28 = vld [vmem:[#allocation18 + $0x30] sm:$0xff]  }
0x1316   : > { %10835 = vmatpush1.bf16.msra.mxu0 %v15019_v14 }
0x1317   : > { %10836 = vmatprep.subr.bf16.mxu0 %v15027_v51 }
0x131a   : > { %10837 = vmatpush1.bf16.msra.mxu0 %v15025_v25 }
0x131b   : > { %10838 = vmatprep.subr.bf16.mxu0 %v15033_v49  ;;  %v10621_v49 = vrot.slane %v10612_v32, %v16031_v8  ;;  %v15119_v8 = vld [vmem:[#allocation18 + $0x28] sm:$0xff]  }
0x131e   : > { %10839 = vmatpush1.bf16.msra.mxu0 %v15031_v18 }
0x131f   : > { %10840 = vmatprep.subr.bf16.mxu0 %v15039_v23 }
0x1322   : > { %10841 = vmatpush1.bf16.msra.mxu0 %v15037_v7 }
0x1323   : > { %10842 = vmatprep.subr.bf16.mxu0 %v15045_v41 }
0x1326   : > { %10843 = vmatpush1.bf16.msra.mxu0 %v15043_v17 }
0x1327   : > { %10844 = vmatprep.subr.bf16.mxu0 %v15051_v45 }
0x132a   : > { %10845 = vmatpush1.bf16.msra.mxu0 %v15049_v26 }
0x132b   : > { %10846 = vmatprep.subr.bf16.mxu0 %v15057_v46 }
0x132e   : > { %10847 = vmatpush2.bf16.msra.mxu0 %v15055_v27 }
0x132f   : > { %10848 = vmatprep.subr.bf16.mxu0 %v15063_v63 }
0x1332   : > { %10849 = vmatpush2.bf16.msra.mxu0 %v15061_v10  ;;  %v15117_v10 = vld [vmem:[#allocation18 + $0x38] sm:$0xff]  }
0x1333   : > { %10850 = vmatprep.subr.bf16.mxu0 %v15069_v47 }
0x1336   : > { %10851 = vmatpush2.bf16.msra.mxu0 %v15067_v34  ;;  %v15120_v34 = vld [vmem:[#allocation18 + $0x20] sm:$0xff]  }
0x1337   : > { %10852 = vmatprep.subr.bf16.mxu0 %v15075_v39  ;;  %v15121_v39 = vld [vmem:[#allocation18 + $0x18] sm:$0xff]  }
0x133a   : > { %10853 = vmatpush2.bf16.msra.mxu0 %v15073_v38  ;;  %v15122_v38 = vld [vmem:[#allocation18 + $0x10] sm:$0xff]  }
0x133b   : > { %10854 = vmatprep.subr.bf16.mxu0 %v15081_v21  ;;  %v15123_v21 = vld [vmem:[#allocation18 + $0x8] sm:$0xff]  }
0x133e   : > { %10855 = vmatpush2.bf16.msra.mxu0 %v15079_v33  ;;  %v15124_v33 = vld [vmem:[#allocation18] sm:$0xff]  }
0x133f   : > { %10856 = vmatprep.subr.bf16.mxu0 %v15087_v50  ;;  %v15133_v50 = vld [vmem:[#allocation19 + $0x38] sm:$0xff]  }
0x1342   : > { %10857 = vmatpush2.bf16.msra.mxu0 %v15085_v52  ;;  %v15134_v52 = vld [vmem:[#allocation19 + $0x30] sm:$0xff]  }
0x1343   : > { %10858 = vmatprep.subr.bf16.mxu0 %v15093_v48  ;;  %v15135_v48 = vld [vmem:[#allocation19 + $0x28] sm:$0xff]  }
0x1346   : > { %10859 = vmatpush2.bf16.msra.mxu0 %v15091_v37  ;;  %v15136_v37 = vld [vmem:[#allocation19 + $0x20] sm:$0xff]  }
0x1347   : > { %v10123_v20 = vpop.f32.mrf.mxu1  ;;  %10860 = vmatprep.subr.bf16.mxu0 %v15099_v22  ;;  %v15137_v22 = vld [vmem:[#allocation19 + $0x18] sm:$0xff]  }
0x1349   : > { %v10125_v42 = vpop.f32.mrf.mxu1 }
0x134a   : > { %10861 = vmatpush2.bf16.msra.mxu0 %v15097_v53  ;;  %v15138_v53 = vld [vmem:[#allocation19 + $0x10] sm:$0xff]  }
0x134b   : > { %v10127_v55 = vpop.f32.mrf.mxu1  ;;  %13204 = vmatprep.subr.bf16.mxu0 %v15567_v1 }
0x134d   : > { %10863 = vmatmul.mubr.bf16.vlgmr.msra.gmra.mxu0 %v16340_v44  ;;  %v10128_v35 = vpop.f32.mrf.mxu1  ;;  %v15111_v44 = vld [vmem:[%s16535_s16 + $0x28] sm:$0xff]  }
0x134e   : > { %13220 = vmatprep.mubr.msk.bf16.mxu0 %vm15568_vm0, %v15567_v1  ;;  %13205 = vmatpush3.bf16.msra.mxu0 %v15133_v50 }
0x134f   : > { %v10367_v56 = vpop.f32.mrf.mxu1  ;;  %13206 = vmatprep.subr.bf16.mxu0 %v15567_v1 }
0x1350   : > { %v10374_v58 = vpack.c.bf16 %v10367_v56, %v10367_v56 }
0x1351   : > { %v10369_v5 = vpop.f32.mrf.mxu1 }
0x1352   : > { %v10375_v57 = vpack.c.bf16 %v10369_v5, %v10369_v5  ;;  %13207 = vmatpush3.bf16.msra.mxu0 %v15134_v52 }
0x1353   : > { %v10371_v2 = vpop.f32.mrf.mxu1  ;;  %13208 = vmatprep.subr.bf16.mxu0 %v15567_v1 }
0x1354   : > { %10601 = vmatprep.mubr.bf16.mxu1 %v10375_v57 }
0x1355   : > { %v10372_v59 = vpop.f32.mrf.mxu1  ;;  %10602 = vmatmul.mubr.bf16.vlgmr.msra.gmra.mxu1 %v10374_v58  ;;  %v15125_v58 = vld [vmem:[%s16535_s16 + $0x38] sm:$0xff]  }
0x1356   : > { %13165 = vmatpush3.bf16.msra.mxu1 %v15109_v4  ;;  %13180 = vmatprep.mubr.msk.bf16.mxu1 %vm15568_vm0, %v15567_v1  ;;  %v15126_v59 = vld [vmem:[%s16535_s16 + $0x30] sm:$0xff]  }
0x1357   : > { %13166 = vmatprep.subr.bf16.mxu1 %v15567_v1  ;;  %13209 = vmatpush3.bf16.msra.mxu0 %v15135_v48 }
0x1358   : > { %13210 = vmatprep.subr.bf16.mxu0 %v15567_v1 }
0x135a   : > { %13167 = vmatpush3.bf16.msra.mxu1 %v15110_v60  ;;  %v15127_v60 = vld [vmem:[%s16535_s16 + $0x28] sm:$0xff]  }
0x135b   : > { %13168 = vmatprep.subr.bf16.mxu1 %v15567_v1  ;;  %13211 = vmatpush3.bf16.msra.mxu0 %v15136_v37 }
0x135c   : > { %13212 = vmatprep.subr.bf16.mxu0 %v15567_v1 }
0x135e   : > { %13169 = vmatpush3.bf16.msra.mxu1 %v15111_v44  ;;  %v15128_v44 = vld [vmem:[%s16535_s16 + $0x20] sm:$0xff]  }
0x135f   : > { %13170 = vmatprep.subr.bf16.mxu1 %v15567_v1  ;;  %13213 = vmatpush3.bf16.msra.mxu0 %v15137_v22 }
0x1360   : > { %13214 = vmatprep.subr.bf16.mxu0 %v15567_v1 }
0x1362   : > { %13171 = vmatpush3.bf16.msra.mxu1 %v15112_v54  ;;  %v15129_v54 = vld [vmem:[%s16535_s16 + $0x18] sm:$0xff]  }
0x1363   : > { %13172 = vmatprep.subr.bf16.mxu1 %v15567_v1  ;;  %13215 = vmatpush3.bf16.msra.mxu0 %v15138_v53 }
0x1364   : > { %13216 = vmatprep.subr.bf16.mxu0 %v15567_v1 }
0x1366   : > { %13173 = vmatpush3.bf16.msra.mxu1 %v15113_v61  ;;  %v15130_v61 = vld [vmem:[%s16535_s16 + $0x10] sm:$0xff]  }
0x1367   : > { %13174 = vmatprep.subr.bf16.mxu1 %v15567_v1 }
0x136a   : > { %13175 = vmatpush3.bf16.msra.mxu1 %v15114_v62  ;;  %v15131_v62 = vld [vmem:[%s16535_s16 + $0x8] sm:$0xff]  }
0x136b   : > { %13176 = vmatprep.subr.bf16.mxu1 %v15567_v1 }
0x136e   : > { %13177 = vmatpush3.bf16.msra.mxu1 %v15115_v0  ;;  %v15132_v0 = vld [vmem:[%s16535_s16] sm:$0xff]  }
0x136f   : > { %13178 = vmatprep.subr.bf16.mxu1 %v15567_v1 }
0x1372   : > { %13179 = vmatpush3.bf16.msra.mxu1 %v15116_v6 }
0x1373   : > { %13184 = vmatprep.subr.bf16.mxu1 %v15567_v1 }
0x13cd   : > { %v10324_v9 = vpop.f32.mrf.mxu0 }
0x13ce   : > { %v10325_v13 = vadd.f32 %v10324_v9, %v10123_v20  ;;  %v15139_v20 = vld [vmem:[#allocation19 + $0x8] sm:$0xff]  }
0x13cf   : > { %v10326_v12 = vpop.f32.mrf.mxu0  ;;  %13217 = vmatpush3.bf16.msra.mxu0 %v15139_v20 }
0x13d0   : > { %v10327_v51 = vadd.f32 %v10326_v12, %v10125_v42  ;;  %13218 = vmatprep.subr.bf16.mxu0 %v15567_v1  ;;  %v16426_v42 = vld [vmem:[%s16538_s23] ss:$0 sm:$0xff] }
0x13d1   : > { %v10328_v11 = vpop.f32.mrf.mxu0  ;;  %v15140_v12 = vld [vmem:[#allocation19] sm:$0xff]  }
0x13d2   : > { %v16452_v11 = vld [vmem:[%s16539_s7] ss:$0 sm:$0xff] }
0x13d3   : > { %v10329_v19 = vpop.f32.mrf.mxu0  ;;  %13219 = vmatpush3.bf16.msra.mxu0 %v15140_v12 }
0x13d4   : > { %13244 = vmatprep.subr.bf16.mxu0 %v15567_v1 }
0x140d   : > { %v10864_v24 = vpop.f32.mrf.mxu0 }
0x140e   : > { %v10865_v23 = vadd.f32 %v10864_v24, %v10663_v40  ;;  %v15144_v40 = vld [vmem:[#allocation18 + $0x20] sm:$0xff]  }
0x140f   : > { %v10866_v31 = vpop.f32.mrf.mxu0 }
0x1410   : > { %v10867_v30 = vadd.f32 %v10866_v31, %v10667_v29 }
0x1411   : > { %v10868_v36 = vpop.f32.mrf.mxu0 }
0x1413   : > { %v10869_v16 = vpop.f32.mrf.mxu0 }
0x1414   : > { %v15142_v16 = vld [vmem:[#allocation18 + $0x30] sm:$0xff]  }
0x1415   : > { %v10603_v14 = vpop.f32.mrf.mxu1 }
0x1416   : > { %v10610_v25 = vadd.f32 %v10603_v14, %v10325_v13  ;;  %v15143_v13 = vld [vmem:[#allocation18 + $0x28] sm:$0xff]   ;;  %v15146_v14 = vld [vmem:[#allocation18 + $0x10] sm:$0xff]  }
0x1417   : > { %v10605_v18 = vpop.f32.mrf.mxu1 }
0x1418   : > { %v10624_v7 = vadd.f32 %v10617_v43, %v10610_v25  ;;  %v10611_v41 = vadd.f32 %v10605_v18, %v10327_v51  ;;  %v15145_v43 = vld [vmem:[#allocation18 + $0x18] sm:$0xff]   ;;  %v15147_v51 = vld [vmem:[#allocation18 + $0x8] sm:$0xff]  }
0x1419   : > { %v10607_v17 = vpop.f32.mrf.mxu1 }
0x141a   : > { %v10871_v45 = vadd.f32 %v10865_v23, %v10624_v7  ;;  %v10625_v26 = vadd.f32 %v10621_v49, %v10611_v41  ;;  %v15148_v49 = vld [vmem:[#allocation18] sm:$0xff]  }
0x141b   : > { %v10608_v46 = vpop.f32.mrf.mxu1 }
0x141c   : > { %v10873_v27 = vmax.f32 %v10871_v45, 0.0  ;;  %v16406_v63 = vadd.f32 %v10867_v30, %v10625_v26  ;;  %v15141_v30 = vld [vmem:[#allocation18 + $0x38] sm:$0xff]   ;;  %v15150_v46 = vld [vmem:[#allocation19 + $0x30] sm:$0xff]  }
0x141d   : > { %v15149_v26 = vld [vmem:[#allocation19 + $0x38] sm:$0xff]  }
0x141e   : > { %v10875_v47 = vpack.c.bf16 %v10873_v27, %v10873_v27  ;;  %v10874_v6 = vmax.f32 %v16406_v63, 0.0  ;;  %v15151_v27 = vld [vmem:[#allocation19 + $0x28] sm:$0xff]   ;;  %v15152_v63 = vld [vmem:[#allocation19 + $0x20] sm:$0xff]  }
0x1420   : > { %13181 = vmatmul.mubr.bf16.vlgmr.msra.gmra.mxu1 %v10875_v47  ;;  %v10876_v9 = vpack.c.bf16 %v10874_v6, %v10874_v6  ;;  %v15154_v47 = vld [vmem:[#allocation19 + $0x10] sm:$0xff]  }
0x1421   : > { %13185 = vmatpush3.bf16.msra.mxu1 %v15117_v10  ;;  %13200 = vmatprep.mubr.msk.bf16.mxu1 %vm15568_vm0, %v15567_v1  ;;  %v15153_v10 = vld [vmem:[#allocation19 + $0x18] sm:$0xff]  }
0x1422   : > { %13186 = vmatprep.subr.bf16.mxu1 %v15567_v1 }
0x1425   : > { %13187 = vmatpush3.bf16.msra.mxu1 %v15118_v28  ;;  %v15155_v28 = vld [vmem:[#allocation19 + $0x8] sm:$0xff]  }
0x1426   : > { %13188 = vmatprep.subr.bf16.mxu1 %v15567_v1 }
0x1429   : > { %13189 = vmatpush3.bf16.msra.mxu1 %v15119_v8  ;;  %v15156_v8 = vld [vmem:[#allocation19] sm:$0xff]  }
0x142a   : > { %13190 = vmatprep.subr.bf16.mxu1 %v15567_v1 }
0x142d   : > { %13191 = vmatpush3.bf16.msra.mxu1 %v15120_v34  ;;  %v13019_v34 = vld [vmem:[%s15718_s27] ss:$0 sm:$0xff] }
0x142e   : > { %13192 = vmatprep.subr.bf16.mxu1 %v15567_v1 }
0x1431   : > { %13193 = vmatpush3.bf16.msra.mxu1 %v15121_v39 }
0x1432   : > { %13194 = vmatprep.subr.bf16.mxu1 %v15567_v1 }
0x1435   : > { %13195 = vmatpush3.bf16.msra.mxu1 %v15122_v38 }
0x1436   : > { %13196 = vmatprep.subr.bf16.mxu1 %v15567_v1 }
0x1439   : > { %13197 = vmatpush3.bf16.msra.mxu1 %v15123_v21 }
0x143a   : > { %13198 = vmatprep.subr.bf16.mxu1 %v15567_v1 }
0x143d   : > { %13199 = vmatpush3.bf16.msra.mxu1 %v15124_v33 }
0x143e   : > { %13224 = vmatprep.subr.bf16.mxu1 %v15567_v1 }
0x14e0   : > { %v10982_v55 = vpop.f32.mrf.mxu1 }
0x14e1   : > { %v10983_v35 = vadd.f32 %v16426_v42, %v10982_v55 }
0x14e2   : > { %v13182_v56 = vpop.f32.mrf.mxu1 }
0x14e3   : > { %v10988_v5 = vmax.f32 %v10983_v35, 0.0 }
0x14e4   : > { %v10985_v57 = vpop.f32.mrf.mxu1 }
0x14e5   : > { %v10989_v2 = vpack.c.bf16 %v10988_v5, %v10988_v5 }
0x14e6   : > { %v13183_v4 = vpop.f32.mrf.mxu1 }
0x14e7   : > { %13201 = vmatmul.mubr.bf16.vlgmr.msra.gmra.mxu1 %v10989_v2 }
0x14e8   : > { %13225 = vmatpush3.bf16.msra.mxu1 %v15125_v58  ;;  %13240 = vmatprep.mubr.msk.bf16.mxu1 %vm15568_vm0, %v15567_v1 }
0x14e9   : > { %13226 = vmatprep.subr.bf16.mxu1 %v15567_v1 }
0x14ec   : > { %13227 = vmatpush3.bf16.msra.mxu1 %v15126_v59 }
0x14ed   : > { %13228 = vmatprep.subr.bf16.mxu1 %v15567_v1 }
0x14f0   : > { %13229 = vmatpush3.bf16.msra.mxu1 %v15127_v60 }
0x14f1   : > { %13230 = vmatprep.subr.bf16.mxu1 %v15567_v1 }
0x14f4   : > { %13231 = vmatpush3.bf16.msra.mxu1 %v15128_v44 }
0x14f5   : > { %13232 = vmatprep.subr.bf16.mxu1 %v15567_v1 }
0x14f8   : > { %13233 = vmatpush3.bf16.msra.mxu1 %v15129_v54 }
0x14f9   : > { %13234 = vmatprep.subr.bf16.mxu1 %v15567_v1 }
0x14fc   : > { %13235 = vmatpush3.bf16.msra.mxu1 %v15130_v61 }
0x14fd   : > { %13236 = vmatprep.subr.bf16.mxu1 %v15567_v1 }
0x1500   : > { %13237 = vmatpush3.bf16.msra.mxu1 %v15131_v62 }
0x1501   : > { %13238 = vmatprep.subr.bf16.mxu1 %v15567_v1 }
0x1504   : > { %13239 = vmatpush3.bf16.msra.mxu1 %v15132_v0 }
0x1505   : > { %13264 = vmatprep.subr.bf16.mxu1 %v15567_v1 }
0x1507   : > { %13241 = vmatmul.mubr.bf16.vlgmr.msra.gmra.mxu1 %v10876_v9 }
0x1508   : > { %13280 = vmatprep.mubr.msk.bf16.mxu1 %vm15568_vm0, %v15567_v1  ;;  %13265 = vmatpush3.bf16.msra.mxu1 %v15149_v26 }
0x1509   : > { %13266 = vmatprep.subr.bf16.mxu1 %v15567_v1 }
0x150c   : > { %13267 = vmatpush3.bf16.msra.mxu1 %v15150_v46 }
0x150d   : > { %13268 = vmatprep.subr.bf16.mxu1 %v15567_v1 }
0x1510   : > { %13269 = vmatpush3.bf16.msra.mxu1 %v15151_v27 }
0x1511   : > { %13270 = vmatprep.subr.bf16.mxu1 %v15567_v1 }
0x1514   : > { %13271 = vmatpush3.bf16.msra.mxu1 %v15152_v63 }
0x1515   : > { %13272 = vmatprep.subr.bf16.mxu1 %v15567_v1 }
0x1518   : > { %13273 = vmatpush3.bf16.msra.mxu1 %v15153_v10 }
0x1519   : > { %13274 = vmatprep.subr.bf16.mxu1 %v15567_v1 }
0x151c   : > { %13275 = vmatpush3.bf16.msra.mxu1 %v15154_v47 }
0x151d   : > { %13276 = vmatprep.subr.bf16.mxu1 %v15567_v1 }
0x1520   : > { %13277 = vmatpush3.bf16.msra.mxu1 %v15155_v28 }
0x1521   : > { %13278 = vmatprep.subr.bf16.mxu1 %v15567_v1 }
0x1524   : > { %13279 = vmatpush3.bf16.msra.mxu1 %v15156_v8 }
0x15a7   : > { %v11095_v19 = vpop.f32.mrf.mxu1 }
0x15a8   : > { %v11096_v15 = vadd.f32 %v16452_v11, %v11095_v19 }
0x15a9   : > { %v13202_v29 = vpop.f32.mrf.mxu1 }
0x15aa   : > { %v11101_v24 = vmax.f32 %v11096_v15, 0.0 }
0x15ab   : > { %v11098_v31 = vpop.f32.mrf.mxu1 }
0x15ac   : > { %v11102_v36 = vpack.c.bf16 %v11101_v24, %v11101_v24 }
0x15ad   : > { %v13203_v32 = vpop.f32.mrf.mxu1 }
0x15ae   : > { %13221 = vmatmul.mubr.bf16.vlgmr.msra.gmra.mxu0 %v11102_v36 }
0x15af   : > { %13245 = vmatpush3.bf16.msra.mxu0 %v15141_v30  ;;  %13260 = vmatprep.mubr.msk.bf16.mxu0 %vm15568_vm0, %v15567_v1  ;;  %vm11214_vm0 = vcmp.lt.s32.totalorder %v15902_v3, 2 }
0x15b0   : > { %13246 = vmatprep.subr.bf16.mxu0 %v15567_v1 }
0x15b3   : > { %13247 = vmatpush3.bf16.msra.mxu0 %v15142_v16 }
0x15b4   : > { %13248 = vmatprep.subr.bf16.mxu0 %v15567_v1 }
0x15b7   : > { %13249 = vmatpush3.bf16.msra.mxu0 %v15143_v13 }
0x15b8   : > { %13250 = vmatprep.subr.bf16.mxu0 %v15567_v1 }
0x15bb   : > { %13251 = vmatpush3.bf16.msra.mxu0 %v15144_v40 }
0x15bc   : > { %13252 = vmatprep.subr.bf16.mxu0 %v15567_v1 }
0x15bf   : > { %13253 = vmatpush3.bf16.msra.mxu0 %v15145_v43 }
0x15c0   : > { %13254 = vmatprep.subr.bf16.mxu0 %v15567_v1 }
0x15c3   : > { %13255 = vmatpush3.bf16.msra.mxu0 %v15146_v14 }
0x15c4   : > { %13256 = vmatprep.subr.bf16.mxu0 %v15567_v1 }
0x15c7   : > { %v11337_v25 = vpop.f32.mrf.mxu1  ;;  %13257 = vmatpush3.bf16.msra.mxu0 %v15147_v51 }
0x15c8   : > { %v11338_v18 = vadd.f32 %v16426_v42, %v11337_v25  ;;  %13258 = vmatprep.subr.bf16.mxu0 %v15567_v1 }
0x15c9   : > { %v13242_v23 = vpop.f32.mrf.mxu1 }
0x15ca   : > { %v11343_v7 = vmax.f32 %v11338_v18, 0.0 }
0x15cb   : > { %v11340_v41 = vpop.f32.mrf.mxu1  ;;  %13259 = vmatpush3.bf16.msra.mxu0 %v15148_v49 }
0x15cc   : > { %v11344_v17 = vpack.c.bf16 %v11343_v7, %v11343_v7 }
0x15cd   : > { %v13243_v45 = vpop.f32.mrf.mxu1 }
0x15ce   : > { %13261 = vmatmul.mubr.bf16.vlgmr.msra.gmra.mxu0 %v11344_v17 }
0x166e   : > { %v11208_v39 = vpop.f32.mrf.mxu0 }
0x166f   : > { %v11209_v38 = vadd.f32 %v13019_v34, %v11208_v39 }
0x1670   : > { %v13222_v21 = vpop.f32.mrf.mxu0 }
0x1671   : > { %v11215_v33 = vsel %vm11214_vm0, %v11209_v38, -1e+30 }
0x1672   : > { %v11211_v50 = vpop.f32.mrf.mxu0  ;;  %v11216_v52 = vsel %vm7886_vm4, %v11215_v33, -inf }
0x1673   : > { %11217 = vmax.xlane.f32.xlu0 %v11216_v52 }
0x1674   : > { %v13223_v48 = vpop.f32.mrf.mxu0 }
0x168e   : > { %v11450_v37 = vpop.f32.mrf.mxu0 }
0x168f   : > { %v11451_v22 = vadd.f32 %v16452_v11, %v11450_v37 }
0x1690   : > { %v13262_v1 = vpop.f32.mrf.mxu0 }
0x1691   : > { %v11456_v53 = vmax.f32 %v11451_v22, 0.0 }
0x1692   : > { %v11453_v20 = vpop.f32.mrf.mxu0 }
0x1693   : > { %v11457_v42 = vpack.c.bf16 %v11456_v53, %v11456_v53 }
0x1694   : > { %v13263_v55 = vpop.f32.mrf.mxu0 }
0x1695   : > { %13281 = vmatmul.mubr.bf16.vlgmr.msra.gmra.mxu1 %v11457_v42 }
0x16fc   : > { %v11218_v35 = vpop.xlane.xlu0 %11217 }
0x16fd   : > { %v11219_v56 = vsub.f32 %v11215_v33, %v11218_v35 }
0x16ff   : > { %v11220_v5 = vmul.f32 1.442695, %v11219_v56 }
0x1701   : > { %15157 = vpow2.f32 %v11220_v5 }
0x170e   : > { %v15158_v57 = vpop.eup %15157 }
0x170f   : > { %v11222_v58 = vsel %vm7886_vm4, %v15158_v57, 0.0 }
0x1710   : > { %11223 = vadd.xlane.f32.xlu1 %v11222_v58 }
0x1755   : > { %v11563_v2 = vpop.f32.mrf.mxu1 }
0x1756   : > { %v11564_v4 = vadd.f32 %v13019_v34, %v11563_v2 }
0x1757   : > { %v13282_v59 = vpop.f32.mrf.mxu1 }
0x1758   : > { %v11569_v60 = vsel %vm11214_vm0, %v11564_v4, -1e+30 }
0x1759   : > { %v11566_v44 = vpop.f32.mrf.mxu1  ;;  %v11570_v54 = vsel %vm7886_vm4, %v11569_v60, -inf }
0x175a   : > { %11571 = vmax.xlane.f32.xlu0 %v11570_v54 }
0x175b   : > { %v13283_v61 = vpop.f32.mrf.mxu1 }
0x1799   : > { %v11224_v62 = vpop.xlane.xlu1 %11223 }
0x179a   : > { %15159 = vrcp.f32 %v11224_v62 }
0x179b   : > { %15161 = vlog2.f32 %v11224_v62 }
0x17a7   : > { %v15160_v0 = vpop.eup %15159 }
0x17a8   : > { %v15162_v6 = vpop.eup %15161  ;;  %v11226_v9 = vmul.f32 %v15160_v0, %v15158_v57 }
0x17a9   : > { %v11229_v12 = vmul.f32 0.6931472, %v15162_v6 }
0x17aa   : > { %11227 = vst [vmem:[%s1113_s10] sm:$0x3] %v11226_v9 }
0x17ab   : > { %v11230_v11 = vsub.f32 %v11219_v56, %v11229_v12 }
0x17ad   : > { %11231 = vst [vmem:[%s1118_s28] sm:$0x3] %v11230_v11 }
0x17e3   : > { %v11572_v3 = vpop.xlane.xlu0 %11571 }
0x17e4   : > { %v11573_v19 = vsub.f32 %v11569_v60, %v11572_v3 }
0x17e6   : > { %v11574_v15 = vmul.f32 1.442695, %v11573_v19 }
0x17e8   : > { %15163 = vpow2.f32 %v11574_v15 }
0x17f5   : > { %v15164_v29 = vpop.eup %15163 }
0x17f6   : > { %v11576_v24 = vsel %vm7886_vm4, %v15164_v29, 0.0 }
0x17f7   : > { %11577 = vadd.xlane.f32.xlu1 %v11576_v24 }
0x1880   : > { %v11578_v31 = vpop.xlane.xlu1 %11577 }
0x1881   : > { %15165 = vrcp.f32 %v11578_v31 }
0x1882   : > { %15167 = vlog2.f32 %v11578_v31 }
0x188e   : > { %v15166_v30 = vpop.eup %15165 }
0x188f   : > { %v15168_v36 = vpop.eup %15167  ;;  %v11580_v32 = vmul.f32 %v15166_v30, %v15164_v29 }
0x1890   : > { %v11584_v16 = vmul.f32 0.6931472, %v15168_v36 }
0x1891   : > { %13055 = vst [vmem:[%s1113_s10 + $0x2] sm:$0x3] %v11580_v32 }
0x1892   : > { %v11585_v13 = vsub.f32 %v11573_v19, %v11584_v16 }
0x1894   : > { %13056 = vst [vmem:[%s1118_s28 + $0x2] sm:$0x3] %v11585_v13 }
0x1895 PF: > { %s79_s15 = sadd.s32 1, %s15517_s15  }
0x1896   : > { %p76_p3 = scmp.ge.s32.totalorder %s79_s15, 4  }
0x1898   :  { %78 = sbr.rel (!%p76_p3) target bundleno = 56 (0x38), region = 279 }
0x189d   :  { %11625 = vsyncpa [#allocation3], 1 }
0x189e   :  { %11627 = vsyncpa [#allocation3 + $0x1], 1 }
0x189f   :  { %11628 = vsyncpa [#allocation5], 1 }
0x18a0   :  { %11629 = vsyncpa [#allocation8], 1 }
0x18a1   :  { %11630 = vsyncpa [#allocation11], 1 }
0x18a2   :  { %11631 = vsyncpa [#allocation14], 1 }
0x18a3   :  { %11632 = vsyncpa [#allocation17], 1 }
0x18a4   :  { %11633 = vsyncpa [#allocation20], 1 }

</bundles_post_ra>
